<compile_context>
chip_gen: v5e
topology: v5e:2x2
jax: 0.10.0
libtpu: 0.0.40
codegen_flags: <defaults>
</compile_context>

<pallas_src>
import jax
import jax.numpy as jnp
from jax.experimental import pallas as pl
from jax.experimental.pallas import tpu as pltpu


def _sigmoid(x):
    # Exact identity for the logistic function; a single EUP tanh + cheap VPU ops.
    return 0.5 * jnp.tanh(0.5 * x) + 0.5


def _supervisor_kernel(x_ref, w_ih0_ref, b_x0_ref, w_big_ref, b_big_ref,
                       w_fc_ref, b_fc_ref, out_ref, gates_ref):
    """All refs live in VMEM (shapes are small).

    x_ref     : (T, Bp, Hp)              time-major, zero-padded input
    w_ih0_ref : (Hp, 3*Hp)               layer-0 fused input weights, gate order [r, z, n]
    b_x0_ref  : (1, 3*Hp)                layer-0 [b_ir+b_hr, b_iz+b_hz, b_in]
    w_big_ref : (L*Hp, (2L-1)*3*Hp)      per-tick fused block weights:
                                         cols [gh_0 | gx_1, gh_1 | gx_2, gh_2 | ...]
    b_big_ref : (1, (2L-1)*3*Hp)         matching fused bias ([0,0,b_hn] for gh blocks,
                                         [b_ir+b_hr, b_iz+b_hz, b_in] for gx blocks)
    w_fc_ref  : (Hp, Hp)                 final Linear weight (transposed, zero-padded)
    b_fc_ref  : (1, Hp)
    out_ref   : (T, Bp, Hp)
    gates_ref : (T, Bp, 3*Hp) f32 scratch: hoisted layer-0 input-side gate pre-activations
    """
    T, Bp, Hp = x_ref.shape
    G = 3 * Hp
    L = w_big_ref.shape[0] // Hp
    W = w_big_ref.shape[1]            # (2L-1) * G

    # ---- hoisted layer-0 input-side gate GEMM for the whole sequence (off h-path) ----
    gx0 = jnp.dot(x_ref[...].astype(jnp.float32).reshape(T * Bp, Hp), w_ih0_ref[...],
                  preferred_element_type=jnp.float32) + b_x0_ref[...]
    gates_ref[...] = gx0.reshape(T, Bp, G)

    # ---- hoisted weight loads / bias broadcasts (JAX does not CSE broadcast_in_dim) ----
    w_big = w_big_ref[...]
    w_fc = w_fc_ref[...]
    b_big = jnp.broadcast_to(b_big_ref[...], (Bp, W))
    b_fc = jnp.broadcast_to(b_fc_ref[...], (Bp, Hp))

    # Hidden states carried in vregs across the fully unrolled wavefront loop.
    hs = [jnp.zeros((Bp, Hp), jnp.float32) for _ in range(L)]

    for tau in range(T + L - 1):       # wavefront over (layer, time); static unroll
        lhs = jnp.concatenate(hs, axis=-1) if L > 1 else hs[0]   # (Bp, L*Hp)
        # One fused MXU GEMM per tick: all hidden-side gates + all layer>=1 input-side gates.
        g = jnp.dot(lhs, w_big, preferred_element_type=jnp.float32) + b_big

        new_hs = list(hs)
        for l in range(L):             # static guards: no out-of-range work / reads
            t_l = tau - l
            if t_l < 0 or t_l >= T:
                continue
            if l == 0:
                gx = gates_ref[t_l]                        # (Bp, G), biases folded
                gh = g[:, 0:G]                             # [0,0,b_hn0] folded via b_big
            else:
                base = G + (l - 1) * 2 * G
                gx = g[:, base:base + G]                   # h_{l-1} @ W_ih_l + b_x_l
                gh = g[:, base + G:base + 2 * G]           # h_l     @ W_hh_l + [0,0,b_hn_l]
            # Gate slices fall on 128-lane (whole-vreg) boundaries.
            r = _sigmoid(gx[:, :Hp] + gh[:, :Hp])
            z = _sigmoid(gx[:, Hp:2 * Hp] + gh[:, Hp:2 * Hp])
            n = jnp.tanh(gx[:, 2 * Hp:] + r * gh[:, 2 * Hp:])
            h_new = n + z * (hs[l] - n)                    # == (1-z)*n + z*h_prev
            new_hs[l] = h_new
            if l == L - 1:
                # Fused Linear + Sigmoid; store rides in the next tick's latency shadow.
                logits = jnp.dot(h_new, w_fc,
                                 preferred_element_type=jnp.float32) + b_fc
                out_ref[t_l] = _sigmoid(logits).astype(out_ref.dtype)
        hs = new_hs


def _round_up(x, m):
    return ((x + m - 1) // m) * m


def prepare_params(params, Hp):
    """One-time parameter fusion/padding (hoisted out of the per-call path).

    Gate order is PyTorch's [r, z, n]. b_hr/b_hz are folded into the input-side
    bias (valid: they sit outside the r-gating); b_hn stays on the hidden side
    so r * (h @ W_hn + b_hn) is exact. Padded rows/cols/lanes are exactly zero.
    """
    w_ih, w_hh, b_ih, b_hh, w_fc, b_fc = params
    L, _, H, _ = w_ih.shape
    G = 3 * Hp

    def pad_mat(m):
        return jnp.pad(m, ((0, 0),) * (m.ndim - 2) + ((0, Hp - H), (0, Hp - H)))

    def pad_vec(v):
        return jnp.pad(v, ((0, 0),) * (v.ndim - 1) + ((0, Hp - H),))

    w_ih_p = pad_mat(w_ih)                                   # (L, 3, Hp, Hp)
    w_hh_p = pad_mat(w_hh)
    b_ih_p = pad_vec(b_ih)                                   # (L, 3, 1, Hp)
    b_hh_p = pad_vec(b_hh)

    def fuse_gates(w):                                       # (3, Hp, Hp) -> (Hp, 3*Hp)
        return jnp.concatenate([w[0], w[1], w[2]], axis=-1)

    def fuse_bias_x(bi, bh):                                 # (1, 3*Hp)
        return jnp.concatenate([bi[0] + bh[0], bi[1] + bh[1], bi[2]], axis=-1)

    def bias_hn(bh):                                         # (1, 3*Hp): [0, 0, b_hn]
        return jnp.concatenate(
            [jnp.zeros_like(bh[0]), jnp.zeros_like(bh[1]), bh[2]], axis=-1)

    # Layer-0 input-side gates (hoisted whole-sequence GEMM in the kernel).
    w_ih0 = fuse_gates(w_ih_p[0])                            # (Hp, G)
    b_x0 = fuse_bias_x(b_ih_p[0], b_hh_p[0])                 # (1, G)

    # Per-tick fused block GEMM weights / bias.
    w_big = jnp.zeros((L * Hp, (2 * L - 1) * G), jnp.float32)
    b_big = jnp.zeros((1, (2 * L - 1) * G), jnp.float32)
    w_big = w_big.at[0:Hp, 0:G].set(fuse_gates(w_hh_p[0]))
    b_big = b_big.at[:, 0:G].set(bias_hn(b_hh_p[0]))
    for l in range(1, L):
        base = G + (l - 1) * 2 * G
        w_big = w_big.at[(l - 1) * Hp:l * Hp, base:base + G].set(fuse_gates(w_ih_p[l]))
        b_big = b_big.at[:, base:base + G].set(fuse_bias_x(b_ih_p[l], b_hh_p[l]))
        w_big = w_big.at[l * Hp:(l + 1) * Hp, base + G:base + 2 * G].set(fuse_gates(w_hh_p[l]))
        b_big = b_big.at[:, base + G:base + 2 * G].set(bias_hn(b_hh_p[l]))

    w_fc_p = pad_mat(w_fc)                                   # (Hp, Hp)
    b_fc_p = pad_vec(b_fc)                                   # (1, Hp)
    return w_ih0, b_x0, w_big, b_big, w_fc_p, b_fc_p


def supervisor_forward(x, prep):
    """x: (B, T, H) batch-first, same convention as the PyTorch module.
    prep: output of prepare_params (fused + padded parameters)."""
    w_ih0, b_x0, w_big, b_big, w_fc_p, b_fc_p = prep
    B, T, H = x.shape
    Hp = w_fc_p.shape[0]
    Bp = _round_up(B, 8)
    G = 3 * Hp

    x_tm = jnp.transpose(x, (1, 0, 2))                              # (T, B, H)
    x_p = jnp.pad(x_tm, ((0, 0), (0, Bp - B), (0, Hp - H)))         # (T, Bp, Hp)

    out_p = pl.pallas_call(
        _supervisor_kernel,
        out_shape=jax.ShapeDtypeStruct((T, Bp, Hp), x.dtype),
        in_specs=[pl.BlockSpec(memory_space=pltpu.MemorySpace.VMEM)] * 7,
        out_specs=pl.BlockSpec(memory_space=pltpu.MemorySpace.VMEM),
        scratch_shapes=[
            pltpu.VMEM((T, Bp, G), jnp.float32),        # hoisted layer-0 input-side gates
        ],
    )(x_p, w_ih0, b_x0, w_big, b_big, w_fc_p, b_fc_p)

    return jnp.transpose(out_p[:, :B, :H], (1, 0, 2))               # back to (B, T, H)


def init_params(key, hidden_dim, num_layers):
    """Deterministic synthetic parameters mimicking PyTorch's U(-1/sqrt(H), 1/sqrt(H)) init."""
    L = num_layers - 1                            # GRU layer count (as in the PyTorch module)
    H = hidden_dim
    k = 1.0 / float(jnp.sqrt(jnp.float32(H)))
    ks = jax.random.split(key, 6)
    # torch weight_ih_l{k} is (3H, H_in) with gate order [r, z, n]; we store the
    # transposed per-gate form (H_in, H_out) so the kernel does x @ W directly.
    w_ih = jax.random.uniform(ks[0], (L, 3, H, H), jnp.float32, -k, k)
    w_hh = jax.random.uniform(ks[1], (L, 3, H, H), jnp.float32, -k, k)
    b_ih = jax.random.uniform(ks[2], (L, 3, 1, H), jnp.float32, -k, k)
    b_hh = jax.random.uniform(ks[3], (L, 3, 1, H), jnp.float32, -k, k)
    w_fc = jax.random.uniform(ks[4], (H, H), jnp.float32, -k, k)   # torch Linear weight.T
    b_fc = jax.random.uniform(ks[5], (1, H), jnp.float32, -k, k)
    return w_ih, w_hh, b_ih, b_hh, w_fc, b_fc


def supervisor_ref(x, params):
    """Pure-JAX reference implementing the same PyTorch GRU + Linear + Sigmoid semantics."""
    w_ih, w_hh, b_ih, b_hh, w_fc, b_fc = params
    L = w_ih.shape[0]
    B, T, H = x.shape
    seq = x.astype(jnp.float32)
    for l in range(L):
        h = jnp.zeros((B, H), jnp.float32)
        outs = []
        for t in range(T):
            x_t = seq[:, t, :]
            r = jax.nn.sigmoid(x_t @ w_ih[l, 0] + b_ih[l, 0] + h @ w_hh[l, 0] + b_hh[l, 0])
            z = jax.nn.sigmoid(x_t @ w_ih[l, 1] + b_ih[l, 1] + h @ w_hh[l, 1] + b_hh[l, 1])
            n = jnp.tanh(x_t @ w_ih[l, 2] + b_ih[l, 2] + r * (h @ w_hh[l, 2] + b_hh[l, 2]))
            h = (1.0 - z) * n + z * h
            outs.append(h)
        seq = jnp.stack(outs, axis=1)
    return jax.nn.sigmoid(seq @ w_fc + b_fc)


if __name__ == "__main__":
    B, T, H, num_layers = 2, 8, 32, 3             # small shapes; GRU has num_layers-1 = 2 layers
    key = jax.random.PRNGKey(0)
    kx, kp = jax.random.split(key)
    x = jax.random.normal(kx, (B, T, H), dtype=jnp.float32)
    params = init_params(kp, H, num_layers)

    # One-time fusion/padding of the parameters (hoisted out of the per-call path).
    Hp = max(128, _round_up(H, 128))
    prep = prepare_params(params, Hp)

    fwd = jax.jit(supervisor_forward)
    out = jax.block_until_ready(fwd(x, prep))
    assert out.shape == (B, T, H) and out.dtype == jnp.float32

    ref = supervisor_ref(x, params)
    max_err = float(jnp.max(jnp.abs(out - ref)))
    assert max_err < 1e-3, f"mismatch vs reference: {max_err}"

    print("KERNEL_OK")
</pallas_src>

<mosaic_0001>
module attributes {stable_mosaic.version = 11 : i64} {
  func.func @_supervisor_kernel(%arg0: memref<8x8x128xf32, #tpu.memory_space<vmem>>, %arg1: memref<128x384xf32, #tpu.memory_space<vmem>>, %arg2: memref<1x384xf32, #tpu.memory_space<vmem>>, %arg3: memref<256x1152xf32, #tpu.memory_space<vmem>>, %arg4: memref<1x1152xf32, #tpu.memory_space<vmem>>, %arg5: memref<128x128xf32, #tpu.memory_space<vmem>>, %arg6: memref<1x128xf32, #tpu.memory_space<vmem>>, %arg7: memref<8x8x128xf32, #tpu.memory_space<vmem>>, %arg8: memref<8x8x384xf32, #tpu.memory_space<vmem>>) attributes {dimension_semantics = [], scalar_prefetch = 0 : i64, scratch_operands = 1 : i64, tpu.core_type = #tpu.core_type<tc>} {
    %c0 = arith.constant 0 : index
    %c0_0 = arith.constant 0 : index
    %c0_1 = arith.constant 0 : index
    %0 = vector.load %arg0[%c0, %c0_0, %c0_1] : memref<8x8x128xf32, #tpu.memory_space<vmem>>, vector<8x8x128xf32>
    %1 = vector.shape_cast %0 : vector<8x8x128xf32> to vector<64x128xf32>
    %c0_2 = arith.constant 0 : index
    %c0_3 = arith.constant 0 : index
    %2 = vector.load %arg1[%c0_2, %c0_3] : memref<128x384xf32, #tpu.memory_space<vmem>>, vector<128x384xf32>
    %cst = arith.constant dense<0.000000e+00> : vector<64x384xf32>
    %3 = tpu.matmul %1, %2, %cst {dimension_numbers = #tpu.dot_dimension_numbers<[1], [0], [0], [1], [0, 0, 1, 1], [], []>} : vector<64x128xf32>, vector<128x384xf32>, vector<64x384xf32> -> vector<64x384xf32>
    %c0_4 = arith.constant 0 : index
    %c0_5 = arith.constant 0 : index
    %4 = vector.load %arg2[%c0_4, %c0_5] : memref<1x384xf32, #tpu.memory_space<vmem>>, vector<1x384xf32>
    %5 = vector.broadcast %4 : vector<1x384xf32> to vector<64x384xf32>
    %6 = arith.addf %3, %5 : vector<64x384xf32>
    %7 = vector.shape_cast %6 : vector<64x384xf32> to vector<8x8x384xf32>
    %c0_6 = arith.constant 0 : index
    %c0_7 = arith.constant 0 : index
    %c0_8 = arith.constant 0 : index
    %8 = vector.load %arg8[%c0_6, %c0_7, %c0_8] : memref<8x8x384xf32, #tpu.memory_space<vmem>>, vector<8x8x384xf32>
    tpu.vector_store %arg8[%c0_6, %c0_7, %c0_8], %7 {strides = array<i32>} : memref<8x8x384xf32, #tpu.memory_space<vmem>>, vector<8x8x384xf32>,
    %c0_9 = arith.constant 0 : index
    %c0_10 = arith.constant 0 : index
    %9 = vector.load %arg3[%c0_9, %c0_10] : memref<256x1152xf32, #tpu.memory_space<vmem>>, vector<256x1152xf32>
    %c0_11 = arith.constant 0 : index
    %c0_12 = arith.constant 0 : index
    %10 = vector.load %arg5[%c0_11, %c0_12] : memref<128x128xf32, #tpu.memory_space<vmem>>, vector<128x128xf32>
    %c0_13 = arith.constant 0 : index
    %c0_14 = arith.constant 0 : index
    %11 = vector.load %arg4[%c0_13, %c0_14] : memref<1x1152xf32, #tpu.memory_space<vmem>>, vector<1x1152xf32>
    %12 = vector.shape_cast %11 : vector<1x1152xf32> to vector<1x1152xf32>
    %13 = vector.broadcast %12 : vector<1x1152xf32> to vector<8x1152xf32>
    %c0_15 = arith.constant 0 : index
    %c0_16 = arith.constant 0 : index
    %14 = vector.load %arg6[%c0_15, %c0_16] : memref<1x128xf32, #tpu.memory_space<vmem>>, vector<1x128xf32>
    %15 = vector.shape_cast %14 : vector<1x128xf32> to vector<1x128xf32>
    %16 = vector.broadcast %15 : vector<1x128xf32> to vector<8x128xf32>
    %cst_17 = arith.constant 0.000000e+00 : f32
    %17 = vector.broadcast %cst_17 : f32 to vector<8x128xf32>
    %cst_18 = arith.constant 0.000000e+00 : f32
    %18 = vector.broadcast %cst_18 : f32 to vector<8x128xf32>
    %19 = tpu.concatenate %17, %18 in 1 : vector<8x128xf32>, vector<8x128xf32> -> vector<8x256xf32>
    %cst_19 = arith.constant dense<0.000000e+00> : vector<8x1152xf32>
    %20 = tpu.matmul %19, %9, %cst_19 {dimension_numbers = #tpu.dot_dimension_numbers<[1], [0], [0], [1], [0, 0, 1, 1], [], []>} : vector<8x256xf32>, vector<256x1152xf32>, vector<8x1152xf32> -> vector<8x1152xf32>
    %21 = arith.addf %20, %13 : vector<8x1152xf32>
    %c0_20 = arith.constant 0 : index
    %c0_21 = arith.constant 0 : index
    %c0_22 = arith.constant 0 : index
    %22 = vector.load %arg8[%c0_20, %c0_21, %c0_22] : memref<8x8x384xf32, #tpu.memory_space<vmem>>, vector<1x8x384xf32>
    %23 = vector.shape_cast %22 : vector<1x8x384xf32> to vector<8x384xf32>
    %24 = vector.extract_strided_slice %21 {offsets = [0, 0], sizes = [8, 384], strides = [1, 1]} : vector<8x1152xf32> to vector<8x384xf32>
    %25 = vector.extract_strided_slice %23 {offsets = [0, 0], sizes = [8, 128], strides = [1, 1]} : vector<8x384xf32> to vector<8x128xf32>
    %26 = vector.extract_strided_slice %24 {offsets = [0, 0], sizes = [8, 128], strides = [1, 1]} : vector<8x384xf32> to vector<8x128xf32>
    %27 = arith.addf %25, %26 : vector<8x128xf32>
    %cst_23 = arith.constant 5.000000e-01 : f32
    %28 = vector.broadcast %cst_23 : f32 to vector<8x128xf32>
    %29 = arith.mulf %28, %27 : vector<8x128xf32>
    %30 = math.tanh %29 : vector<8x128xf32>
    %cst_24 = arith.constant 5.000000e-01 : f32
    %31 = vector.broadcast %cst_24 : f32 to vector<8x128xf32>
    %32 = arith.mulf %31, %30 : vector<8x128xf32>
    %cst_25 = arith.constant 5.000000e-01 : f32
    %33 = vector.broadcast %cst_25 : f32 to vector<8x128xf32>
    %34 = arith.addf %32, %33 : vector<8x128xf32>
    %35 = vector.extract_strided_slice %23 {offsets = [0, 128], sizes = [8, 128], strides = [1, 1]} : vector<8x384xf32> to vector<8x128xf32>
    %36 = vector.extract_strided_slice %24 {offsets = [0, 128], sizes = [8, 128], strides = [1, 1]} : vector<8x384xf32> to vector<8x128xf32>
    %37 = arith.addf %35, %36 : vector<8x128xf32>
    %cst_26 = arith.constant 5.000000e-01 : f32
    %38 = vector.broadcast %cst_26 : f32 to vector<8x128xf32>
    %39 = arith.mulf %38, %37 : vector<8x128xf32>
    %40 = math.tanh %39 : vector<8x128xf32>
    %cst_27 = arith.constant 5.000000e-01 : f32
    %41 = vector.broadcast %cst_27 : f32 to vector<8x128xf32>
    %42 = arith.mulf %41, %40 : vector<8x128xf32>
    %cst_28 = arith.constant 5.000000e-01 : f32
    %43 = vector.broadcast %cst_28 : f32 to vector<8x128xf32>
    %44 = arith.addf %42, %43 : vector<8x128xf32>
    %45 = vector.extract_strided_slice %23 {offsets = [0, 256], sizes = [8, 128], strides = [1, 1]} : vector<8x384xf32> to vector<8x128xf32>
    %46 = vector.extract_strided_slice %24 {offsets = [0, 256], sizes = [8, 128], strides = [1, 1]} : vector<8x384xf32> to vector<8x128xf32>
    %47 = arith.mulf %34, %46 : vector<8x128xf32>
    %48 = arith.addf %45, %47 : vector<8x128xf32>
    %49 = math.tanh %48 : vector<8x128xf32>
    %50 = arith.subf %17, %49 : vector<8x128xf32>
    %51 = arith.mulf %44, %50 : vector<8x128xf32>
    %52 = arith.addf %49, %51 : vector<8x128xf32>
    %53 = tpu.concatenate %52, %18 in 1 : vector<8x128xf32>, vector<8x128xf32> -> vector<8x256xf32>
    %cst_29 = arith.constant dense<0.000000e+00> : vector<8x1152xf32>
    %54 = tpu.matmul %53, %9, %cst_29 {dimension_numbers = #tpu.dot_dimension_numbers<[1], [0], [0], [1], [0, 0, 1, 1], [], []>} : vector<8x256xf32>, vector<256x1152xf32>, vector<8x1152xf32> -> vector<8x1152xf32>
    %55 = arith.addf %54, %13 : vector<8x1152xf32>
    %c1 = arith.constant 1 : index
    %c0_30 = arith.constant 0 : index
    %c0_31 = arith.constant 0 : index
    %56 = vector.load %arg8[%c1, %c0_30, %c0_31] : memref<8x8x384xf32, #tpu.memory_space<vmem>>, vector<1x8x384xf32>
    %57 = vector.shape_cast %56 : vector<1x8x384xf32> to vector<8x384xf32>
    %58 = vector.extract_strided_slice %55 {offsets = [0, 0], sizes = [8, 384], strides = [1, 1]} : vector<8x1152xf32> to vector<8x384xf32>
    %59 = vector.extract_strided_slice %57 {offsets = [0, 0], sizes = [8, 128], strides = [1, 1]} : vector<8x384xf32> to vector<8x128xf32>
    %60 = vector.extract_strided_slice %58 {offsets = [0, 0], sizes = [8, 128], strides = [1, 1]} : vector<8x384xf32> to vector<8x128xf32>
    %61 = arith.addf %59, %60 : vector<8x128xf32>
    %cst_32 = arith.constant 5.000000e-01 : f32
    %62 = vector.broadcast %cst_32 : f32 to vector<8x128xf32>
    %63 = arith.mulf %62, %61 : vector<8x128xf32>
    %64 = math.tanh %63 : vector<8x128xf32>
    %cst_33 = arith.constant 5.000000e-01 : f32
    %65 = vector.broadcast %cst_33 : f32 to vector<8x128xf32>
    %66 = arith.mulf %65, %64 : vector<8x128xf32>
    %cst_34 = arith.constant 5.000000e-01 : f32
    %67 = vector.broadcast %cst_34 : f32 to vector<8x128xf32>
    %68 = arith.addf %66, %67 : vector<8x128xf32>
    %69 = vector.extract_strided_slice %57 {offsets = [0, 128], sizes = [8, 128], strides = [1, 1]} : vector<8x384xf32> to vector<8x128xf32>
    %70 = vector.extract_strided_slice %58 {offsets = [0, 128], sizes = [8, 128], strides = [1, 1]} : vector<8x384xf32> to vector<8x128xf32>
    %71 = arith.addf %69, %70 : vector<8x128xf32>
    %cst_35 = arith.constant 5.000000e-01 : f32
    %72 = vector.broadcast %cst_35 : f32 to vector<8x128xf32>
    %73 = arith.mulf %72, %71 : vector<8x128xf32>
    %74 = math.tanh %73 : vector<8x128xf32>
    %cst_36 = arith.constant 5.000000e-01 : f32
    %75 = vector.broadcast %cst_36 : f32 to vector<8x128xf32>
    %76 = arith.mulf %75, %74 : vector<8x128xf32>
    %cst_37 = arith.constant 5.000000e-01 : f32
    %77 = vector.broadcast %cst_37 : f32 to vector<8x128xf32>
    %78 = arith.addf %76, %77 : vector<8x128xf32>
    %79 = vector.extract_strided_slice %57 {offsets = [0, 256], sizes = [8, 128], strides = [1, 1]} : vector<8x384xf32> to vector<8x128xf32>
    %80 = vector.extract_strided_slice %58 {offsets = [0, 256], sizes = [8, 128], strides = [1, 1]} : vector<8x384xf32> to vector<8x128xf32>
    %81 = arith.mulf %68, %80 : vector<8x128xf32>
    %82 = arith.addf %79, %81 : vector<8x128xf32>
    %83 = math.tanh %82 : vector<8x128xf32>
    %84 = arith.subf %52, %83 : vector<8x128xf32>
    %85 = arith.mulf %78, %84 : vector<8x128xf32>
    %86 = arith.addf %83, %85 : vector<8x128xf32>
    %87 = vector.extract_strided_slice %55 {offsets = [0, 384], sizes = [8, 384], strides = [1, 1]} : vector<8x1152xf32> to vector<8x384xf32>
    %88 = vector.extract_strided_slice %55 {offsets = [0, 768], sizes = [8, 384], strides = [1, 1]} : vector<8x1152xf32> to vector<8x384xf32>
    %89 = vector.extract_strided_slice %87 {offsets = [0, 0], sizes = [8, 128], strides = [1, 1]} : vector<8x384xf32> to vector<8x128xf32>
    %90 = vector.extract_strided_slice %88 {offsets = [0, 0], sizes = [8, 128], strides = [1, 1]} : vector<8x384xf32> to vector<8x128xf32>
    %91 = arith.addf %89, %90 : vector<8x128xf32>
    %cst_38 = arith.constant 5.000000e-01 : f32
    %92 = vector.broadcast %cst_38 : f32 to vector<8x128xf32>
    %93 = arith.mulf %92, %91 : vector<8x128xf32>
    %94 = math.tanh %93 : vector<8x128xf32>
    %cst_39 = arith.constant 5.000000e-01 : f32
    %95 = vector.broadcast %cst_39 : f32 to vector<8x128xf32>
    %96 = arith.mulf %95, %94 : vector<8x128xf32>
    %cst_40 = arith.constant 5.000000e-01 : f32
    %97 = vector.broadcast %cst_40 : f32 to vector<8x128xf32>
    %98 = arith.addf %96, %97 : vector<8x128xf32>
    %99 = vector.extract_strided_slice %87 {offsets = [0, 128], sizes = [8, 128], strides = [1, 1]} : vector<8x384xf32> to vector<8x128xf32>
    %100 = vector.extract_strided_slice %88 {offsets = [0, 128], sizes = [8, 128], strides = [1, 1]} : vector<8x384xf32> to vector<8x128xf32>
    %101 = arith.addf %99, %100 : vector<8x128xf32>
    %cst_41 = arith.constant 5.000000e-01 : f32
    %102 = vector.broadcast %cst_41 : f32 to vector<8x128xf32>
    %103 = arith.mulf %102, %101 : vector<8x128xf32>
    %104 = math.tanh %103 : vector<8x128xf32>
    %cst_42 = arith.constant 5.000000e-01 : f32
    %105 = vector.broadcast %cst_42 : f32 to vector<8x128xf32>
    %106 = arith.mulf %105, %104 : vector<8x128xf32>
    %cst_43 = arith.constant 5.000000e-01 : f32
    %107 = vector.broadcast %cst_43 : f32 to vector<8x128xf32>
    %108 = arith.addf %106, %107 : vector<8x128xf32>
    %109 = vector.extract_strided_slice %87 {offsets = [0, 256], sizes = [8, 128], strides = [1, 1]} : vector<8x384xf32> to vector<8x128xf32>
    %110 = vector.extract_strided_slice %88 {offsets = [0, 256], sizes = [8, 128], strides = [1, 1]} : vector<8x384xf32> to vector<8x128xf32>
    %111 = arith.mulf %98, %110 : vector<8x128xf32>
    %112 = arith.addf %109, %111 : vector<8x128xf32>
    %113 = math.tanh %112 : vector<8x128xf32>
    %114 = arith.subf %18, %113 : vector<8x128xf32>
    %115 = arith.mulf %108, %114 : vector<8x128xf32>
    %116 = arith.addf %113, %115 : vector<8x128xf32>
    %cst_44 = arith.constant dense<0.000000e+00> : vector<8x128xf32>
    %117 = tpu.matmul %116, %10, %cst_44 {dimension_numbers = #tpu.dot_dimension_numbers<[1], [0], [0], [1], [0, 0, 1, 1], [], []>} : vector<8x128xf32>, vector<128x128xf32>, vector<8x128xf32> -> vector<8x128xf32>
    %118 = arith.addf %117, %16 : vector<8x128xf32>
    %cst_45 = arith.constant 5.000000e-01 : f32
    %119 = vector.broadcast %cst_45 : f32 to vector<8x128xf32>
    %120 = arith.mulf %119, %118 : vector<8x128xf32>
    %121 = math.tanh %120 : vector<8x128xf32>
    %cst_46 = arith.constant 5.000000e-01 : f32
    %122 = vector.broadcast %cst_46 : f32 to vector<8x128xf32>
    %123 = arith.mulf %122, %121 : vector<8x128xf32>
    %cst_47 = arith.constant 5.000000e-01 : f32
    %124 = vector.broadcast %cst_47 : f32 to vector<8x128xf32>
    %125 = arith.addf %123, %124 : vector<8x128xf32>
    %c0_48 = arith.constant 0 : index
    %c0_49 = arith.constant 0 : index
    %c0_50 = arith.constant 0 : index
    %126 = vector.load %arg7[%c0_48, %c0_49, %c0_50] : memref<8x8x128xf32, #tpu.memory_space<vmem>>, vector<1x8x128xf32>
    %127 = vector.shape_cast %126 : vector<1x8x128xf32> to vector<8x128xf32>
    %128 = vector.shape_cast %125 : vector<8x128xf32> to vector<1x8x128xf32>
    tpu.vector_store %arg7[%c0_48, %c0_49, %c0_50], %128 {strides = array<i32>} : memref<8x8x128xf32, #tpu.memory_space<vmem>>, vector<1x8x128xf32>,
    %129 = tpu.concatenate %86, %116 in 1 : vector<8x128xf32>, vector<8x128xf32> -> vector<8x256xf32>
    %cst_51 = arith.constant dense<0.000000e+00> : vector<8x1152xf32>
    %130 = tpu.matmul %129, %9, %cst_51 {dimension_numbers = #tpu.dot_dimension_numbers<[1], [0], [0], [1], [0, 0, 1, 1], [], []>} : vector<8x256xf32>, vector<256x1152xf32>, vector<8x1152xf32> -> vector<8x1152xf32>
    %131 = arith.addf %130, %13 : vector<8x1152xf32>
    %c2 = arith.constant 2 : index
    %c0_52 = arith.constant 0 : index
    %c0_53 = arith.constant 0 : index
    %132 = vector.load %arg8[%c2, %c0_52, %c0_53] : memref<8x8x384xf32, #tpu.memory_space<vmem>>, vector<1x8x384xf32>
    %133 = vector.shape_cast %132 : vector<1x8x384xf32> to vector<8x384xf32>
    %134 = vector.extract_strided_slice %131 {offsets = [0, 0], sizes = [8, 384], strides = [1, 1]} : vector<8x1152xf32> to vector<8x384xf32>
    %135 = vector.extract_strided_slice %133 {offsets = [0, 0], sizes = [8, 128], strides = [1, 1]} : vector<8x384xf32> to vector<8x128xf32>
    %136 = vector.extract_strided_slice %134 {offsets = [0, 0], sizes = [8, 128], strides = [1, 1]} : vector<8x384xf32> to vector<8x128xf32>
    %137 = arith.addf %135, %136 : vector<8x128xf32>
    %cst_54 = arith.constant 5.000000e-01 : f32
    %138 = vector.broadcast %cst_54 : f32 to vector<8x128xf32>
    %139 = arith.mulf %138, %137 : vector<8x128xf32>
    %140 = math.tanh %139 : vector<8x128xf32>
    %cst_55 = arith.constant 5.000000e-01 : f32
    %141 = vector.broadcast %cst_55 : f32 to vector<8x128xf32>
    %142 = arith.mulf %141, %140 : vector<8x128xf32>
    %cst_56 = arith.constant 5.000000e-01 : f32
    %143 = vector.broadcast %cst_56 : f32 to vector<8x128xf32>
    %144 = arith.addf %142, %143 : vector<8x128xf32>
    %145 = vector.extract_strided_slice %133 {offsets = [0, 128], sizes = [8, 128], strides = [1, 1]} : vector<8x384xf32> to vector<8x128xf32>
    %146 = vector.extract_strided_slice %134 {offsets = [0, 128], sizes = [8, 128], strides = [1, 1]} : vector<8x384xf32> to vector<8x128xf32>
    %147 = arith.addf %145, %146 : vector<8x128xf32>
    %cst_57 = arith.constant 5.000000e-01 : f32
    %148 = vector.broadcast %cst_57 : f32 to vector<8x128xf32>
    %149 = arith.mulf %148, %147 : vector<8x128xf32>
    %150 = math.tanh %149 : vector<8x128xf32>
    %cst_58 = arith.constant 5.000000e-01 : f32
    %151 = vector.broadcast %cst_58 : f32 to vector<8x128xf32>
    %152 = arith.mulf %151, %150 : vector<8x128xf32>
    %cst_59 = arith.constant 5.000000e-01 : f32
    %153 = vector.broadcast %cst_59 : f32 to vector<8x128xf32>
    %154 = arith.addf %152, %153 : vector<8x128xf32>
    %155 = vector.extract_strided_slice %133 {offsets = [0, 256], sizes = [8, 128], strides = [1, 1]} : vector<8x384xf32> to vector<8x128xf32>
    %156 = vector.extract_strided_slice %134 {offsets = [0, 256], sizes = [8, 128], strides = [1, 1]} : vector<8x384xf32> to vector<8x128xf32>
    %157 = arith.mulf %144, %156 : vector<8x128xf32>
    %158 = arith.addf %155, %157 : vector<8x128xf32>
    %159 = math.tanh %158 : vector<8x128xf32>
    %160 = arith.subf %86, %159 : vector<8x128xf32>
    %161 = arith.mulf %154, %160 : vector<8x128xf32>
    %162 = arith.addf %159, %161 : vector<8x128xf32>
    %163 = vector.extract_strided_slice %131 {offsets = [0, 384], sizes = [8, 384], strides = [1, 1]} : vector<8x1152xf32> to vector<8x384xf32>
    %164 = vector.extract_strided_slice %131 {offsets = [0, 768], sizes = [8, 384], strides = [1, 1]} : vector<8x1152xf32> to vector<8x384xf32>
    %165 = vector.extract_strided_slice %163 {offsets = [0, 0], sizes = [8, 128], strides = [1, 1]} : vector<8x384xf32> to vector<8x128xf32>
    %166 = vector.extract_strided_slice %164 {offsets = [0, 0], sizes = [8, 128], strides = [1, 1]} : vector<8x384xf32> to vector<8x128xf32>
    %167 = arith.addf %165, %166 : vector<8x128xf32>
    %cst_60 = arith.constant 5.000000e-01 : f32
    %168 = vector.broadcast %cst_60 : f32 to vector<8x128xf32>
    %169 = arith.mulf %168, %167 : vector<8x128xf32>
    %170 = math.tanh %169 : vector<8x128xf32>
    %cst_61 = arith.constant 5.000000e-01 : f32
    %171 = vector.broadcast %cst_61 : f32 to vector<8x128xf32>
    %172 = arith.mulf %171, %170 : vector<8x128xf32>
    %cst_62 = arith.constant 5.000000e-01 : f32
    %173 = vector.broadcast %cst_62 : f32 to vector<8x128xf32>
    %174 = arith.addf %172, %173 : vector<8x128xf32>
    %175 = vector.extract_strided_slice %163 {offsets = [0, 128], sizes = [8, 128], strides = [1, 1]} : vector<8x384xf32> to vector<8x128xf32>
    %176 = vector.extract_strided_slice %164 {offsets = [0, 128], sizes = [8, 128], strides = [1, 1]} : vector<8x384xf32> to vector<8x128xf32>
    %177 = arith.addf %175, %176 : vector<8x128xf32>
    %cst_63 = arith.constant 5.000000e-01 : f32
    %178 = vector.broadcast %cst_63 : f32 to vector<8x128xf32>
    %179 = arith.mulf %178, %177 : vector<8x128xf32>
    %180 = math.tanh %179 : vector<8x128xf32>
    %cst_64 = arith.constant 5.000000e-01 : f32
    %181 = vector.broadcast %cst_64 : f32 to vector<8x128xf32>
    %182 = arith.mulf %181, %180 : vector<8x128xf32>
    %cst_65 = arith.constant 5.000000e-01 : f32
    %183 = vector.broadcast %cst_65 : f32 to vector<8x128xf32>
    %184 = arith.addf %182, %183 : vector<8x128xf32>
    %185 = vector.extract_strided_slice %163 {offsets = [0, 256], sizes = [8, 128], strides = [1, 1]} : vector<8x384xf32> to vector<8x128xf32>
    %186 = vector.extract_strided_slice %164 {offsets = [0, 256], sizes = [8, 128], strides = [1, 1]} : vector<8x384xf32> to vector<8x128xf32>
    %187 = arith.mulf %174, %186 : vector<8x128xf32>
    %188 = arith.addf %185, %187 : vector<8x128xf32>
    %189 = math.tanh %188 : vector<8x128xf32>
    %190 = arith.subf %116, %189 : vector<8x128xf32>
    %191 = arith.mulf %184, %190 : vector<8x128xf32>
    %192 = arith.addf %189, %191 : vector<8x128xf32>
    %cst_66 = arith.constant dense<0.000000e+00> : vector<8x128xf32>
    %193 = tpu.matmul %192, %10, %cst_66 {dimension_numbers = #tpu.dot_dimension_numbers<[1], [0], [0], [1], [0, 0, 1, 1], [], []>} : vector<8x128xf32>, vector<128x128xf32>, vector<8x128xf32> -> vector<8x128xf32>
    %194 = arith.addf %193, %16 : vector<8x128xf32>
    %cst_67 = arith.constant 5.000000e-01 : f32
    %195 = vector.broadcast %cst_67 : f32 to vector<8x128xf32>
    %196 = arith.mulf %195, %194 : vector<8x128xf32>
    %197 = math.tanh %196 : vector<8x128xf32>
    %cst_68 = arith.constant 5.000000e-01 : f32
    %198 = vector.broadcast %cst_68 : f32 to vector<8x128xf32>
    %199 = arith.mulf %198, %197 : vector<8x128xf32>
    %cst_69 = arith.constant 5.000000e-01 : f32
    %200 = vector.broadcast %cst_69 : f32 to vector<8x128xf32>
    %201 = arith.addf %199, %200 : vector<8x128xf32>
    %c1_70 = arith.constant 1 : index
    %c0_71 = arith.constant 0 : index
    %c0_72 = arith.constant 0 : index
    %202 = vector.load %arg7[%c1_70, %c0_71, %c0_72] : memref<8x8x128xf32, #tpu.memory_space<vmem>>, vector<1x8x128xf32>
    %203 = vector.shape_cast %202 : vector<1x8x128xf32> to vector<8x128xf32>
    %204 = vector.shape_cast %201 : vector<8x128xf32> to vector<1x8x128xf32>
    tpu.vector_store %arg7[%c1_70, %c0_71, %c0_72], %204 {strides = array<i32>} : memref<8x8x128xf32, #tpu.memory_space<vmem>>, vector<1x8x128xf32>,
    %205 = tpu.concatenate %162, %192 in 1 : vector<8x128xf32>, vector<8x128xf32> -> vector<8x256xf32>
    %cst_73 = arith.constant dense<0.000000e+00> : vector<8x1152xf32>
    %206 = tpu.matmul %205, %9, %cst_73 {dimension_numbers = #tpu.dot_dimension_numbers<[1], [0], [0], [1], [0, 0, 1, 1], [], []>} : vector<8x256xf32>, vector<256x1152xf32>, vector<8x1152xf32> -> vector<8x1152xf32>
    %207 = arith.addf %206, %13 : vector<8x1152xf32>
    %c3 = arith.constant 3 : index
    %c0_74 = arith.constant 0 : index
    %c0_75 = arith.constant 0 : index
    %208 = vector.load %arg8[%c3, %c0_74, %c0_75] : memref<8x8x384xf32, #tpu.memory_space<vmem>>, vector<1x8x384xf32>
    %209 = vector.shape_cast %208 : vector<1x8x384xf32> to vector<8x384xf32>
    %210 = vector.extract_strided_slice %207 {offsets = [0, 0], sizes = [8, 384], strides = [1, 1]} : vector<8x1152xf32> to vector<8x384xf32>
    %211 = vector.extract_strided_slice %209 {offsets = [0, 0], sizes = [8, 128], strides = [1, 1]} : vector<8x384xf32> to vector<8x128xf32>
    %212 = vector.extract_strided_slice %210 {offsets = [0, 0], sizes = [8, 128], strides = [1, 1]} : vector<8x384xf32> to vector<8x128xf32>
    %213 = arith.addf %211, %212 : vector<8x128xf32>
    %cst_76 = arith.constant 5.000000e-01 : f32
    %214 = vector.broadcast %cst_76 : f32 to vector<8x128xf32>
    %215 = arith.mulf %214, %213 : vector<8x128xf32>
    %216 = math.tanh %215 : vector<8x128xf32>
    %cst_77 = arith.constant 5.000000e-01 : f32
    %217 = vector.broadcast %cst_77 : f32 to vector<8x128xf32>
    %218 = arith.mulf %217, %216 : vector<8x128xf32>
    %cst_78 = arith.constant 5.000000e-01 : f32
    %219 = vector.broadcast %cst_78 : f32 to vector<8x128xf32>
    %220 = arith.addf %218, %219 : vector<8x128xf32>
    %221 = vector.extract_strided_slice %209 {offsets = [0, 128], sizes = [8, 128], strides = [1, 1]} : vector<8x384xf32> to vector<8x128xf32>
    %222 = vector.extract_strided_slice %210 {offsets = [0, 128], sizes = [8, 128], strides = [1, 1]} : vector<8x384xf32> to vector<8x128xf32>
    %223 = arith.addf %221, %222 : vector<8x128xf32>
    %cst_79 = arith.constant 5.000000e-01 : f32
    %224 = vector.broadcast %cst_79 : f32 to vector<8x128xf32>
    %225 = arith.mulf %224, %223 : vector<8x128xf32>
    %226 = math.tanh %225 : vector<8x128xf32>
    %cst_80 = arith.constant 5.000000e-01 : f32
    %227 = vector.broadcast %cst_80 : f32 to vector<8x128xf32>
    %228 = arith.mulf %227, %226 : vector<8x128xf32>
    %cst_81 = arith.constant 5.000000e-01 : f32
    %229 = vector.broadcast %cst_81 : f32 to vector<8x128xf32>
    %230 = arith.addf %228, %229 : vector<8x128xf32>
    %231 = vector.extract_strided_slice %209 {offsets = [0, 256], sizes = [8, 128], strides = [1, 1]} : vector<8x384xf32> to vector<8x128xf32>
    %232 = vector.extract_strided_slice %210 {offsets = [0, 256], sizes = [8, 128], strides = [1, 1]} : vector<8x384xf32> to vector<8x128xf32>
    %233 = arith.mulf %220, %232 : vector<8x128xf32>
    %234 = arith.addf %231, %233 : vector<8x128xf32>
    %235 = math.tanh %234 : vector<8x128xf32>
    %236 = arith.subf %162, %235 : vector<8x128xf32>
    %237 = arith.mulf %230, %236 : vector<8x128xf32>
    %238 = arith.addf %235, %237 : vector<8x128xf32>
    %239 = vector.extract_strided_slice %207 {offsets = [0, 384], sizes = [8, 384], strides = [1, 1]} : vector<8x1152xf32> to vector<8x384xf32>
    %240 = vector.extract_strided_slice %207 {offsets = [0, 768], sizes = [8, 384], strides = [1, 1]} : vector<8x1152xf32> to vector<8x384xf32>
    %241 = vector.extract_strided_slice %239 {offsets = [0, 0], sizes = [8, 128], strides = [1, 1]} : vector<8x384xf32> to vector<8x128xf32>
    %242 = vector.extract_strided_slice %240 {offsets = [0, 0], sizes = [8, 128], strides = [1, 1]} : vector<8x384xf32> to vector<8x128xf32>
    %243 = arith.addf %241, %242 : vector<8x128xf32>
    %cst_82 = arith.constant 5.000000e-01 : f32
    %244 = vector.broadcast %cst_82 : f32 to vector<8x128xf32>
    %245 = arith.mulf %244, %243 : vector<8x128xf32>
    %246 = math.tanh %245 : vector<8x128xf32>
    %cst_83 = arith.constant 5.000000e-01 : f32
    %247 = vector.broadcast %cst_83 : f32 to vector<8x128xf32>
    %248 = arith.mulf %247, %246 : vector<8x128xf32>
    %cst_84 = arith.constant 5.000000e-01 : f32
    %249 = vector.broadcast %cst_84 : f32 to vector<8x128xf32>
    %250 = arith.addf %248, %249 : vector<8x128xf32>
    %251 = vector.extract_strided_slice %239 {offsets = [0, 128], sizes = [8, 128], strides = [1, 1]} : vector<8x384xf32> to vector<8x128xf32>
    %252 = vector.extract_strided_slice %240 {offsets = [0, 128], sizes = [8, 128], strides = [1, 1]} : vector<8x384xf32> to vector<8x128xf32>
    %253 = arith.addf %251, %252 : vector<8x128xf32>
    %cst_85 = arith.constant 5.000000e-01 : f32
    %254 = vector.broadcast %cst_85 : f32 to vector<8x128xf32>
    %255 = arith.mulf %254, %253 : vector<8x128xf32>
    %256 = math.tanh %255 : vector<8x128xf32>
    %cst_86 = arith.constant 5.000000e-01 : f32
    %257 = vector.broadcast %cst_86 : f32 to vector<8x128xf32>
    %258 = arith.mulf %257, %256 : vector<8x128xf32>
    %cst_87 = arith.constant 5.000000e-01 : f32
    %259 = vector.broadcast %cst_87 : f32 to vector<8x128xf32>
    %260 = arith.addf %258, %259 : vector<8x128xf32>
    %261 = vector.extract_strided_slice %239 {offsets = [0, 256], sizes = [8, 128], strides = [1, 1]} : vector<8x384xf32> to vector<8x128xf32>
    %262 = vector.extract_strided_slice %240 {offsets = [0, 256], sizes = [8, 128], strides = [1, 1]} : vector<8x384xf32> to vector<8x128xf32>
    %263 = arith.mulf %250, %262 : vector<8x128xf32>
    %264 = arith.addf %261, %263 : vector<8x128xf32>
    %265 = math.tanh %264 : vector<8x128xf32>
    %266 = arith.subf %192, %265 : vector<8x128xf32>
    %267 = arith.mulf %260, %266 : vector<8x128xf32>
    %268 = arith.addf %265, %267 : vector<8x128xf32>
    %cst_88 = arith.constant dense<0.000000e+00> : vector<8x128xf32>
    %269 = tpu.matmul %268, %10, %cst_88 {dimension_numbers = #tpu.dot_dimension_numbers<[1], [0], [0], [1], [0, 0, 1, 1], [], []>} : vector<8x128xf32>, vector<128x128xf32>, vector<8x128xf32> -> vector<8x128xf32>
    %270 = arith.addf %269, %16 : vector<8x128xf32>
    %cst_89 = arith.constant 5.000000e-01 : f32
    %271 = vector.broadcast %cst_89 : f32 to vector<8x128xf32>
    %272 = arith.mulf %271, %270 : vector<8x128xf32>
    %273 = math.tanh %272 : vector<8x128xf32>
    %cst_90 = arith.constant 5.000000e-01 : f32
    %274 = vector.broadcast %cst_90 : f32 to vector<8x128xf32>
    %275 = arith.mulf %274, %273 : vector<8x128xf32>
    %cst_91 = arith.constant 5.000000e-01 : f32
    %276 = vector.broadcast %cst_91 : f32 to vector<8x128xf32>
    %277 = arith.addf %275, %276 : vector<8x128xf32>
    %c2_92 = arith.constant 2 : index
    %c0_93 = arith.constant 0 : index
    %c0_94 = arith.constant 0 : index
    %278 = vector.load %arg7[%c2_92, %c0_93, %c0_94] : memref<8x8x128xf32, #tpu.memory_space<vmem>>, vector<1x8x128xf32>
    %279 = vector.shape_cast %278 : vector<1x8x128xf32> to vector<8x128xf32>
    %280 = vector.shape_cast %277 : vector<8x128xf32> to vector<1x8x128xf32>
    tpu.vector_store %arg7[%c2_92, %c0_93, %c0_94], %280 {strides = array<i32>} : memref<8x8x128xf32, #tpu.memory_space<vmem>>, vector<1x8x128xf32>,
    %281 = tpu.concatenate %238, %268 in 1 : vector<8x128xf32>, vector<8x128xf32> -> vector<8x256xf32>
    %cst_95 = arith.constant dense<0.000000e+00> : vector<8x1152xf32>
    %282 = tpu.matmul %281, %9, %cst_95 {dimension_numbers = #tpu.dot_dimension_numbers<[1], [0], [0], [1], [0, 0, 1, 1], [], []>} : vector<8x256xf32>, vector<256x1152xf32>, vector<8x1152xf32> -> vector<8x1152xf32>
    %283 = arith.addf %282, %13 : vector<8x1152xf32>
    %c4 = arith.constant 4 : index
    %c0_96 = arith.constant 0 : index
    %c0_97 = arith.constant 0 : index
    %284 = vector.load %arg8[%c4, %c0_96, %c0_97] : memref<8x8x384xf32, #tpu.memory_space<vmem>>, vector<1x8x384xf32>
    %285 = vector.shape_cast %284 : vector<1x8x384xf32> to vector<8x384xf32>
    %286 = vector.extract_strided_slice %283 {offsets = [0, 0], sizes = [8, 384], strides = [1, 1]} : vector<8x1152xf32> to vector<8x384xf32>
    %287 = vector.extract_strided_slice %285 {offsets = [0, 0], sizes = [8, 128], strides = [1, 1]} : vector<8x384xf32> to vector<8x128xf32>
    %288 = vector.extract_strided_slice %286 {offsets = [0, 0], sizes = [8, 128], strides = [1, 1]} : vector<8x384xf32> to vector<8x128xf32>
    %289 = arith.addf %287, %288 : vector<8x128xf32>
    %cst_98 = arith.constant 5.000000e-01 : f32
    %290 = vector.broadcast %cst_98 : f32 to vector<8x128xf32>
    %291 = arith.mulf %290, %289 : vector<8x128xf32>
    %292 = math.tanh %291 : vector<8x128xf32>
    %cst_99 = arith.constant 5.000000e-01 : f32
    %293 = vector.broadcast %cst_99 : f32 to vector<8x128xf32>
    %294 = arith.mulf %293, %292 : vector<8x128xf32>
    %cst_100 = arith.constant 5.000000e-01 : f32
    %295 = vector.broadcast %cst_100 : f32 to vector<8x128xf32>
    %296 = arith.addf %294, %295 : vector<8x128xf32>
    %297 = vector.extract_strided_slice %285 {offsets = [0, 128], sizes = [8, 128], strides = [1, 1]} : vector<8x384xf32> to vector<8x128xf32>
    %298 = vector.extract_strided_slice %286 {offsets = [0, 128], sizes = [8, 128], strides = [1, 1]} : vector<8x384xf32> to vector<8x128xf32>
    %299 = arith.addf %297, %298 : vector<8x128xf32>
    %cst_101 = arith.constant 5.000000e-01 : f32
    %300 = vector.broadcast %cst_101 : f32 to vector<8x128xf32>
    %301 = arith.mulf %300, %299 : vector<8x128xf32>
    %302 = math.tanh %301 : vector<8x128xf32>
    %cst_102 = arith.constant 5.000000e-01 : f32
    %303 = vector.broadcast %cst_102 : f32 to vector<8x128xf32>
    %304 = arith.mulf %303, %302 : vector<8x128xf32>
    %cst_103 = arith.constant 5.000000e-01 : f32
    %305 = vector.broadcast %cst_103 : f32 to vector<8x128xf32>
    %306 = arith.addf %304, %305 : vector<8x128xf32>
    %307 = vector.extract_strided_slice %285 {offsets = [0, 256], sizes = [8, 128], strides = [1, 1]} : vector<8x384xf32> to vector<8x128xf32>
    %308 = vector.extract_strided_slice %286 {offsets = [0, 256], sizes = [8, 128], strides = [1, 1]} : vector<8x384xf32> to vector<8x128xf32>
    %309 = arith.mulf %296, %308 : vector<8x128xf32>
    %310 = arith.addf %307, %309 : vector<8x128xf32>
    %311 = math.tanh %310 : vector<8x128xf32>
    %312 = arith.subf %238, %311 : vector<8x128xf32>
    %313 = arith.mulf %306, %312 : vector<8x128xf32>
    %314 = arith.addf %311, %313 : vector<8x128xf32>
    %315 = vector.extract_strided_slice %283 {offsets = [0, 384], sizes = [8, 384], strides = [1, 1]} : vector<8x1152xf32> to vector<8x384xf32>
    %316 = vector.extract_strided_slice %283 {offsets = [0, 768], sizes = [8, 384], strides = [1, 1]} : vector<8x1152xf32> to vector<8x384xf32>
    %317 = vector.extract_strided_slice %315 {offsets = [0, 0], sizes = [8, 128], strides = [1, 1]} : vector<8x384xf32> to vector<8x128xf32>
    %318 = vector.extract_strided_slice %316 {offsets = [0, 0], sizes = [8, 128], strides = [1, 1]} : vector<8x384xf32> to vector<8x128xf32>
    %319 = arith.addf %317, %318 : vector<8x128xf32>
    %cst_104 = arith.constant 5.000000e-01 : f32
    %320 = vector.broadcast %cst_104 : f32 to vector<8x128xf32>
    %321 = arith.mulf %320, %319 : vector<8x128xf32>
    %322 = math.tanh %321 : vector<8x128xf32>
    %cst_105 = arith.constant 5.000000e-01 : f32
    %323 = vector.broadcast %cst_105 : f32 to vector<8x128xf32>
    %324 = arith.mulf %323, %322 : vector<8x128xf32>
    %cst_106 = arith.constant 5.000000e-01 : f32
    %325 = vector.broadcast %cst_106 : f32 to vector<8x128xf32>
    %326 = arith.addf %324, %325 : vector<8x128xf32>
    %327 = vector.extract_strided_slice %315 {offsets = [0, 128], sizes = [8, 128], strides = [1, 1]} : vector<8x384xf32> to vector<8x128xf32>
    %328 = vector.extract_strided_slice %316 {offsets = [0, 128], sizes = [8, 128], strides = [1, 1]} : vector<8x384xf32> to vector<8x128xf32>
    %329 = arith.addf %327, %328 : vector<8x128xf32>
    %cst_107 = arith.constant 5.000000e-01 : f32
    %330 = vector.broadcast %cst_107 : f32 to vector<8x128xf32>
    %331 = arith.mulf %330, %329 : vector<8x128xf32>
    %332 = math.tanh %331 : vector<8x128xf32>
    %cst_108 = arith.constant 5.000000e-01 : f32
    %333 = vector.broadcast %cst_108 : f32 to vector<8x128xf32>
    %334 = arith.mulf %333, %332 : vector<8x128xf32>
    %cst_109 = arith.constant 5.000000e-01 : f32
    %335 = vector.broadcast %cst_109 : f32 to vector<8x128xf32>
    %336 = arith.addf %334, %335 : vector<8x128xf32>
    %337 = vector.extract_strided_slice %315 {offsets = [0, 256], sizes = [8, 128], strides = [1, 1]} : vector<8x384xf32> to vector<8x128xf32>
    %338 = vector.extract_strided_slice %316 {offsets = [0, 256], sizes = [8, 128], strides = [1, 1]} : vector<8x384xf32> to vector<8x128xf32>
    %339 = arith.mulf %326, %338 : vector<8x128xf32>
    %340 = arith.addf %337, %339 : vector<8x128xf32>
    %341 = math.tanh %340 : vector<8x128xf32>
    %342 = arith.subf %268, %341 : vector<8x128xf32>
    %343 = arith.mulf %336, %342 : vector<8x128xf32>
    %344 = arith.addf %341, %343 : vector<8x128xf32>
    %cst_110 = arith.constant dense<0.000000e+00> : vector<8x128xf32>
    %345 = tpu.matmul %344, %10, %cst_110 {dimension_numbers = #tpu.dot_dimension_numbers<[1], [0], [0], [1], [0, 0, 1, 1], [], []>} : vector<8x128xf32>, vector<128x128xf32>, vector<8x128xf32> -> vector<8x128xf32>
    %346 = arith.addf %345, %16 : vector<8x128xf32>
    %cst_111 = arith.constant 5.000000e-01 : f32
    %347 = vector.broadcast %cst_111 : f32 to vector<8x128xf32>
    %348 = arith.mulf %347, %346 : vector<8x128xf32>
    %349 = math.tanh %348 : vector<8x128xf32>
    %cst_112 = arith.constant 5.000000e-01 : f32
    %350 = vector.broadcast %cst_112 : f32 to vector<8x128xf32>
    %351 = arith.mulf %350, %349 : vector<8x128xf32>
    %cst_113 = arith.constant 5.000000e-01 : f32
    %352 = vector.broadcast %cst_113 : f32 to vector<8x128xf32>
    %353 = arith.addf %351, %352 : vector<8x128xf32>
    %c3_114 = arith.constant 3 : index
    %c0_115 = arith.constant 0 : index
    %c0_116 = arith.constant 0 : index
    %354 = vector.load %arg7[%c3_114, %c0_115, %c0_116] : memref<8x8x128xf32, #tpu.memory_space<vmem>>, vector<1x8x128xf32>
    %355 = vector.shape_cast %354 : vector<1x8x128xf32> to vector<8x128xf32>
    %356 = vector.shape_cast %353 : vector<8x128xf32> to vector<1x8x128xf32>
    tpu.vector_store %arg7[%c3_114, %c0_115, %c0_116], %356 {strides = array<i32>} : memref<8x8x128xf32, #tpu.memory_space<vmem>>, vector<1x8x128xf32>,
    %357 = tpu.concatenate %314, %344 in 1 : vector<8x128xf32>, vector<8x128xf32> -> vector<8x256xf32>
    %cst_117 = arith.constant dense<0.000000e+00> : vector<8x1152xf32>
    %358 = tpu.matmul %357, %9, %cst_117 {dimension_numbers = #tpu.dot_dimension_numbers<[1], [0], [0], [1], [0, 0, 1, 1], [], []>} : vector<8x256xf32>, vector<256x1152xf32>, vector<8x1152xf32> -> vector<8x1152xf32>
    %359 = arith.addf %358, %13 : vector<8x1152xf32>
    %c5 = arith.constant 5 : index
    %c0_118 = arith.constant 0 : index
    %c0_119 = arith.constant 0 : index
    %360 = vector.load %arg8[%c5, %c0_118, %c0_119] : memref<8x8x384xf32, #tpu.memory_space<vmem>>, vector<1x8x384xf32>
    %361 = vector.shape_cast %360 : vector<1x8x384xf32> to vector<8x384xf32>
    %362 = vector.extract_strided_slice %359 {offsets = [0, 0], sizes = [8, 384], strides = [1, 1]} : vector<8x1152xf32> to vector<8x384xf32>
    %363 = vector.extract_strided_slice %361 {offsets = [0, 0], sizes = [8, 128], strides = [1, 1]} : vector<8x384xf32> to vector<8x128xf32>
    %364 = vector.extract_strided_slice %362 {offsets = [0, 0], sizes = [8, 128], strides = [1, 1]} : vector<8x384xf32> to vector<8x128xf32>
    %365 = arith.addf %363, %364 : vector<8x128xf32>
    %cst_120 = arith.constant 5.000000e-01 : f32
    %366 = vector.broadcast %cst_120 : f32 to vector<8x128xf32>
    %367 = arith.mulf %366, %365 : vector<8x128xf32>
    %368 = math.tanh %367 : vector<8x128xf32>
    %cst_121 = arith.constant 5.000000e-01 : f32
    %369 = vector.broadcast %cst_121 : f32 to vector<8x128xf32>
    %370 = arith.mulf %369, %368 : vector<8x128xf32>
    %cst_122 = arith.constant 5.000000e-01 : f32
    %371 = vector.broadcast %cst_122 : f32 to vector<8x128xf32>
    %372 = arith.addf %370, %371 : vector<8x128xf32>
    %373 = vector.extract_strided_slice %361 {offsets = [0, 128], sizes = [8, 128], strides = [1, 1]} : vector<8x384xf32> to vector<8x128xf32>
    %374 = vector.extract_strided_slice %362 {offsets = [0, 128], sizes = [8, 128], strides = [1, 1]} : vector<8x384xf32> to vector<8x128xf32>
    %375 = arith.addf %373, %374 : vector<8x128xf32>
    %cst_123 = arith.constant 5.000000e-01 : f32
    %376 = vector.broadcast %cst_123 : f32 to vector<8x128xf32>
    %377 = arith.mulf %376, %375 : vector<8x128xf32>
    %378 = math.tanh %377 : vector<8x128xf32>
    %cst_124 = arith.constant 5.000000e-01 : f32
    %379 = vector.broadcast %cst_124 : f32 to vector<8x128xf32>
    %380 = arith.mulf %379, %378 : vector<8x128xf32>
    %cst_125 = arith.constant 5.000000e-01 : f32
    %381 = vector.broadcast %cst_125 : f32 to vector<8x128xf32>
    %382 = arith.addf %380, %381 : vector<8x128xf32>
    %383 = vector.extract_strided_slice %361 {offsets = [0, 256], sizes = [8, 128], strides = [1, 1]} : vector<8x384xf32> to vector<8x128xf32>
    %384 = vector.extract_strided_slice %362 {offsets = [0, 256], sizes = [8, 128], strides = [1, 1]} : vector<8x384xf32> to vector<8x128xf32>
    %385 = arith.mulf %372, %384 : vector<8x128xf32>
    %386 = arith.addf %383, %385 : vector<8x128xf32>
    %387 = math.tanh %386 : vector<8x128xf32>
    %388 = arith.subf %314, %387 : vector<8x128xf32>
    %389 = arith.mulf %382, %388 : vector<8x128xf32>
    %390 = arith.addf %387, %389 : vector<8x128xf32>
    %391 = vector.extract_strided_slice %359 {offsets = [0, 384], sizes = [8, 384], strides = [1, 1]} : vector<8x1152xf32> to vector<8x384xf32>
    %392 = vector.extract_strided_slice %359 {offsets = [0, 768], sizes = [8, 384], strides = [1, 1]} : vector<8x1152xf32> to vector<8x384xf32>
    %393 = vector.extract_strided_slice %391 {offsets = [0, 0], sizes = [8, 128], strides = [1, 1]} : vector<8x384xf32> to vector<8x128xf32>
    %394 = vector.extract_strided_slice %392 {offsets = [0, 0], sizes = [8, 128], strides = [1, 1]} : vector<8x384xf32> to vector<8x128xf32>
    %395 = arith.addf %393, %394 : vector<8x128xf32>
    %cst_126 = arith.constant 5.000000e-01 : f32
    %396 = vector.broadcast %cst_126 : f32 to vector<8x128xf32>
    %397 = arith.mulf %396, %395 : vector<8x128xf32>
    %398 = math.tanh %397 : vector<8x128xf32>
    %cst_127 = arith.constant 5.000000e-01 : f32
    %399 = vector.broadcast %cst_127 : f32 to vector<8x128xf32>
    %400 = arith.mulf %399, %398 : vector<8x128xf32>
    %cst_128 = arith.constant 5.000000e-01 : f32
    %401 = vector.broadcast %cst_128 : f32 to vector<8x128xf32>
    %402 = arith.addf %400, %401 : vector<8x128xf32>
    %403 = vector.extract_strided_slice %391 {offsets = [0, 128], sizes = [8, 128], strides = [1, 1]} : vector<8x384xf32> to vector<8x128xf32>
    %404 = vector.extract_strided_slice %392 {offsets = [0, 128], sizes = [8, 128], strides = [1, 1]} : vector<8x384xf32> to vector<8x128xf32>
    %405 = arith.addf %403, %404 : vector<8x128xf32>
    %cst_129 = arith.constant 5.000000e-01 : f32
    %406 = vector.broadcast %cst_129 : f32 to vector<8x128xf32>
    %407 = arith.mulf %406, %405 : vector<8x128xf32>
    %408 = math.tanh %407 : vector<8x128xf32>
    %cst_130 = arith.constant 5.000000e-01 : f32
    %409 = vector.broadcast %cst_130 : f32 to vector<8x128xf32>
    %410 = arith.mulf %409, %408 : vector<8x128xf32>
    %cst_131 = arith.constant 5.000000e-01 : f32
    %411 = vector.broadcast %cst_131 : f32 to vector<8x128xf32>
    %412 = arith.addf %410, %411 : vector<8x128xf32>
    %413 = vector.extract_strided_slice %391 {offsets = [0, 256], sizes = [8, 128], strides = [1, 1]} : vector<8x384xf32> to vector<8x128xf32>
    %414 = vector.extract_strided_slice %392 {offsets = [0, 256], sizes = [8, 128], strides = [1, 1]} : vector<8x384xf32> to vector<8x128xf32>
    %415 = arith.mulf %402, %414 : vector<8x128xf32>
    %416 = arith.addf %413, %415 : vector<8x128xf32>
    %417 = math.tanh %416 : vector<8x128xf32>
    %418 = arith.subf %344, %417 : vector<8x128xf32>
    %419 = arith.mulf %412, %418 : vector<8x128xf32>
    %420 = arith.addf %417, %419 : vector<8x128xf32>
    %cst_132 = arith.constant dense<0.000000e+00> : vector<8x128xf32>
    %421 = tpu.matmul %420, %10, %cst_132 {dimension_numbers = #tpu.dot_dimension_numbers<[1], [0], [0], [1], [0, 0, 1, 1], [], []>} : vector<8x128xf32>, vector<128x128xf32>, vector<8x128xf32> -> vector<8x128xf32>
    %422 = arith.addf %421, %16 : vector<8x128xf32>
    %cst_133 = arith.constant 5.000000e-01 : f32
    %423 = vector.broadcast %cst_133 : f32 to vector<8x128xf32>
    %424 = arith.mulf %423, %422 : vector<8x128xf32>
    %425 = math.tanh %424 : vector<8x128xf32>
    %cst_134 = arith.constant 5.000000e-01 : f32
    %426 = vector.broadcast %cst_134 : f32 to vector<8x128xf32>
    %427 = arith.mulf %426, %425 : vector<8x128xf32>
    %cst_135 = arith.constant 5.000000e-01 : f32
    %428 = vector.broadcast %cst_135 : f32 to vector<8x128xf32>
    %429 = arith.addf %427, %428 : vector<8x128xf32>
    %c4_136 = arith.constant 4 : index
    %c0_137 = arith.constant 0 : index
    %c0_138 = arith.constant 0 : index
    %430 = vector.load %arg7[%c4_136, %c0_137, %c0_138] : memref<8x8x128xf32, #tpu.memory_space<vmem>>, vector<1x8x128xf32>
    %431 = vector.shape_cast %430 : vector<1x8x128xf32> to vector<8x128xf32>
    %432 = vector.shape_cast %429 : vector<8x128xf32> to vector<1x8x128xf32>
    tpu.vector_store %arg7[%c4_136, %c0_137, %c0_138], %432 {strides = array<i32>} : memref<8x8x128xf32, #tpu.memory_space<vmem>>, vector<1x8x128xf32>,
    %433 = tpu.concatenate %390, %420 in 1 : vector<8x128xf32>, vector<8x128xf32> -> vector<8x256xf32>
    %cst_139 = arith.constant dense<0.000000e+00> : vector<8x1152xf32>
    %434 = tpu.matmul %433, %9, %cst_139 {dimension_numbers = #tpu.dot_dimension_numbers<[1], [0], [0], [1], [0, 0, 1, 1], [], []>} : vector<8x256xf32>, vector<256x1152xf32>, vector<8x1152xf32> -> vector<8x1152xf32>
    %435 = arith.addf %434, %13 : vector<8x1152xf32>
    %c6 = arith.constant 6 : index
    %c0_140 = arith.constant 0 : index
    %c0_141 = arith.constant 0 : index
    %436 = vector.load %arg8[%c6, %c0_140, %c0_141] : memref<8x8x384xf32, #tpu.memory_space<vmem>>, vector<1x8x384xf32>
    %437 = vector.shape_cast %436 : vector<1x8x384xf32> to vector<8x384xf32>
    %438 = vector.extract_strided_slice %435 {offsets = [0, 0], sizes = [8, 384], strides = [1, 1]} : vector<8x1152xf32> to vector<8x384xf32>
    %439 = vector.extract_strided_slice %437 {offsets = [0, 0], sizes = [8, 128], strides = [1, 1]} : vector<8x384xf32> to vector<8x128xf32>
    %440 = vector.extract_strided_slice %438 {offsets = [0, 0], sizes = [8, 128], strides = [1, 1]} : vector<8x384xf32> to vector<8x128xf32>
    %441 = arith.addf %439, %440 : vector<8x128xf32>
    %cst_142 = arith.constant 5.000000e-01 : f32
    %442 = vector.broadcast %cst_142 : f32 to vector<8x128xf32>
    %443 = arith.mulf %442, %441 : vector<8x128xf32>
    %444 = math.tanh %443 : vector<8x128xf32>
    %cst_143 = arith.constant 5.000000e-01 : f32
    %445 = vector.broadcast %cst_143 : f32 to vector<8x128xf32>
    %446 = arith.mulf %445, %444 : vector<8x128xf32>
    %cst_144 = arith.constant 5.000000e-01 : f32
    %447 = vector.broadcast %cst_144 : f32 to vector<8x128xf32>
    %448 = arith.addf %446, %447 : vector<8x128xf32>
    %449 = vector.extract_strided_slice %437 {offsets = [0, 128], sizes = [8, 128], strides = [1, 1]} : vector<8x384xf32> to vector<8x128xf32>
    %450 = vector.extract_strided_slice %438 {offsets = [0, 128], sizes = [8, 128], strides = [1, 1]} : vector<8x384xf32> to vector<8x128xf32>
    %451 = arith.addf %449, %450 : vector<8x128xf32>
    %cst_145 = arith.constant 5.000000e-01 : f32
    %452 = vector.broadcast %cst_145 : f32 to vector<8x128xf32>
    %453 = arith.mulf %452, %451 : vector<8x128xf32>
    %454 = math.tanh %453 : vector<8x128xf32>
    %cst_146 = arith.constant 5.000000e-01 : f32
    %455 = vector.broadcast %cst_146 : f32 to vector<8x128xf32>
    %456 = arith.mulf %455, %454 : vector<8x128xf32>
    %cst_147 = arith.constant 5.000000e-01 : f32
    %457 = vector.broadcast %cst_147 : f32 to vector<8x128xf32>
    %458 = arith.addf %456, %457 : vector<8x128xf32>
    %459 = vector.extract_strided_slice %437 {offsets = [0, 256], sizes = [8, 128], strides = [1, 1]} : vector<8x384xf32> to vector<8x128xf32>
    %460 = vector.extract_strided_slice %438 {offsets = [0, 256], sizes = [8, 128], strides = [1, 1]} : vector<8x384xf32> to vector<8x128xf32>
    %461 = arith.mulf %448, %460 : vector<8x128xf32>
    %462 = arith.addf %459, %461 : vector<8x128xf32>
    %463 = math.tanh %462 : vector<8x128xf32>
    %464 = arith.subf %390, %463 : vector<8x128xf32>
    %465 = arith.mulf %458, %464 : vector<8x128xf32>
    %466 = arith.addf %463, %465 : vector<8x128xf32>
    %467 = vector.extract_strided_slice %435 {offsets = [0, 384], sizes = [8, 384], strides = [1, 1]} : vector<8x1152xf32> to vector<8x384xf32>
    %468 = vector.extract_strided_slice %435 {offsets = [0, 768], sizes = [8, 384], strides = [1, 1]} : vector<8x1152xf32> to vector<8x384xf32>
    %469 = vector.extract_strided_slice %467 {offsets = [0, 0], sizes = [8, 128], strides = [1, 1]} : vector<8x384xf32> to vector<8x128xf32>
    %470 = vector.extract_strided_slice %468 {offsets = [0, 0], sizes = [8, 128], strides = [1, 1]} : vector<8x384xf32> to vector<8x128xf32>
    %471 = arith.addf %469, %470 : vector<8x128xf32>
    %cst_148 = arith.constant 5.000000e-01 : f32
    %472 = vector.broadcast %cst_148 : f32 to vector<8x128xf32>
    %473 = arith.mulf %472, %471 : vector<8x128xf32>
    %474 = math.tanh %473 : vector<8x128xf32>
    %cst_149 = arith.constant 5.000000e-01 : f32
    %475 = vector.broadcast %cst_149 : f32 to vector<8x128xf32>
    %476 = arith.mulf %475, %474 : vector<8x128xf32>
    %cst_150 = arith.constant 5.000000e-01 : f32
    %477 = vector.broadcast %cst_150 : f32 to vector<8x128xf32>
    %478 = arith.addf %476, %477 : vector<8x128xf32>
    %479 = vector.extract_strided_slice %467 {offsets = [0, 128], sizes = [8, 128], strides = [1, 1]} : vector<8x384xf32> to vector<8x128xf32>
    %480 = vector.extract_strided_slice %468 {offsets = [0, 128], sizes = [8, 128], strides = [1, 1]} : vector<8x384xf32> to vector<8x128xf32>
    %481 = arith.addf %479, %480 : vector<8x128xf32>
    %cst_151 = arith.constant 5.000000e-01 : f32
    %482 = vector.broadcast %cst_151 : f32 to vector<8x128xf32>
    %483 = arith.mulf %482, %481 : vector<8x128xf32>
    %484 = math.tanh %483 : vector<8x128xf32>
    %cst_152 = arith.constant 5.000000e-01 : f32
    %485 = vector.broadcast %cst_152 : f32 to vector<8x128xf32>
    %486 = arith.mulf %485, %484 : vector<8x128xf32>
    %cst_153 = arith.constant 5.000000e-01 : f32
    %487 = vector.broadcast %cst_153 : f32 to vector<8x128xf32>
    %488 = arith.addf %486, %487 : vector<8x128xf32>
    %489 = vector.extract_strided_slice %467 {offsets = [0, 256], sizes = [8, 128], strides = [1, 1]} : vector<8x384xf32> to vector<8x128xf32>
    %490 = vector.extract_strided_slice %468 {offsets = [0, 256], sizes = [8, 128], strides = [1, 1]} : vector<8x384xf32> to vector<8x128xf32>
    %491 = arith.mulf %478, %490 : vector<8x128xf32>
    %492 = arith.addf %489, %491 : vector<8x128xf32>
    %493 = math.tanh %492 : vector<8x128xf32>
    %494 = arith.subf %420, %493 : vector<8x128xf32>
    %495 = arith.mulf %488, %494 : vector<8x128xf32>
    %496 = arith.addf %493, %495 : vector<8x128xf32>
    %cst_154 = arith.constant dense<0.000000e+00> : vector<8x128xf32>
    %497 = tpu.matmul %496, %10, %cst_154 {dimension_numbers = #tpu.dot_dimension_numbers<[1], [0], [0], [1], [0, 0, 1, 1], [], []>} : vector<8x128xf32>, vector<128x128xf32>, vector<8x128xf32> -> vector<8x128xf32>
    %498 = arith.addf %497, %16 : vector<8x128xf32>
    %cst_155 = arith.constant 5.000000e-01 : f32
    %499 = vector.broadcast %cst_155 : f32 to vector<8x128xf32>
    %500 = arith.mulf %499, %498 : vector<8x128xf32>
    %501 = math.tanh %500 : vector<8x128xf32>
    %cst_156 = arith.constant 5.000000e-01 : f32
    %502 = vector.broadcast %cst_156 : f32 to vector<8x128xf32>
    %503 = arith.mulf %502, %501 : vector<8x128xf32>
    %cst_157 = arith.constant 5.000000e-01 : f32
    %504 = vector.broadcast %cst_157 : f32 to vector<8x128xf32>
    %505 = arith.addf %503, %504 : vector<8x128xf32>
    %c5_158 = arith.constant 5 : index
    %c0_159 = arith.constant 0 : index
    %c0_160 = arith.constant 0 : index
    %506 = vector.load %arg7[%c5_158, %c0_159, %c0_160] : memref<8x8x128xf32, #tpu.memory_space<vmem>>, vector<1x8x128xf32>
    %507 = vector.shape_cast %506 : vector<1x8x128xf32> to vector<8x128xf32>
    %508 = vector.shape_cast %505 : vector<8x128xf32> to vector<1x8x128xf32>
    tpu.vector_store %arg7[%c5_158, %c0_159, %c0_160], %508 {strides = array<i32>} : memref<8x8x128xf32, #tpu.memory_space<vmem>>, vector<1x8x128xf32>,
    %509 = tpu.concatenate %466, %496 in 1 : vector<8x128xf32>, vector<8x128xf32> -> vector<8x256xf32>
    %cst_161 = arith.constant dense<0.000000e+00> : vector<8x1152xf32>
    %510 = tpu.matmul %509, %9, %cst_161 {dimension_numbers = #tpu.dot_dimension_numbers<[1], [0], [0], [1], [0, 0, 1, 1], [], []>} : vector<8x256xf32>, vector<256x1152xf32>, vector<8x1152xf32> -> vector<8x1152xf32>
    %511 = arith.addf %510, %13 : vector<8x1152xf32>
    %c7 = arith.constant 7 : index
    %c0_162 = arith.constant 0 : index
    %c0_163 = arith.constant 0 : index
    %512 = vector.load %arg8[%c7, %c0_162, %c0_163] : memref<8x8x384xf32, #tpu.memory_space<vmem>>, vector<1x8x384xf32>
    %513 = vector.shape_cast %512 : vector<1x8x384xf32> to vector<8x384xf32>
    %514 = vector.extract_strided_slice %511 {offsets = [0, 0], sizes = [8, 384], strides = [1, 1]} : vector<8x1152xf32> to vector<8x384xf32>
    %515 = vector.extract_strided_slice %513 {offsets = [0, 0], sizes = [8, 128], strides = [1, 1]} : vector<8x384xf32> to vector<8x128xf32>
    %516 = vector.extract_strided_slice %514 {offsets = [0, 0], sizes = [8, 128], strides = [1, 1]} : vector<8x384xf32> to vector<8x128xf32>
    %517 = arith.addf %515, %516 : vector<8x128xf32>
    %cst_164 = arith.constant 5.000000e-01 : f32
    %518 = vector.broadcast %cst_164 : f32 to vector<8x128xf32>
    %519 = arith.mulf %518, %517 : vector<8x128xf32>
    %520 = math.tanh %519 : vector<8x128xf32>
    %cst_165 = arith.constant 5.000000e-01 : f32
    %521 = vector.broadcast %cst_165 : f32 to vector<8x128xf32>
    %522 = arith.mulf %521, %520 : vector<8x128xf32>
    %cst_166 = arith.constant 5.000000e-01 : f32
    %523 = vector.broadcast %cst_166 : f32 to vector<8x128xf32>
    %524 = arith.addf %522, %523 : vector<8x128xf32>
    %525 = vector.extract_strided_slice %513 {offsets = [0, 128], sizes = [8, 128], strides = [1, 1]} : vector<8x384xf32> to vector<8x128xf32>
    %526 = vector.extract_strided_slice %514 {offsets = [0, 128], sizes = [8, 128], strides = [1, 1]} : vector<8x384xf32> to vector<8x128xf32>
    %527 = arith.addf %525, %526 : vector<8x128xf32>
    %cst_167 = arith.constant 5.000000e-01 : f32
    %528 = vector.broadcast %cst_167 : f32 to vector<8x128xf32>
    %529 = arith.mulf %528, %527 : vector<8x128xf32>
    %530 = math.tanh %529 : vector<8x128xf32>
    %cst_168 = arith.constant 5.000000e-01 : f32
    %531 = vector.broadcast %cst_168 : f32 to vector<8x128xf32>
    %532 = arith.mulf %531, %530 : vector<8x128xf32>
    %cst_169 = arith.constant 5.000000e-01 : f32
    %533 = vector.broadcast %cst_169 : f32 to vector<8x128xf32>
    %534 = arith.addf %532, %533 : vector<8x128xf32>
    %535 = vector.extract_strided_slice %513 {offsets = [0, 256], sizes = [8, 128], strides = [1, 1]} : vector<8x384xf32> to vector<8x128xf32>
    %536 = vector.extract_strided_slice %514 {offsets = [0, 256], sizes = [8, 128], strides = [1, 1]} : vector<8x384xf32> to vector<8x128xf32>
    %537 = arith.mulf %524, %536 : vector<8x128xf32>
    %538 = arith.addf %535, %537 : vector<8x128xf32>
    %539 = math.tanh %538 : vector<8x128xf32>
    %540 = arith.subf %466, %539 : vector<8x128xf32>
    %541 = arith.mulf %534, %540 : vector<8x128xf32>
    %542 = arith.addf %539, %541 : vector<8x128xf32>
    %543 = vector.extract_strided_slice %511 {offsets = [0, 384], sizes = [8, 384], strides = [1, 1]} : vector<8x1152xf32> to vector<8x384xf32>
    %544 = vector.extract_strided_slice %511 {offsets = [0, 768], sizes = [8, 384], strides = [1, 1]} : vector<8x1152xf32> to vector<8x384xf32>
    %545 = vector.extract_strided_slice %543 {offsets = [0, 0], sizes = [8, 128], strides = [1, 1]} : vector<8x384xf32> to vector<8x128xf32>
    %546 = vector.extract_strided_slice %544 {offsets = [0, 0], sizes = [8, 128], strides = [1, 1]} : vector<8x384xf32> to vector<8x128xf32>
    %547 = arith.addf %545, %546 : vector<8x128xf32>
    %cst_170 = arith.constant 5.000000e-01 : f32
    %548 = vector.broadcast %cst_170 : f32 to vector<8x128xf32>
    %549 = arith.mulf %548, %547 : vector<8x128xf32>
    %550 = math.tanh %549 : vector<8x128xf32>
    %cst_171 = arith.constant 5.000000e-01 : f32
    %551 = vector.broadcast %cst_171 : f32 to vector<8x128xf32>
    %552 = arith.mulf %551, %550 : vector<8x128xf32>
    %cst_172 = arith.constant 5.000000e-01 : f32
    %553 = vector.broadcast %cst_172 : f32 to vector<8x128xf32>
    %554 = arith.addf %552, %553 : vector<8x128xf32>
    %555 = vector.extract_strided_slice %543 {offsets = [0, 128], sizes = [8, 128], strides = [1, 1]} : vector<8x384xf32> to vector<8x128xf32>
    %556 = vector.extract_strided_slice %544 {offsets = [0, 128], sizes = [8, 128], strides = [1, 1]} : vector<8x384xf32> to vector<8x128xf32>
    %557 = arith.addf %555, %556 : vector<8x128xf32>
    %cst_173 = arith.constant 5.000000e-01 : f32
    %558 = vector.broadcast %cst_173 : f32 to vector<8x128xf32>
    %559 = arith.mulf %558, %557 : vector<8x128xf32>
    %560 = math.tanh %559 : vector<8x128xf32>
    %cst_174 = arith.constant 5.000000e-01 : f32
    %561 = vector.broadcast %cst_174 : f32 to vector<8x128xf32>
    %562 = arith.mulf %561, %560 : vector<8x128xf32>
    %cst_175 = arith.constant 5.000000e-01 : f32
    %563 = vector.broadcast %cst_175 : f32 to vector<8x128xf32>
    %564 = arith.addf %562, %563 : vector<8x128xf32>
    %565 = vector.extract_strided_slice %543 {offsets = [0, 256], sizes = [8, 128], strides = [1, 1]} : vector<8x384xf32> to vector<8x128xf32>
    %566 = vector.extract_strided_slice %544 {offsets = [0, 256], sizes = [8, 128], strides = [1, 1]} : vector<8x384xf32> to vector<8x128xf32>
    %567 = arith.mulf %554, %566 : vector<8x128xf32>
    %568 = arith.addf %565, %567 : vector<8x128xf32>
    %569 = math.tanh %568 : vector<8x128xf32>
    %570 = arith.subf %496, %569 : vector<8x128xf32>
    %571 = arith.mulf %564, %570 : vector<8x128xf32>
    %572 = arith.addf %569, %571 : vector<8x128xf32>
    %cst_176 = arith.constant dense<0.000000e+00> : vector<8x128xf32>
    %573 = tpu.matmul %572, %10, %cst_176 {dimension_numbers = #tpu.dot_dimension_numbers<[1], [0], [0], [1], [0, 0, 1, 1], [], []>} : vector<8x128xf32>, vector<128x128xf32>, vector<8x128xf32> -> vector<8x128xf32>
    %574 = arith.addf %573, %16 : vector<8x128xf32>
    %cst_177 = arith.constant 5.000000e-01 : f32
    %575 = vector.broadcast %cst_177 : f32 to vector<8x128xf32>
    %576 = arith.mulf %575, %574 : vector<8x128xf32>
    %577 = math.tanh %576 : vector<8x128xf32>
    %cst_178 = arith.constant 5.000000e-01 : f32
    %578 = vector.broadcast %cst_178 : f32 to vector<8x128xf32>
    %579 = arith.mulf %578, %577 : vector<8x128xf32>
    %cst_179 = arith.constant 5.000000e-01 : f32
    %580 = vector.broadcast %cst_179 : f32 to vector<8x128xf32>
    %581 = arith.addf %579, %580 : vector<8x128xf32>
    %c6_180 = arith.constant 6 : index
    %c0_181 = arith.constant 0 : index
    %c0_182 = arith.constant 0 : index
    %582 = vector.load %arg7[%c6_180, %c0_181, %c0_182] : memref<8x8x128xf32, #tpu.memory_space<vmem>>, vector<1x8x128xf32>
    %583 = vector.shape_cast %582 : vector<1x8x128xf32> to vector<8x128xf32>
    %584 = vector.shape_cast %581 : vector<8x128xf32> to vector<1x8x128xf32>
    tpu.vector_store %arg7[%c6_180, %c0_181, %c0_182], %584 {strides = array<i32>} : memref<8x8x128xf32, #tpu.memory_space<vmem>>, vector<1x8x128xf32>,
    %585 = tpu.concatenate %542, %572 in 1 : vector<8x128xf32>, vector<8x128xf32> -> vector<8x256xf32>
    %cst_183 = arith.constant dense<0.000000e+00> : vector<8x1152xf32>
    %586 = tpu.matmul %585, %9, %cst_183 {dimension_numbers = #tpu.dot_dimension_numbers<[1], [0], [0], [1], [0, 0, 1, 1], [], []>} : vector<8x256xf32>, vector<256x1152xf32>, vector<8x1152xf32> -> vector<8x1152xf32>
    %587 = arith.addf %586, %13 : vector<8x1152xf32>
    %588 = vector.extract_strided_slice %587 {offsets = [0, 384], sizes = [8, 384], strides = [1, 1]} : vector<8x1152xf32> to vector<8x384xf32>
    %589 = vector.extract_strided_slice %587 {offsets = [0, 768], sizes = [8, 384], strides = [1, 1]} : vector<8x1152xf32> to vector<8x384xf32>
    %590 = vector.extract_strided_slice %588 {offsets = [0, 0], sizes = [8, 128], strides = [1, 1]} : vector<8x384xf32> to vector<8x128xf32>
    %591 = vector.extract_strided_slice %589 {offsets = [0, 0], sizes = [8, 128], strides = [1, 1]} : vector<8x384xf32> to vector<8x128xf32>
    %592 = arith.addf %590, %591 : vector<8x128xf32>
    %cst_184 = arith.constant 5.000000e-01 : f32
    %593 = vector.broadcast %cst_184 : f32 to vector<8x128xf32>
    %594 = arith.mulf %593, %592 : vector<8x128xf32>
    %595 = math.tanh %594 : vector<8x128xf32>
    %cst_185 = arith.constant 5.000000e-01 : f32
    %596 = vector.broadcast %cst_185 : f32 to vector<8x128xf32>
    %597 = arith.mulf %596, %595 : vector<8x128xf32>
    %cst_186 = arith.constant 5.000000e-01 : f32
    %598 = vector.broadcast %cst_186 : f32 to vector<8x128xf32>
    %599 = arith.addf %597, %598 : vector<8x128xf32>
    %600 = vector.extract_strided_slice %588 {offsets = [0, 128], sizes = [8, 128], strides = [1, 1]} : vector<8x384xf32> to vector<8x128xf32>
    %601 = vector.extract_strided_slice %589 {offsets = [0, 128], sizes = [8, 128], strides = [1, 1]} : vector<8x384xf32> to vector<8x128xf32>
    %602 = arith.addf %600, %601 : vector<8x128xf32>
    %cst_187 = arith.constant 5.000000e-01 : f32
    %603 = vector.broadcast %cst_187 : f32 to vector<8x128xf32>
    %604 = arith.mulf %603, %602 : vector<8x128xf32>
    %605 = math.tanh %604 : vector<8x128xf32>
    %cst_188 = arith.constant 5.000000e-01 : f32
    %606 = vector.broadcast %cst_188 : f32 to vector<8x128xf32>
    %607 = arith.mulf %606, %605 : vector<8x128xf32>
    %cst_189 = arith.constant 5.000000e-01 : f32
    %608 = vector.broadcast %cst_189 : f32 to vector<8x128xf32>
    %609 = arith.addf %607, %608 : vector<8x128xf32>
    %610 = vector.extract_strided_slice %588 {offsets = [0, 256], sizes = [8, 128], strides = [1, 1]} : vector<8x384xf32> to vector<8x128xf32>
    %611 = vector.extract_strided_slice %589 {offsets = [0, 256], sizes = [8, 128], strides = [1, 1]} : vector<8x384xf32> to vector<8x128xf32>
    %612 = arith.mulf %599, %611 : vector<8x128xf32>
    %613 = arith.addf %610, %612 : vector<8x128xf32>
    %614 = math.tanh %613 : vector<8x128xf32>
    %615 = arith.subf %572, %614 : vector<8x128xf32>
    %616 = arith.mulf %609, %615 : vector<8x128xf32>
    %617 = arith.addf %614, %616 : vector<8x128xf32>
    %cst_190 = arith.constant dense<0.000000e+00> : vector<8x128xf32>
    %618 = tpu.matmul %617, %10, %cst_190 {dimension_numbers = #tpu.dot_dimension_numbers<[1], [0], [0], [1], [0, 0, 1, 1], [], []>} : vector<8x128xf32>, vector<128x128xf32>, vector<8x128xf32> -> vector<8x128xf32>
    %619 = arith.addf %618, %16 : vector<8x128xf32>
    %cst_191 = arith.constant 5.000000e-01 : f32
    %620 = vector.broadcast %cst_191 : f32 to vector<8x128xf32>
    %621 = arith.mulf %620, %619 : vector<8x128xf32>
    %622 = math.tanh %621 : vector<8x128xf32>
    %cst_192 = arith.constant 5.000000e-01 : f32
    %623 = vector.broadcast %cst_192 : f32 to vector<8x128xf32>
    %624 = arith.mulf %623, %622 : vector<8x128xf32>
    %cst_193 = arith.constant 5.000000e-01 : f32
    %625 = vector.broadcast %cst_193 : f32 to vector<8x128xf32>
    %626 = arith.addf %624, %625 : vector<8x128xf32>
    %c7_194 = arith.constant 7 : index
    %c0_195 = arith.constant 0 : index
    %c0_196 = arith.constant 0 : index
    %627 = vector.load %arg7[%c7_194, %c0_195, %c0_196] : memref<8x8x128xf32, #tpu.memory_space<vmem>>, vector<1x8x128xf32>
    %628 = vector.shape_cast %627 : vector<1x8x128xf32> to vector<8x128xf32>
    %629 = vector.shape_cast %626 : vector<8x128xf32> to vector<1x8x128xf32>
    tpu.vector_store %arg7[%c7_194, %c0_195, %c0_196], %629 {strides = array<i32>} : memref<8x8x128xf32, #tpu.memory_space<vmem>>, vector<1x8x128xf32>,
    return
  }
}

</mosaic_0001>

<bundles_post_ra>
// kernel: supervisor_forward.1
= control target key start
LH: loop header
LB: loop body
LE: loop exit
PB: predicated region body
PF: predicated region fallthrough
CT: control target
= control target key end

     0   :  { %12 = vsyncpa [#allocation4], 0  ;;  %s10306_s0 = inlined_call_operand.vmem [shape: f32[8,8,128], index: 0, kind: input, shape index: {}]   ;;  %s10307_s1 = inlined_call_operand.hbm [shape: f32[128,384], index: 1, kind: input, shape index: {}]   ;;  %s10308_s2 = inlined_call_operand.hbm [shape: f32[1,384], index: 2, kind: input, shape index: {}]   ;;  %s10309_s3 = inlined_call_operand.hbm [shape: f32[256,1152], index: 3, kind: input, shape index: {}]   ;;  %s10310_s4 = inlined_call_operand.hbm [shape: f32[1,1152], index: 4, kind: input, shape index: {}]   ;;  %s10311_s5 = inlined_call_operand.hbm [shape: f32[128,128], index: 5, kind: input, shape index: {}]   ;;  %s10312_s6 = inlined_call_operand.hbm [shape: f32[1,128], index: 6, kind: input, shape index: {}]   ;;  %s10313_s7 = inlined_call_operand.vmem [shape: f32[8,8,128], index: 7, kind: output, shape index: {}]  }
   0x1   :  { %13 = vsyncpa [#allocation6], 0 }
   0x2   :  { %14 = vsyncpa [#allocation9], 0  ;;  %s36_s26 = sshll.u32 %s10308_s2, 4  ;;  %s37_s26 = int_to_ptr.hbm [resolvable:$true] %s36_s26 }
   0x3   :  { %15 = vsyncpa [#allocation12], 0  ;;  %s5317_s27 = smov [#allocation5]   ;;  %s60_s8 = sshll.u32 %s10310_s4, 4  ;;  %s61_s8 = int_to_ptr.hbm [resolvable:$true] %s60_s8 }
   0x4   :  { %s38_s28 = sshll.u32 %s5317_s27, 4  ;;  %s5318_s9 = smov [#allocation8]   ;;  %s39_s28 = int_to_ptr.vmem [resolvable:$true] %s38_s28 }
   0x5   :  { %41 = dma.hbm_to_vmem [thread:$0]  %s37_s26, 48, %s39_s28, [#allocation6]  }
   0x6   :  { %s62_s10 = sshll.u32 %s5318_s9, 4  ;;  %s22_s13 = sshll.u32 %s10307_s1, 4  ;;  %s63_s10 = int_to_ptr.vmem [resolvable:$true] %s62_s10  ;;  %s23_s13 = int_to_ptr.hbm [resolvable:$true] %s22_s13 }
   0x7   :  { %65 = dma.hbm_to_vmem [thread:$0]  %s61_s8, 144, %s63_s10, [#allocation9]  }
   0x8   :  { %s5319_s2 = smov [#allocation3]   ;;  %s46_s17 = sshll.u32 %s10309_s3, 4  ;;  %s47_s17 = int_to_ptr.hbm [resolvable:$true] %s46_s17 }
   0x9   :  { %s24_s14 = sshll.u32 %s5319_s2, 4  ;;  %s5320_s18 = smov 384   ;;  %s25_s14 = int_to_ptr.vmem [resolvable:$true] %s24_s14 }
   0xa   :  { %s5321_s4 = smov 24   ;;  %s5322_s19 = smov [#allocation7]  }
   0xb   :  { %30 = dma.hbm_to_vmem [thread:$0]  %s23_s13, 6144, %s25_s14, [#allocation4], %s5320_s18, %s5320_s18, %s5321_s4  }
   0xc   :  { %s48_s20 = sshll.u32 %s5322_s19, 4  ;;  %s5323_s21 = smov 1152   ;;  %s49_s20 = int_to_ptr.vmem [resolvable:$true] %s48_s20 }
   0xd   :  { %s5324_s22 = smov 72   ;;  %s70_s24 = sshll.u32 %s10311_s5, 4  ;;  %s71_s24 = int_to_ptr.hbm [resolvable:$true] %s70_s24 }
   0xe   :  { %54 = dma.hbm_to_vmem [thread:$0]  %s47_s17, 36864, %s49_s20, [#allocation6], %s5323_s21, %s5323_s21, %s5324_s22  }
   0xf   :  { %s5325_s25 = smov [#allocation10]   ;;  %s84_s28 = sshll.u32 %s10312_s6, 4  ;;  %s85_s28 = int_to_ptr.hbm [resolvable:$true] %s84_s28 }
  0x10   :  { %s72_s26 = sshll.u32 %s5325_s25, 4  ;;  %s5326_s29 = smov 128   ;;  %s73_s26 = int_to_ptr.vmem [resolvable:$true] %s72_s26 }
  0x11   :  { %s5327_s30 = smov 8   ;;  %s5328_s8 = smov [#allocation11]  }
  0x12   :  { %78 = dma.hbm_to_vmem [thread:$0]  %s71_s24, 2048, %s73_s26, [#allocation9], %s5326_s29, %s5326_s29, %s5327_s30  }
  0x13   :  { %s86_s9 = sshll.u32 %s5328_s8, 4  ;;  %s87_s9 = int_to_ptr.vmem [resolvable:$true] %s86_s9 }
  0x14   :  { %89 = dma.hbm_to_vmem [thread:$0]  %s85_s28, 16, %s87_s9, [#allocation12]  }
  0x15   :  { %5309 = dma.done.wait [#allocation4], 6144  }
  0x16   :  { %5310 = vsyncadd [#allocation4], 4294961152 }
  0x17   :  { %5311 = dma.done.wait [#allocation6], 36912  }
  0x18   :  { %5312 = vsyncadd [#allocation6], 4294930384 }
  0x19   :  { %5313 = dma.done.wait [#allocation9], 2192  }
  0x1a   :  { %5314 = vsyncadd [#allocation9], 4294965104 }
  0x1b   :  { %5315 = dma.done.wait [#allocation12], 16  }
  0x1c   :  { %5316 = vsyncadd [#allocation12], 4294967280  ;;  %v167_v0 = vld [vmem:[#allocation3 + $0x168] sm:$0xff]  ;;  %v169_v1 = vld [vmem:[#allocation3 + $0x178] sm:$0xff] }
  0x1d   :  { %v5388_v2 = vld [vmem:[#allocation7 + $0x438] sm:$0xff]  ;;  %178 = vmatpush.msra.mxu0 %v167_v0  ;;  %260 = vmatpush.msra.mxu2 %v169_v1  ;;  %v164_v3 = vld [vmem:[#allocation3 + $0x150] sm:$0xff]  ;;  %v163_v9 = vld [vmem:[#allocation3 + $0x148] sm:$0xff] }
  0x1e   :  { %v168_v4 = vld [vmem:[#allocation3 + $0x170] sm:$0xff]  ;;  %v166_v5 = vld [vmem:[#allocation3 + $0x160] sm:$0xff]  ;;  %655 = vmatpush.msra.mxu3 %v5388_v2  ;;  %v161_v7 = vld [vmem:[#allocation3 + $0x138] sm:$0xff] }
  0x1f   :  { %219 = vmatpush.msra.mxu1 %v168_v4  ;;  %v5391_v6 = vld [vmem:[#allocation7 + $0x3f0] sm:$0xff]  ;;  %179 = vmatpush.msra.mxu0 %v164_v3  ;;  %v5393_v10 = vld [vmem:[#allocation7 + $0x3a8] sm:$0xff]  ;;  %v158_v11 = vld [vmem:[#allocation3 + $0x120] sm:$0xff] }
  0x20   :  { %v165_v8 = vld [vmem:[#allocation3 + $0x158] sm:$0xff]  ;;  %261 = vmatpush.msra.mxu2 %v166_v5  ;;  %656 = vmatpush.msra.mxu3 %v5391_v6  ;;  %v162_v12 = vld [vmem:[#allocation3 + $0x140] sm:$0xff]  ;;  %v160_v13 = vld [vmem:[#allocation3 + $0x130] sm:$0xff] }
  0x21   :  { %220 = vmatpush.msra.mxu1 %v165_v8  ;;  %180 = vmatpush.msra.mxu0 %v161_v7  ;;  %v5396_v14 = vld [vmem:[#allocation7 + $0x360] sm:$0xff]  ;;  %v157_v17 = vld [vmem:[#allocation3 + $0x118] sm:$0xff]  ;;  %v156_v19 = vld [vmem:[#allocation3 + $0x110] sm:$0xff]  ;;  %v10314_v8 = vmov 0.0  }
  0x22   :  { %262 = vmatpush.msra.mxu2 %v163_v9  ;;  %v159_v15 = vld [vmem:[#allocation3 + $0x128] sm:$0xff]  ;;  %657 = vmatpush.msra.mxu3 %v5393_v10  ;;  %v5399_v18 = vld [vmem:[#allocation7 + $0x318] sm:$0xff]  ;;  %v152_v20 = vld [vmem:[#allocation3 + $0xf0] sm:$0xff] }
  0x23   :  { %221 = vmatpush.msra.mxu1 %v162_v12  ;;  %v155_v16 = vld [vmem:[#allocation3 + $0x108] sm:$0xff]  ;;  %181 = vmatpush.msra.mxu0 %v158_v11  ;;  %v154_v21 = vld [vmem:[#allocation3 + $0x100] sm:$0xff]  ;;  %v5402_v22 = vld [vmem:[#allocation7 + $0x2d0] sm:$0xff] }
  0x24   :  { %263 = vmatpush.msra.mxu2 %v160_v13  ;;  %658 = vmatpush.msra.mxu3 %v5396_v14  ;;  %v153_v23 = vld [vmem:[#allocation3 + $0xf8] sm:$0xff]  ;;  %v151_v25 = vld [vmem:[#allocation3 + $0xe8] sm:$0xff]  ;;  %v150_v27 = vld [vmem:[#allocation3 + $0xe0] sm:$0xff] }
  0x25   :  { %222 = vmatpush.msra.mxu1 %v159_v15  ;;  %182 = vmatpush.msra.mxu0 %v155_v16  ;;  %v149_v24 = vld [vmem:[#allocation3 + $0xd8] sm:$0xff]  ;;  %v5405_v26 = vld [vmem:[#allocation7 + $0x288] sm:$0xff]  ;;  %v146_v28 = vld [vmem:[#allocation3 + $0xc0] sm:$0xff] }
  0x26   :  { %264 = vmatpush.msra.mxu2 %v157_v17  ;;  %659 = vmatpush.msra.mxu3 %v5399_v18  ;;  %v148_v29 = vld [vmem:[#allocation3 + $0xd0] sm:$0xff]  ;;  %v5408_v30 = vld [vmem:[#allocation7 + $0x240] sm:$0xff]  ;;  %v145_v33 = vld [vmem:[#allocation3 + $0xb8] sm:$0xff] }
  0x27   :  { %223 = vmatpush.msra.mxu1 %v156_v19  ;;  %183 = vmatpush.msra.mxu0 %v152_v20  ;;  %v147_v31 = vld [vmem:[#allocation3 + $0xc8] sm:$0xff]  ;;  %v5411_v34 = vld [vmem:[#allocation7 + $0x1f8] sm:$0xff]  ;;  %v144_v35 = vld [vmem:[#allocation3 + $0xb0] sm:$0xff] }
  0x28   :  { %265 = vmatpush.msra.mxu2 %v154_v21  ;;  %660 = vmatpush.msra.mxu3 %v5402_v22  ;;  %v143_v32 = vld [vmem:[#allocation3 + $0xa8] sm:$0xff]  ;;  %v140_v36 = vld [vmem:[#allocation3 + $0x90] sm:$0xff]  ;;  %v142_v37 = vld [vmem:[#allocation3 + $0xa0] sm:$0xff] }
  0x29   :  { %224 = vmatpush.msra.mxu1 %v153_v23  ;;  %184 = vmatpush.msra.mxu0 %v149_v24  ;;  %v5414_v38 = vld [vmem:[#allocation7 + $0x1b0] sm:$0xff]  ;;  %v139_v41 = vld [vmem:[#allocation3 + $0x88] sm:$0xff]  ;;  %v138_v43 = vld [vmem:[#allocation3 + $0x80] sm:$0xff] }
  0x2a   :  { %266 = vmatpush.msra.mxu2 %v151_v25  ;;  %661 = vmatpush.msra.mxu3 %v5405_v26  ;;  %v141_v39 = vld [vmem:[#allocation3 + $0x98] sm:$0xff]  ;;  %v5417_v42 = vld [vmem:[#allocation7 + $0x168] sm:$0xff]  ;;  %v134_v44 = vld [vmem:[#allocation3 + $0x60] sm:$0xff] }
  0x2b   :  { %225 = vmatpush.msra.mxu1 %v150_v27  ;;  %185 = vmatpush.msra.mxu0 %v146_v28  ;;  %v137_v40 = vld [vmem:[#allocation3 + $0x78] sm:$0xff]  ;;  %v136_v45 = vld [vmem:[#allocation3 + $0x70] sm:$0xff]  ;;  %v5420_v46 = vld [vmem:[#allocation7 + $0x120] sm:$0xff] }
  0x2c   :  { %267 = vmatpush.msra.mxu2 %v148_v29  ;;  %662 = vmatpush.msra.mxu3 %v5408_v30  ;;  %v135_v47 = vld [vmem:[#allocation3 + $0x68] sm:$0xff]  ;;  %v133_v49 = vld [vmem:[#allocation3 + $0x58] sm:$0xff]  ;;  %v132_v51 = vld [vmem:[#allocation3 + $0x50] sm:$0xff] }
  0x2d   :  { %226 = vmatpush.msra.mxu1 %v147_v31  ;;  %186 = vmatpush.msra.mxu0 %v143_v32  ;;  %v131_v48 = vld [vmem:[#allocation3 + $0x48] sm:$0xff]  ;;  %v5423_v50 = vld [vmem:[#allocation7 + $0xd8] sm:$0xff]  ;;  %v128_v52 = vld [vmem:[#allocation3 + $0x30] sm:$0xff] }
  0x2e   :  { %268 = vmatpush.msra.mxu2 %v145_v33  ;;  %663 = vmatpush.msra.mxu3 %v5411_v34  ;;  %v130_v53 = vld [vmem:[#allocation3 + $0x40] sm:$0xff]  ;;  %v5426_v54 = vld [vmem:[#allocation7 + $0x90] sm:$0xff]  ;;  %v127_v57 = vld [vmem:[#allocation3 + $0x28] sm:$0xff] }
  0x2f   :  { %227 = vmatpush.msra.mxu1 %v144_v35  ;;  %187 = vmatpush.msra.mxu0 %v140_v36  ;;  %v129_v55 = vld [vmem:[#allocation3 + $0x38] sm:$0xff]  ;;  %v5429_v58 = vld [vmem:[#allocation7 + $0x48] sm:$0xff]  ;;  %v126_v59 = vld [vmem:[#allocation3 + $0x20] sm:$0xff] }
  0x30   :  { %269 = vmatpush.msra.mxu2 %v142_v37  ;;  %664 = vmatpush.msra.mxu3 %v5414_v38  ;;  %v125_v56 = vld [vmem:[#allocation3 + $0x18] sm:$0xff]  ;;  %v122_v60 = vld [vmem:[#allocation3] sm:$0xff]  ;;  %v124_v61 = vld [vmem:[#allocation3 + $0x10] sm:$0xff] }
  0x31   :  { %228 = vmatpush.msra.mxu1 %v141_v39  ;;  %188 = vmatpush.msra.mxu0 %v137_v40  ;;  %v5432_v62 = vld [vmem:[#allocation7] sm:$0xff]  ;;  %v5438_v0 = vld [vmem:[#allocation7 + $0x8b8] sm:$0xff]  ;;  %v5441_v3 = vld [vmem:[#allocation7 + $0x870] sm:$0xff] }
  0x32   :  { %270 = vmatpush.msra.mxu2 %v139_v41  ;;  %665 = vmatpush.msra.mxu3 %v5417_v42  ;;  %11078 = vst [vmem:[#allocation17_spill] sm:$0xff] %v5432_v62  ;;  %v114_v63 = vld [vmem:[%s10306_s0] sm:$0xff]  ;;  %v123_v1 = vld [vmem:[#allocation3 + $0x8] sm:$0xff]  ;;  %v5476_v20 = vld [vmem:[#allocation7 + $0x3b0] sm:$0xff] }
  0x33   :  { %229 = vmatpush.msra.mxu1 %v138_v43  ;;  %189 = vmatpush.msra.mxu0 %v134_v44  ;;  %v5444_v4 = vld [vmem:[#allocation7 + $0x440] sm:$0xff]  ;;  %v5446_v5 = vld [vmem:[#allocation7 + $0x448] sm:$0xff]  ;;  %v5452_v9 = vld [vmem:[#allocation7 + $0x3f8] sm:$0xff] }
  0x34   :  { %271 = vmatpush.msra.mxu2 %v136_v45  ;;  %666 = vmatpush.msra.mxu3 %v5420_v46  ;;  %11079 = vst [vmem:[#allocation18_spill] sm:$0xff] %v5446_v5  ;;  %v5448_v7 = vld [vmem:[#allocation7 + $0x828] sm:$0xff]  ;;  %v5454_v11 = vld [vmem:[#allocation7 + $0x8c0] sm:$0xff]  ;;  %v5462_v15 = vld [vmem:[#allocation7 + $0x878] sm:$0xff] }
  0x35   :  { %230 = vmatpush.msra.mxu1 %v135_v47  ;;  %190 = vmatpush.msra.mxu0 %v131_v48  ;;  %v5456_v12 = vld [vmem:[#allocation7 + $0x400] sm:$0xff]  ;;  %v5469_v17 = vld [vmem:[#allocation7 + $0x3b8] sm:$0xff]  ;;  %v5479_v21 = vld [vmem:[#allocation7 + $0x830] sm:$0xff] }
  0x36   :  { %272 = vmatpush.msra.mxu2 %v133_v49  ;;  %667 = vmatpush.msra.mxu3 %v5423_v50  ;;  %11080 = vst [vmem:[#allocation19_spill] sm:$0xff] %v5456_v12  ;;  %v5458_v13 = vld [vmem:[#allocation7 + $0x7e0] sm:$0xff]  ;;  %v5471_v19 = vld [vmem:[#allocation7 + $0x798] sm:$0xff]  ;;  %v5481_v23 = vld [vmem:[#allocation7 + $0x750] sm:$0xff] }
  0x37   :  { %231 = vmatpush.msra.mxu1 %v132_v51  ;;  %191 = vmatpush.msra.mxu0 %v128_v52  ;;  %v115_v16 = vld [vmem:[%s10306_s0 + $0x8] sm:$0xff]  ;;  %11081 = vst [vmem:[#allocation20_spill] sm:$0xff] %v5469_v17  ;;  %v5487_v25 = vld [vmem:[#allocation7 + $0x370] sm:$0xff]  ;;  %v5513_v37 = vld [vmem:[#allocation7 + $0x678] sm:$0xff] }
  0x38   :  { %273 = vmatpush.msra.mxu2 %v130_v53  ;;  %668 = vmatpush.msra.mxu3 %v5426_v54  ;;  %v5485_v24 = vld [vmem:[#allocation7 + $0x368] sm:$0xff]  ;;  %11082 = vst [vmem:[#allocation21_spill] sm:$0xff] %v5487_v25  ;;  %v5496_v29 = vld [vmem:[#allocation7 + $0x320] sm:$0xff]  ;;  %v5518_v39 = vld [vmem:[#allocation7 + $0x2d8] sm:$0xff] }
  0x39   :  { %232 = vmatpush.msra.mxu1 %v129_v55  ;;  %192 = vmatpush.msra.mxu0 %v125_v56  ;;  %v5489_v27 = vld [vmem:[#allocation7 + $0x708] sm:$0xff]  ;;  %v5500_v32 = vld [vmem:[#allocation7 + $0x6c0] sm:$0xff]  ;;  %v5521_v40 = vld [vmem:[#allocation7 + $0x758] sm:$0xff] }
  0x3a   :  { %274 = vmatpush.msra.mxu2 %v127_v57  ;;  %669 = vmatpush.msra.mxu3 %v5429_v58  ;;  %v5493_v28 = vld [vmem:[#allocation7 + $0x7e8] sm:$0xff]  ;;  %v5504_v33 = vld [vmem:[#allocation7 + $0x7a0] sm:$0xff]  ;;  %v5523_v41 = vld [vmem:[#allocation7 + $0x630] sm:$0xff] }
  0x3b   :  { %233 = vmatpush.msra.mxu1 %v126_v59  ;;  %193 = vmatpush.msra.mxu0 %v122_v60  ;;  %v5498_v31 = vld [vmem:[#allocation7 + $0x328] sm:$0xff]  ;;  %v5511_v36 = vld [vmem:[#allocation7 + $0x2e0] sm:$0xff]  ;;  %v5527_v43 = vld [vmem:[#allocation7 + $0x290] sm:$0xff] }
  0x3c   :  { %275 = vmatpush.msra.mxu2 %v124_v61  ;;  %670 = vmatpush.msra.mxu3 %v5432_v62  ;;  %11083 = vst [vmem:[#allocation22_spill] sm:$0xff] %v5498_v31  ;;  %v116_v35 = vld [vmem:[%s10306_s0 + $0x10] sm:$0xff]  ;;  %v5529_v44 = vld [vmem:[#allocation7 + $0x298] sm:$0xff]  ;;  %v5542_v51 = vld [vmem:[#allocation7 + $0x5a0] sm:$0xff] }
  0x3d   :  { %194 = vmatmul.f32.vlgmr.msra.gmra.mxu0 %v114_v63  ;;  %276 = vmatmul.f32.vlgmr.msra.gmra.mxu2 %v114_v63  ;;  %11084 = vst [vmem:[#allocation23_spill] sm:$0xff] %v5511_v36  ;;  %v5531_v45 = vld [vmem:[#allocation7 + $0x5e8] sm:$0xff]  ;;  %v5535_v47 = vld [vmem:[#allocation7 + $0x710] sm:$0xff]  ;;  %v5555_v56 = vld [vmem:[#allocation7 + $0x558] sm:$0xff] }
  0x3e   :  { %675 = vmatpush.msrb.mxu3 %v5438_v0  ;;  %234 = vmatpush.msra.mxu1 %v123_v1  ;;  %11085 = vst [vmem:[#allocation24_spill] sm:$0xff] %v5529_v44  ;;  %v5538_v48 = vld [vmem:[#allocation7 + $0x248] sm:$0xff]  ;;  %v5540_v49 = vld [vmem:[#allocation7 + $0x250] sm:$0xff]  ;;  %v5560_v57 = vld [vmem:[#allocation7 + $0x200] sm:$0xff] }
  0x3f   :  { %671 = vmatmul.f32.vlgmr.msra.gmra.mxu3 %v10314_v8  ;;  %235 = vmatmul.f32.vlgmr.msra.gmra.mxu1 %v114_v63  ;;  %11086 = vst [vmem:[#allocation25_spill] sm:$0xff] %v5540_v49  ;;  %v5546_v52 = vld [vmem:[#allocation7 + $0x6c8] sm:$0xff]  ;;  %v117_v53 = vld [vmem:[%s10306_s0 + $0x18] sm:$0xff]  ;;  %v5563_v59 = vld [vmem:[#allocation7 + $0x680] sm:$0xff] }
  0x40   :  { %676 = vmatpush.msrb.mxu3 %v5441_v3  ;;  %695 = vmatpush.msrb.mxu0 %v5444_v4  ;;  %v5553_v55 = vld [vmem:[#allocation7 + $0x208] sm:$0xff]  ;;  %v5565_v60 = vld [vmem:[#allocation7 + $0x510] sm:$0xff]  ;;  %v5569_v61 = vld [vmem:[#allocation7 + $0x1b8] sm:$0xff] }
  0x41   :  { %735 = vmatpush.msrb.mxu2 %v5446_v5  ;;  %715 = vmatpush.msrb.mxu1 %v5454_v11  ;;  %11087 = vst [vmem:[#allocation26_spill] sm:$0xff] %v5553_v55  ;;  %v5571_v63 = vld [vmem:[#allocation7 + $0x1c0] sm:$0xff]  ;;  %v5573_v1 = vld [vmem:[#allocation7 + $0x4c8] sm:$0xff]  ;;  %v5582_v8 = vld [vmem:[#allocation7 + $0x178] sm:$0xff] }
  0x42   :  { %677 = vmatpush.msrb.mxu3 %v5448_v7  ;;  %696 = vmatpush.msrb.mxu0 %v5452_v9  ;;  %11088 = vst [vmem:[#allocation27_spill] sm:$0xff] %v5571_v63  ;;  %v5622_v5 = vld [vmem:[#allocation7 + $0x560] sm:$0xff]  ;;  %v5653_v62 = vld [vmem:[#allocation7 + $0x4d0] sm:$0xff] }
  0x43   :  { %736 = vmatpush.msrb.mxu2 %v5456_v12  ;;  %716 = vmatpush.msrb.mxu1 %v5462_v15  ;;  %11089 = vst [vmem:[#allocation28_spill] sm:$0xff] %v5573_v1  ;;  %v5611_v12 = vld [vmem:[#allocation7 + $0x5a8] sm:$0xff] }
  0x44   :  { %678 = vmatpush.msrb.mxu3 %v5458_v13  ;;  %697 = vmatpush.msrb.mxu0 %v5476_v20  ;;  %11091 = vst [vmem:[#allocation30_spill] sm:$0xff] %v5582_v8 }
  0x45   :  { %197 = vmatmul.f32.gmra.mxu0 %v115_v16  ;;  %737 = vmatpush.msrb.mxu2 %v5469_v17  ;;  %v5609_v17 = vld [vmem:[#allocation7 + $0xe0] sm:$0xff]  ;;  %11098 = vst [vmem:[#allocation36_spill] sm:$0xff] %v5611_v12 }
  0x46   :  { %279 = vmatmul.f32.gmra.mxu2 %v115_v16  ;;  %679 = vmatpush.msrb.mxu3 %v5471_v19  ;;  %11101 = vst [vmem:[#allocation39_spill] sm:$0xff] %v5622_v5 }
  0x47   :  { %717 = vmatpush.msrb.mxu1 %v5479_v21  ;;  %698 = vmatpush.msrb.mxu0 %v5485_v24 }
  0x48   :  { %238 = vmatmul.f32.gmra.mxu1 %v115_v16  ;;  %680 = vmatpush.msrb.mxu3 %v5481_v23  ;;  %v5577_v16 = vld [vmem:[#allocation7 + $0x638] sm:$0xff] }
  0x49   :  { %738 = vmatpush.msrb.mxu2 %v5487_v25  ;;  %718 = vmatpush.msrb.mxu1 %v5493_v28  ;;  %11090 = vst [vmem:[#allocation29_spill] sm:$0xff] %v5577_v16  ;;  %v5606_v25 = vld [vmem:[#allocation7 + $0x880] sm:$0xff] }
  0x4a   :  { %681 = vmatpush.msrb.mxu3 %v5489_v27  ;;  %699 = vmatpush.msrb.mxu0 %v5496_v29  ;;  %11097 = vst [vmem:[#allocation35_spill] sm:$0xff] %v5606_v25 }
  0x4b   :  { %739 = vmatpush.msrb.mxu2 %v5498_v31  ;;  %719 = vmatpush.msrb.mxu1 %v5504_v33  ;;  %v11096_v31 = vmov 0.0  }
  0x4c   :  { %682 = vmatpush.msrb.mxu3 %v5500_v32  ;;  %700 = vmatpush.msrb.mxu0 %v5518_v39 }
  0x4d   :  { %200 = vmatmul.f32.gmra.mxu0 %v116_v35  ;;  %740 = vmatpush.msrb.mxu2 %v5511_v36  ;;  %v5600_v36 = vld [vmem:[#allocation7 + $0x128] sm:$0xff] }
  0x4e   :  { %282 = vmatmul.f32.gmra.mxu2 %v116_v35  ;;  %683 = vmatpush.msrb.mxu3 %v5513_v37 }
  0x4f   :  { %720 = vmatpush.msrb.mxu1 %v5521_v40  ;;  %701 = vmatpush.msrb.mxu0 %v5527_v43 }
  0x50   :  { %241 = vmatmul.f32.gmra.mxu1 %v116_v35  ;;  %684 = vmatpush.msrb.mxu3 %v5523_v41  ;;  %v5580_v35 = vld [vmem:[#allocation7 + $0x170] sm:$0xff] }
  0x51   :  { %741 = vmatpush.msrb.mxu2 %v5529_v44  ;;  %721 = vmatpush.msrb.mxu1 %v5535_v47  ;;  %v5595_v44 = vld [vmem:[#allocation7 + $0x8c8] sm:$0xff] }
  0x52   :  { %685 = vmatpush.msrb.mxu3 %v5531_v45  ;;  %702 = vmatpush.msrb.mxu0 %v5538_v48  ;;  %11094 = vst [vmem:[#allocation33_spill] sm:$0xff] %v5595_v44 }
  0x53   :  { %742 = vmatpush.msrb.mxu2 %v5540_v49  ;;  %722 = vmatpush.msrb.mxu1 %v5546_v52  ;;  %v5588_v49 = vld [vmem:[#allocation7 + $0x5f0] sm:$0xff] }
  0x54   :  { %686 = vmatpush.msrb.mxu3 %v5542_v51  ;;  %703 = vmatpush.msrb.mxu0 %v5560_v57  ;;  %11093 = vst [vmem:[#allocation32_spill] sm:$0xff] %v5588_v49 }
  0x55   :  { %203 = vmatmul.f32.gmra.mxu0 %v117_v53  ;;  %743 = vmatpush.msrb.mxu2 %v5553_v55  ;;  %v5584_v55 = vld [vmem:[#allocation7 + $0x480] sm:$0xff] }
  0x56   :  { %285 = vmatmul.f32.gmra.mxu2 %v117_v53  ;;  %687 = vmatpush.msrb.mxu3 %v5555_v56  ;;  %11092 = vst [vmem:[#allocation31_spill] sm:$0xff] %v5584_v55 }
  0x57   :  { %723 = vmatpush.msrb.mxu1 %v5563_v59  ;;  %704 = vmatpush.msrb.mxu0 %v5569_v61 }
  0x58   :  { %244 = vmatmul.f32.gmra.mxu1 %v117_v53  ;;  %688 = vmatpush.msrb.mxu3 %v5565_v60  ;;  %v118_v53 = vld [vmem:[%s10306_s0 + $0x20] sm:$0xff] }
  0x59   :  { %744 = vmatpush.msrb.mxu2 %v5571_v63  ;;  %724 = vmatpush.msrb.mxu1 %v5577_v16  ;;  %v5603_v63 = vld [vmem:[#allocation7 + $0x130] sm:$0xff]  ;;  %v5647_v16 = vld [vmem:[#allocation7 + $0x760] sm:$0xff] }
  0x5a   :  { %689 = vmatpush.msrb.mxu3 %v5573_v1  ;;  %705 = vmatpush.msrb.mxu0 %v5580_v35  ;;  %11095 = vst [vmem:[#allocation34_spill] sm:$0xff] %v5603_v63  ;;  %v5628_v1 = vld [vmem:[#allocation7 + $0xa0] sm:$0xff] }
  0x5b   :  { %745 = vmatpush.msrb.mxu2 %v5582_v8  ;;  %725 = vmatpush.msrb.mxu1 %v5588_v49  ;;  %v5613_v8 = vld [vmem:[#allocation7 + $0x838] sm:$0xff]  ;;  %11103 = vst [vmem:[#allocation41_spill] sm:$0xff] %v5628_v1 }
  0x5c   :  { %690 = vmatpush.msrb.mxu3 %v5584_v55  ;;  %11099 = vst [vmem:[#allocation37_spill] sm:$0xff] %v5613_v8  ;;  %706 = vmatpush.msrb.mxu0 %v5600_v36  ;;  %v5617_v55 = vld [vmem:[#allocation7 + $0xe8] sm:$0xff]  ;;  %v5620_v49 = vld [vmem:[#allocation7 + $0x98] sm:$0xff] }
  0x5d   :  { %691 = vmatmul.f32.vlgmr.msrb.gmra.mxu3 %v11096_v31  ;;  %206 = vmatmul.f32.gmra.mxu0 %v118_v53  ;;  %11100 = vst [vmem:[#allocation38_spill] sm:$0xff] %v5617_v55 }
  0x5e   :  { %288 = vmatmul.f32.gmra.mxu2 %v118_v53  ;;  %755 = vmatpush.msra.mxu3 %v5595_v44  ;;  %v5624_v44 = vld [vmem:[#allocation7 + $0x7f0] sm:$0xff] }
  0x5f   :  { %746 = vmatpush.msrb.mxu2 %v5603_v63  ;;  %11102 = vst [vmem:[#allocation40_spill] sm:$0xff] %v5624_v44  ;;  %707 = vmatpush.msrb.mxu0 %v5609_v17  ;;  %v5635_v63 = vld [vmem:[#allocation7 + $0x518] sm:$0xff] }
  0x60   :  { %247 = vmatmul.f32.gmra.mxu1 %v118_v53  ;;  %756 = vmatpush.msra.mxu3 %v5606_v25  ;;  %v119_v53 = vld [vmem:[%s10306_s0 + $0x28] sm:$0xff]  ;;  %11104 = vst [vmem:[#allocation42_spill] sm:$0xff] %v5635_v63 }
  0x61   :  { %726 = vmatpush.msrb.mxu1 %v5611_v12  ;;  %747 = vmatpush.msrb.mxu2 %v5617_v55  ;;  %v5637_v25 = vld [vmem:[#allocation7 + $0x7a8] sm:$0xff]  ;;  %v5643_v12 = vld [vmem:[#allocation7 + $0x50] sm:$0xff] }
  0x62   :  { %757 = vmatpush.msra.mxu3 %v5613_v8  ;;  %11105 = vst [vmem:[#allocation43_spill] sm:$0xff] %v5637_v25  ;;  %708 = vmatpush.msrb.mxu0 %v5620_v49  ;;  %v5645_v8 = vld [vmem:[#allocation7 + $0x58] sm:$0xff]  ;;  %v5651_v55 = vld [vmem:[#allocation7 + $0x8] sm:$0xff] }
  0x63   :  { %727 = vmatpush.msrb.mxu1 %v5622_v5  ;;  %748 = vmatpush.msrb.mxu2 %v5628_v1  ;;  %11106 = vst [vmem:[#allocation44_spill] sm:$0xff] %v5645_v8  ;;  %v5655_v5 = vld [vmem:[#allocation7 + $0x718] sm:$0xff]  ;;  %v5659_v1 = vld [vmem:[#allocation7 + $0x10] sm:$0xff] }
  0x64   :  { %758 = vmatpush.msra.mxu3 %v5624_v44  ;;  %11107 = vst [vmem:[#allocation45_spill] sm:$0xff] %v5655_v5  ;;  %709 = vmatpush.msrb.mxu0 %v5643_v12  ;;  %v5662_v44 = vld [vmem:[#allocation7 + $0x488] sm:$0xff] }
  0x65   :  { %209 = vmatmul.f32.gmra.mxu0 %v119_v53  ;;  %728 = vmatpush.msrb.mxu1 %v5635_v63  ;;  %v5664_v63 = vld [vmem:[#allocation7 + $0x6d0] sm:$0xff] }
  0x66   :  { %291 = vmatmul.f32.gmra.mxu2 %v119_v53  ;;  %759 = vmatpush.msra.mxu3 %v5637_v25  ;;  %v120_v25 = vld [vmem:[%s10306_s0 + $0x30] sm:$0xff] }
  0x67   :  { %749 = vmatpush.msrb.mxu2 %v5645_v8  ;;  %710 = vmatpush.msrb.mxu0 %v5651_v55  ;;  %v5673_v8 = vld [vmem:[#allocation7 + $0x688] sm:$0xff] }
  0x68   :  { %250 = vmatmul.f32.gmra.mxu1 %v119_v53  ;;  %760 = vmatpush.msra.mxu3 %v5647_v16  ;;  %v5679_v53 = vld [vmem:[#allocation7 + $0x640] sm:$0xff] }
  0x69   :  { %729 = vmatpush.msrb.mxu1 %v5653_v62  ;;  %750 = vmatpush.msrb.mxu2 %v5659_v1 }
  0x6a   :  { %761 = vmatpush.msra.mxu3 %v5655_v5  ;;  %794 = vmatpush.msra.mxu0 %v5388_v2  ;;  %v5683_v5 = vld [vmem:[#allocation7 + $0x5f8] sm:$0xff]  ;;  %v5688_v2 = vld [vmem:[#allocation7 + $0x5b0] sm:$0xff] }
  0x6b   :  { %730 = vmatpush.msrb.mxu1 %v5662_v44  ;;  %834 = vmatpush.msra.mxu2 %v5444_v4  ;;  %v11119_v4 = vld [vmem:[#allocation39_spill] sm:$0xff] }
  0x6c   :  { %762 = vmatpush.msra.mxu3 %v5664_v63  ;;  %795 = vmatpush.msra.mxu0 %v5391_v6  ;;  %v5697_v6 = vld [vmem:[#allocation7 + $0x568] sm:$0xff] }
  0x6d   :  { %212 = vmatmul.f32.gmra.mxu0 %v120_v25  ;;  %814 = vmatpush.msra.mxu1 %v5438_v0  ;;  %v121_v0 = vld [vmem:[%s10306_s0 + $0x38] sm:$0xff] }
  0x6e   :  { %294 = vmatmul.f32.gmra.mxu2 %v120_v25  ;;  %763 = vmatpush.msra.mxu3 %v5673_v8 }
  0x6f   :  { %835 = vmatpush.msra.mxu2 %v5452_v9  ;;  %796 = vmatpush.msra.mxu0 %v5393_v10  ;;  %v5703_v10 = vld [vmem:[#allocation7 + $0x520] sm:$0xff]  ;;  %v11121_v9 = vld [vmem:[#allocation37_spill] sm:$0xff] }
  0x70   :  { %253 = vmatmul.f32.gmra.mxu1 %v120_v25  ;;  %764 = vmatpush.msra.mxu3 %v5679_v53  ;;  %v11133_v25 = vld [vmem:[#allocation34_spill] sm:$0xff] }
  0x71   :  { %815 = vmatpush.msra.mxu1 %v5441_v3  ;;  %836 = vmatpush.msra.mxu2 %v5476_v20  ;;  %v5707_v3 = vld [vmem:[#allocation7 + $0x4d8] sm:$0xff]  ;;  %v11128_v20 = vld [vmem:[#allocation25_spill] sm:$0xff] }
  0x72   :  { %765 = vmatpush.msra.mxu3 %v5683_v5  ;;  %797 = vmatpush.msra.mxu0 %v5396_v14  ;;  %v5712_v14 = vld [vmem:[#allocation7 + $0x490] sm:$0xff] }
  0x73   :  { %816 = vmatpush.msra.mxu1 %v5448_v7  ;;  %837 = vmatpush.msra.mxu2 %v5485_v24  ;;  %v11120_v7 = vld [vmem:[#allocation21_spill] sm:$0xff]  ;;  %v11132_v24 = vld [vmem:[#allocation30_spill] sm:$0xff] }
  0x74   :  { %766 = vmatpush.msra.mxu3 %v5688_v2  ;;  %798 = vmatpush.msra.mxu0 %v5399_v18  ;;  %v11108_v18 = vld [vmem:[#allocation17_spill] sm:$0xff] }
  0x75   :  { %215 = vmatmul.f32.gmra.mxu0 %v121_v0  ;;  %817 = vmatpush.msra.mxu1 %v5458_v13  ;;  %v11124_v13 = vld [vmem:[#allocation40_spill] sm:$0xff] }
  0x76   :  { %297 = vmatmul.f32.gmra.mxu2 %v121_v0  ;;  %767 = vmatpush.msra.mxu3 %v5697_v6 }
  0x77   :  { %838 = vmatpush.msra.mxu2 %v5496_v29  ;;  %799 = vmatpush.msra.mxu0 %v5402_v22  ;;  %v11109_v22 = vld [vmem:[#allocation29_spill] sm:$0xff]  ;;  %v11136_v29 = vld [vmem:[#allocation44_spill] sm:$0xff] }
  0x78   :  { %256 = vmatmul.f32.gmra.mxu1 %v121_v0  ;;  %768 = vmatpush.msra.mxu3 %v5703_v10 }
  0x79   :  { %818 = vmatpush.msra.mxu1 %v5471_v19  ;;  %839 = vmatpush.msra.mxu2 %v5518_v39  ;;  %v11127_v19 = vld [vmem:[#allocation24_spill] sm:$0xff] }
  0x7a   :  { %769 = vmatpush.msra.mxu3 %v5707_v3  ;;  %800 = vmatpush.msra.mxu0 %v5405_v26  ;;  %v11110_v26 = vld [vmem:[#allocation28_spill] sm:$0xff] }
  0x7b   :  { %819 = vmatpush.msra.mxu1 %v5481_v23  ;;  %840 = vmatpush.msra.mxu2 %v5527_v43  ;;  %v11130_v23 = vld [vmem:[#allocation26_spill] sm:$0xff] }
  0x7c   :  { %770 = vmatpush.msra.mxu3 %v5712_v14  ;;  %801 = vmatpush.msra.mxu0 %v5408_v30  ;;  %v11111_v30 = vld [vmem:[#allocation18_spill] sm:$0xff] }
  0x7d   :  { %711 = vmatmul.f32.vlgmr.msrb.gmra.mxu0 %v11096_v31  ;;  %771 = vmatmul.f32.vlgmr.msra.gmra.mxu3 %v11096_v31 }
  0x7e   :  { %751 = vmatmul.f32.vlgmr.msrb.gmra.mxu2 %v11096_v31  ;;  %854 = vmatpush.msrb.mxu3 %v5454_v11  ;;  %v11122_v11 = vld [vmem:[#allocation42_spill] sm:$0xff] }
  0x7f   :  { %820 = vmatpush.msra.mxu1 %v5489_v27  ;;  %841 = vmatpush.msra.mxu2 %v5538_v48  ;;  %v11134_v27 = vld [vmem:[#allocation38_spill] sm:$0xff]  ;;  %v5832_v48 = vld [vmem:[#allocation7 + $0x408] sm:$0xff] }
  0x80   :  { %731 = vmatmul.f32.vlgmr.msrb.gmra.mxu1 %v11096_v31  ;;  %855 = vmatpush.msrb.mxu3 %v5462_v15  ;;  %v11125_v15 = vld [vmem:[#allocation23_spill] sm:$0xff] }
  0x81   :  { %802 = vmatpush.msra.mxu0 %v5411_v34  ;;  %821 = vmatpush.msra.mxu1 %v5500_v32  ;;  %v11112_v34 = vld [vmem:[#allocation32_spill] sm:$0xff] }
  0x82   :  { %856 = vmatpush.msrb.mxu3 %v5479_v21  ;;  %842 = vmatpush.msra.mxu2 %v5560_v57  ;;  %v11129_v21 = vld [vmem:[#allocation45_spill] sm:$0xff]  ;;  %v5842_v57 = vld [vmem:[#allocation7 + $0x378] sm:$0xff] }
  0x83   :  { %803 = vmatpush.msra.mxu0 %v5414_v38  ;;  %822 = vmatpush.msra.mxu1 %v5513_v37  ;;  %v11113_v38 = vld [vmem:[#allocation31_spill] sm:$0xff] }
  0x84   :  { %857 = vmatpush.msrb.mxu3 %v5493_v28  ;;  %843 = vmatpush.msra.mxu2 %v5569_v61  ;;  %v11135_v28 = vld [vmem:[#allocation41_spill] sm:$0xff] }
  0x85   :  { %804 = vmatpush.msra.mxu0 %v5417_v42  ;;  %823 = vmatpush.msra.mxu1 %v5523_v41  ;;  %v11114_v42 = vld [vmem:[#allocation19_spill] sm:$0xff]  ;;  %v5845_v61 = vld [vmem:[#allocation7 + $0x330] sm:$0xff] }
  0x86   :  { %858 = vmatpush.msrb.mxu3 %v5504_v33  ;;  %844 = vmatpush.msra.mxu2 %v5580_v35  ;;  %v5852_v35 = vld [vmem:[#allocation7 + $0x2e8] sm:$0xff] }
  0x87   :  { %805 = vmatpush.msra.mxu0 %v5420_v46  ;;  %824 = vmatpush.msra.mxu1 %v5531_v45  ;;  %v11115_v46 = vld [vmem:[#allocation33_spill] sm:$0xff] }
  0x88   :  { %859 = vmatpush.msrb.mxu3 %v5521_v40  ;;  %845 = vmatpush.msra.mxu2 %v5600_v36  ;;  %v5827_v45 = vld [vmem:[#allocation7 + $0x450] sm:$0xff] }
  0x89   :  { %806 = vmatpush.msra.mxu0 %v5423_v50  ;;  %825 = vmatpush.msra.mxu1 %v5542_v51  ;;  %v11116_v50 = vld [vmem:[#allocation36_spill] sm:$0xff] }
  0x8a   :  { %860 = vmatpush.msrb.mxu3 %v5535_v47  ;;  %846 = vmatpush.msra.mxu2 %v5609_v17  ;;  %v11126_v17 = vld [vmem:[#allocation43_spill] sm:$0xff] }
  0x8b   :  { %807 = vmatpush.msra.mxu0 %v5426_v54  ;;  %826 = vmatpush.msra.mxu1 %v5555_v56  ;;  %v11117_v54 = vld [vmem:[#allocation20_spill] sm:$0xff] }
  0x8c   :  { %861 = vmatpush.msrb.mxu3 %v5546_v52  ;;  %847 = vmatpush.msra.mxu2 %v5620_v49  ;;  %v607_v49 = vld [vmem:[#allocation7 + $0x8d0] sm:$0xff]  ;;  %v5837_v52 = vld [vmem:[#allocation7 + $0x3c0] sm:$0xff] }
  0x8d   :  { %808 = vmatpush.msra.mxu0 %v5429_v58  ;;  %827 = vmatpush.msra.mxu1 %v5565_v60  ;;  %v11118_v58 = vld [vmem:[#allocation35_spill] sm:$0xff] }
  0x8e   :  { %862 = vmatpush.msrb.mxu3 %v5563_v59  ;;  %848 = vmatpush.msra.mxu2 %v5643_v12  ;;  %v11123_v12 = vld [vmem:[#allocation22_spill] sm:$0xff]  ;;  %v589_v59 = vld [vmem:[#allocation7 + $0x840] sm:$0xff] }
  0x8f   :  { %809 = vmatpush.msra.mxu0 %v11108_v18  ;;  %828 = vmatpush.msra.mxu1 %v11110_v26  ;;  %v553_v18 = vld [vmem:[#allocation7 + $0x720] sm:$0xff] }
  0x90   :  { %863 = vmatpush.msrb.mxu3 %v11109_v22  ;;  %849 = vmatpush.msra.mxu2 %v5651_v55  ;;  %v598_v55 = vld [vmem:[#allocation7 + $0x888] sm:$0xff]  ;;  %v5867_v22 = vld [vmem:[#allocation5] sm:$0x7] }
  0x91   :  { %874 = vmatpush.msrb.mxu0 %v11111_v30  ;;  %829 = vmatpush.msra.mxu1 %v11113_v38  ;;  %v5871_v30 = vld [vmem:[#allocation7 + $0x210] sm:$0xff] }
  0x92   :  { %864 = vmatpush.msrb.mxu3 %v11112_v34  ;;  %830 = vmatmul.f32.vlgmr.msra.gmra.mxu1 %v11096_v31  ;;  %v544_v34 = vld [vmem:[#allocation7 + $0x6d8] sm:$0xff] }
  0x93   :  { %875 = vmatpush.msrb.mxu0 %v11114_v42  ;;  %894 = vmatpush.msrb.mxu1 %v11115_v46  ;;  %v5875_v42 = vperm.slane %v5867_v22, 0 }
  0x94   :  { %865 = vmatpush.msrb.mxu3 %v11116_v50  ;;  %914 = vmatpush.msrb.mxu2 %v5827_v45  ;;  %v5879_v50 = vld [vmem:[#allocation7 + $0x1c8] sm:$0xff] }
  0x95   :  { %876 = vmatpush.msrb.mxu0 %v11117_v54  ;;  %895 = vmatpush.msrb.mxu1 %v11118_v58  ;;  %11149 = vst [vmem:[#allocation21_spill] sm:$0xff] %v5875_v42  ;;  %v535_v54 = vld [vmem:[#allocation7 + $0x690] sm:$0xff] }
  0x96   :  { %866 = vmatpush.msrb.mxu3 %v11119_v4  ;;  %915 = vmatpush.msrb.mxu2 %v5832_v48 }
  0x97   :  { %877 = vmatpush.msrb.mxu0 %v11120_v7  ;;  %896 = vmatpush.msrb.mxu1 %v11121_v9  ;;  %v5884_v7 = vld [vmem:[#allocation7 + $0x180] sm:$0xff]  ;;  %v526_v9 = vld [vmem:[#allocation7 + $0x648] sm:$0xff] }
  0x98   :  { %867 = vmatpush.msrb.mxu3 %v11122_v11  ;;  %916 = vmatpush.msrb.mxu2 %v5837_v52 }
  0x99   :  { %878 = vmatpush.msrb.mxu0 %v11123_v12  ;;  %897 = vmatpush.msrb.mxu1 %v11124_v13  ;;  %v5891_v13 = vld [vmem:[#allocation7 + $0x138] sm:$0xff] }
  0x9a   :  { %868 = vmatpush.msrb.mxu3 %v5653_v62  ;;  %v11131_v62 = vld [vmem:[#allocation27_spill] sm:$0xff]  ;;  %917 = vmatpush.msrb.mxu2 %v5842_v57 }
  0x9b   :  { %879 = vmatpush.msrb.mxu0 %v11125_v15  ;;  %898 = vmatpush.msrb.mxu1 %v11126_v17  ;;  %v517_v15 = vld [vmem:[#allocation7 + $0x600] sm:$0xff] }
  0x9c   :  { %869 = vmatpush.msrb.mxu3 %v5662_v44  ;;  %918 = vmatpush.msrb.mxu2 %v5845_v61 }
  0x9d   :  { %880 = vmatpush.msrb.mxu0 %v11127_v19  ;;  %899 = vmatpush.msrb.mxu1 %v5647_v16  ;;  %v5894_v19 = vld [vmem:[#allocation7 + $0xf0] sm:$0xff] }
  0x9e   :  { %870 = vmatmul.f32.vlgmr.msrb.gmra.mxu3 %v11096_v31  ;;  %919 = vmatpush.msrb.mxu2 %v5852_v35 }
  0x9f   :  { %881 = vmatpush.msrb.mxu0 %v11128_v20  ;;  %900 = vmatpush.msrb.mxu1 %v11129_v21  ;;  %v508_v20 = vld [vmem:[#allocation7 + $0x5b8] sm:$0xff] }
  0xa0   :  { %934 = vmatpush.msra.mxu3 %v607_v49  ;;  %v481_v49 = vld [vmem:[#allocation7 + $0x4e0] sm:$0xff] }
  0xa1   :  { %882 = vmatpush.msrb.mxu0 %v11130_v23  ;;  %901 = vmatpush.msrb.mxu1 %v5664_v63  ;;  %v580_v63 = vld [vmem:[#allocation7 + $0x7f8] sm:$0xff]  ;;  %v5899_v23 = vld [vmem:[#allocation7 + $0xa8] sm:$0xff] }
  0xa2   :  { %935 = vmatpush.msra.mxu3 %v598_v55 }
  0xa3   :  { %883 = vmatpush.msrb.mxu0 %v11131_v62  ;;  %902 = vmatpush.msrb.mxu1 %v5673_v8  ;;  %v499_v62 = vld [vmem:[#allocation7 + $0x570] sm:$0xff] }
  0xa4   :  { %936 = vmatpush.msra.mxu3 %v589_v59  ;;  %v472_v59 = vld [vmem:[#allocation7 + $0x498] sm:$0xff] }
  0xa5   :  { %884 = vmatpush.msrb.mxu0 %v11132_v24  ;;  %903 = vmatpush.msrb.mxu1 %v5679_v53  ;;  %v571_v53 = vld [vmem:[#allocation7 + $0x7b0] sm:$0xff] }
  0xa6   :  { %937 = vmatpush.msra.mxu3 %v580_v63  ;;  %v608_v63 = vld [vmem:[#allocation7 + $0x8d8] sm:$0xff] }
  0xa7   :  { %885 = vmatpush.msrb.mxu0 %v11133_v25  ;;  %904 = vmatpush.msrb.mxu1 %v5683_v5 }
  0xa8   :  { %938 = vmatpush.msra.mxu3 %v571_v53  ;;  %v609_v53 = vld [vmem:[#allocation7 + $0x8e0] sm:$0xff] }
  0xa9   :  { %886 = vmatpush.msrb.mxu0 %v11134_v27  ;;  %905 = vmatpush.msrb.mxu1 %v5688_v2  ;;  %v5904_v27 = vld [vmem:[#allocation7 + $0x60] sm:$0xff] }
  0xab   :  { %887 = vmatpush.msrb.mxu0 %v11135_v28  ;;  %906 = vmatpush.msrb.mxu1 %v5697_v6  ;;  %v5860_v6 = vld [vmem:[#allocation7 + $0x2a0] sm:$0xff]  ;;  %v490_v28 = vld [vmem:[#allocation7 + $0x528] sm:$0xff] }
  0xac   :  { %920 = vmatpush.msrb.mxu2 %v5860_v6 }
  0xad   :  { %888 = vmatpush.msrb.mxu0 %v11136_v29  ;;  %907 = vmatpush.msrb.mxu1 %v5703_v10  ;;  %v562_v10 = vld [vmem:[#allocation7 + $0x768] sm:$0xff] }
  0xae   :  { %939 = vmatpush.msra.mxu3 %v562_v10  ;;  %v5918_v10 = vperm.slane %v5867_v22, 1 }
  0xaf   :  { %889 = vmatpush.msrb.mxu0 %v5659_v1  ;;  %908 = vmatpush.msrb.mxu1 %v5707_v3  ;;  %v5847_v1 = vld [vmem:[#allocation8] sm:$0xff] }
  0xb0   :  { %v5858_v0 = vperm.slane %v5847_v1, 0  ;;  %940 = vmatpush.msra.mxu3 %v553_v18  ;;  %v5913_v55 = vperm.slane %v5847_v1, 1  ;;  %11158 = vst [vmem:[#allocation45_spill] sm:$0xff] %v5918_v10 }
  0xb1   :  { %909 = vmatpush.msrb.mxu1 %v5712_v14  ;;  %v5865_v14 = vld [vmem:[#allocation7 + $0x258] sm:$0xff] }
  0xb2   :  { %910 = vmatmul.f32.vlgmr.msrb.gmra.mxu1 %v11096_v31  ;;  %11147 = vst [vmem:[#allocation35_spill] sm:$0xff] %v5858_v0  ;;  %921 = vmatpush.msrb.mxu2 %v5865_v14 }
  0xb3   :  { %941 = vmatpush.msra.mxu3 %v544_v34  ;;  %11156 = vst [vmem:[#allocation24_spill] sm:$0xff] %v5913_v55  ;;  %974 = vmatpush.msra.mxu1 %v608_v63  ;;  %v599_v34 = vld [vmem:[#allocation7 + $0x890] sm:$0xff] }
  0xb4   :  { %922 = vmatpush.msrb.mxu2 %v5871_v30 }
  0xb5   :  { %942 = vmatpush.msra.mxu3 %v535_v54  ;;  %975 = vmatpush.msra.mxu1 %v599_v34  ;;  %v5928_v34 = vperm.slane %v5867_v22, 2  ;;  %v545_v22 = vld [vmem:[#allocation7 + $0x6e0] sm:$0xff] }
  0xb6   :  { %923 = vmatpush.msrb.mxu2 %v5879_v50 }
  0xb7   :  { %943 = vmatpush.msra.mxu3 %v526_v9  ;;  %v590_v9 = vld [vmem:[#allocation7 + $0x848] sm:$0xff]  ;;  %11160 = vst [vmem:[#allocation27_spill] sm:$0xff] %v5928_v34 }
  0xb8   :  { %924 = vmatpush.msrb.mxu2 %v5884_v7  ;;  %976 = vmatpush.msra.mxu1 %v590_v9  ;;  %v554_v9 = vld [vmem:[#allocation7 + $0x728] sm:$0xff] }
  0xb9   :  { %944 = vmatpush.msra.mxu3 %v517_v15 }
  0xba   :  { %v5805_v5 = vpop.f32.mrf.mxu0  ;;  %925 = vmatpush.msrb.mxu2 %v5891_v13 }
  0xbb   :  { %v196_v11 = vadd.f32 %v5805_v5, %v5875_v42  ;;  %945 = vmatpush.msra.mxu3 %v508_v20  ;;  %v5909_v5 = vld [vmem:[#allocation7 + $0x18] sm:$0xff]  ;;  %v5925_v20 = vperm.slane %v5847_v1, 2  ;;  %v563_v1 = vld [vmem:[#allocation7 + $0x770] sm:$0xff] }
  0xbc   :  { %v5807_v8 = vpop.f32.mrf.mxu1  ;;  %926 = vmatpush.msrb.mxu2 %v5894_v19 }
  0xbd   :  { %946 = vmatpush.msra.mxu3 %v499_v62  ;;  %v237_v15 = vadd.f32 %v5807_v8, %v5918_v10  ;;  %11159 = vst [vmem:[#allocation26_spill] sm:$0xff] %v5925_v20  ;;  %v581_v62 = vld [vmem:[#allocation7 + $0x800] sm:$0xff] }
  0xbe   :  { %927 = vmatpush.msrb.mxu2 %v5899_v23  ;;  %977 = vmatpush.msra.mxu1 %v581_v62  ;;  %v546_v62 = vld [vmem:[#allocation7 + $0x6e8] sm:$0xff] }
  0xbf   :  { %947 = vmatpush.msra.mxu3 %v490_v28 }
  0xc0   :  { %v5809_v32 = vpop.f32.mrf.mxu2  ;;  %928 = vmatpush.msrb.mxu2 %v5904_v27 }
  0xc1   :  { %948 = vmatpush.msra.mxu3 %v481_v49  ;;  %v582_v49 = vld [vmem:[#allocation7 + $0x808] sm:$0xff] }
  0xc2   :  { %v5811_v33 = vpop.f32.mrf.mxu0  ;;  %v672_v60 = vpop.f32.mrf.mxu3  ;;  %929 = vmatpush.msrb.mxu2 %v5909_v5 }
  0xc3   :  { %v673_v26 = vadd.f32 %v672_v60, %v5858_v0  ;;  %949 = vmatpush.msra.mxu3 %v472_v59 }
  0xc4   :  { %950 = vmatmul.f32.vlgmr.msra.gmra.mxu3 %v11096_v31 }
  0xc5   :  { %v5813_v36 = vpop.f32.mrf.mxu1  ;;  %1014 = vmatpush.msrb.mxu3 %v609_v53  ;;  %v572_v53 = vld [vmem:[#allocation7 + $0x7b8] sm:$0xff] }
  0xc6   :  { %978 = vmatpush.msra.mxu1 %v572_v53 }
  0xc8   :  { %979 = vmatpush.msra.mxu1 %v563_v1  ;;  %v510_v1 = vld [vmem:[#allocation7 + $0x5c8] sm:$0xff] }
  0xc9   :  { %v5815_v37 = vpop.f32.mrf.mxu2 }
  0xca   :  { %v5817_v39 = vpop.f32.mrf.mxu0  ;;  %980 = vmatpush.msra.mxu1 %v554_v9  ;;  %v500_v9 = vld [vmem:[#allocation7 + $0x578] sm:$0xff] }
  0xcb   :  { %11137 = vst [vmem:[#allocation17_spill] sm:$0xff] %v5817_v39  ;;  %v521_v39 = vld [vmem:[#allocation7 + $0x620] sm:$0xff] }
  0xcc   :  { %981 = vmatpush.msra.mxu1 %v545_v22  ;;  %v492_v22 = vld [vmem:[#allocation7 + $0x538] sm:$0xff] }
  0xcd   :  { %v5819_v40 = vpop.f32.mrf.mxu1 }
  0xce   :  { %11138 = vst [vmem:[#allocation29_spill] sm:$0xff] %v5819_v40  ;;  %v520_v40 = vld [vmem:[#allocation7 + $0x618] sm:$0xff] }
  0xd1   :  { %v5821_v41 = vpop.f32.mrf.mxu2 }
  0xd2   :  { %11139 = vst [vmem:[#allocation28_spill] sm:$0xff] %v5821_v41  ;;  %v5823_v43 = vpop.f32.mrf.mxu0  ;;  %v530_v41 = vld [vmem:[#allocation7 + $0x668] sm:$0xff] }
  0xd3   :  { %11140 = vst [vmem:[#allocation18_spill] sm:$0xff] %v5823_v43  ;;  %v529_v43 = vld [vmem:[#allocation7 + $0x660] sm:$0xff] }
  0xd5   :  { %v5825_v44 = vpop.f32.mrf.mxu1 }
  0xd6   :  { %11141 = vst [vmem:[#allocation32_spill] sm:$0xff] %v5825_v44  ;;  %v539_v44 = vld [vmem:[#allocation7 + $0x6b0] sm:$0xff] }
  0xd9   :  { %v5830_v47 = vpop.f32.mrf.mxu2 }
  0xda   :  { %11142 = vst [vmem:[#allocation31_spill] sm:$0xff] %v5830_v47  ;;  %v5834_v51 = vpop.f32.mrf.mxu0  ;;  %v538_v47 = vld [vmem:[#allocation7 + $0x6a8] sm:$0xff] }
  0xdb   :  { %11143 = vst [vmem:[#allocation19_spill] sm:$0xff] %v5834_v51  ;;  %v548_v51 = vld [vmem:[#allocation7 + $0x6f8] sm:$0xff] }
  0xdd   :  { %v5840_v56 = vpop.f32.mrf.mxu1 }
  0xde   :  { %11144 = vst [vmem:[#allocation33_spill] sm:$0xff] %v5840_v56  ;;  %v547_v56 = vld [vmem:[#allocation7 + $0x6f0] sm:$0xff] }
  0xe0   :  { %v692_v38 = vpop.f32.mrf.mxu3 }
  0xe1   :  { %v5850_v16 = vpop.f32.mrf.mxu2  ;;  %v693_v4 = vadd.f32 %v692_v38, %v673_v26  ;;  %v600_v38 = vld [vmem:[#allocation7 + $0x898] sm:$0xff] }
  0xe2   :  { %11145 = vst [vmem:[#allocation36_spill] sm:$0xff] %v5850_v16  ;;  %v5854_v2 = vpop.f32.mrf.mxu0  ;;  %1015 = vmatpush.msrb.mxu3 %v600_v38  ;;  %v564_v38 = vld [vmem:[#allocation7 + $0x778] sm:$0xff]  ;;  %v557_v16 = vld [vmem:[#allocation7 + $0x740] sm:$0xff] }
  0xe3   :  { %11146 = vst [vmem:[#allocation20_spill] sm:$0xff] %v5854_v2  ;;  %v778_v17 = vadd.f32 %v693_v4, %v196_v11  ;;  %v591_v11 = vld [vmem:[#allocation7 + $0x850] sm:$0xff]  ;;  %v556_v2 = vld [vmem:[#allocation7 + $0x738] sm:$0xff] }
  0xe4   :  { %1016 = vmatpush.msrb.mxu3 %v591_v11  ;;  %v555_v11 = vld [vmem:[#allocation7 + $0x730] sm:$0xff] }
  0xe5   :  { %v5863_v3 = vpop.f32.mrf.mxu1  ;;  %v779_v25 = vmul.f32 0.5, %v778_v17 }
  0xe6   :  { %11148 = vst [vmem:[#allocation39_spill] sm:$0xff] %v5863_v3  ;;  %1017 = vmatpush.msrb.mxu3 %v582_v49  ;;  %v536_v49 = vld [vmem:[#allocation7 + $0x698] sm:$0xff]  ;;  %v566_v3 = vld [vmem:[#allocation7 + $0x788] sm:$0xff] }
  0xe7   :  { %4059 = vtanh.f32 %v779_v25  ;;  %982 = vmatpush.msra.mxu1 %v536_v49  ;;  %v5937_v49 = vld [vmem:[#allocation7 + $0x460] sm:$0xff] }
  0xe9   :  { %v5877_v46 = vpop.f32.mrf.mxu2 }
  0xea   :  { %11150 = vst [vmem:[#allocation37_spill] sm:$0xff] %v5877_v46  ;;  %v5881_v58 = vpop.f32.mrf.mxu0  ;;  %v565_v46 = vld [vmem:[#allocation7 + $0x780] sm:$0xff] }
  0xeb   :  { %11151 = vst [vmem:[#allocation42_spill] sm:$0xff] %v5881_v58  ;;  %v575_v58 = vld [vmem:[#allocation7 + $0x7d0] sm:$0xff] }
  0xed   :  { %v5889_v12 = vpop.f32.mrf.mxu1  ;;  %v4060_v54 = vpop.eup %4059 }
  0xee   :  { %11152 = vst [vmem:[#allocation22_spill] sm:$0xff] %v5889_v12  ;;  %v781_v28 = vmul.f32 0.5, %v4060_v54  ;;  %v574_v12 = vld [vmem:[#allocation7 + $0x7c8] sm:$0xff] }
  0xf0   :  { %v782_v54 = vadd.f32 0.5, %v781_v28  ;;  %v527_v28 = vld [vmem:[#allocation7 + $0x650] sm:$0xff] }
  0xf1   :  { %v5897_v21 = vpop.f32.mrf.mxu2  ;;  %983 = vmatpush.msra.mxu1 %v527_v28  ;;  %v5941_v28 = vld [vmem:[#allocation7 + $0x410] sm:$0xff] }
  0xf2   :  { %11153 = vst [vmem:[#allocation40_spill] sm:$0xff] %v5897_v21  ;;  %v5901_v24 = vpop.f32.mrf.mxu0  ;;  %v584_v21 = vld [vmem:[#allocation7 + $0x818] sm:$0xff] }
  0xf3   :  { %11154 = vst [vmem:[#allocation23_spill] sm:$0xff] %v5901_v24  ;;  %v5983_v24 = vld [vmem:[#allocation7 + $0x268] sm:$0xff] }
  0xf5   :  { %v5907_v29 = vpop.f32.mrf.mxu1 }
  0xf6   :  { %11155 = vst [vmem:[#allocation43_spill] sm:$0xff] %v5907_v29  ;;  %v5981_v29 = vld [vmem:[#allocation7 + $0x260] sm:$0xff] }
  0xf9   :  { %v5915_v60 = vpop.f32.mrf.mxu2 }
  0xfa   :  { %11157 = vst [vmem:[#allocation25_spill] sm:$0xff] %v5915_v60  ;;  %v712_v18 = vpop.f32.mrf.mxu0  ;;  %v583_v60 = vld [vmem:[#allocation7 + $0x810] sm:$0xff] }
  0xfb   :  { %v713_v26 = vadd.f32 %v712_v18, %v5913_v55  ;;  %v573_v18 = vld [vmem:[#allocation7 + $0x7c0] sm:$0xff] }
  0xfc   :  { %1018 = vmatpush.msrb.mxu3 %v573_v18 }
  0xfd   :  { %v732_v4 = vpop.f32.mrf.mxu1 }
  0xfe   :  { %v733_v17 = vadd.f32 %v732_v4, %v713_v26  ;;  %1019 = vmatpush.msrb.mxu3 %v564_v38 }
 0x100   :  { %v783_v25 = vadd.f32 %v733_v17, %v237_v15  ;;  %v772_v63 = vpop.f32.mrf.mxu3  ;;  %v278_v15 = vadd.f32 %v5809_v32, %v5928_v34  ;;  %1020 = vmatpush.msrb.mxu3 %v555_v11  ;;  %v518_v32 = vld [vmem:[#allocation7 + $0x608] sm:$0xff]  ;;  %v501_v11 = vld [vmem:[#allocation7 + $0x580] sm:$0xff] }
 0x101   :  { %v752_v59 = vpop.f32.mrf.mxu2  ;;  %984 = vmatpush.msra.mxu1 %v518_v32  ;;  %v474_v32 = vld [vmem:[#allocation7 + $0x4a8] sm:$0xff] }
 0x102   :  { %v784_v8 = vmul.f32 0.5, %v783_v25  ;;  %v753_v26 = vadd.f32 %v752_v59, %v5925_v20  ;;  %1021 = vmatpush.msrb.mxu3 %v546_v62  ;;  %v537_v59 = vld [vmem:[#allocation7 + $0x6a0] sm:$0xff] }
 0x104   :  { %4061 = vtanh.f32 %v784_v8  ;;  %v773_v4 = vadd.f32 %v772_v63, %v753_v26  ;;  %1022 = vmatpush.msrb.mxu3 %v537_v59  ;;  %v528_v63 = vld [vmem:[#allocation7 + $0x658] sm:$0xff]  ;;  %v519_v8 = vld [vmem:[#allocation7 + $0x610] sm:$0xff]  ;;  %v509_v26 = vld [vmem:[#allocation7 + $0x5c0] sm:$0xff] }
 0x105   :  { %985 = vmatpush.msra.mxu1 %v509_v26  ;;  %v482_v59 = vld [vmem:[#allocation7 + $0x4e8] sm:$0xff]  ;;  %v5949_v26 = vld [vmem:[#allocation7 + $0x3d0] sm:$0xff] }
 0x106   :  { %v788_v17 = vmul.f32 %v782_v54, %v773_v4  ;;  %1023 = vmatpush.msrb.mxu3 %v528_v63  ;;  %v5943_v63 = vld [vmem:[#allocation7 + $0x418] sm:$0xff] }
 0x107   :  { %986 = vmatpush.msra.mxu1 %v500_v9  ;;  %v5962_v9 = vld [vmem:[#allocation7 + $0x340] sm:$0xff] }
 0x108   :  { %v789_v25 = vadd.f32 %v788_v17, %v278_v15  ;;  %1024 = vmatpush.msrb.mxu3 %v519_v8  ;;  %v491_v17 = vld [vmem:[#allocation7 + $0x530] sm:$0xff]  ;;  %v5947_v8 = vld [vmem:[#allocation7 + $0x3c8] sm:$0xff] }
 0x109   :  { %987 = vmatpush.msra.mxu1 %v491_v17  ;;  %v5969_v17 = vld [vmem:[#allocation7 + $0x2f0] sm:$0xff] }
 0x10a   :  { %v4062_v53 = vpop.eup %4061  ;;  %4063 = vtanh.f32 %v789_v25  ;;  %1025 = vmatpush.msrb.mxu3 %v510_v1  ;;  %v5935_v25 = vld [vmem:[#allocation7 + $0x458] sm:$0xff]  ;;  %v610_v1 = vld [vmem:[#allocation7 + $0x8e8] sm:$0xff] }
 0x10b   :  { %v786_v18 = vmul.f32 0.5, %v4062_v53  ;;  %988 = vmatpush.msra.mxu1 %v482_v59  ;;  %v483_v53 = vld [vmem:[#allocation7 + $0x4f0] sm:$0xff]  ;;  %v602_v59 = vld [vmem:[#allocation7 + $0x8a8] sm:$0xff] }
 0x10c   :  { %1026 = vmatpush.msrb.mxu3 %v501_v11  ;;  %v611_v11 = vld [vmem:[#allocation7 + $0x8f0] sm:$0xff] }
 0x10d   :  { %v787_v4 = vadd.f32 0.5, %v786_v18  ;;  %v473_v18 = vld [vmem:[#allocation7 + $0x4a0] sm:$0xff] }
 0x10e   :  { %1027 = vmatpush.msrb.mxu3 %v492_v22  ;;  %989 = vmatpush.msra.mxu1 %v473_v18  ;;  %v5971_v22 = vld [vmem:[#allocation7 + $0x2f8] sm:$0xff]  ;;  %v5975_v18 = vld [vmem:[#allocation7 + $0x2a8] sm:$0xff] }
 0x10f   :  { %990 = vmatmul.f32.vlgmr.msra.gmra.mxu1 %v11096_v31 }
 0x110   :  { %v4064_v38 = vpop.eup %4063  ;;  %1028 = vmatpush.msrb.mxu3 %v483_v53  ;;  %1054 = vmatpush.msrb.mxu1 %v610_v1  ;;  %v592_v53 = vld [vmem:[#allocation7 + $0x858] sm:$0xff]  ;;  %v593_v1 = vld [vmem:[#allocation7 + $0x860] sm:$0xff] }
 0x111   :  { %v791_v54 = vsub.f32 0.0, %v4064_v38 }
 0x112   :  { %1029 = vmatpush.msrb.mxu3 %v474_v32  ;;  %v5977_v32 = vld [vmem:[#allocation7 + $0x2b0] sm:$0xff] }
 0x113   :  { %v792_v15 = vmul.f32 %v791_v54, %v787_v4  ;;  %v5955_v4 = vld [vmem:[#allocation7 + $0x388] sm:$0xff]  ;;  %v5960_v54 = vld [vmem:[#allocation7 + $0x338] sm:$0xff]  ;;  %1030 = vmatmul.f32.vlgmr.msrb.gmra.mxu3 %v11096_v31 }
 0x114   :  { %1094 = vmatpush.msra.mxu3 %v611_v11  ;;  %v5987_v11 = vld [vmem:[#allocation7 + $0x218] sm:$0xff] }
 0x115   :  { %v5933_v62 = vadd.f32 %v4064_v38, %v792_v15  ;;  %v5953_v38 = vld [vmem:[#allocation7 + $0x380] sm:$0xff] }
 0x116   :  { %v601_v15 = vld [vmem:[#allocation7 + $0x8a0] sm:$0xff]  ;;  %1095 = vmatpush.msra.mxu3 %v602_v59  ;;  %v5993_v59 = vld [vmem:[#allocation7 + $0x1d0] sm:$0xff] }
 0x117   :  { %810 = vmatmul.f32.vlgmr.msra.gmra.mxu0 %v5933_v62  ;;  %850 = vmatmul.f32.vlgmr.msra.gmra.mxu2 %v5933_v62 }
 0x118   :  { %954 = vmatpush.msra.mxu0 %v5935_v25  ;;  %994 = vmatpush.msra.mxu2 %v5937_v49 }
 0x119   :  { %1055 = vmatpush.msrb.mxu1 %v601_v15  ;;  %v5989_v15 = vld [vmem:[#allocation7 + $0x220] sm:$0xff]  ;;  %1096 = vmatpush.msra.mxu3 %v593_v1  ;;  %v5999_v1 = vld [vmem:[#allocation7 + $0x188] sm:$0xff] }
 0x11a   :  { %955 = vmatpush.msra.mxu0 %v5941_v28  ;;  %995 = vmatpush.msra.mxu2 %v5943_v63 }
 0x11b   :  { %1056 = vmatpush.msrb.mxu1 %v592_v53  ;;  %v5995_v53 = vld [vmem:[#allocation7 + $0x1d8] sm:$0xff]  ;;  %1097 = vmatpush.msra.mxu3 %v584_v21  ;;  %v6005_v21 = vld [vmem:[#allocation7 + $0x140] sm:$0xff] }
 0x11c   :  { %956 = vmatpush.msra.mxu0 %v5947_v8  ;;  %996 = vmatpush.msra.mxu2 %v5949_v26 }
 0x11d   :  { %1057 = vmatpush.msrb.mxu1 %v583_v60  ;;  %v6001_v60 = vld [vmem:[#allocation7 + $0x190] sm:$0xff]  ;;  %1098 = vmatpush.msra.mxu3 %v575_v58  ;;  %v6011_v58 = vld [vmem:[#allocation7 + $0xf8] sm:$0xff] }
 0x11e   :  { %957 = vmatpush.msra.mxu0 %v5953_v38  ;;  %997 = vmatpush.msra.mxu2 %v5955_v4  ;;  %11162 = vst [vmem:[#allocation34_spill] sm:$0xff] %v6011_v58 }
 0x11f   :  { %890 = vmatmul.f32.vlgmr.msrb.gmra.mxu0 %v5933_v62  ;;  %930 = vmatmul.f32.vlgmr.msrb.gmra.mxu2 %v5933_v62 }
 0x120   :  { %958 = vmatpush.msra.mxu0 %v5960_v54  ;;  %998 = vmatpush.msra.mxu2 %v5962_v9 }
 0x121   :  { %1058 = vmatpush.msrb.mxu1 %v574_v12  ;;  %v6007_v12 = vld [vmem:[#allocation7 + $0x148] sm:$0xff]  ;;  %1099 = vmatpush.msra.mxu3 %v566_v3  ;;  %v6017_v3 = vld [vmem:[#allocation7 + $0xb0] sm:$0xff] }
 0x122   :  { %959 = vmatpush.msra.mxu0 %v5969_v17  ;;  %999 = vmatpush.msra.mxu2 %v5971_v22  ;;  %11161 = vst [vmem:[#allocation30_spill] sm:$0xff] %v6007_v12 }
 0x123   :  { %1059 = vmatpush.msrb.mxu1 %v565_v46  ;;  %v6013_v46 = vld [vmem:[#allocation7 + $0x100] sm:$0xff]  ;;  %1100 = vmatpush.msra.mxu3 %v557_v16  ;;  %11164 = vst [vmem:[#allocation41_spill] sm:$0xff] %v6017_v3  ;;  %v6023_v16 = vld [vmem:[#allocation7 + $0x68] sm:$0xff] }
 0x124   :  { %960 = vmatpush.msra.mxu0 %v5975_v18  ;;  %1000 = vmatpush.msra.mxu2 %v5977_v32  ;;  %11163 = vst [vmem:[#allocation38_spill] sm:$0xff] %v6013_v46 }
 0x125   :  { %1060 = vmatpush.msrb.mxu1 %v556_v2  ;;  %v6019_v2 = vld [vmem:[#allocation7 + $0xb8] sm:$0xff]  ;;  %1101 = vmatpush.msra.mxu3 %v548_v51  ;;  %11166 = vst [vmem:[#allocation46_spill] sm:$0xff] %v6023_v16  ;;  %v6029_v51 = vld [vmem:[#allocation7 + $0x20] sm:$0xff] }
 0x126   :  { %961 = vmatpush.msra.mxu0 %v5981_v29  ;;  %1001 = vmatpush.msra.mxu2 %v5983_v24  ;;  %11165 = vst [vmem:[#allocation44_spill] sm:$0xff] %v6019_v2 }
 0x127   :  { %1061 = vmatpush.msrb.mxu1 %v547_v56  ;;  %v6025_v56 = vld [vmem:[#allocation7 + $0x70] sm:$0xff]  ;;  %1102 = vmatpush.msra.mxu3 %v539_v44  ;;  %11168 = vst [vmem:[#allocation48_spill] sm:$0xff] %v6029_v51 }
 0x128   :  { %962 = vmatpush.msra.mxu0 %v5987_v11  ;;  %1002 = vmatpush.msra.mxu2 %v5989_v15  ;;  %11167 = vst [vmem:[#allocation47_spill] sm:$0xff] %v6025_v56  ;;  %v6037_v44 = vld [vmem:[#allocation7 + $0x470] sm:$0xff] }
 0x129   :  { %1062 = vmatpush.msrb.mxu1 %v538_v47  ;;  %v6031_v47 = vld [vmem:[#allocation7 + $0x28] sm:$0xff]  ;;  %1103 = vmatpush.msra.mxu3 %v530_v41  ;;  %11171 = vst [vmem:[#allocation51_spill] sm:$0xff] %v6037_v44 }
 0x12a   :  { %963 = vmatpush.msra.mxu0 %v5993_v59  ;;  %1003 = vmatpush.msra.mxu2 %v5995_v53  ;;  %11169 = vst [vmem:[#allocation49_spill] sm:$0xff] %v6031_v47  ;;  %v6045_v41 = vld [vmem:[#allocation7 + $0x428] sm:$0xff] }
 0x12b   :  { %1063 = vmatpush.msrb.mxu1 %v529_v43  ;;  %1104 = vmatpush.msra.mxu3 %v521_v39  ;;  %v512_v43 = vld [vmem:[#allocation7 + $0x5d8] sm:$0xff]  ;;  %11173 = vst [vmem:[#allocation53_spill] sm:$0xff] %v6045_v41  ;;  %v503_v39 = vld [vmem:[#allocation7 + $0x590] sm:$0xff] }
 0x12c   :  { %964 = vmatpush.msra.mxu0 %v5999_v1  ;;  %1004 = vmatpush.msra.mxu2 %v6001_v60 }
 0x12d   :  { %1064 = vmatpush.msrb.mxu1 %v520_v40  ;;  %v6043_v40 = vld [vmem:[#allocation7 + $0x420] sm:$0xff]  ;;  %1105 = vmatpush.msra.mxu3 %v512_v43  ;;  %v6061_v43 = vld [vmem:[#allocation7 + $0x348] sm:$0xff] }
 0x12e   :  { %965 = vmatpush.msra.mxu0 %v6005_v21  ;;  %1005 = vmatpush.msra.mxu2 %v6007_v12  ;;  %v511_v12 = vld [vmem:[#allocation7 + $0x5d0] sm:$0xff]  ;;  %11172 = vst [vmem:[#allocation52_spill] sm:$0xff] %v6043_v40 }
 0x12f   :  { %1065 = vmatpush.msrb.mxu1 %v511_v12  ;;  %v493_v12 = vld [vmem:[#allocation7 + $0x540] sm:$0xff]  ;;  %1106 = vmatpush.msra.mxu3 %v503_v39  ;;  %11176 = vst [vmem:[#allocation56_spill] sm:$0xff] %v6061_v43  ;;  %v6069_v39 = vld [vmem:[#allocation7 + $0x308] sm:$0xff] }
 0x130   :  { %966 = vmatpush.msra.mxu0 %v6011_v58  ;;  %1006 = vmatpush.msra.mxu2 %v6013_v46  ;;  %v6035_v46 = vld [vmem:[#allocation7 + $0x468] sm:$0xff]  ;;  %v6057_v58 = vld [vmem:[#allocation7 + $0x398] sm:$0xff]  ;;  %11179 = vst [vmem:[#allocation59_spill] sm:$0xff] %v6069_v39 }
 0x131   :  { %11170 = vst [vmem:[#allocation50_spill] sm:$0xff] %v6035_v46 }
 0x132   :  { %967 = vmatpush.msra.mxu0 %v6017_v3  ;;  %1007 = vmatpush.msra.mxu2 %v6019_v2  ;;  %v502_v2 = vld [vmem:[#allocation7 + $0x588] sm:$0xff]  ;;  %v6055_v3 = vld [vmem:[#allocation7 + $0x390] sm:$0xff]  ;;  %11175 = vst [vmem:[#allocation55_spill] sm:$0xff] %v6057_v58 }
 0x133   :  { %1066 = vmatpush.msrb.mxu1 %v502_v2  ;;  %v6063_v2 = vld [vmem:[#allocation7 + $0x350] sm:$0xff] }
 0x134   :  { %968 = vmatpush.msra.mxu0 %v6023_v16  ;;  %1008 = vmatpush.msra.mxu2 %v6025_v56  ;;  %v6049_v56 = vld [vmem:[#allocation7 + $0x3d8] sm:$0xff]  ;;  %11177 = vst [vmem:[#allocation57_spill] sm:$0xff] %v6063_v2 }
 0x135   :  { %v484_v16 = vld [vmem:[#allocation7 + $0x4f8] sm:$0xff]  ;;  %1067 = vmatpush.msrb.mxu1 %v493_v12 }
 0x136   :  { %969 = vmatpush.msra.mxu0 %v6029_v51  ;;  %1009 = vmatpush.msra.mxu2 %v6031_v47  ;;  %v6051_v51 = vld [vmem:[#allocation7 + $0x3e0] sm:$0xff]  ;;  %v494_v47 = vld [vmem:[#allocation7 + $0x548] sm:$0xff]  ;;  %v612_v12 = vld [vmem:[#allocation7 + $0x8f8] sm:$0xff] }
 0x137   :  { %970 = vmatmul.f32.vlgmr.msra.gmra.mxu0 %v5933_v62  ;;  %1010 = vmatmul.f32.vlgmr.msra.gmra.mxu2 %v5933_v62  ;;  %11174 = vst [vmem:[#allocation54_spill] sm:$0xff] %v6051_v51 }
 0x138   :  { %1034 = vmatpush.msrb.mxu0 %v6035_v46  ;;  %1074 = vmatpush.msrb.mxu2 %v6037_v44  ;;  %v485_v44 = vld [vmem:[#allocation7 + $0x500] sm:$0xff]  ;;  %v475_v46 = vld [vmem:[#allocation7 + $0x4b0] sm:$0xff] }
 0x139   :  { %1107 = vmatpush.msra.mxu3 %v494_v47  ;;  %1068 = vmatpush.msrb.mxu1 %v484_v16  ;;  %v6075_v47 = vld [vmem:[#allocation7 + $0x2c0] sm:$0xff]  ;;  %v603_v16 = vld [vmem:[#allocation7 + $0x8b0] sm:$0xff] }
 0x13a   :  { %1035 = vmatpush.msrb.mxu0 %v6043_v40  ;;  %1075 = vmatpush.msrb.mxu2 %v6045_v41  ;;  %v476_v41 = vld [vmem:[#allocation7 + $0x4b8] sm:$0xff]  ;;  %v6067_v40 = vld [vmem:[#allocation7 + $0x300] sm:$0xff]  ;;  %11181 = vst [vmem:[#allocation61_spill] sm:$0xff] %v6075_v47 }
 0x13b   :  { %11178 = vst [vmem:[#allocation58_spill] sm:$0xff] %v6067_v40  ;;  %1108 = vmatpush.msra.mxu3 %v485_v44  ;;  %1069 = vmatpush.msrb.mxu1 %v475_v46  ;;  %v6082_v46 = vld [vmem:[#allocation7 + $0x278] sm:$0xff]  ;;  %v594_v44 = vld [vmem:[#allocation7 + $0x868] sm:$0xff] }
 0x13c   :  { %1036 = vmatpush.msrb.mxu0 %v6049_v56  ;;  %1076 = vmatpush.msrb.mxu2 %v6051_v51  ;;  %v6073_v51 = vld [vmem:[#allocation7 + $0x2b8] sm:$0xff]  ;;  %11183 = vst [vmem:[#allocation63_spill] sm:$0xff] %v6082_v46 }
 0x13d   :  { %11180 = vst [vmem:[#allocation60_spill] sm:$0xff] %v6073_v51  ;;  %1109 = vmatpush.msra.mxu3 %v476_v41  ;;  %1070 = vmatmul.f32.vlgmr.msrb.gmra.mxu1 %v11096_v31  ;;  %v6087_v41 = vld [vmem:[#allocation7 + $0x228] sm:$0xff] }
 0x13e   :  { %1037 = vmatpush.msrb.mxu0 %v6055_v3  ;;  %1077 = vmatpush.msrb.mxu2 %v6057_v58  ;;  %v6080_v58 = vld [vmem:[#allocation7 + $0x270] sm:$0xff]  ;;  %11184 = vst [vmem:[#allocation64_spill] sm:$0xff] %v6087_v41 }
 0x13f   :  { %11182 = vst [vmem:[#allocation62_spill] sm:$0xff] %v6080_v58  ;;  %1110 = vmatmul.f32.vlgmr.msra.gmra.mxu3 %v11096_v31  ;;  %1134 = vmatpush.msra.mxu1 %v612_v12  ;;  %v6095_v12 = vld [vmem:[#allocation7 + $0x1e8] sm:$0xff] }
 0x140   :  { %1038 = vmatpush.msrb.mxu0 %v6061_v43  ;;  %1078 = vmatpush.msrb.mxu2 %v6063_v2  ;;  %v6089_v2 = vld [vmem:[#allocation7 + $0x230] sm:$0xff]  ;;  %v6093_v43 = vld [vmem:[#allocation7 + $0x1e0] sm:$0xff]  ;;  %11187 = vst [vmem:[#allocation67_spill] sm:$0xff] %v6095_v12 }
 0x141   :  { %11185 = vst [vmem:[#allocation65_spill] sm:$0xff] %v6089_v2  ;;  %1135 = vmatpush.msra.mxu1 %v603_v16  ;;  %v6099_v16 = vld [vmem:[#allocation7 + $0x198] sm:$0xff] }
 0x142   :  { %1039 = vmatpush.msrb.mxu0 %v6067_v40  ;;  %1079 = vmatpush.msrb.mxu2 %v6069_v39  ;;  %v4171_v40 = vld [vmem:[#allocation7 + $0x438] sm:$0xff]  ;;  %v585_v39 = vld [vmem:[#allocation7 + $0x820] sm:$0xff]  ;;  %11186 = vst [vmem:[#allocation66_spill] sm:$0xff] %v6093_v43 }
 0x143   :  { %1215 = vmatpush.msrb.mxu3 %v4171_v40  ;;  %1136 = vmatpush.msra.mxu1 %v594_v44  ;;  %11188 = vst [vmem:[#allocation68_spill] sm:$0xff] %v6099_v16  ;;  %v6101_v40 = vld [vmem:[#allocation7 + $0x1a0] sm:$0xff]  ;;  %v6105_v44 = vld [vmem:[#allocation7 + $0x150] sm:$0xff] }
 0x144   :  { %1040 = vmatpush.msrb.mxu0 %v6073_v51  ;;  %1080 = vmatpush.msrb.mxu2 %v6075_v47  ;;  %v4172_v51 = vld [vmem:[#allocation7 + $0x3f0] sm:$0xff]  ;;  %v576_v47 = vld [vmem:[#allocation7 + $0x7d8] sm:$0xff]  ;;  %11189 = vst [vmem:[#allocation69_spill] sm:$0xff] %v6101_v40 }
 0x145   :  { %1216 = vmatpush.msrb.mxu3 %v4172_v51  ;;  %1137 = vmatpush.msra.mxu1 %v585_v39  ;;  %11190 = vst [vmem:[#allocation70_spill] sm:$0xff] %v6105_v44  ;;  %v6107_v51 = vld [vmem:[#allocation7 + $0x158] sm:$0xff]  ;;  %v6111_v39 = vld [vmem:[#allocation7 + $0x108] sm:$0xff] }
 0x146   :  { %1041 = vmatpush.msrb.mxu0 %v6080_v58  ;;  %1081 = vmatpush.msrb.mxu2 %v6082_v46  ;;  %v4173_v58 = vld [vmem:[#allocation7 + $0x3a8] sm:$0xff]  ;;  %v567_v46 = vld [vmem:[#allocation7 + $0x790] sm:$0xff]  ;;  %11191 = vst [vmem:[#allocation71_spill] sm:$0xff] %v6107_v51 }
 0x147   :  { %1217 = vmatpush.msrb.mxu3 %v4173_v58  ;;  %1138 = vmatpush.msra.mxu1 %v576_v47  ;;  %11192 = vst [vmem:[#allocation72_spill] sm:$0xff] %v6111_v39  ;;  %v6113_v58 = vld [vmem:[#allocation7 + $0x110] sm:$0xff]  ;;  %v6117_v47 = vld [vmem:[#allocation7 + $0xc0] sm:$0xff] }
 0x148   :  { %1042 = vmatpush.msrb.mxu0 %v6087_v41  ;;  %1082 = vmatpush.msrb.mxu2 %v6089_v2  ;;  %v4174_v41 = vld [vmem:[#allocation7 + $0x360] sm:$0xff]  ;;  %v558_v2 = vld [vmem:[#allocation7 + $0x748] sm:$0xff]  ;;  %11193 = vst [vmem:[#allocation73_spill] sm:$0xff] %v6113_v58 }
 0x149   :  { %1218 = vmatpush.msrb.mxu3 %v4174_v41  ;;  %1139 = vmatpush.msra.mxu1 %v567_v46  ;;  %v6119_v41 = vld [vmem:[#allocation7 + $0xc8] sm:$0xff]  ;;  %v6123_v46 = vld [vmem:[#allocation7 + $0x78] sm:$0xff] }
 0x14a   :  { %1043 = vmatpush.msrb.mxu0 %v6093_v43  ;;  %1083 = vmatpush.msrb.mxu2 %v6095_v12  ;;  %v4175_v43 = vld [vmem:[#allocation7 + $0x318] sm:$0xff]  ;;  %v549_v12 = vld [vmem:[#allocation7 + $0x700] sm:$0xff]  ;;  %11194 = vst [vmem:[#allocation74_spill] sm:$0xff] %v6119_v41 }
 0x14b   :  { %1219 = vmatpush.msrb.mxu3 %v4175_v43  ;;  %1140 = vmatpush.msra.mxu1 %v558_v2  ;;  %11195 = vst [vmem:[#allocation75_spill] sm:$0xff] %v6123_v46  ;;  %v6125_v43 = vld [vmem:[#allocation7 + $0x80] sm:$0xff]  ;;  %v6129_v2 = vld [vmem:[#allocation7 + $0x30] sm:$0xff] }
 0x14c   :  { %1044 = vmatpush.msrb.mxu0 %v6099_v16  ;;  %1084 = vmatpush.msrb.mxu2 %v6101_v40  ;;  %v4176_v16 = vld [vmem:[#allocation7 + $0x2d0] sm:$0xff]  ;;  %v540_v40 = vld [vmem:[#allocation7 + $0x6b8] sm:$0xff]  ;;  %11196 = vst [vmem:[#allocation76_spill] sm:$0xff] %v6125_v43 }
 0x14d   :  { %1220 = vmatpush.msrb.mxu3 %v4176_v16  ;;  %1141 = vmatpush.msra.mxu1 %v549_v12  ;;  %11197 = vst [vmem:[#allocation77_spill] sm:$0xff] %v6129_v2  ;;  %v6131_v16 = vld [vmem:[#allocation7 + $0x38] sm:$0xff]  ;;  %v522_v12 = vld [vmem:[#allocation7 + $0x628] sm:$0xff] }
 0x14e   :  { %1045 = vmatpush.msrb.mxu0 %v6105_v44  ;;  %1085 = vmatpush.msrb.mxu2 %v6107_v51  ;;  %v4177_v44 = vld [vmem:[#allocation7 + $0x288] sm:$0xff]  ;;  %v531_v51 = vld [vmem:[#allocation7 + $0x670] sm:$0xff]  ;;  %11198 = vst [vmem:[#allocation78_spill] sm:$0xff] %v6131_v16 }
 0x14f   :  { %1221 = vmatpush.msrb.mxu3 %v4177_v44  ;;  %1142 = vmatpush.msra.mxu1 %v540_v40  ;;  %v4179_v44 = vld [vmem:[#allocation7 + $0x1f8] sm:$0xff]  ;;  %v6141_v40 = vld [vmem:[#allocation7 + $0x430] sm:$0xff] }
 0x150   :  { %1046 = vmatpush.msrb.mxu0 %v6111_v39  ;;  %1086 = vmatpush.msrb.mxu2 %v6113_v58  ;;  %v4178_v39 = vld [vmem:[#allocation7 + $0x240] sm:$0xff]  ;;  %v6135_v58 = vld [vmem:[#allocation7 + $0x478] sm:$0xff]  ;;  %11200 = vst [vmem:[#allocation80_spill] sm:$0xff] %v6141_v40 }
 0x151   :  { %1222 = vmatpush.msrb.mxu3 %v4178_v39  ;;  %11199 = vst [vmem:[#allocation79_spill] sm:$0xff] %v6135_v58  ;;  %1143 = vmatpush.msra.mxu1 %v531_v51  ;;  %v6143_v39 = vld [vmem:[#allocation7 + $0x5e0] sm:$0xff]  ;;  %v6148_v51 = vld [vmem:[#allocation7 + $0x598] sm:$0xff] }
 0x152   :  { %1047 = vmatpush.msrb.mxu0 %v6117_v47  ;;  %1087 = vmatpush.msrb.mxu2 %v6119_v41  ;;  %11201 = vst [vmem:[#allocation81_spill] sm:$0xff] %v6143_v39  ;;  %v4182_v41 = vld [vmem:[#allocation7 + $0x120] sm:$0xff] }
 0x153   :  { %1223 = vmatpush.msrb.mxu3 %v4179_v44  ;;  %1144 = vmatpush.msra.mxu1 %v522_v12  ;;  %11202 = vst [vmem:[#allocation82_spill] sm:$0xff] %v6148_v51  ;;  %v4180_v44 = vld [vmem:[#allocation7 + $0x1b0] sm:$0xff]  ;;  %v6158_v12 = vld [vmem:[#allocation7 + $0x358] sm:$0xff] }
 0x154   :  { %1048 = vmatpush.msrb.mxu0 %v6123_v46  ;;  %1088 = vmatpush.msrb.mxu2 %v6125_v43  ;;  %v6146_v43 = vld [vmem:[#allocation7 + $0x3e8] sm:$0xff]  ;;  %11204 = vst [vmem:[#allocation84_spill] sm:$0xff] %v6158_v12 }
 0x155   :  { %1224 = vmatpush.msrb.mxu3 %v4180_v44  ;;  %1145 = vmatpush.msra.mxu1 %v6143_v39  ;;  %v4181_v46 = vld [vmem:[#allocation7 + $0x168] sm:$0xff]  ;;  %v6164_v44 = vld [vmem:[#allocation7 + $0x310] sm:$0xff]  ;;  %v6166_v39 = vld [vmem:[#allocation7 + $0x4c0] sm:$0xff] }
 0x156   :  { %1049 = vmatpush.msrb.mxu0 %v6129_v2  ;;  %1089 = vmatpush.msrb.mxu2 %v6131_v16  ;;  %v6152_v16 = vld [vmem:[#allocation7 + $0x3a0] sm:$0xff]  ;;  %v6154_v2 = vld [vmem:[#allocation7 + $0x550] sm:$0xff]  ;;  %11206 = vst [vmem:[#allocation86_spill] sm:$0xff] %v6166_v39 }
 0x157   :  { %1050 = vmatmul.f32.vlgmr.msrb.gmra.mxu0 %v5933_v62  ;;  %1090 = vmatmul.f32.vlgmr.msrb.gmra.mxu2 %v5933_v62  ;;  %11203 = vst [vmem:[#allocation83_spill] sm:$0xff] %v6154_v2 }
 0x158   :  { %1114 = vmatpush.msra.mxu0 %v6135_v58  ;;  %1225 = vmatpush.msrb.mxu3 %v4181_v46  ;;  %v6160_v58 = vld [vmem:[#allocation7 + $0x508] sm:$0xff] }
 0x159   :  { %1146 = vmatpush.msra.mxu1 %v6148_v51  ;;  %11205 = vst [vmem:[#allocation85_spill] sm:$0xff] %v6160_v58  ;;  %v6170_v46 = vld [vmem:[#allocation7 + $0x2c8] sm:$0xff]  ;;  %v4184_v51 = vld [vmem:[#allocation7 + $0x90] sm:$0xff] }
 0x15a   :  { %1115 = vmatpush.msra.mxu0 %v6141_v40  ;;  %1226 = vmatpush.msrb.mxu3 %v4182_v41  ;;  %v4183_v40 = vld [vmem:[#allocation7 + $0xd8] sm:$0xff]  ;;  %11207 = vst [vmem:[#allocation87_spill] sm:$0xff] %v6170_v46  ;;  %v6174_v41 = vld [vmem:[#allocation7 + $0x280] sm:$0xff] }
 0x15b   :  { %1147 = vmatpush.msra.mxu1 %v6154_v2  ;;  %11208 = vst [vmem:[#allocation88_spill] sm:$0xff] %v6174_v41  ;;  %v4185_v2 = vld [vmem:[#allocation7 + $0x48] sm:$0xff] }
 0x15c   :  { %1116 = vmatpush.msra.mxu0 %v6146_v43  ;;  %1227 = vmatpush.msrb.mxu3 %v4183_v40  ;;  %v6178_v40 = vld [vmem:[#allocation7 + $0x440] sm:$0xff] }
 0x15d   :  { %1148 = vmatpush.msra.mxu1 %v6160_v58  ;;  %11209 = vst [vmem:[#allocation89_spill] sm:$0xff] %v6178_v40  ;;  %v6181_v58 = vld [vmem:[#allocation7 + $0x238] sm:$0xff] }
 0x15e   :  { %1117 = vmatpush.msra.mxu0 %v6152_v16  ;;  %1228 = vmatpush.msrb.mxu3 %v4184_v51  ;;  %11210 = vst [vmem:[#allocation90_spill] sm:$0xff] %v6181_v58  ;;  %v6184_v51 = vld [vmem:[#allocation7 + $0x3f8] sm:$0xff] }
 0x15f   :  { %1149 = vmatpush.msra.mxu1 %v6166_v39  ;;  %11211 = vst [vmem:[#allocation91_spill] sm:$0xff] %v6184_v51  ;;  %v6187_v39 = vld [vmem:[#allocation7 + $0x1f0] sm:$0xff] }
 0x160   :  { %1118 = vmatpush.msra.mxu0 %v6158_v12  ;;  %1150 = vmatmul.f32.vlgmr.msra.gmra.mxu1 %v11096_v31  ;;  %v4187_v12 = vld [vmem:[#allocation7] sm:$0xff]  ;;  %11212 = vst [vmem:[#allocation92_spill] sm:$0xff] %v6187_v39  ;;  %v4189_v31 = vld [vmem:[#allocation7 + $0x448] sm:$0xff] }
 0x161   :  { %1229 = vmatpush.msrb.mxu3 %v4185_v2  ;;  %1255 = vmatpush.msrb.mxu1 %v6178_v40  ;;  %v6190_v2 = vld [vmem:[#allocation7 + $0x3b0] sm:$0xff]  ;;  %v6193_v40 = vld [vmem:[#allocation7 + $0x1a8] sm:$0xff] }
 0x162   :  { %1119 = vmatpush.msra.mxu0 %v6164_v44  ;;  %11213 = vst [vmem:[#allocation93_spill] sm:$0xff] %v6190_v2 }
 0x163   :  { %1230 = vmatpush.msrb.mxu3 %v4187_v12  ;;  %1256 = vmatpush.msrb.mxu1 %v6184_v51  ;;  %11214 = vst [vmem:[#allocation94_spill] sm:$0xff] %v6193_v40  ;;  %v6196_v12 = vld [vmem:[#allocation7 + $0x368] sm:$0xff]  ;;  %v6199_v51 = vld [vmem:[#allocation7 + $0x160] sm:$0xff] }
 0x164   :  { %1120 = vmatpush.msra.mxu0 %v6170_v46  ;;  %v4191_v46 = vld [vmem:[#allocation7 + $0x400] sm:$0xff]  ;;  %11215 = vst [vmem:[#allocation95_spill] sm:$0xff] %v6196_v12 }
 0x165   :  { %1295 = vmatpush.msra.mxu3 %v4189_v31  ;;  %1257 = vmatpush.msrb.mxu1 %v6190_v2  ;;  %11216 = vst [vmem:[#allocation96_spill] sm:$0xff] %v6199_v51  ;;  %v6202_v31 = vld [vmem:[#allocation7 + $0x320] sm:$0xff]  ;;  %v6205_v2 = vld [vmem:[#allocation7 + $0x118] sm:$0xff] }
 0x166   :  { %1121 = vmatpush.msra.mxu0 %v6174_v41  ;;  %v4193_v41 = vld [vmem:[#allocation7 + $0x3b8] sm:$0xff]  ;;  %11217 = vst [vmem:[#allocation97_spill] sm:$0xff] %v6202_v31 }
 0x167   :  { %1296 = vmatpush.msra.mxu3 %v4191_v46  ;;  %1258 = vmatpush.msrb.mxu1 %v6196_v12  ;;  %v6208_v46 = vld [vmem:[#allocation7 + $0x2d8] sm:$0xff]  ;;  %v6211_v12 = vld [vmem:[#allocation7 + $0xd0] sm:$0xff] }
 0x168   :  { %1122 = vmatpush.msra.mxu0 %v6181_v58  ;;  %v4195_v58 = vld [vmem:[#allocation7 + $0x370] sm:$0xff]  ;;  %11218 = vst [vmem:[#allocation98_spill] sm:$0xff] %v6208_v46 }
 0x169   :  { %1297 = vmatpush.msra.mxu3 %v4193_v41  ;;  %1259 = vmatpush.msrb.mxu1 %v6202_v31  ;;  %11219 = vst [vmem:[#allocation99_spill] sm:$0xff] %v6211_v12  ;;  %v6214_v41 = vld [vmem:[#allocation7 + $0x290] sm:$0xff]  ;;  %v6217_v31 = vld [vmem:[#allocation7 + $0x88] sm:$0xff] }
 0x16a   :  { %1123 = vmatpush.msra.mxu0 %v6187_v39  ;;  %v4197_v39 = vld [vmem:[#allocation7 + $0x328] sm:$0xff]  ;;  %11220 = vst [vmem:[#allocation100_spill] sm:$0xff] %v6214_v41 }
 0x16b   :  { %1298 = vmatpush.msra.mxu3 %v4195_v58  ;;  %1260 = vmatpush.msrb.mxu1 %v6208_v46  ;;  %v6220_v58 = vld [vmem:[#allocation7 + $0x248] sm:$0xff]  ;;  %v6223_v46 = vld [vmem:[#allocation7 + $0x40] sm:$0xff] }
 0x16c   :  { %1124 = vmatpush.msra.mxu0 %v6193_v40  ;;  %v4199_v40 = vld [vmem:[#allocation7 + $0x2e0] sm:$0xff]  ;;  %11221 = vst [vmem:[#allocation101_spill] sm:$0xff] %v6220_v58 }
 0x16d   :  { %1299 = vmatpush.msra.mxu3 %v4197_v39  ;;  %1261 = vmatpush.msrb.mxu1 %v6214_v41  ;;  %11222 = vst [vmem:[#allocation102_spill] sm:$0xff] %v6223_v46  ;;  %v6226_v39 = vld [vmem:[#allocation7 + $0x200] sm:$0xff]  ;;  %v4203_v41 = vld [vmem:[#allocation7 + $0x250] sm:$0xff] }
 0x16e   :  { %1125 = vmatpush.msra.mxu0 %v6199_v51  ;;  %v4201_v51 = vld [vmem:[#allocation7 + $0x298] sm:$0xff]  ;;  %11223 = vst [vmem:[#allocation103_spill] sm:$0xff] %v6226_v39 }
 0x16f   :  { %1300 = vmatpush.msra.mxu3 %v4199_v40  ;;  %1262 = vmatpush.msrb.mxu1 %v6220_v58  ;;  %v6230_v40 = vld [vmem:[#allocation7 + $0x1b8] sm:$0xff]  ;;  %v4205_v58 = vld [vmem:[#allocation7 + $0x208] sm:$0xff] }
 0x170   :  { %1126 = vmatpush.msra.mxu0 %v6205_v2  ;;  %11224 = vst [vmem:[#allocation104_spill] sm:$0xff] %v6230_v40 }
 0x171   :  { %1301 = vmatpush.msra.mxu3 %v4201_v51  ;;  %1263 = vmatpush.msrb.mxu1 %v6226_v39  ;;  %v6237_v51 = vld [vmem:[#allocation7 + $0x8b8] sm:$0xff]  ;;  %v4208_v39 = vld [vmem:[#allocation7 + $0x1c0] sm:$0xff] }
 0x172   :  { %1127 = vmatpush.msra.mxu0 %v6211_v12  ;;  %v6234_v12 = vld [vmem:[#allocation7 + $0x170] sm:$0xff]  ;;  %11226 = vst [vmem:[#allocation106_spill] sm:$0xff] %v6237_v51 }
 0x173   :  { %1302 = vmatpush.msra.mxu3 %v4203_v41  ;;  %1264 = vmatpush.msrb.mxu1 %v6230_v40  ;;  %11225 = vst [vmem:[#allocation105_spill] sm:$0xff] %v6234_v12  ;;  %v6240_v41 = vld [vmem:[#allocation7 + $0x128] sm:$0xff]  ;;  %v4211_v40 = vld [vmem:[#allocation7 + $0x178] sm:$0xff] }
 0x174   :  { %1128 = vmatpush.msra.mxu0 %v6217_v31  ;;  %11227 = vst [vmem:[#allocation107_spill] sm:$0xff] %v6240_v41 }
 0x175   :  { %1303 = vmatpush.msra.mxu3 %v4205_v58  ;;  %1265 = vmatpush.msrb.mxu1 %v6234_v12  ;;  %v6246_v58 = vld [vmem:[#allocation7 + $0xe0] sm:$0xff]  ;;  %v6249_v12 = vld [vmem:[#allocation7 + $0x828] sm:$0xff] }
 0x176   :  { %1129 = vmatpush.msra.mxu0 %v6223_v46  ;;  %v6243_v46 = vld [vmem:[#allocation7 + $0x870] sm:$0xff]  ;;  %11229 = vst [vmem:[#allocation109_spill] sm:$0xff] %v6246_v58 }
 0x177   :  { %1130 = vmatmul.f32.vlgmr.msra.gmra.mxu0 %v5933_v62  ;;  %1304 = vmatpush.msra.mxu3 %v4208_v39  ;;  %11228 = vst [vmem:[#allocation108_spill] sm:$0xff] %v6243_v46  ;;  %v6252_v39 = vld [vmem:[#allocation7 + $0x98] sm:$0xff] }
 0x178   :  { %1235 = vmatpush.msrb.mxu0 %v6237_v51  ;;  %1266 = vmatpush.msrb.mxu1 %v6240_v41  ;;  %11230 = vst [vmem:[#allocation110_spill] sm:$0xff] %v6249_v12  ;;  %v4214_v51 = vld [vmem:[#allocation7 + $0x130] sm:$0xff]  ;;  %v6255_v41 = vld [vmem:[#allocation7 + $0x7e0] sm:$0xff] }
 0x179   :  { %1305 = vmatpush.msra.mxu3 %v4211_v40  ;;  %11231 = vst [vmem:[#allocation111_spill] sm:$0xff] %v6252_v39  ;;  %v6258_v40 = vld [vmem:[#allocation7 + $0x50] sm:$0xff] }
 0x17a   :  { %1236 = vmatpush.msrb.mxu0 %v6243_v46  ;;  %1267 = vmatpush.msrb.mxu1 %v6246_v58  ;;  %11232 = vst [vmem:[#allocation112_spill] sm:$0xff] %v6255_v41  ;;  %v4217_v46 = vld [vmem:[#allocation7 + $0xe8] sm:$0xff]  ;;  %v6261_v58 = vld [vmem:[#allocation7 + $0x798] sm:$0xff] }
 0x17b   :  { %1306 = vmatpush.msra.mxu3 %v4214_v51  ;;  %11233 = vst [vmem:[#allocation113_spill] sm:$0xff] %v6258_v40  ;;  %v6264_v51 = vld [vmem:[#allocation7 + $0x8] sm:$0xff] }
 0x17c   :  { %1237 = vmatpush.msrb.mxu0 %v6249_v12  ;;  %1268 = vmatpush.msrb.mxu1 %v6252_v39  ;;  %v4220_v12 = vld [vmem:[#allocation7 + $0xa0] sm:$0xff]  ;;  %11234 = vst [vmem:[#allocation114_spill] sm:$0xff] %v6264_v51  ;;  %v6267_v39 = vld [vmem:[#allocation7 + $0x750] sm:$0xff] }
 0x17d   :  { %1307 = vmatpush.msra.mxu3 %v4217_v46  ;;  %v4223_v46 = vld [vmem:[#allocation7 + $0x58] sm:$0xff] }
 0x17e   :  { %1238 = vmatpush.msrb.mxu0 %v6255_v41  ;;  %1269 = vmatpush.msrb.mxu1 %v6258_v40  ;;  %v6271_v41 = vld [vmem:[#allocation7 + $0x708] sm:$0xff]  ;;  %v4225_v40 = vld [vmem:[#allocation7 + $0x10] sm:$0xff] }
 0x17f   :  { %1308 = vmatpush.msra.mxu3 %v4220_v12  ;;  %v6275_v12 = vld [vmem:[#allocation7 + $0x6c0] sm:$0xff] }
 0x180   :  { %1239 = vmatpush.msrb.mxu0 %v6261_v58  ;;  %1270 = vmatpush.msrb.mxu1 %v6264_v51  ;;  %v6279_v51 = vld [vmem:[#allocation7 + $0x678] sm:$0xff] }
 0x181   :  { %1309 = vmatpush.msra.mxu3 %v4223_v46  ;;  %v6303_v46 = vld [vmem:[#allocation7 + $0x4c8] sm:$0xff] }
 0x182   :  { %1240 = vmatpush.msrb.mxu0 %v6267_v39  ;;  %1335 = vmatpush.msra.mxu1 %v5827_v45  ;;  %v6283_v45 = vld [vmem:[#allocation7 + $0x630] sm:$0xff]  ;;  %11238 = vst [vmem:[#allocation118_spill] sm:$0xff] %v6303_v46 }
 0x183   :  { %1310 = vmatpush.msra.mxu3 %v4225_v40  ;;  %v6291_v40 = vld [vmem:[#allocation7 + $0x5a0] sm:$0xff] }
 0x184   :  { %1241 = vmatpush.msrb.mxu0 %v6271_v41  ;;  %1336 = vmatpush.msra.mxu1 %v5832_v48  ;;  %v6287_v48 = vld [vmem:[#allocation7 + $0x5e8] sm:$0xff]  ;;  %11235 = vst [vmem:[#allocation115_spill] sm:$0xff] %v6291_v40 }
 0x186   :  { %1242 = vmatpush.msrb.mxu0 %v6275_v12  ;;  %1337 = vmatpush.msra.mxu1 %v5837_v52  ;;  %v6295_v52 = vld [vmem:[#allocation7 + $0x558] sm:$0xff] }
 0x187   :  { %11236 = vst [vmem:[#allocation116_spill] sm:$0xff] %v6295_v52 }
 0x188   :  { %1243 = vmatpush.msrb.mxu0 %v6279_v51  ;;  %1338 = vmatpush.msra.mxu1 %v5842_v57  ;;  %v6299_v57 = vld [vmem:[#allocation7 + $0x510] sm:$0xff] }
 0x189   :  { %11237 = vst [vmem:[#allocation117_spill] sm:$0xff] %v6299_v57 }
 0x18a   :  { %1244 = vmatpush.msrb.mxu0 %v6283_v45  ;;  %1339 = vmatpush.msra.mxu1 %v5845_v61 }
 0x18c   :  { %1245 = vmatpush.msrb.mxu0 %v6287_v48  ;;  %1340 = vmatpush.msra.mxu1 %v5852_v35  ;;  %v831_v35 = vpop.f32.mrf.mxu1 }
 0x18e   :  { %1246 = vmatpush.msrb.mxu0 %v6291_v40  ;;  %1341 = vmatpush.msra.mxu1 %v5860_v6  ;;  %v6308_v40 = vld [vmem:[#allocation7 + $0x480] sm:$0xff] }
 0x18f   :  { %11239 = vst [vmem:[#allocation119_spill] sm:$0xff] %v6308_v40 }
 0x190   :  { %1247 = vmatpush.msrb.mxu0 %v6295_v52  ;;  %1342 = vmatpush.msra.mxu1 %v5865_v14  ;;  %v199_v14 = vadd.f32 %v5811_v33, %v5875_v42  ;;  %v6323_v33 = vld [vmem:[#allocation7 + $0x838] sm:$0xff] }
 0x191   :  { %11240 = vst [vmem:[#allocation120_spill] sm:$0xff] %v6323_v33  ;;  %v6383_v42 = vld [vmem:[#allocation7 + $0x4d8] sm:$0xff] }
 0x192   :  { %1248 = vmatpush.msrb.mxu0 %v6299_v57  ;;  %1343 = vmatpush.msra.mxu1 %v5871_v30  ;;  %v6314_v30 = vld [vmem:[#allocation7 + $0x8c8] sm:$0xff]  ;;  %11252 = vst [vmem:[#allocation132_spill] sm:$0xff] %v6383_v42 }
 0x194   :  { %v811_v61 = vpop.f32.mrf.mxu0  ;;  %1249 = vmatpush.msrb.mxu0 %v6303_v46  ;;  %1344 = vmatpush.msra.mxu1 %v5879_v50 }
 0x195   :  { %v812_v6 = vadd.f32 %v811_v61, %v5858_v0  ;;  %v6318_v61 = vld [vmem:[#allocation7 + $0x880] sm:$0xff]  ;;  %v871_v0 = vpop.f32.mrf.mxu3 }
 0x196   :  { %1250 = vmatpush.msrb.mxu0 %v6308_v40  ;;  %1345 = vmatpush.msra.mxu1 %v5884_v7  ;;  %v240_v7 = vadd.f32 %v5813_v36, %v5918_v10 }
 0x197   :  { %v832_v57 = vadd.f32 %v831_v35, %v812_v6  ;;  %v6337_v6 = vld [vmem:[#allocation7 + $0x760] sm:$0xff] }
 0x198   :  { %1315 = vmatpush.msra.mxu0 %v6314_v30  ;;  %1346 = vmatpush.msra.mxu1 %v5891_v13  ;;  %11243 = vst [vmem:[#allocation123_spill] sm:$0xff] %v6337_v6 }
 0x199   :  { %v1158_v52 = vadd.f32 %v832_v57, %v199_v14  ;;  %v6329_v57 = vld [vmem:[#allocation7 + $0x7f0] sm:$0xff] }
 0x19a   :  { %1316 = vmatpush.msra.mxu0 %v6318_v61  ;;  %v851_v50 = vpop.f32.mrf.mxu2  ;;  %1347 = vmatpush.msra.mxu1 %v5894_v19  ;;  %11241 = vst [vmem:[#allocation121_spill] sm:$0xff] %v6329_v57  ;;  %v6333_v19 = vld [vmem:[#allocation7 + $0x7a8] sm:$0xff]  ;;  %v6344_v14 = vld [vmem:[#allocation7 + $0x6d0] sm:$0xff] }
 0x19b   :  { %v1159_v40 = vmul.f32 0.5, %v1158_v52  ;;  %v852_v46 = vadd.f32 %v851_v50, %v5913_v55  ;;  %11242 = vst [vmem:[#allocation122_spill] sm:$0xff] %v6333_v19 }
 0x19c   :  { %1317 = vmatpush.msra.mxu0 %v6323_v33  ;;  %1348 = vmatpush.msra.mxu1 %v5899_v23  ;;  %v891_v35 = vpop.f32.mrf.mxu0  ;;  %11245 = vst [vmem:[#allocation125_spill] sm:$0xff] %v6344_v14  ;;  %v11295_v33 = vld [vmem:[#allocation76_spill] sm:$0xff] }
 0x19d   :  { %4065 = vtanh.f32 %v1159_v40  ;;  %v872_v13 = vadd.f32 %v871_v0, %v852_v46  ;;  %v892_v0 = vadd.f32 %v891_v35, %v5925_v20  ;;  %v911_v40 = vpop.f32.mrf.mxu1  ;;  %v6341_v46 = vld [vmem:[#allocation7 + $0x718] sm:$0xff]  ;;  %v6352_v35 = vld [vmem:[#allocation10 + $0x78] sm:$0xff] }
 0x19e   :  { %1318 = vmatpush.msra.mxu0 %v6329_v57  ;;  %1349 = vmatpush.msra.mxu1 %v5904_v27  ;;  %11244 = vst [vmem:[#allocation124_spill] sm:$0xff] %v6341_v46  ;;  %v11293_v57 = vld [vmem:[#allocation74_spill] sm:$0xff] }
 0x19f   :  { %v1163_v52 = vadd.f32 %v872_v13, %v240_v7  ;;  %v6347_v7 = vld [vmem:[#allocation7 + $0x688] sm:$0xff]  ;;  %v281_v13 = vadd.f32 %v5815_v37, %v5928_v34  ;;  %1190 = vmatpush.msra.mxu2 %v6352_v35  ;;  %v6364_v37 = vld [vmem:[#allocation10 + $0x68] sm:$0xff] }
 0x1a0   :  { %1319 = vmatpush.msra.mxu0 %v6333_v19  ;;  %1350 = vmatpush.msra.mxu1 %v5909_v5  ;;  %v912_v5 = vadd.f32 %v911_v40, %v892_v0  ;;  %11246 = vst [vmem:[#allocation126_spill] sm:$0xff] %v6347_v7  ;;  %v6361_v0 = vld [vmem:[#allocation7 + $0x5f8] sm:$0xff]  ;;  %v6541_v19 = vld [vmem:[#allocation7 + $0x560] sm:$0xff] }
 0x1a1   :  { %v1164_v36 = vmul.f32 0.5, %v1163_v52  ;;  %11248 = vst [vmem:[#allocation128_spill] sm:$0xff] %v6361_v0 }
 0x1a2   :  { %1320 = vmatpush.msra.mxu0 %v6337_v6 }
 0x1a3   :  { %v4066_v23 = vpop.eup %4065  ;;  %4067 = vtanh.f32 %v1164_v36  ;;  %v6358_v36 = vld [vmem:[#allocation10 + $0x70] sm:$0xff] }
 0x1a4   :  { %1321 = vmatpush.msra.mxu0 %v6341_v46  ;;  %v1161_v27 = vmul.f32 0.5, %v4066_v23  ;;  %v6355_v23 = vld [vmem:[#allocation7 + $0x640] sm:$0xff]  ;;  %1191 = vmatpush.msra.mxu2 %v6358_v36 }
 0x1a5   :  { %11247 = vst [vmem:[#allocation127_spill] sm:$0xff] %v6355_v23  ;;  %v11280_v46 = vld [vmem:[#allocation63_spill] sm:$0xff] }
 0x1a6   :  { %1322 = vmatpush.msra.mxu0 %v6344_v14  ;;  %v1162_v50 = vadd.f32 0.5, %v1161_v27  ;;  %1192 = vmatpush.msra.mxu2 %v6364_v37  ;;  %v6367_v27 = vld [vmem:[#allocation7 + $0x5b0] sm:$0xff]  ;;  %v6534_v14 = vld [vmem:[#allocation7 + $0x5a8] sm:$0xff] }
 0x1a7   :  { %11249 = vst [vmem:[#allocation129_spill] sm:$0xff] %v6367_v27 }
 0x1a8   :  { %1323 = vmatpush.msra.mxu0 %v6347_v7  ;;  %v1168_v52 = vmul.f32 %v1162_v50, %v912_v5  ;;  %v6370_v5 = vld [vmem:[#allocation10 + $0x60] sm:$0xff] }
 0x1a9   :  { %v4068_v40 = vpop.eup %4067  ;;  %1193 = vmatpush.msra.mxu2 %v6370_v5 }
 0x1aa   :  { %1324 = vmatpush.msra.mxu0 %v6355_v23  ;;  %v1169_v10 = vadd.f32 %v1168_v52, %v281_v13  ;;  %v1166_v50 = vmul.f32 0.5, %v4068_v40  ;;  %v6373_v13 = vld [vmem:[#allocation7 + $0x568] sm:$0xff]  ;;  %v6500_v23 = vld [vmem:[#allocation7 + $0x710] sm:$0xff] }
 0x1ab   :  { %11250 = vst [vmem:[#allocation130_spill] sm:$0xff] %v6373_v13  ;;  %v6376_v52 = vld [vmem:[#allocation10 + $0x58] sm:$0xff] }
 0x1ac   :  { %1325 = vmatpush.msra.mxu0 %v6361_v0  ;;  %4069 = vtanh.f32 %v1169_v10  ;;  %1194 = vmatpush.msra.mxu2 %v6376_v52  ;;  %v6379_v10 = vld [vmem:[#allocation7 + $0x520] sm:$0xff]  ;;  %v1167_v20 = vadd.f32 0.5, %v1166_v50 }
 0x1ad   :  { %11251 = vst [vmem:[#allocation131_spill] sm:$0xff] %v6379_v10 }
 0x1ae   :  { %1326 = vmatpush.msra.mxu0 %v6367_v27  ;;  %v6386_v27 = vld [vmem:[#allocation10 + $0x50] sm:$0xff] }
 0x1af   :  { %1195 = vmatpush.msra.mxu2 %v6386_v27 }
 0x1b0   :  { %1327 = vmatpush.msra.mxu0 %v6373_v13  ;;  %v6388_v13 = vld [vmem:[#allocation7 + $0x490] sm:$0xff] }
 0x1b1   :  { %11253 = vst [vmem:[#allocation133_spill] sm:$0xff] %v6388_v13 }
 0x1b2   :  { %1328 = vmatpush.msra.mxu0 %v6379_v10  ;;  %v4070_v34 = vpop.eup %4069  ;;  %v6394_v10 = vld [vmem:[#allocation10 + $0x48] sm:$0xff] }
 0x1b3   :  { %v1171_v55 = vsub.f32 %v5933_v62, %v4070_v34  ;;  %1196 = vmatpush.msra.mxu2 %v6394_v10  ;;  %v6399_v62 = vld [vmem:[#allocation10 + $0x40] sm:$0xff] }
 0x1b4   :  { %1329 = vmatpush.msra.mxu0 %v6383_v42  ;;  %v11268_v42 = vld [vmem:[#allocation53_spill] sm:$0xff] }
 0x1b5   :  { %v1172_v40 = vmul.f32 %v1171_v55, %v1167_v20  ;;  %1197 = vmatpush.msra.mxu2 %v6399_v62  ;;  %v6404_v55 = vld [vmem:[#allocation10 + $0x38] sm:$0xff]  ;;  %v6409_v20 = vld [vmem:[#allocation10 + $0x30] sm:$0xff] }
 0x1b6   :  { %1330 = vmatpush.msra.mxu0 %v6388_v13 }
 0x1b7   :  { %v6392_v0 = vadd.f32 %v4070_v34, %v1172_v40  ;;  %1198 = vmatpush.msra.mxu2 %v6404_v55  ;;  %v6416_v34 = vld [vmem:[#allocation10 + $0x28] sm:$0xff]  ;;  %v951_v40 = vpop.f32.mrf.mxu3 }
 0x1b9   :  { %1231 = vmatmul.f32.vlgmr.msrb.gmra.mxu3 %v6392_v0  ;;  %1271 = vmatmul.f32.vlgmr.msrb.gmra.mxu1 %v6392_v0 }
 0x1ba   :  { %1375 = vmatpush.msrb.mxu3 %v5935_v25  ;;  %1415 = vmatpush.msrb.mxu1 %v5937_v49  ;;  %v6422_v25 = vld [vmem:[#allocation10 + $0x20] sm:$0xff]  ;;  %v6427_v49 = vld [vmem:[#allocation10 + $0x18] sm:$0xff] }
 0x1bb   :  { %1199 = vmatpush.msra.mxu2 %v6409_v20 }
 0x1bc   :  { %1376 = vmatpush.msrb.mxu3 %v5941_v28  ;;  %1416 = vmatpush.msrb.mxu1 %v5943_v63  ;;  %v6432_v28 = vld [vmem:[#allocation10 + $0x10] sm:$0xff]  ;;  %v6437_v63 = vld [vmem:[#allocation10 + $0x8] sm:$0xff] }
 0x1bd   :  { %1200 = vmatpush.msra.mxu2 %v6416_v34 }
 0x1be   :  { %1377 = vmatpush.msrb.mxu3 %v5947_v8  ;;  %1417 = vmatpush.msrb.mxu1 %v5949_v26  ;;  %v6442_v8 = vld [vmem:[#allocation10] sm:$0xff]  ;;  %v11254_v26 = vld [vmem:[#allocation30_spill] sm:$0xff] }
 0x1bf   :  { %1201 = vmatpush.msra.mxu2 %v6422_v25 }
 0x1c0   :  { %1378 = vmatpush.msrb.mxu3 %v5953_v38  ;;  %1418 = vmatpush.msrb.mxu1 %v5955_v4  ;;  %v6457_v38 = vld [vmem:[#allocation7 + $0x878] sm:$0xff] }
 0x1c1   :  { %1311 = vmatmul.f32.vlgmr.msra.gmra.mxu3 %v6392_v0  ;;  %1351 = vmatmul.f32.vlgmr.msra.gmra.mxu1 %v6392_v0  ;;  %v11255_v4 = vld [vmem:[#allocation34_spill] sm:$0xff] }
 0x1c2   :  { %1379 = vmatpush.msrb.mxu3 %v5960_v54  ;;  %1419 = vmatpush.msrb.mxu1 %v5962_v9  ;;  %v11256_v54 = vld [vmem:[#allocation38_spill] sm:$0xff]  ;;  %v6462_v9 = vpop.f32.mrf.mxu1 }
 0x1c3   :  { %1202 = vmatpush.msra.mxu2 %v6427_v49 }
 0x1c4   :  { %1380 = vmatpush.msrb.mxu3 %v5969_v17  ;;  %1420 = vmatpush.msrb.mxu1 %v5971_v22  ;;  %v6464_v17 = vld [vmem:[#allocation7 + $0x830] sm:$0xff]  ;;  %v931_v22 = vpop.f32.mrf.mxu2 }
 0x1c5   :  { %1203 = vmatpush.msra.mxu2 %v6432_v28 }
 0x1c6   :  { %1381 = vmatpush.msrb.mxu3 %v5975_v18  ;;  %1421 = vmatpush.msrb.mxu1 %v5977_v32  ;;  %v11257_v18 = vld [vmem:[#allocation41_spill] sm:$0xff]  ;;  %v11258_v32 = vld [vmem:[#allocation44_spill] sm:$0xff] }
 0x1c7   :  { %1204 = vmatpush.msra.mxu2 %v6437_v63 }
 0x1c8   :  { %1382 = vmatpush.msrb.mxu3 %v5981_v29  ;;  %1422 = vmatpush.msrb.mxu1 %v5983_v24  ;;  %v6450_v24 = vpop.f32.mrf.mxu0  ;;  %v6452_v29 = vld [vmem:[#allocation7 + $0x8c0] sm:$0xff] }
 0x1c9   :  { %1205 = vmatpush.msra.mxu2 %v6442_v8 }
 0x1ca   :  { %1383 = vmatpush.msrb.mxu3 %v5987_v11  ;;  %1423 = vmatpush.msrb.mxu1 %v5989_v15  ;;  %v6469_v11 = vld [vmem:[#allocation7 + $0x7e8] sm:$0xff]  ;;  %v6472_v15 = vld [vmem:[#allocation8] sm:$0xff] }
 0x1cb   :  { %1275 = vmatpush.msrb.mxu2 %v6452_v29  ;;  %v6483_v50 = vperm.slane %v6472_v15, 3 }
 0x1cc   :  { %1384 = vmatpush.msrb.mxu3 %v5993_v59  ;;  %1424 = vmatpush.msrb.mxu1 %v5995_v53  ;;  %v6475_v59 = vperm.slane %v6472_v15, 6  ;;  %v11260_v53 = vld [vmem:[#allocation46_spill] sm:$0xff] }
 0x1cd   :  { %1276 = vmatpush.msrb.mxu2 %v6457_v38  ;;  %11262 = vst [vmem:[#allocation34_spill] sm:$0xff] %v6483_v50  ;;  %v932_v13 = vadd.f32 %v931_v22, %v6483_v50  ;;  %v6508_v50 = vpop.f32.mrf.mxu3 }
 0x1ce   :  { %1385 = vmatpush.msrb.mxu3 %v5999_v1  ;;  %1425 = vmatpush.msrb.mxu1 %v6001_v60  ;;  %11259 = vst [vmem:[#allocation30_spill] sm:$0xff] %v6475_v59  ;;  %v11261_v1 = vld [vmem:[#allocation47_spill] sm:$0xff] }
 0x1cf   :  { %1277 = vmatpush.msrb.mxu2 %v6464_v17  ;;  %v952_v22 = vadd.f32 %v951_v40, %v932_v13  ;;  %v11275_v40 = vld [vmem:[#allocation59_spill] sm:$0xff] }
 0x1d0   :  { %1386 = vmatpush.msrb.mxu3 %v6005_v21  ;;  %1426 = vmatpush.msrb.mxu1 %v11254_v26  ;;  %v6479_v21 = vld [vmem:[#allocation7 + $0x7a0] sm:$0xff] }
 0x1d1   :  { %1278 = vmatpush.msrb.mxu2 %v6469_v11  ;;  %v11263_v26 = vld [vmem:[#allocation48_spill] sm:$0xff] }
 0x1d2   :  { %1387 = vmatpush.msrb.mxu3 %v11255_v4  ;;  %1427 = vmatpush.msrb.mxu1 %v11256_v54  ;;  %v11264_v4 = vld [vmem:[#allocation49_spill] sm:$0xff] }
 0x1d3   :  { %1279 = vmatpush.msrb.mxu2 %v6479_v21 }
 0x1d4   :  { %1388 = vmatpush.msrb.mxu3 %v11257_v18  ;;  %1428 = vmatpush.msrb.mxu1 %v11258_v32  ;;  %v1051_v60 = vpop.f32.mrf.mxu0  ;;  %v11265_v18 = vld [vmem:[#allocation50_spill] sm:$0xff]  ;;  %v11266_v32 = vld [vmem:[#allocation51_spill] sm:$0xff] }
 0x1d5   :  { %v1052_v54 = vadd.f32 %v1051_v60, %v6475_v59  ;;  %v6520_v59 = vld [vmem:[#allocation7 + $0x638] sm:$0xff] }
 0x1d6   :  { %1389 = vmatpush.msrb.mxu3 %v11260_v53  ;;  %1429 = vmatpush.msrb.mxu1 %v11261_v1  ;;  %v1071_v53 = vpop.f32.mrf.mxu1  ;;  %v6492_v1 = vld [vmem:[#allocation7 + $0x758] sm:$0xff] }
 0x1d7   :  { %1280 = vmatpush.msrb.mxu2 %v6492_v1  ;;  %v1072_v60 = vadd.f32 %v1071_v53, %v1052_v54  ;;  %v11271_v53 = vld [vmem:[#allocation56_spill] sm:$0xff] }
 0x1d8   :  { %1390 = vmatpush.msrb.mxu3 %v11263_v26  ;;  %1430 = vmatpush.msrb.mxu1 %v11264_v4  ;;  %v6496_v26 = vpop.f32.mrf.mxu2  ;;  %v11267_v4 = vld [vmem:[#allocation52_spill] sm:$0xff] }
 0x1d9   :  { %1391 = vmatmul.f32.vlgmr.msrb.gmra.mxu3 %v6392_v0  ;;  %1431 = vmatmul.f32.vlgmr.msrb.gmra.mxu1 %v6392_v0  ;;  %v1174_v54 = vadd.f32 %v1072_v60, %v952_v22  ;;  %v6528_v60 = vld [vmem:[#allocation7 + $0x5f0] sm:$0xff] }
 0x1da   :  { %1455 = vmatpush.msra.mxu3 %v11265_v18  ;;  %1495 = vmatpush.msra.mxu1 %v11266_v32  ;;  %v11269_v18 = vld [vmem:[#allocation54_spill] sm:$0xff]  ;;  %v6505_v32 = vld [vmem:[#allocation7 + $0x6c8] sm:$0xff] }
 0x1db   :  { %1281 = vmatpush.msrb.mxu2 %v6500_v23  ;;  %v1175_v22 = vmul.f32 0.5, %v1174_v54  ;;  %v11281_v54 = vld [vmem:[#allocation64_spill] sm:$0xff] }
 0x1dc   :  { %1456 = vmatpush.msra.mxu3 %v11267_v4  ;;  %1496 = vmatpush.msra.mxu1 %v11268_v42  ;;  %v11270_v4 = vld [vmem:[#allocation55_spill] sm:$0xff] }
 0x1dd   :  { %1282 = vmatpush.msrb.mxu2 %v6505_v32  ;;  %v6512_v42 = vld [vmem:[#allocation7 + $0x680] sm:$0xff]  ;;  %4071 = vtanh.f32 %v1175_v22 }
 0x1de   :  { %1457 = vmatpush.msra.mxu3 %v6049_v56  ;;  %1497 = vmatpush.msra.mxu1 %v11269_v18  ;;  %v11272_v56 = vld [vmem:[#allocation57_spill] sm:$0xff]  ;;  %v6518_v18 = vperm.slane %v6472_v15, 7  ;;  %v11285_v22 = vld [vmem:[#allocation68_spill] sm:$0xff] }
 0x1df   :  { %1283 = vmatpush.msrb.mxu2 %v6512_v42 }
 0x1e0   :  { %1458 = vmatpush.msra.mxu3 %v6055_v3  ;;  %1498 = vmatpush.msra.mxu1 %v11270_v4  ;;  %11273 = vst [vmem:[#allocation38_spill] sm:$0xff] %v6518_v18  ;;  %v1091_v13 = vpop.f32.mrf.mxu2  ;;  %v11274_v3 = vld [vmem:[#allocation58_spill] sm:$0xff]  ;;  %v6526_v4 = vperm.slane %v6472_v15, 4 }
 0x1e1   :  { %1284 = vmatpush.msrb.mxu2 %v6520_v59  ;;  %v1092_v7 = vadd.f32 %v1091_v13, %v6518_v18  ;;  %v11282_v13 = vld [vmem:[#allocation65_spill] sm:$0xff] }
 0x1e2   :  { %1459 = vmatpush.msra.mxu3 %v11271_v53  ;;  %1499 = vmatpush.msra.mxu1 %v11272_v56  ;;  %11276 = vst [vmem:[#allocation41_spill] sm:$0xff] %v6526_v4  ;;  %v11277_v53 = vld [vmem:[#allocation60_spill] sm:$0xff]  ;;  %v11278_v56 = vld [vmem:[#allocation61_spill] sm:$0xff]  ;;  %v972_v6 = vadd.f32 %v6450_v24, %v6526_v4  ;;  %v11288_v4 = vld [vmem:[#allocation70_spill] sm:$0xff] }
 0x1e3   :  { %1285 = vmatpush.msrb.mxu2 %v6528_v60  ;;  %v6552_v18 = vld [vmem:[#allocation7 + $0x4d0] sm:$0xff] }
 0x1e4   :  { %1460 = vmatpush.msra.mxu3 %v11274_v3  ;;  %1500 = vmatpush.msra.mxu1 %v11275_v40  ;;  %v1111_v3 = vpop.f32.mrf.mxu3  ;;  %v11279_v40 = vld [vmem:[#allocation62_spill] sm:$0xff]  ;;  %v992_v24 = vadd.f32 %v6462_v9, %v972_v6  ;;  %v6563_v6 = vperm.slane %v6472_v15, 5  ;;  %v6565_v9 = vld [vmem:[#allocation8 + $0x8] ss:$0 sm:$0xff] }
 0x1e5   :  { %1286 = vmatpush.msrb.mxu2 %v6534_v14 }
 0x1e6   :  { %1461 = vmatpush.msra.mxu3 %v11277_v53  ;;  %1501 = vmatpush.msra.mxu1 %v11278_v56  ;;  %v1112_v53 = vadd.f32 %v1111_v3, %v1092_v7  ;;  %v6546_v56 = vld [vmem:[#allocation7 + $0x518] sm:$0xff]  ;;  %v6557_v7 = vld [vmem:[#allocation7 + $0x488] sm:$0xff]  ;;  %v4072_v3 = vpop.eup %4071  ;;  %11290 = vst [vmem:[#allocation46_spill] sm:$0xff] %v6563_v6 }
 0x1e7   :  { %1287 = vmatpush.msrb.mxu2 %v6541_v19  ;;  %11287 = vst [vmem:[#allocation44_spill] sm:$0xff] %v6557_v7 }
 0x1e8   :  { %1462 = vmatpush.msra.mxu3 %v11279_v40  ;;  %1502 = vmatpush.msra.mxu1 %v11280_v46  ;;  %v11283_v40 = vld [vmem:[#allocation66_spill] sm:$0xff]  ;;  %v11284_v46 = vld [vmem:[#allocation67_spill] sm:$0xff] }
 0x1e9   :  { %1288 = vmatpush.msrb.mxu2 %v6546_v56 }
 0x1ea   :  { %1463 = vmatpush.msra.mxu3 %v11281_v54  ;;  %1503 = vmatpush.msra.mxu1 %v11282_v13  ;;  %v11286_v54 = vld [vmem:[#allocation69_spill] sm:$0xff]  ;;  %v1179_v13 = vadd.f32 %v1112_v53, %v992_v24  ;;  %v1177_v53 = vmul.f32 0.5, %v4072_v3  ;;  %v11297_v3 = vld [vmem:[#allocation78_spill] sm:$0xff] }
 0x1eb   :  { %1289 = vmatpush.msrb.mxu2 %v6552_v18 }
 0x1ec   :  { %1464 = vmatpush.msra.mxu3 %v11283_v40  ;;  %1504 = vmatpush.msra.mxu1 %v11284_v46  ;;  %v11289_v40 = vld [vmem:[#allocation71_spill] sm:$0xff]  ;;  %v11291_v46 = vld [vmem:[#allocation72_spill] sm:$0xff] }
 0x1ed   :  { %1290 = vmatpush.msrb.mxu2 %v6557_v7  ;;  %v1151_v7 = vpop.f32.mrf.mxu1 }
 0x1ee   :  { %1465 = vmatpush.msra.mxu3 %v11285_v22  ;;  %1505 = vmatpush.msra.mxu1 %v11286_v54  ;;  %v11292_v22 = vld [vmem:[#allocation73_spill] sm:$0xff]  ;;  %v1180_v54 = vmul.f32 0.5, %v1179_v13 }
 0x1ef   :  { %v11296_v13 = vld [vmem:[#allocation77_spill] sm:$0xff] }
 0x1f0   :  { %1466 = vmatpush.msra.mxu3 %v11288_v4  ;;  %1506 = vmatpush.msra.mxu1 %v11289_v40  ;;  %v1012_v4 = vadd.f32 %v6496_v26, %v6563_v6  ;;  %v11294_v40 = vld [vmem:[#allocation75_spill] sm:$0xff]  ;;  %4073 = vtanh.f32 %v1180_v54  ;;  %v11300_v54 = vld [vmem:[#allocation84_spill] sm:$0xff] }
 0x1f1   :  { %v11298_v26 = vld [vmem:[#allocation79_spill] sm:$0xff] }
 0x1f2   :  { %1467 = vmatpush.msra.mxu3 %v11291_v46  ;;  %1507 = vmatpush.msra.mxu1 %v11292_v22  ;;  %v1178_v22 = vadd.f32 0.5, %v1177_v53 }
 0x1f4   :  { %v1131_v24 = vpop.f32.mrf.mxu0  ;;  %1468 = vmatpush.msra.mxu3 %v6117_v47  ;;  %1508 = vmatpush.msra.mxu1 %v11293_v57  ;;  %v1032_v47 = vadd.f32 %v6508_v50, %v1012_v4 }
 0x1f5   :  { %v1132_v15 = vadd.f32 %v6565_v9, %v1131_v24 }
 0x1f6   :  { %1469 = vmatpush.msra.mxu3 %v11294_v40  ;;  %1509 = vmatpush.msra.mxu1 %v11295_v33  ;;  %v11299_v33 = vld [vmem:[#allocation80_spill] sm:$0xff] }
 0x1f7   :  { %v1152_v46 = vadd.f32 %v1151_v7, %v1132_v15  ;;  %v4074_v7 = vpop.eup %4073  ;;  %v6617_v15 = vld [vmem:[#allocation7 + $0x840] sm:$0xff]  ;;  %v6620_v40 = vld [vmem:[#allocation7 + $0x848] sm:$0xff] }
 0x1f8   :  { %1470 = vmatpush.msra.mxu3 %v11296_v13  ;;  %1510 = vmatpush.msra.mxu1 %v11297_v3  ;;  %v1182_v50 = vmul.f32 0.5, %v4074_v7  ;;  %v6634_v13 = vld [vmem:[#allocation7 + $0x7b0] sm:$0xff]  ;;  %v6637_v3 = vld [vmem:[#allocation7 + $0x7b8] sm:$0xff] }
 0x1f9   :  { %v1184_v57 = vmul.f32 %v1178_v22, %v1152_v46  ;;  %1471 = vmatmul.f32.vlgmr.msra.gmra.mxu3 %v6392_v0  ;;  %1511 = vmatmul.f32.vlgmr.msra.gmra.mxu1 %v6392_v0  ;;  %v6625_v46 = vld [vmem:[#allocation7 + $0x7f8] sm:$0xff]  ;;  %v6628_v22 = vld [vmem:[#allocation7 + $0x800] sm:$0xff] }
 0x1fa   :  { %1535 = vmatpush.msrb.mxu3 %v11298_v26  ;;  %1611 = vmatpush.msrb.mxu1 %v6352_v35  ;;  %v1183_v53 = vadd.f32 0.5, %v1182_v50  ;;  %v6649_v26 = vld [vmem:[#allocation7 + $0x720] sm:$0xff]  ;;  %v6669_v7 = vld [vmem:[#allocation7 + $0x698] sm:$0xff]  ;;  %v6673_v50 = vld [vmem:[#allocation7 + $0x648] sm:$0xff] }
 0x1fb   :  { %v1185_v24 = vadd.f32 %v1184_v57, %v1032_v47  ;;  %v6645_v47 = vld [vmem:[#allocation7 + $0x770] sm:$0xff]  ;;  %v11307_v57 = vld [vmem:[#allocation99_spill] sm:$0xff] }
 0x1fc   :  { %1536 = vmatpush.msrb.mxu3 %v11299_v33  ;;  %1612 = vmatpush.msrb.mxu1 %v6358_v36  ;;  %v11308_v33 = vld [vmem:[#allocation102_spill] sm:$0xff] }
 0x1fd   :  { %4075 = vtanh.f32 %v1185_v24  ;;  %v6653_v24 = vld [vmem:[#allocation7 + $0x728] sm:$0xff] }
 0x1fe   :  { %1537 = vmatpush.msrb.mxu3 %v6146_v43  ;;  %1613 = vmatpush.msrb.mxu1 %v6364_v37  ;;  %v11301_v43 = vld [vmem:[#allocation87_spill] sm:$0xff] }
 0x200   :  { %1538 = vmatpush.msrb.mxu3 %v6152_v16  ;;  %1614 = vmatpush.msrb.mxu1 %v6370_v5  ;;  %v11302_v16 = vld [vmem:[#allocation88_spill] sm:$0xff]  ;;  %v6601_v5 = vld [vmem:[#allocation7 + $0x8d0] sm:$0xff] }
 0x202   :  { %1539 = vmatpush.msrb.mxu3 %v11300_v54  ;;  %1615 = vmatpush.msrb.mxu1 %v6376_v52  ;;  %v6609_v52 = vld [vmem:[#allocation7 + $0x888] sm:$0xff] }
 0x203   :  { %v4076_v35 = vpop.eup %4075  ;;  %v11310_v54 = vld [vmem:[#allocation108_spill] sm:$0xff] }
 0x204   :  { %v1187_v4 = vsub.f32 0.0, %v4076_v35  ;;  %1540 = vmatpush.msrb.mxu3 %v6164_v44  ;;  %1616 = vmatpush.msrb.mxu1 %v6386_v27  ;;  %v6604_v44 = vld [vmem:[#allocation7 + $0x8d8] sm:$0xff] }
 0x205   :  { %v11303_v27 = vld [vmem:[#allocation90_spill] sm:$0xff] }
 0x206   :  { %v1188_v36 = vmul.f32 %v1187_v4, %v1183_v53  ;;  %1541 = vmatpush.msrb.mxu3 %v11301_v43  ;;  %1617 = vmatpush.msrb.mxu1 %v6394_v10  ;;  %v6612_v10 = vld [vmem:[#allocation7 + $0x890] sm:$0xff]  ;;  %v6685_v53 = vld [vmem:[#allocation7 + $0x608] sm:$0xff] }
 0x207   :  { %v11311_v4 = vld [vmem:[#allocation110_spill] sm:$0xff]  ;;  %v11312_v43 = vld [vmem:[#allocation112_spill] sm:$0xff] }
 0x208   :  { %v6595_v37 = vadd.f32 %v4076_v35, %v1188_v36  ;;  %1542 = vmatpush.msrb.mxu3 %v11302_v16  ;;  %1618 = vmatpush.msrb.mxu1 %v6399_v62  ;;  %v11304_v62 = vld [vmem:[#allocation92_spill] sm:$0xff]  ;;  %v6689_v36 = vld [vmem:[#allocation7 + $0x5b8] sm:$0xff]  ;;  %v6697_v16 = vld [vmem:[#allocation7 + $0x570] sm:$0xff] }
 0x209   :  { %v6681_v35 = vld [vmem:[#allocation7 + $0x600] sm:$0xff] }
 0x20a   :  { %1206 = vmatmul.f32.vlgmr.msra.gmra.mxu2 %v6595_v37  ;;  %1251 = vmatmul.f32.vlgmr.msrb.gmra.mxu0 %v6595_v37 }
 0x20b   :  { %1355 = vmatpush.msra.mxu2 %v6601_v5  ;;  %1395 = vmatpush.msrb.mxu0 %v6604_v44 }
 0x20c   :  { %1543 = vmatpush.msrb.mxu3 %v11303_v27  ;;  %1619 = vmatpush.msrb.mxu1 %v6404_v55  ;;  %v11305_v55 = vld [vmem:[#allocation94_spill] sm:$0xff]  ;;  %v6705_v27 = vld [vmem:[#allocation7 + $0x528] sm:$0xff] }
 0x20d   :  { %1356 = vmatpush.msra.mxu2 %v6609_v52  ;;  %1396 = vmatpush.msrb.mxu0 %v6612_v10 }
 0x20e   :  { %1544 = vmatpush.msrb.mxu3 %v11304_v62  ;;  %1620 = vmatpush.msrb.mxu1 %v6409_v20  ;;  %v11306_v20 = vld [vmem:[#allocation96_spill] sm:$0xff] }
 0x20f   :  { %1357 = vmatpush.msra.mxu2 %v6617_v15  ;;  %1397 = vmatpush.msrb.mxu0 %v6620_v40  ;;  %v6713_v62 = vld [vmem:[#allocation7 + $0x4e0] sm:$0xff] }
 0x210   :  { %1545 = vmatpush.msrb.mxu3 %v11305_v55  ;;  %1621 = vmatpush.msrb.mxu1 %v6416_v34  ;;  %v6641_v34 = vld [vmem:[#allocation7 + $0x768] sm:$0xff]  ;;  %v6745_v55 = vld [vmem:[#allocation7 + $0x850] sm:$0xff] }
 0x211   :  { %1358 = vmatpush.msra.mxu2 %v6625_v46  ;;  %1398 = vmatpush.msrb.mxu0 %v6628_v22 }
 0x212   :  { %1546 = vmatpush.msrb.mxu3 %v11306_v20  ;;  %1291 = vmatmul.f32.vlgmr.msrb.gmra.mxu2 %v6595_v37  ;;  %v6749_v20 = vld [vmem:[#allocation7 + $0x858] sm:$0xff] }
 0x213   :  { %1331 = vmatmul.f32.vlgmr.msra.gmra.mxu0 %v6595_v37  ;;  %1359 = vmatpush.msra.mxu2 %v6634_v13 }
 0x214   :  { %1399 = vmatpush.msrb.mxu0 %v6637_v3  ;;  %1547 = vmatpush.msrb.mxu3 %v6205_v2  ;;  %v6657_v2 = vld [vmem:[#allocation7 + $0x6d8] sm:$0xff] }
 0x215   :  { %1360 = vmatpush.msra.mxu2 %v6641_v34  ;;  %1622 = vmatpush.msrb.mxu1 %v6422_v25  ;;  %v6661_v25 = vld [vmem:[#allocation7 + $0x6e0] sm:$0xff] }
 0x216   :  { %1400 = vmatpush.msrb.mxu0 %v6645_v47  ;;  %1548 = vmatpush.msrb.mxu3 %v11307_v57  ;;  %v6769_v57 = vld [vmem:[#allocation7 + $0x778] sm:$0xff] }
 0x217   :  { %1361 = vmatpush.msra.mxu2 %v6649_v26  ;;  %1623 = vmatpush.msrb.mxu1 %v6427_v49  ;;  %v6666_v49 = vld [vmem:[#allocation7 + $0x690] sm:$0xff]  ;;  %11314 = vst [vmem:[#allocation47_spill] sm:$0xff] %v6769_v57 }
 0x218   :  { %1401 = vmatpush.msrb.mxu0 %v6653_v24  ;;  %1549 = vmatpush.msrb.mxu3 %v6217_v31  ;;  %v11309_v31 = vld [vmem:[#allocation106_spill] sm:$0xff] }
 0x219   :  { %1362 = vmatpush.msra.mxu2 %v6657_v2  ;;  %1624 = vmatpush.msrb.mxu1 %v6432_v28  ;;  %v6677_v28 = vld [vmem:[#allocation7 + $0x650] sm:$0xff] }
 0x21a   :  { %1402 = vmatpush.msrb.mxu0 %v6661_v25  ;;  %1550 = vmatpush.msrb.mxu3 %v11308_v33  ;;  %v6777_v33 = vld [vmem:[#allocation7 + $0x730] sm:$0xff] }
 0x21b   :  { %1551 = vmatmul.f32.vlgmr.msrb.gmra.mxu3 %v6392_v0  ;;  %1363 = vmatpush.msra.mxu2 %v6666_v49  ;;  %11317 = vst [vmem:[#allocation49_spill] sm:$0xff] %v6777_v33 }
 0x21c   :  { %1403 = vmatpush.msrb.mxu0 %v6669_v7  ;;  %1657 = vmatpush.msra.mxu3 %v11309_v31  ;;  %v11319_v31 = vld [vmem:[#allocation117_spill] sm:$0xff] }
 0x21d   :  { %1364 = vmatpush.msra.mxu2 %v6673_v50  ;;  %1625 = vmatpush.msrb.mxu1 %v6437_v63  ;;  %v6693_v63 = vld [vmem:[#allocation7 + $0x5c0] sm:$0xff] }
 0x21e   :  { %1404 = vmatpush.msrb.mxu0 %v6677_v28  ;;  %1658 = vmatpush.msra.mxu3 %v11310_v54  ;;  %v6785_v54 = vld [vmem:[#allocation7 + $0x6e8] sm:$0xff] }
 0x21f   :  { %1365 = vmatpush.msra.mxu2 %v6681_v35  ;;  %1626 = vmatpush.msrb.mxu1 %v6442_v8  ;;  %v6701_v8 = vld [vmem:[#allocation7 + $0x578] sm:$0xff]  ;;  %11320 = vst [vmem:[#allocation51_spill] sm:$0xff] %v6785_v54 }
 0x220   :  { %1405 = vmatpush.msrb.mxu0 %v6685_v53  ;;  %1659 = vmatpush.msra.mxu3 %v11311_v4  ;;  %v11322_v4 = vld [vmem:[#allocation118_spill] sm:$0xff] }
 0x221   :  { %1366 = vmatpush.msra.mxu2 %v6689_v36  ;;  %1697 = vmatpush.msra.mxu1 %v6452_v29  ;;  %v6709_v29 = vld [vmem:[#allocation7 + $0x530] sm:$0xff] }
 0x222   :  { %1406 = vmatpush.msrb.mxu0 %v6693_v63  ;;  %1660 = vmatpush.msra.mxu3 %v11312_v43  ;;  %v6793_v43 = vld [vmem:[#allocation7 + $0x6a0] sm:$0xff] }
 0x223   :  { %1367 = vmatpush.msra.mxu2 %v6697_v16  ;;  %1698 = vmatpush.msra.mxu1 %v6457_v38  ;;  %v6717_v38 = vld [vmem:[#allocation7 + $0x4e8] sm:$0xff]  ;;  %11323 = vst [vmem:[#allocation53_spill] sm:$0xff] %v6793_v43 }
 0x224   :  { %1407 = vmatpush.msrb.mxu0 %v6701_v8  ;;  %1661 = vmatpush.msra.mxu3 %v6261_v58  ;;  %v6721_v58 = vld [vmem:[#allocation7 + $0x498] sm:$0xff] }
 0x225   :  { %1368 = vmatpush.msra.mxu2 %v6705_v27  ;;  %1699 = vmatpush.msra.mxu1 %v6464_v17  ;;  %v6725_v17 = vld [vmem:[#allocation7 + $0x4a0] sm:$0xff] }
 0x226   :  { %1408 = vmatpush.msrb.mxu0 %v6709_v29  ;;  %1662 = vmatpush.msra.mxu3 %v6267_v39  ;;  %v6730_v39 = vld [vmem:[#allocation7 + $0x8e0] sm:$0xff] }
 0x227   :  { %1369 = vmatpush.msra.mxu2 %v6713_v62  ;;  %1700 = vmatpush.msra.mxu1 %v6469_v11  ;;  %v6733_v11 = vld [vmem:[#allocation7 + $0x8e8] sm:$0xff] }
 0x228   :  { %1409 = vmatpush.msrb.mxu0 %v6717_v38  ;;  %1663 = vmatpush.msra.mxu3 %v6271_v41  ;;  %v6737_v41 = vld [vmem:[#allocation7 + $0x898] sm:$0xff] }
 0x229   :  { %1370 = vmatpush.msra.mxu2 %v6721_v58  ;;  %1701 = vmatpush.msra.mxu1 %v6479_v21  ;;  %v6741_v21 = vld [vmem:[#allocation7 + $0x8a0] sm:$0xff] }
 0x22a   :  { %1410 = vmatpush.msrb.mxu0 %v6725_v17  ;;  %1371 = vmatmul.f32.vlgmr.msra.gmra.mxu2 %v6595_v37 }
 0x22b   :  { %1411 = vmatmul.f32.vlgmr.msrb.gmra.mxu0 %v6595_v37  ;;  %1435 = vmatpush.msrb.mxu2 %v6730_v39 }
 0x22c   :  { %1475 = vmatpush.msra.mxu0 %v6733_v11  ;;  %1664 = vmatpush.msra.mxu3 %v6275_v12  ;;  %v6753_v12 = vld [vmem:[#allocation7 + $0x808] sm:$0xff] }
 0x22d   :  { %1436 = vmatpush.msrb.mxu2 %v6737_v41  ;;  %1702 = vmatpush.msra.mxu1 %v6492_v1  ;;  %v6757_v1 = vld [vmem:[#allocation7 + $0x810] sm:$0xff] }
 0x22e   :  { %1476 = vmatpush.msra.mxu0 %v6741_v21  ;;  %1665 = vmatpush.msra.mxu3 %v6279_v51  ;;  %v6761_v51 = vld [vmem:[#allocation7 + $0x7c0] sm:$0xff] }
 0x22f   :  { %1437 = vmatpush.msrb.mxu2 %v6745_v55  ;;  %1703 = vmatpush.msra.mxu1 %v6500_v23  ;;  %v6765_v23 = vld [vmem:[#allocation7 + $0x7c8] sm:$0xff] }
 0x230   :  { %1477 = vmatpush.msra.mxu0 %v6749_v20  ;;  %1666 = vmatpush.msra.mxu3 %v6283_v45  ;;  %v11313_v45 = vld [vmem:[#allocation115_spill] sm:$0xff] }
 0x231   :  { %1438 = vmatpush.msrb.mxu2 %v6753_v12  ;;  %1704 = vmatpush.msra.mxu1 %v6505_v32  ;;  %v6773_v32 = vld [vmem:[#allocation7 + $0x780] sm:$0xff] }
 0x232   :  { %1478 = vmatpush.msra.mxu0 %v6757_v1  ;;  %1667 = vmatpush.msra.mxu3 %v6287_v48  ;;  %11315 = vst [vmem:[#allocation48_spill] sm:$0xff] %v6773_v32  ;;  %v11316_v48 = vld [vmem:[#allocation116_spill] sm:$0xff] }
 0x233   :  { %1439 = vmatpush.msrb.mxu2 %v6761_v51  ;;  %1705 = vmatpush.msra.mxu1 %v6512_v42  ;;  %v6781_v42 = vld [vmem:[#allocation7 + $0x738] sm:$0xff] }
 0x234   :  { %1479 = vmatpush.msra.mxu0 %v6765_v23  ;;  %1668 = vmatpush.msra.mxu3 %v11313_v45  ;;  %11318 = vst [vmem:[#allocation50_spill] sm:$0xff] %v6781_v42  ;;  %v11325_v45 = vld [vmem:[#allocation119_spill] sm:$0xff] }
 0x235   :  { %1440 = vmatpush.msrb.mxu2 %v6769_v57  ;;  %1706 = vmatpush.msra.mxu1 %v6520_v59  ;;  %v6789_v59 = vld [vmem:[#allocation7 + $0x6f0] sm:$0xff]  ;;  %v7065_v57 = vld [vmem:[#allocation7 + $0x2a0] sm:$0xff] }
 0x236   :  { %1480 = vmatpush.msra.mxu0 %v6773_v32  ;;  %1669 = vmatpush.msra.mxu3 %v11316_v48  ;;  %11321 = vst [vmem:[#allocation52_spill] sm:$0xff] %v6789_v59  ;;  %v6801_v48 = vld [vmem:[#allocation7 + $0x658] sm:$0xff] }
 0x237   :  { %1441 = vmatpush.msrb.mxu2 %v6777_v33  ;;  %1707 = vmatpush.msra.mxu1 %v6528_v60  ;;  %v6797_v60 = vld [vmem:[#allocation7 + $0x6a8] sm:$0xff]  ;;  %11326 = vst [vmem:[#allocation55_spill] sm:$0xff] %v6801_v48  ;;  %v7062_v32 = vld [vmem:[#allocation7 + $0x298] sm:$0xff] }
 0x238   :  { %1481 = vmatpush.msra.mxu0 %v6781_v42  ;;  %1670 = vmatpush.msra.mxu3 %v11319_v31  ;;  %11324 = vst [vmem:[#allocation54_spill] sm:$0xff] %v6797_v60  ;;  %v6809_v31 = vld [vmem:[#allocation7 + $0x610] sm:$0xff] }
 0x239   :  { %1442 = vmatpush.msrb.mxu2 %v6785_v54  ;;  %1708 = vmatpush.msra.mxu1 %v6534_v14  ;;  %v6805_v14 = vld [vmem:[#allocation7 + $0x660] sm:$0xff]  ;;  %11328 = vst [vmem:[#allocation57_spill] sm:$0xff] %v6809_v31  ;;  %v11421_v54 = vld [vmem:[#allocation114_spill] sm:$0xff]  ;;  %v11438_v42 = vld [vmem:[#allocation29_spill] sm:$0xff] }
 0x23a   :  { %1482 = vmatpush.msra.mxu0 %v6789_v59  ;;  %1671 = vmatpush.msra.mxu3 %v11322_v4  ;;  %11327 = vst [vmem:[#allocation56_spill] sm:$0xff] %v6805_v14  ;;  %v6817_v4 = vld [vmem:[#allocation7 + $0x5c8] sm:$0xff] }
 0x23b   :  { %1443 = vmatpush.msrb.mxu2 %v6793_v43  ;;  %1709 = vmatpush.msra.mxu1 %v6541_v19  ;;  %v6813_v19 = vld [vmem:[#allocation7 + $0x618] sm:$0xff]  ;;  %11330 = vst [vmem:[#allocation59_spill] sm:$0xff] %v6817_v4 }
 0x23c   :  { %1483 = vmatpush.msra.mxu0 %v6797_v60  ;;  %1672 = vmatpush.msra.mxu3 %v11325_v45  ;;  %11329 = vst [vmem:[#allocation58_spill] sm:$0xff] %v6813_v19  ;;  %v6821_v45 = vld [vmem:[#allocation7 + $0x5d0] sm:$0xff]  ;;  %v7009_v60 = vld [vmem:[#allocation7 + $0x48] sm:$0xff] }
 0x23d   :  { %1444 = vmatpush.msrb.mxu2 %v6801_v48  ;;  %1710 = vmatpush.msra.mxu1 %v6546_v56  ;;  %11332 = vst [vmem:[#allocation60_spill] sm:$0xff] %v6821_v45  ;;  %v11333_v56 = vld [vmem:[#allocation44_spill] sm:$0xff] }
 0x23e   :  { %1737 = vmatpush.msrb.mxu3 %v6314_v30  ;;  %1484 = vmatpush.msra.mxu0 %v6805_v14  ;;  %v11331_v30 = vld [vmem:[#allocation120_spill] sm:$0xff] }
 0x23f   :  { %1445 = vmatpush.msrb.mxu2 %v6809_v31  ;;  %1711 = vmatpush.msra.mxu1 %v6552_v18  ;;  %v6825_v31 = vld [vmem:[#allocation7 + $0x580] sm:$0xff]  ;;  %v6832_v18 = vld [vmem:[#allocation7 + $0x538] sm:$0xff] }
 0x240   :  { %1738 = vmatpush.msrb.mxu3 %v6318_v61  ;;  %1485 = vmatpush.msra.mxu0 %v6813_v19  ;;  %11334 = vst [vmem:[#allocation61_spill] sm:$0xff] %v6825_v31  ;;  %v11335_v61 = vld [vmem:[#allocation121_spill] sm:$0xff] }
 0x241   :  { %1446 = vmatpush.msrb.mxu2 %v6817_v4  ;;  %1712 = vmatpush.msra.mxu1 %v11333_v56  ;;  %v6829_v19 = vld [vmem:[#allocation7 + $0x588] sm:$0xff]  ;;  %11337 = vst [vmem:[#allocation63_spill] sm:$0xff] %v6832_v18  ;;  %v6836_v4 = vld [vmem:[#allocation7 + $0x540] sm:$0xff]  ;;  %v6839_v56 = vld [vmem:[#allocation7 + $0x4f0] sm:$0xff] }
 0x242   :  { %1739 = vmatpush.msrb.mxu3 %v11331_v30  ;;  %1486 = vmatpush.msra.mxu0 %v6821_v45  ;;  %11336 = vst [vmem:[#allocation62_spill] sm:$0xff] %v6829_v19  ;;  %v11338_v30 = vld [vmem:[#allocation122_spill] sm:$0xff]  ;;  %v6942_v45 = vld [vmem:[#allocation7 + $0x500] sm:$0xff] }
 0x243   :  { %1447 = vmatpush.msrb.mxu2 %v6825_v31  ;;  %11339 = vst [vmem:[#allocation64_spill] sm:$0xff] %v6836_v4  ;;  %v11341_v31 = vld [vmem:[#allocation123_spill] sm:$0xff] }
 0x244   :  { %1740 = vmatpush.msrb.mxu3 %v11335_v61  ;;  %1487 = vmatpush.msra.mxu0 %v6829_v19  ;;  %11340 = vst [vmem:[#allocation65_spill] sm:$0xff] %v6839_v56  ;;  %v6843_v61 = vld [vmem:[#allocation7 + $0x4f8] sm:$0xff]  ;;  %v6846_v19 = vld [vmem:[#allocation7 + $0x4a8] sm:$0xff] }
 0x245   :  { %1448 = vmatpush.msrb.mxu2 %v6832_v18  ;;  %11342 = vst [vmem:[#allocation66_spill] sm:$0xff] %v6843_v61  ;;  %v11344_v18 = vld [vmem:[#allocation124_spill] sm:$0xff] }
 0x246   :  { %1741 = vmatpush.msrb.mxu3 %v11338_v30  ;;  %1488 = vmatpush.msra.mxu0 %v6836_v4  ;;  %11343 = vst [vmem:[#allocation67_spill] sm:$0xff] %v6846_v19  ;;  %v6850_v30 = vld [vmem:[#allocation7 + $0x4b0] sm:$0xff]  ;;  %v6869_v4 = vld [vmem:[#allocation7 + $0x860] sm:$0xff] }
 0x247   :  { %1449 = vmatpush.msrb.mxu2 %v6839_v56  ;;  %11345 = vst [vmem:[#allocation68_spill] sm:$0xff] %v6850_v30  ;;  %v6855_v56 = vld [vmem:[#allocation7 + $0x8f0] sm:$0xff] }
 0x248   :  { %1742 = vmatpush.msrb.mxu3 %v11341_v31  ;;  %1489 = vmatpush.msra.mxu0 %v6843_v61  ;;  %11346 = vst [vmem:[#allocation69_spill] sm:$0xff] %v6855_v56  ;;  %v6858_v31 = vld [vmem:[#allocation7 + $0x8f8] sm:$0xff]  ;;  %v11348_v61 = vld [vmem:[#allocation125_spill] sm:$0xff] }
 0x249   :  { %1450 = vmatpush.msrb.mxu2 %v6846_v19  ;;  %11347 = vst [vmem:[#allocation70_spill] sm:$0xff] %v6858_v31  ;;  %v6862_v19 = vld [vmem:[#allocation7 + $0x8a8] sm:$0xff] }
 0x24a   :  { %1743 = vmatpush.msrb.mxu3 %v11344_v18  ;;  %1490 = vmatpush.msra.mxu0 %v6850_v30  ;;  %11349 = vst [vmem:[#allocation71_spill] sm:$0xff] %v6862_v19  ;;  %v6865_v18 = vld [vmem:[#allocation7 + $0x8b0] sm:$0xff] }
 0x24b   :  { %1451 = vmatmul.f32.vlgmr.msrb.gmra.mxu2 %v6595_v37  ;;  %1491 = vmatmul.f32.vlgmr.msra.gmra.mxu0 %v6595_v37  ;;  %11350 = vst [vmem:[#allocation72_spill] sm:$0xff] %v6865_v18  ;;  %v11351_v30 = vld [vmem:[#allocation126_spill] sm:$0xff] }
 0x24c   :  { %1515 = vmatpush.msra.mxu2 %v6855_v56  ;;  %1555 = vmatpush.msrb.mxu0 %v6858_v31  ;;  %11352 = vst [vmem:[#allocation73_spill] sm:$0xff] %v6869_v4  ;;  %v6872_v56 = vld [vmem:[#allocation7 + $0x868] sm:$0xff]  ;;  %v11354_v31 = vld [vmem:[#allocation127_spill] sm:$0xff] }
 0x24d   :  { %1744 = vmatpush.msrb.mxu3 %v11348_v61  ;;  %11353 = vst [vmem:[#allocation74_spill] sm:$0xff] %v6872_v56  ;;  %v6876_v61 = vld [vmem:[#allocation7 + $0x818] sm:$0xff] }
 0x24e   :  { %1516 = vmatpush.msra.mxu2 %v6862_v19  ;;  %1556 = vmatpush.msrb.mxu0 %v6865_v18  ;;  %11355 = vst [vmem:[#allocation75_spill] sm:$0xff] %v6876_v61  ;;  %v6879_v19 = vld [vmem:[#allocation7 + $0x820] sm:$0xff] }
 0x24f   :  { %1745 = vmatpush.msrb.mxu3 %v11351_v30  ;;  %11356 = vst [vmem:[#allocation76_spill] sm:$0xff] %v6879_v19  ;;  %v11357_v18 = vld [vmem:[#allocation128_spill] sm:$0xff]  ;;  %v6883_v30 = vld [vmem:[#allocation7 + $0x7d0] sm:$0xff] }
 0x250   :  { %1517 = vmatpush.msra.mxu2 %v6869_v4  ;;  %1557 = vmatpush.msrb.mxu0 %v6872_v56  ;;  %11358 = vst [vmem:[#allocation77_spill] sm:$0xff] %v6883_v30  ;;  %v6886_v4 = vld [vmem:[#allocation7 + $0x7d8] sm:$0xff]  ;;  %v11360_v56 = vld [vmem:[#allocation129_spill] sm:$0xff] }
 0x251   :  { %1746 = vmatpush.msrb.mxu3 %v11354_v31  ;;  %11359 = vst [vmem:[#allocation78_spill] sm:$0xff] %v6886_v4  ;;  %v6890_v31 = vld [vmem:[#allocation7 + $0x788] sm:$0xff] }
 0x252   :  { %1518 = vmatpush.msra.mxu2 %v6876_v61  ;;  %1558 = vmatpush.msrb.mxu0 %v6879_v19  ;;  %11361 = vst [vmem:[#allocation79_spill] sm:$0xff] %v6890_v31  ;;  %v6893_v61 = vld [vmem:[#allocation7 + $0x790] sm:$0xff] }
 0x253   :  { %1747 = vmatpush.msrb.mxu3 %v11357_v18  ;;  %11362 = vst [vmem:[#allocation80_spill] sm:$0xff] %v6893_v61  ;;  %v11363_v19 = vld [vmem:[#allocation130_spill] sm:$0xff]  ;;  %v6897_v18 = vld [vmem:[#allocation7 + $0x740] sm:$0xff] }
 0x254   :  { %1519 = vmatpush.msra.mxu2 %v6883_v30  ;;  %1559 = vmatpush.msrb.mxu0 %v6886_v4  ;;  %11364 = vst [vmem:[#allocation84_spill] sm:$0xff] %v6897_v18  ;;  %v6900_v30 = vld [vmem:[#allocation7 + $0x748] sm:$0xff]  ;;  %v11366_v4 = vld [vmem:[#allocation131_spill] sm:$0xff] }
 0x255   :  { %1748 = vmatpush.msrb.mxu3 %v11360_v56  ;;  %11365 = vst [vmem:[#allocation87_spill] sm:$0xff] %v6900_v30  ;;  %v6904_v56 = vld [vmem:[#allocation7 + $0x6f8] sm:$0xff] }
 0x256   :  { %1520 = vmatpush.msra.mxu2 %v6890_v31  ;;  %1560 = vmatpush.msrb.mxu0 %v6893_v61  ;;  %11367 = vst [vmem:[#allocation88_spill] sm:$0xff] %v6904_v56  ;;  %v6907_v31 = vld [vmem:[#allocation7 + $0x700] sm:$0xff] }
 0x257   :  { %1749 = vmatpush.msrb.mxu3 %v11363_v19  ;;  %11368 = vst [vmem:[#allocation90_spill] sm:$0xff] %v6907_v31  ;;  %v11369_v61 = vld [vmem:[#allocation132_spill] sm:$0xff]  ;;  %v6911_v19 = vld [vmem:[#allocation7 + $0x6b0] sm:$0xff] }
 0x258   :  { %1521 = vmatpush.msra.mxu2 %v6897_v18  ;;  %1561 = vmatpush.msrb.mxu0 %v6900_v30  ;;  %11370 = vst [vmem:[#allocation92_spill] sm:$0xff] %v6911_v19  ;;  %v6914_v18 = vld [vmem:[#allocation7 + $0x6b8] sm:$0xff]  ;;  %v11372_v30 = vld [vmem:[#allocation133_spill] sm:$0xff] }
 0x259   :  { %1750 = vmatpush.msrb.mxu3 %v11366_v4  ;;  %11371 = vst [vmem:[#allocation94_spill] sm:$0xff] %v6914_v18  ;;  %v6918_v4 = vld [vmem:[#allocation7 + $0x668] sm:$0xff] }
 0x25a   :  { %1522 = vmatpush.msra.mxu2 %v6904_v56  ;;  %1562 = vmatpush.msrb.mxu0 %v6907_v31  ;;  %11373 = vst [vmem:[#allocation96_spill] sm:$0xff] %v6918_v4  ;;  %v6921_v56 = vld [vmem:[#allocation7 + $0x670] sm:$0xff]  ;;  %v6924_v31 = vld [vmem:[#allocation7 + $0x620] sm:$0xff] }
 0x25b   :  { %1751 = vmatpush.msrb.mxu3 %v11369_v61  ;;  %11374 = vst [vmem:[#allocation99_spill] sm:$0xff] %v6921_v56  ;;  %v6927_v61 = vld [vmem:[#allocation7 + $0x628] sm:$0xff] }
 0x25c   :  { %1523 = vmatpush.msra.mxu2 %v6911_v19  ;;  %1563 = vmatpush.msrb.mxu0 %v6914_v18  ;;  %11375 = vst [vmem:[#allocation102_spill] sm:$0xff] %v6924_v31  ;;  %v6930_v19 = vld [vmem:[#allocation7 + $0x5d8] sm:$0xff]  ;;  %v6934_v18 = vld [vmem:[#allocation7 + $0x590] sm:$0xff] }
 0x25d   :  { %1752 = vmatpush.msrb.mxu3 %v11372_v30  ;;  %11376 = vst [vmem:[#allocation106_spill] sm:$0xff] %v6927_v61  ;;  %v11378_v30 = vld [vmem:[#allocation81_spill] sm:$0xff] }
 0x25e   :  { %1524 = vmatpush.msra.mxu2 %v6918_v4  ;;  %1564 = vmatpush.msrb.mxu0 %v6921_v56  ;;  %11377 = vst [vmem:[#allocation108_spill] sm:$0xff] %v6930_v19  ;;  %v11380_v4 = vld [vmem:[#allocation82_spill] sm:$0xff]  ;;  %v6938_v56 = vld [vmem:[#allocation7 + $0x548] sm:$0xff] }
 0x25f   :  { %11379 = vst [vmem:[#allocation110_spill] sm:$0xff] %v6934_v18 }
 0x260   :  { %1525 = vmatpush.msra.mxu2 %v6924_v31  ;;  %1565 = vmatpush.msrb.mxu0 %v6927_v61  ;;  %11381 = vst [vmem:[#allocation112_spill] sm:$0xff] %v6938_v56  ;;  %v11382_v31 = vld [vmem:[#allocation83_spill] sm:$0xff]  ;;  %v11384_v61 = vld [vmem:[#allocation85_spill] sm:$0xff] }
 0x261   :  { %11383 = vst [vmem:[#allocation115_spill] sm:$0xff] %v6942_v45 }
 0x262   :  { %1526 = vmatpush.msra.mxu2 %v6930_v19  ;;  %1566 = vmatpush.msrb.mxu0 %v11378_v30  ;;  %v6946_v19 = vld [vmem:[#allocation7 + $0x4b8] sm:$0xff]  ;;  %11416 = vst [vmem:[#allocation130_spill] sm:$0xff] %v7009_v60 }
 0x263   :  { %11385 = vst [vmem:[#allocation116_spill] sm:$0xff] %v6946_v19  ;;  %v11386_v30 = vld [vmem:[#allocation86_spill] sm:$0xff] }
 0x264   :  { %1527 = vmatpush.msra.mxu2 %v6934_v18  ;;  %1567 = vmatpush.msrb.mxu0 %v11380_v4  ;;  %v6952_v4 = vld [vmem:[#allocation7 + $0x438] sm:$0xff] }
 0x265   :  { %11387 = vst [vmem:[#allocation117_spill] sm:$0xff] %v6952_v4  ;;  %v11394_v18 = vld [vmem:[#allocation95_spill] sm:$0xff] }
 0x266   :  { %1528 = vmatpush.msra.mxu2 %v6938_v56  ;;  %1568 = vmatpush.msrb.mxu0 %v11382_v31  ;;  %v11388_v31 = vld [vmem:[#allocation89_spill] sm:$0xff] }
 0x267   :  { %v6956_v56 = vld [vmem:[#allocation7 + $0x3f0] sm:$0xff] }
 0x268   :  { %1529 = vmatpush.msra.mxu2 %v6942_v45  ;;  %1569 = vmatpush.msrb.mxu0 %v11384_v61  ;;  %11389 = vst [vmem:[#allocation118_spill] sm:$0xff] %v6956_v56  ;;  %v11390_v61 = vld [vmem:[#allocation91_spill] sm:$0xff]  ;;  %v6960_v45 = vld [vmem:[#allocation7 + $0x3a8] sm:$0xff] }
 0x269   :  { %11391 = vst [vmem:[#allocation119_spill] sm:$0xff] %v6960_v45 }
 0x26a   :  { %1530 = vmatpush.msra.mxu2 %v6946_v19  ;;  %1570 = vmatpush.msrb.mxu0 %v11386_v30  ;;  %v11392_v30 = vld [vmem:[#allocation93_spill] sm:$0xff]  ;;  %v6964_v19 = vld [vmem:[#allocation7 + $0x360] sm:$0xff] }
 0x26b   :  { %1531 = vmatmul.f32.vlgmr.msra.gmra.mxu2 %v6595_v37  ;;  %1571 = vmatmul.f32.vlgmr.msrb.gmra.mxu0 %v6595_v37  ;;  %11393 = vst [vmem:[#allocation120_spill] sm:$0xff] %v6964_v19 }
 0x26c   :  { %1637 = vmatpush.msrb.mxu2 %v6952_v4  ;;  %1677 = vmatpush.msra.mxu0 %v11388_v31  ;;  %v6968_v4 = vld [vmem:[#allocation7 + $0x318] sm:$0xff]  ;;  %v11396_v31 = vld [vmem:[#allocation97_spill] sm:$0xff] }
 0x26d   :  { %11395 = vst [vmem:[#allocation44_spill] sm:$0xff] %v6968_v4 }
 0x26e   :  { %1638 = vmatpush.msrb.mxu2 %v6956_v56  ;;  %1678 = vmatpush.msra.mxu0 %v11390_v61  ;;  %v6972_v56 = vld [vmem:[#allocation7 + $0x2d0] sm:$0xff] }
 0x26f   :  { %11397 = vst [vmem:[#allocation121_spill] sm:$0xff] %v6972_v56  ;;  %v11398_v61 = vld [vmem:[#allocation98_spill] sm:$0xff] }
 0x270   :  { %1639 = vmatpush.msrb.mxu2 %v6960_v45  ;;  %1679 = vmatpush.msra.mxu0 %v11392_v30  ;;  %v6976_v45 = vld [vmem:[#allocation7 + $0x288] sm:$0xff] }
 0x271   :  { %11399 = vst [vmem:[#allocation122_spill] sm:$0xff] %v6976_v45  ;;  %v11400_v30 = vld [vmem:[#allocation100_spill] sm:$0xff] }
 0x272   :  { %1640 = vmatpush.msrb.mxu2 %v6964_v19  ;;  %1680 = vmatpush.msra.mxu0 %v11394_v18  ;;  %v6980_v19 = vld [vmem:[#allocation7 + $0x240] sm:$0xff]  ;;  %v11402_v18 = vld [vmem:[#allocation101_spill] sm:$0xff] }
 0x273   :  { %11401 = vst [vmem:[#allocation123_spill] sm:$0xff] %v6980_v19 }
 0x274   :  { %1641 = vmatpush.msrb.mxu2 %v6968_v4  ;;  %1681 = vmatpush.msra.mxu0 %v11396_v31  ;;  %v6984_v4 = vld [vmem:[#allocation7 + $0x1f8] sm:$0xff] }
 0x275   :  { %11403 = vst [vmem:[#allocation124_spill] sm:$0xff] %v6984_v4  ;;  %v11404_v31 = vld [vmem:[#allocation103_spill] sm:$0xff] }
 0x276   :  { %1642 = vmatpush.msrb.mxu2 %v6972_v56  ;;  %1682 = vmatpush.msra.mxu0 %v11398_v61  ;;  %v6988_v56 = vld [vmem:[#allocation7 + $0x1b0] sm:$0xff]  ;;  %v11406_v61 = vld [vmem:[#allocation104_spill] sm:$0xff] }
 0x277   :  { %11405 = vst [vmem:[#allocation125_spill] sm:$0xff] %v6988_v56 }
 0x278   :  { %1643 = vmatpush.msrb.mxu2 %v6976_v45  ;;  %1683 = vmatpush.msra.mxu0 %v11400_v30  ;;  %v6992_v45 = vld [vmem:[#allocation7 + $0x168] sm:$0xff] }
 0x279   :  { %11407 = vst [vmem:[#allocation126_spill] sm:$0xff] %v6992_v45  ;;  %v11408_v30 = vld [vmem:[#allocation105_spill] sm:$0xff] }
 0x27a   :  { %1644 = vmatpush.msrb.mxu2 %v6980_v19  ;;  %1684 = vmatpush.msra.mxu0 %v11402_v18  ;;  %v6996_v19 = vld [vmem:[#allocation7 + $0x120] sm:$0xff] }
 0x27b   :  { %11409 = vst [vmem:[#allocation127_spill] sm:$0xff] %v6996_v19  ;;  %v11410_v18 = vld [vmem:[#allocation107_spill] sm:$0xff] }
 0x27c   :  { %1645 = vmatpush.msrb.mxu2 %v6984_v4  ;;  %1685 = vmatpush.msra.mxu0 %v11404_v31  ;;  %v1232_v4 = vpop.f32.mrf.mxu3  ;;  %v7000_v31 = vld [vmem:[#allocation7 + $0xd8] sm:$0xff] }
 0x27d   :  { %11411 = vst [vmem:[#allocation128_spill] sm:$0xff] %v7000_v31 }
 0x27e   :  { %1646 = vmatpush.msrb.mxu2 %v6988_v56  ;;  %1686 = vmatpush.msra.mxu0 %v11406_v61  ;;  %v11412_v56 = vld [vmem:[#allocation109_spill] sm:$0xff] }
 0x27f   :  { %v7004_v61 = vld [vmem:[#allocation7 + $0x90] sm:$0xff] }
 0x280   :  { %1647 = vmatpush.msrb.mxu2 %v6992_v45  ;;  %1687 = vmatpush.msra.mxu0 %v11408_v30  ;;  %11413 = vst [vmem:[#allocation129_spill] sm:$0xff] %v7004_v61  ;;  %v11414_v45 = vld [vmem:[#allocation35_spill] sm:$0xff] }
 0x281   :  { %v1233_v14 = vadd.f32 %v1232_v4, %v11414_v45  ;;  %v11415_v30 = vld [vmem:[#allocation111_spill] sm:$0xff]  ;;  %v7019_v4 = vld [vmem:[#allocation7 + $0x448] sm:$0xff]  ;;  %v7024_v45 = vld [vmem:[#allocation7 + $0x450] sm:$0xff] }
 0x282   :  { %1648 = vmatpush.msrb.mxu2 %v6996_v19  ;;  %1688 = vmatpush.msra.mxu0 %v11410_v18  ;;  %v11417_v18 = vld [vmem:[#allocation21_spill] sm:$0xff]  ;;  %11422 = vst [vmem:[#allocation132_spill] sm:$0xff] %v7019_v4 }
 0x283   :  { %v11418_v19 = vld [vmem:[#allocation17_spill] sm:$0xff]  ;;  %11424 = vst [vmem:[#allocation81_spill] sm:$0xff] %v7024_v45 }
 0x284   :  { %1649 = vmatpush.msrb.mxu2 %v7000_v31  ;;  %1689 = vmatpush.msra.mxu0 %v11412_v56  ;;  %v202_v43 = vadd.f32 %v11418_v19, %v11417_v18  ;;  %v11419_v31 = vld [vmem:[#allocation113_spill] sm:$0xff]  ;;  %v7015_v56 = vld [vmem:[#allocation7] sm:$0xff] }
 0x285   :  { %11420 = vst [vmem:[#allocation131_spill] sm:$0xff] %v7015_v56  ;;  %v7040_v18 = vld [vmem:[#allocation7 + $0x370] sm:$0xff] }
 0x286   :  { %1650 = vmatpush.msrb.mxu2 %v7004_v61  ;;  %1690 = vmatpush.msra.mxu0 %v11415_v30  ;;  %v7022_v30 = vld [vmem:[#allocation11] ss:$0 sm:$0xff]  ;;  %11429 = vst [vmem:[#allocation89_spill] sm:$0xff] %v7040_v18 }
 0x287   :  { %v1252_v48 = vpop.f32.mrf.mxu0  ;;  %11423 = vst [vmem:[#allocation133_spill] sm:$0xff] %v7022_v30 }
 0x288   :  { %1651 = vmatpush.msrb.mxu2 %v7009_v60  ;;  %v1253_v59 = vadd.f32 %v1252_v48, %v1233_v14  ;;  %1691 = vmatpush.msra.mxu0 %v11419_v31  ;;  %v7027_v14 = vld [vmem:[#allocation7 + $0x400] sm:$0xff]  ;;  %v7030_v31 = vld [vmem:[#allocation7 + $0x408] sm:$0xff] }
 0x289   :  { %11425 = vst [vmem:[#allocation82_spill] sm:$0xff] %v7027_v14  ;;  %v7057_v60 = vld [vmem:[#allocation7 + $0x2e8] sm:$0xff] }
 0x28a   :  { %1652 = vmatpush.msrb.mxu2 %v7015_v56  ;;  %v1579_v61 = vadd.f32 %v1253_v59, %v202_v43  ;;  %1692 = vmatpush.msra.mxu0 %v11421_v54  ;;  %11426 = vst [vmem:[#allocation83_spill] sm:$0xff] %v7030_v31  ;;  %v7034_v59 = vld [vmem:[#allocation7 + $0x3b8] sm:$0xff]  ;;  %v7037_v43 = vld [vmem:[#allocation7 + $0x3c0] sm:$0xff] }
 0x28b   :  { %11427 = vst [vmem:[#allocation85_spill] sm:$0xff] %v7034_v59  ;;  %v11435_v56 = vld [vmem:[#allocation26_spill] sm:$0xff] }
 0x28c   :  { %1717 = vmatpush.msra.mxu2 %v7019_v4  ;;  %1757 = vmatpush.msrb.mxu0 %v7024_v45  ;;  %v1580_v48 = vmul.f32 0.5, %v1579_v61  ;;  %11428 = vst [vmem:[#allocation86_spill] sm:$0xff] %v7037_v43  ;;  %v7043_v45 = vld [vmem:[#allocation7 + $0x378] sm:$0xff] }
 0x28d   :  { %v1207_v19 = vpop.f32.mrf.mxu2  ;;  %11430 = vst [vmem:[#allocation91_spill] sm:$0xff] %v7043_v45 }
 0x28e   :  { %1718 = vmatpush.msra.mxu2 %v7027_v14  ;;  %1758 = vmatpush.msrb.mxu0 %v7030_v31  ;;  %4077 = vtanh.f32 %v1580_v48  ;;  %v1208_v54 = vadd.f32 %v7022_v30, %v1207_v19  ;;  %v1272_v14 = vpop.f32.mrf.mxu1  ;;  %v1312_v48 = vpop.f32.mrf.mxu3  ;;  %v7046_v19 = vld [vmem:[#allocation7 + $0x328] sm:$0xff]  ;;  %11436 = vst [vmem:[#allocation98_spill] sm:$0xff] %v7057_v60 }
 0x28f   :  { %11431 = vst [vmem:[#allocation93_spill] sm:$0xff] %v7046_v19 }
 0x290   :  { %1719 = vmatpush.msra.mxu2 %v7034_v59  ;;  %1759 = vmatpush.msrb.mxu0 %v7037_v43  ;;  %v1210_v61 = vmul.f32 0.5, %v1208_v54  ;;  %v7049_v59 = vld [vmem:[#allocation7 + $0x330] sm:$0xff]  ;;  %v11433_v43 = vld [vmem:[#allocation24_spill] sm:$0xff]  ;;  %v1332_v4 = vpop.f32.mrf.mxu0 }
 0x291   :  { %11432 = vst [vmem:[#allocation95_spill] sm:$0xff] %v7049_v59  ;;  %v1273_v31 = vadd.f32 %v1272_v14, %v11433_v43 }
 0x292   :  { %1720 = vmatpush.msra.mxu2 %v7040_v18  ;;  %1760 = vmatpush.msrb.mxu0 %v7043_v45  ;;  %4079 = vtanh.f32 %v1210_v61  ;;  %v7053_v18 = vld [vmem:[#allocation7 + $0x2e0] sm:$0xff]  ;;  %v1313_v45 = vadd.f32 %v1312_v48, %v11435_v56  ;;  %v7068_v56 = vld [vmem:[#allocation7 + $0x250] sm:$0xff] }
 0x293   :  { %11434 = vst [vmem:[#allocation97_spill] sm:$0xff] %v7053_v18 }
 0x294   :  { %1721 = vmatpush.msra.mxu2 %v7046_v19  ;;  %1761 = vmatpush.msrb.mxu0 %v7049_v59  ;;  %v4078_v54 = vpop.eup %4077  ;;  %v11437_v19 = vld [vmem:[#allocation45_spill] sm:$0xff]  ;;  %v1333_v14 = vadd.f32 %v1332_v4, %v1313_v45  ;;  %11439 = vst [vmem:[#allocation100_spill] sm:$0xff] %v7068_v56 }
 0x295   :  { %v1582_v30 = vmul.f32 0.5, %v4078_v54  ;;  %v1292_v61 = vpop.f32.mrf.mxu2  ;;  %v243_v33 = vadd.f32 %v11438_v42, %v11437_v19  ;;  %v7073_v19 = vld [vmem:[#allocation7 + $0x258] sm:$0xff]  ;;  %v7076_v4 = vld [vmem:[#allocation7 + $0x208] sm:$0xff] }
 0x296   :  { %1722 = vmatpush.msra.mxu2 %v7053_v18  ;;  %1762 = vmatpush.msrb.mxu0 %v7057_v60  ;;  %v1293_v59 = vadd.f32 %v1292_v61, %v1273_v31  ;;  %v11440_v60 = vld [vmem:[#allocation27_spill] sm:$0xff]  ;;  %v11441_v18 = vld [vmem:[#allocation28_spill] sm:$0xff]  ;;  %11442 = vst [vmem:[#allocation101_spill] sm:$0xff] %v7073_v19 }
 0x297   :  { %v1583_v43 = vadd.f32 0.5, %v1582_v30  ;;  %v284_v42 = vadd.f32 %v11441_v18, %v11440_v60  ;;  %11443 = vst [vmem:[#allocation103_spill] sm:$0xff] %v7076_v4  ;;  %v7088_v18 = vld [vmem:[#allocation7 + $0x1c8] sm:$0xff] }
 0x298   :  { %1723 = vmatpush.msra.mxu2 %v7062_v32  ;;  %1763 = vmatpush.msrb.mxu0 %v7065_v57  ;;  %v4080_v48 = vpop.eup %4079  ;;  %v1584_v54 = vadd.f32 %v1293_v59, %v243_v33  ;;  %v7079_v59 = vld [vmem:[#allocation7 + $0x210] sm:$0xff]  ;;  %11446 = vst [vmem:[#allocation107_spill] sm:$0xff] %v7088_v18  ;;  %v7113_v60 = vld [vmem:[#allocation7 + $0xa8] sm:$0xff] }
 0x299   :  { %v1212_v31 = vmul.f32 0.5, %v4080_v48  ;;  %v1589_v61 = vmul.f32 %v1583_v43, %v1333_v14  ;;  %11444 = vst [vmem:[#allocation104_spill] sm:$0xff] %v7079_v59  ;;  %v7091_v43 = vld [vmem:[#allocation7 + $0x178] sm:$0xff]  ;;  %v7094_v14 = vld [vmem:[#allocation7 + $0x180] sm:$0xff]  ;;  %v7097_v48 = vld [vmem:[#allocation7 + $0x130] sm:$0xff] }
 0x29a   :  { %1724 = vmatpush.msra.mxu2 %v7068_v56  ;;  %1764 = vmatpush.msrb.mxu0 %v7073_v19  ;;  %v1585_v45 = vmul.f32 0.5, %v1584_v54  ;;  %v7082_v56 = vld [vmem:[#allocation7 + $0x1c0] sm:$0xff]  ;;  %11447 = vst [vmem:[#allocation109_spill] sm:$0xff] %v7091_v43  ;;  %v7100_v54 = vld [vmem:[#allocation7 + $0x138] sm:$0xff]  ;;  %v7329_v19 = vld [vmem:[#allocation7 + $0x30] sm:$0xff] }
 0x29b   :  { %v1213_v30 = vadd.f32 0.5, %v1212_v31  ;;  %v1590_v33 = vadd.f32 %v1589_v61, %v284_v42  ;;  %11445 = vst [vmem:[#allocation105_spill] sm:$0xff] %v7082_v56  ;;  %v7103_v31 = vld [vmem:[#allocation7 + $0xe8] sm:$0xff] }
 0x29c   :  { %1725 = vmatpush.msra.mxu2 %v7076_v4  ;;  %1765 = vmatpush.msrb.mxu0 %v7079_v59  ;;  %4081 = vtanh.f32 %v1585_v45  ;;  %11448 = vst [vmem:[#allocation111_spill] sm:$0xff] %v7094_v14  ;;  %v7250_v4 = vld [vmem:[#allocation7 + $0x3d8] sm:$0xff] }
 0x29d   :  { %1214 = vst [vmem:[%s10313_s7] sm:$0xff] %v1213_v30  ;;  %4083 = vtanh.f32 %v1590_v33  ;;  %v7106_v30 = vld [vmem:[#allocation7 + $0xf0] sm:$0xff] }
 0x29e   :  { %1726 = vmatpush.msra.mxu2 %v7082_v56  ;;  %1766 = vmatpush.msrb.mxu0 %v7088_v18  ;;  %11449 = vst [vmem:[#allocation17_spill] sm:$0xff] %v7097_v48  ;;  %v11496_v56 = vld [vmem:[#allocation34_spill] sm:$0xff] }
 0x29f   :  { %11450 = vst [vmem:[#allocation113_spill] sm:$0xff] %v7100_v54 }
 0x2a0   :  { %1727 = vmatpush.msra.mxu2 %v7091_v43  ;;  %1767 = vmatpush.msrb.mxu0 %v7094_v14  ;;  %11451 = vst [vmem:[#allocation114_spill] sm:$0xff] %v7103_v31  ;;  %v7110_v14 = vld [vmem:[#allocation7 + $0xa0] sm:$0xff] }
 0x2a1   :  { %11452 = vst [vmem:[#allocation29_spill] sm:$0xff] %v7106_v30  ;;  %v7243_v43 = vld [vmem:[#allocation7 + $0x420] sm:$0xff] }
 0x2a2   :  { %1728 = vmatpush.msra.mxu2 %v7097_v48  ;;  %1768 = vmatpush.msrb.mxu0 %v7100_v54  ;;  %v4082_v42 = vpop.eup %4081  ;;  %11453 = vst [vmem:[#allocation28_spill] sm:$0xff] %v7110_v14  ;;  %v7116_v54 = vld [vmem:[#allocation7 + $0x58] sm:$0xff] }
 0x2a3   :  { %v4084_v61 = vpop.eup %4083  ;;  %v1587_v45 = vmul.f32 0.5, %v4082_v42  ;;  %11454 = vst [vmem:[#allocation134_spill] sm:$0xff] %v7113_v60 }
 0x2a4   :  { %1729 = vmatpush.msra.mxu2 %v7103_v31  ;;  %1769 = vmatpush.msrb.mxu0 %v7106_v30  ;;  %v1592_v33 = vsub.f32 %v6392_v0, %v4084_v61  ;;  %11455 = vst [vmem:[#allocation135_spill] sm:$0xff] %v7116_v54  ;;  %v7119_v31 = vld [vmem:[#allocation7 + $0x60] sm:$0xff]  ;;  %v7122_v30 = vld [vmem:[#allocation7 + $0x10] sm:$0xff] }
 0x2a5   :  { %v1588_v48 = vadd.f32 0.5, %v1587_v45  ;;  %11456 = vst [vmem:[#allocation136_spill] sm:$0xff] %v7119_v31  ;;  %v7127_v45 = vld [vmem:[#allocation7 + $0x18] sm:$0xff] }
 0x2a6   :  { %1730 = vmatpush.msra.mxu2 %v7110_v14  ;;  %1770 = vmatpush.msrb.mxu0 %v7113_v60  ;;  %11457 = vst [vmem:[#allocation137_spill] sm:$0xff] %v7122_v30 }
 0x2a7   :  { %v1593_v42 = vmul.f32 %v1592_v33, %v1588_v48  ;;  %11458 = vst [vmem:[#allocation138_spill] sm:$0xff] %v7127_v45  ;;  %v7135_v48 = vld [vmem:[#allocation7 + $0x460] sm:$0xff]  ;;  %v7138_v33 = vld [vmem:[#allocation7 + $0x410] sm:$0xff] }
 0x2a8   :  { %1731 = vmatpush.msra.mxu2 %v7116_v54  ;;  %1771 = vmatpush.msrb.mxu0 %v7119_v31  ;;  %v7132_v54 = vld [vmem:[#allocation7 + $0x458] sm:$0xff]  ;;  %11460 = vst [vmem:[#allocation140_spill] sm:$0xff] %v7135_v48  ;;  %v7225_v31 = vld [vmem:[#allocation7 + $0x70] sm:$0xff] }
 0x2a9   :  { %v7125_v0 = vadd.f32 %v4084_v61, %v1593_v42  ;;  %11459 = vst [vmem:[#allocation139_spill] sm:$0xff] %v7132_v54  ;;  %v7141_v61 = vld [vmem:[#allocation7 + $0x418] sm:$0xff]  ;;  %v7144_v42 = vld [vmem:[#allocation7 + $0x3c8] sm:$0xff] }
 0x2aa   :  { %1732 = vmatpush.msra.mxu2 %v7122_v30  ;;  %1772 = vmatpush.msrb.mxu0 %v7127_v45  ;;  %11461 = vst [vmem:[#allocation141_spill] sm:$0xff] %v7138_v33  ;;  %v7147_v45 = vld [vmem:[#allocation7 + $0x3d0] sm:$0xff]  ;;  %v7208_v30 = vld [vmem:[#allocation7 + $0xf8] sm:$0xff] }
 0x2ab   :  { %1653 = vmatmul.f32.vlgmr.msrb.gmra.mxu2 %v7125_v0  ;;  %1693 = vmatmul.f32.vlgmr.msra.gmra.mxu0 %v7125_v0  ;;  %11462 = vst [vmem:[#allocation142_spill] sm:$0xff] %v7141_v61 }
 0x2ac   :  { %1797 = vmatpush.msrb.mxu2 %v7132_v54  ;;  %1837 = vmatpush.msra.mxu0 %v7135_v48  ;;  %11463 = vst [vmem:[#allocation143_spill] sm:$0xff] %v7144_v42  ;;  %v7150_v54 = vld [vmem:[#allocation7 + $0x380] sm:$0xff]  ;;  %v7153_v48 = vld [vmem:[#allocation7 + $0x388] sm:$0xff] }
 0x2ad   :  { %11464 = vst [vmem:[#allocation144_spill] sm:$0xff] %v7147_v45  ;;  %v1372_v18 = vpop.f32.mrf.mxu2 }
 0x2ae   :  { %1798 = vmatpush.msrb.mxu2 %v7138_v33  ;;  %1838 = vmatpush.msra.mxu0 %v7141_v61  ;;  %11465 = vst [vmem:[#allocation145_spill] sm:$0xff] %v7150_v54  ;;  %v7158_v61 = vld [vmem:[#allocation7 + $0x338] sm:$0xff]  ;;  %v7173_v33 = vld [vmem:[#allocation7 + $0x2b0] sm:$0xff] }
 0x2af   :  { %11466 = vst [vmem:[#allocation146_spill] sm:$0xff] %v7153_v48 }
 0x2b0   :  { %1799 = vmatpush.msrb.mxu2 %v7144_v42  ;;  %1839 = vmatpush.msra.mxu0 %v7147_v45  ;;  %11467 = vst [vmem:[#allocation147_spill] sm:$0xff] %v7158_v61  ;;  %v7161_v42 = vld [vmem:[#allocation7 + $0x340] sm:$0xff]  ;;  %v7164_v45 = vld [vmem:[#allocation7 + $0x2f0] sm:$0xff] }
 0x2b1   :  { %11468 = vst [vmem:[#allocation148_spill] sm:$0xff] %v7161_v42 }
 0x2b2   :  { %1800 = vmatpush.msrb.mxu2 %v7150_v54  ;;  %1840 = vmatpush.msra.mxu0 %v7153_v48  ;;  %11469 = vst [vmem:[#allocation149_spill] sm:$0xff] %v7164_v45  ;;  %v7167_v54 = vld [vmem:[#allocation7 + $0x2f8] sm:$0xff]  ;;  %v7170_v48 = vld [vmem:[#allocation7 + $0x2a8] sm:$0xff] }
 0x2b3   :  { %1733 = vmatmul.f32.vlgmr.msra.gmra.mxu2 %v7125_v0  ;;  %1773 = vmatmul.f32.vlgmr.msrb.gmra.mxu0 %v7125_v0  ;;  %11470 = vst [vmem:[#allocation150_spill] sm:$0xff] %v7167_v54 }
 0x2b4   :  { %1801 = vmatpush.msrb.mxu2 %v7158_v61  ;;  %1841 = vmatpush.msra.mxu0 %v7161_v42  ;;  %11471 = vst [vmem:[#allocation151_spill] sm:$0xff] %v7170_v48  ;;  %v7176_v61 = vld [vmem:[#allocation7 + $0x260] sm:$0xff]  ;;  %v7179_v42 = vld [vmem:[#allocation7 + $0x268] sm:$0xff] }
 0x2b5   :  { %11472 = vst [vmem:[#allocation152_spill] sm:$0xff] %v7173_v33 }
 0x2b6   :  { %1802 = vmatpush.msrb.mxu2 %v7164_v45  ;;  %1842 = vmatpush.msra.mxu0 %v7167_v54  ;;  %11473 = vst [vmem:[#allocation153_spill] sm:$0xff] %v7176_v61  ;;  %v7182_v45 = vld [vmem:[#allocation7 + $0x218] sm:$0xff]  ;;  %v7185_v54 = vld [vmem:[#allocation7 + $0x220] sm:$0xff] }
 0x2b7   :  { %11474 = vst [vmem:[#allocation154_spill] sm:$0xff] %v7179_v42 }
 0x2b8   :  { %1803 = vmatpush.msrb.mxu2 %v7170_v48  ;;  %1843 = vmatpush.msra.mxu0 %v7173_v33  ;;  %11475 = vst [vmem:[#allocation155_spill] sm:$0xff] %v7182_v45  ;;  %v7188_v48 = vld [vmem:[#allocation7 + $0x1d0] sm:$0xff]  ;;  %v7191_v33 = vld [vmem:[#allocation7 + $0x1d8] sm:$0xff] }
 0x2b9   :  { %11476 = vst [vmem:[#allocation156_spill] sm:$0xff] %v7185_v54 }
 0x2ba   :  { %1804 = vmatpush.msrb.mxu2 %v7176_v61  ;;  %1844 = vmatpush.msra.mxu0 %v7179_v42  ;;  %11477 = vst [vmem:[#allocation157_spill] sm:$0xff] %v7188_v48  ;;  %v7194_v61 = vld [vmem:[#allocation7 + $0x188] sm:$0xff]  ;;  %v7197_v42 = vld [vmem:[#allocation7 + $0x190] sm:$0xff] }
 0x2bb   :  { %11478 = vst [vmem:[#allocation158_spill] sm:$0xff] %v7191_v33 }
 0x2bc   :  { %1805 = vmatpush.msrb.mxu2 %v7182_v45  ;;  %1845 = vmatpush.msra.mxu0 %v7185_v54  ;;  %11479 = vst [vmem:[#allocation159_spill] sm:$0xff] %v7194_v61  ;;  %v7200_v45 = vld [vmem:[#allocation7 + $0x140] sm:$0xff]  ;;  %v7203_v54 = vld [vmem:[#allocation7 + $0x148] sm:$0xff] }
 0x2bd   :  { %11480 = vst [vmem:[#allocation160_spill] sm:$0xff] %v7197_v42 }
 0x2be   :  { %1806 = vmatpush.msrb.mxu2 %v7188_v48  ;;  %1846 = vmatpush.msra.mxu0 %v7191_v33  ;;  %11481 = vst [vmem:[#allocation161_spill] sm:$0xff] %v7200_v45  ;;  %v7206_v48 = vpop.f32.mrf.mxu3  ;;  %v7211_v33 = vld [vmem:[#allocation7 + $0x100] sm:$0xff] }
 0x2bf   :  { %11482 = vst [vmem:[#allocation162_spill] sm:$0xff] %v7203_v54 }
 0x2c0   :  { %1807 = vmatpush.msrb.mxu2 %v7194_v61  ;;  %1847 = vmatpush.msra.mxu0 %v7197_v42  ;;  %11483 = vst [vmem:[#allocation163_spill] sm:$0xff] %v7208_v30  ;;  %v7214_v61 = vpop.f32.mrf.mxu0  ;;  %v7216_v42 = vld [vmem:[#allocation7 + $0xb0] sm:$0xff] }
 0x2c1   :  { %11484 = vst [vmem:[#allocation164_spill] sm:$0xff] %v7211_v33 }
 0x2c2   :  { %1808 = vmatpush.msrb.mxu2 %v7200_v45  ;;  %1848 = vmatpush.msra.mxu0 %v7203_v54  ;;  %11485 = vst [vmem:[#allocation165_spill] sm:$0xff] %v7216_v42  ;;  %v7219_v45 = vld [vmem:[#allocation7 + $0xb8] sm:$0xff]  ;;  %v7222_v54 = vld [vmem:[#allocation7 + $0x68] sm:$0xff] }
 0x2c3   :  { %11486 = vst [vmem:[#allocation166_spill] sm:$0xff] %v7219_v45 }
 0x2c4   :  { %1809 = vmatpush.msrb.mxu2 %v7208_v30  ;;  %1849 = vmatpush.msra.mxu0 %v7211_v33  ;;  %11487 = vst [vmem:[#allocation167_spill] sm:$0xff] %v7222_v54  ;;  %v7228_v30 = vld [vmem:[#allocation7 + $0x20] sm:$0xff]  ;;  %v7231_v33 = vld [vmem:[#allocation7 + $0x28] sm:$0xff] }
 0x2c5   :  { %11488 = vst [vmem:[#allocation168_spill] sm:$0xff] %v7225_v31 }
 0x2c6   :  { %1810 = vmatpush.msrb.mxu2 %v7216_v42  ;;  %1850 = vmatpush.msra.mxu0 %v7219_v45  ;;  %11489 = vst [vmem:[#allocation169_spill] sm:$0xff] %v7228_v30  ;;  %v1472_v42 = vpop.f32.mrf.mxu3  ;;  %v7236_v45 = vld [vmem:[#allocation7 + $0x468] sm:$0xff] }
 0x2c7   :  { %11490 = vst [vmem:[#allocation170_spill] sm:$0xff] %v7231_v33 }
 0x2c8   :  { %1811 = vmatpush.msrb.mxu2 %v7222_v54  ;;  %1851 = vmatpush.msra.mxu0 %v7225_v31  ;;  %11491 = vst [vmem:[#allocation171_spill] sm:$0xff] %v7236_v45  ;;  %v7239_v54 = vld [vmem:[#allocation7 + $0x470] sm:$0xff]  ;;  %v1352_v31 = vpop.f32.mrf.mxu1  ;;  %v1492_v60 = vpop.f32.mrf.mxu0 }
 0x2c9   :  { %11492 = vst [vmem:[#allocation172_spill] sm:$0xff] %v7239_v54  ;;  %v1353_v59 = vadd.f32 %v1352_v31, %v11496_v56  ;;  %v7262_v31 = vld [vmem:[#allocation7 + $0x348] sm:$0xff] }
 0x2ca   :  { %1812 = vmatpush.msrb.mxu2 %v7228_v30  ;;  %1852 = vmatpush.msra.mxu0 %v7231_v33  ;;  %v11493_v30 = vld [vmem:[#allocation30_spill] sm:$0xff]  ;;  %11494 = vst [vmem:[#allocation173_spill] sm:$0xff] %v7243_v43  ;;  %v7246_v33 = vld [vmem:[#allocation7 + $0x428] sm:$0xff] }
 0x2cb   :  { %1813 = vmatmul.f32.vlgmr.msrb.gmra.mxu2 %v7125_v0  ;;  %1853 = vmatmul.f32.vlgmr.msra.gmra.mxu0 %v7125_v0  ;;  %v1473_v14 = vadd.f32 %v1472_v42, %v11493_v30  ;;  %11495 = vst [vmem:[#allocation174_spill] sm:$0xff] %v7246_v33  ;;  %v1373_v42 = vadd.f32 %v1372_v18, %v1353_v59  ;;  %v7256_v30 = vld [vmem:[#allocation7 + $0x390] sm:$0xff]  ;;  %v7271_v59 = vld [vmem:[#allocation7 + $0x308] sm:$0xff] }
 0x2cc   :  { %1877 = vmatpush.msra.mxu2 %v7236_v45  ;;  %1917 = vmatpush.msrb.mxu0 %v7239_v54  ;;  %11497 = vst [vmem:[#allocation175_spill] sm:$0xff] %v7250_v4  ;;  %v7253_v54 = vld [vmem:[#allocation7 + $0x3e0] sm:$0xff] }
 0x2cd   :  { %v1493_v45 = vadd.f32 %v1492_v60, %v1473_v14  ;;  %11498 = vst [vmem:[#allocation176_spill] sm:$0xff] %v7253_v54  ;;  %v7265_v60 = vld [vmem:[#allocation7 + $0x350] sm:$0xff]  ;;  %v7268_v14 = vld [vmem:[#allocation7 + $0x300] sm:$0xff] }
 0x2ce   :  { %1878 = vmatpush.msra.mxu2 %v7243_v43  ;;  %1918 = vmatpush.msrb.mxu0 %v7246_v33  ;;  %11499 = vst [vmem:[#allocation177_spill] sm:$0xff] %v7256_v30  ;;  %v7259_v43 = vld [vmem:[#allocation7 + $0x398] sm:$0xff] }
 0x2cf   :  { %11500 = vst [vmem:[#allocation178_spill] sm:$0xff] %v7259_v43  ;;  %v1595_v33 = vadd.f32 %v1493_v45, %v1373_v42  ;;  %v7277_v45 = vld [vmem:[#allocation7 + $0x2c0] sm:$0xff]  ;;  %v7280_v42 = vld [vmem:[#allocation7 + $0x270] sm:$0xff] }
 0x2d0   :  { %1879 = vmatpush.msra.mxu2 %v7250_v4  ;;  %1919 = vmatpush.msrb.mxu0 %v7253_v54  ;;  %11501 = vst [vmem:[#allocation179_spill] sm:$0xff] %v7262_v31  ;;  %v7323_v54 = vld [vmem:[#allocation7 + $0x78] sm:$0xff] }
 0x2d1   :  { %11502 = vst [vmem:[#allocation180_spill] sm:$0xff] %v7265_v60  ;;  %v1596_v18 = vmul.f32 0.5, %v1595_v33  ;;  %v7289_v33 = vld [vmem:[#allocation7 + $0x230] sm:$0xff] }
 0x2d2   :  { %1880 = vmatpush.msra.mxu2 %v7256_v30  ;;  %1920 = vmatpush.msrb.mxu0 %v7259_v43  ;;  %11503 = vst [vmem:[#allocation181_spill] sm:$0xff] %v7268_v14  ;;  %v7274_v30 = vld [vmem:[#allocation7 + $0x2b8] sm:$0xff]  ;;  %v7316_v43 = vld [vmem:[#allocation7 + $0xc0] sm:$0xff] }
 0x2d3   :  { %11504 = vst [vmem:[#allocation182_spill] sm:$0xff] %v7271_v59  ;;  %4085 = vtanh.f32 %v1596_v18  ;;  %v7301_v18 = vld [vmem:[#allocation7 + $0x1a0] sm:$0xff] }
 0x2d4   :  { %1881 = vmatpush.msra.mxu2 %v7262_v31  ;;  %1921 = vmatpush.msrb.mxu0 %v7265_v60  ;;  %11505 = vst [vmem:[#allocation183_spill] sm:$0xff] %v7274_v30  ;;  %v7283_v60 = vld [vmem:[#allocation7 + $0x278] sm:$0xff] }
 0x2d5   :  { %11506 = vst [vmem:[#allocation184_spill] sm:$0xff] %v7277_v45 }
 0x2d6   :  { %1882 = vmatpush.msra.mxu2 %v7268_v14  ;;  %1922 = vmatpush.msrb.mxu0 %v7271_v59  ;;  %11507 = vst [vmem:[#allocation185_spill] sm:$0xff] %v7280_v42  ;;  %v7286_v14 = vld [vmem:[#allocation7 + $0x228] sm:$0xff]  ;;  %v7304_v59 = vld [vmem:[#allocation7 + $0x150] sm:$0xff] }
 0x2d7   :  { %11508 = vst [vmem:[#allocation186_spill] sm:$0xff] %v7283_v60 }
 0x2d8   :  { %1883 = vmatpush.msra.mxu2 %v7274_v30  ;;  %1923 = vmatpush.msrb.mxu0 %v7277_v45  ;;  %11509 = vst [vmem:[#allocation187_spill] sm:$0xff] %v7286_v14  ;;  %v7292_v30 = vld [vmem:[#allocation7 + $0x1e0] sm:$0xff]  ;;  %v7295_v45 = vld [vmem:[#allocation7 + $0x1e8] sm:$0xff] }
 0x2d9   :  { %11510 = vst [vmem:[#allocation188_spill] sm:$0xff] %v7289_v33 }
 0x2da   :  { %1884 = vmatpush.msra.mxu2 %v7280_v42  ;;  %1924 = vmatpush.msrb.mxu0 %v7283_v60  ;;  %11511 = vst [vmem:[#allocation189_spill] sm:$0xff] %v7292_v30  ;;  %v7298_v42 = vld [vmem:[#allocation7 + $0x198] sm:$0xff]  ;;  %v4086_v60 = vpop.eup %4085 }
 0x2db   :  { %11512 = vst [vmem:[#allocation190_spill] sm:$0xff] %v7295_v45  ;;  %v1598_v31 = vmul.f32 0.5, %v4086_v60 }
 0x2dc   :  { %1885 = vmatpush.msra.mxu2 %v7286_v14  ;;  %1925 = vmatpush.msrb.mxu0 %v7289_v33  ;;  %11513 = vst [vmem:[#allocation191_spill] sm:$0xff] %v7298_v42  ;;  %v1432_v14 = vpop.f32.mrf.mxu1  ;;  %v7307_v33 = vld [vmem:[#allocation7 + $0x158] sm:$0xff] }
 0x2dd   :  { %11514 = vst [vmem:[#allocation192_spill] sm:$0xff] %v7301_v18  ;;  %v1599_v4 = vadd.f32 0.5, %v1598_v31 }
 0x2de   :  { %1886 = vmatpush.msra.mxu2 %v7292_v30  ;;  %1926 = vmatpush.msrb.mxu0 %v7295_v45  ;;  %11515 = vst [vmem:[#allocation193_spill] sm:$0xff] %v7304_v59  ;;  %v1552_v30 = vpop.f32.mrf.mxu3  ;;  %v7310_v45 = vld [vmem:[#allocation7 + $0x108] sm:$0xff] }
 0x2df   :  { %11516 = vst [vmem:[#allocation194_spill] sm:$0xff] %v7307_v33 }
 0x2e0   :  { %1887 = vmatpush.msra.mxu2 %v7298_v42  ;;  %1927 = vmatpush.msrb.mxu0 %v7301_v18  ;;  %11517 = vst [vmem:[#allocation195_spill] sm:$0xff] %v7310_v45  ;;  %v7313_v42 = vld [vmem:[#allocation7 + $0x110] sm:$0xff]  ;;  %v1452_v18 = vpop.f32.mrf.mxu2 }
 0x2e1   :  { %11518 = vst [vmem:[#allocation196_spill] sm:$0xff] %v7313_v42 }
 0x2e2   :  { %1888 = vmatpush.msra.mxu2 %v7304_v59  ;;  %1928 = vmatpush.msrb.mxu0 %v7307_v33  ;;  %11519 = vst [vmem:[#allocation197_spill] sm:$0xff] %v7316_v43  ;;  %v7319_v59 = vld [vmem:[#allocation7 + $0xc8] sm:$0xff]  ;;  %v1553_v33 = vadd.f32 %v6565_v9, %v1552_v30  ;;  %v1433_v9 = vadd.f32 %v1432_v14, %v6563_v6  ;;  %v7348_v6 = vld [vmem:[#allocation7 + $0x430] sm:$0xff] }
 0x2e3   :  { %11520 = vst [vmem:[#allocation198_spill] sm:$0xff] %v7319_v59 }
 0x2e4   :  { %1889 = vmatpush.msra.mxu2 %v7310_v45  ;;  %1929 = vmatpush.msrb.mxu0 %v7313_v42  ;;  %11521 = vst [vmem:[#allocation199_spill] sm:$0xff] %v7323_v54  ;;  %v7326_v45 = vld [vmem:[#allocation7 + $0x80] sm:$0xff]  ;;  %v1512_v60 = vpop.f32.mrf.mxu1 }
 0x2e5   :  { %11522 = vst [vmem:[#allocation200_spill] sm:$0xff] %v7326_v45 }
 0x2e6   :  { %1890 = vmatpush.msra.mxu2 %v7316_v43  ;;  %1930 = vmatpush.msrb.mxu0 %v7319_v59  ;;  %11523 = vst [vmem:[#allocation201_spill] sm:$0xff] %v7329_v19  ;;  %v7332_v43 = vld [vmem:[#allocation7 + $0x38] sm:$0xff] }
 0x2e7   :  { %11524 = vst [vmem:[#allocation202_spill] sm:$0xff] %v7332_v43 }
 0x2e8   :  { %v1572_v56 = vpop.f32.mrf.mxu0  ;;  %1891 = vmatpush.msra.mxu2 %v7323_v54  ;;  %1931 = vmatpush.msrb.mxu0 %v7326_v45  ;;  %v11525_v54 = vld [vmem:[#allocation41_spill] sm:$0xff] }
 0x2e9   :  { %v1573_v42 = vadd.f32 %v1572_v56, %v1553_v33  ;;  %v1393_v45 = vadd.f32 %v7206_v48, %v11525_v54  ;;  %v11526_v56 = vld [vmem:[#allocation38_spill] sm:$0xff] }
 0x2ea   :  { %1892 = vmatpush.msra.mxu2 %v7329_v19  ;;  %1932 = vmatpush.msrb.mxu0 %v7332_v43  ;;  %v1513_v31 = vadd.f32 %v1512_v60, %v11526_v56  ;;  %v7341_v33 = vld [vmem:[#allocation7 + $0x478] sm:$0xff]  ;;  %v7344_v19 = vld [vmem:[#allocation10 + $0x78] sm:$0xff]  ;;  %v1453_v43 = vadd.f32 %v1452_v18, %v1433_v9  ;;  %v7363_v18 = vld [vmem:[#allocation10 + $0x60] sm:$0xff] }
 0x2eb   :  { %v1605_v30 = vmul.f32 %v1599_v4, %v1573_v42  ;;  %1893 = vmatmul.f32.vlgmr.msra.gmra.mxu2 %v7125_v0  ;;  %1933 = vmatmul.f32.vlgmr.msrb.gmra.mxu0 %v7125_v0  ;;  %11527 = vst [vmem:[#allocation203_spill] sm:$0xff] %v7341_v33  ;;  %v1413_v4 = vadd.f32 %v7214_v61, %v1393_v45  ;;  %v7351_v48 = vld [vmem:[#allocation10 + $0x70] sm:$0xff]  ;;  %v7369_v9 = vld [vmem:[#allocation10 + $0x58] sm:$0xff] }
 0x2ec   :  { %1957 = vmatpush.msrb.mxu2 %v7341_v33  ;;  %11528 = vst [vmem:[#allocation204_spill] sm:$0xff] %v7344_v19  ;;  %2033 = vmatpush.msra.mxu0 %v7344_v19  ;;  %v7354_v33 = vld [vmem:[#allocation7 + $0x3e8] sm:$0xff]  ;;  %v7357_v19 = vld [vmem:[#allocation10 + $0x68] sm:$0xff]  ;;  %v7360_v45 = vld [vmem:[#allocation7 + $0x3a0] sm:$0xff] }
 0x2ed   :  { %v1606_v60 = vadd.f32 %v1605_v30, %v1453_v43  ;;  %v7366_v43 = vld [vmem:[#allocation7 + $0x358] sm:$0xff]  ;;  %11530 = vst [vmem:[#allocation206_spill] sm:$0xff] %v7369_v9  ;;  %v7372_v30 = vld [vmem:[#allocation7 + $0x310] sm:$0xff] }
 0x2ee   :  { %v1532_v14 = vpop.f32.mrf.mxu2  ;;  %1958 = vmatpush.msrb.mxu2 %v7348_v6  ;;  %2034 = vmatpush.msra.mxu0 %v7351_v48  ;;  %11529 = vst [vmem:[#allocation205_spill] sm:$0xff] %v7366_v43 }
 0x2ef   :  { %v1533_v42 = vadd.f32 %v1532_v14, %v1513_v31  ;;  %4087 = vtanh.f32 %v1606_v60  ;;  %11531 = vst [vmem:[#allocation207_spill] sm:$0xff] %v7372_v30  ;;  %v7378_v31 = vld [vmem:[#allocation7 + $0x2c8] sm:$0xff]  ;;  %v7381_v14 = vld [vmem:[#allocation10 + $0x48] sm:$0xff]  ;;  %v7384_v60 = vld [vmem:[#allocation7 + $0x280] sm:$0xff] }
 0x2f0   :  { %1959 = vmatpush.msrb.mxu2 %v7354_v33  ;;  %2035 = vmatpush.msra.mxu0 %v7357_v19  ;;  %11533 = vst [vmem:[#allocation209_spill] sm:$0xff] %v7378_v31 }
 0x2f1   :  { %v1600_v59 = vadd.f32 %v1533_v42, %v1413_v4  ;;  %11534 = vst [vmem:[#allocation210_spill] sm:$0xff] %v7381_v14 }
 0x2f2   :  { %1960 = vmatpush.msrb.mxu2 %v7360_v45  ;;  %2036 = vmatpush.msra.mxu0 %v7363_v18  ;;  %11535 = vst [vmem:[#allocation211_spill] sm:$0xff] %v7384_v60 }
 0x2f3   :  { %v1601_v61 = vmul.f32 0.5, %v1600_v59  ;;  %v7375_v59 = vld [vmem:[#allocation10 + $0x50] sm:$0xff] }
 0x2f4   :  { %1961 = vmatpush.msrb.mxu2 %v7366_v43  ;;  %2037 = vmatpush.msra.mxu0 %v7369_v9  ;;  %11532 = vst [vmem:[#allocation208_spill] sm:$0xff] %v7375_v59  ;;  %v7397_v43 = vld [vmem:[#allocation7 + $0x1f0] sm:$0xff] }
 0x2f5   :  { %4089 = vtanh.f32 %v1601_v61  ;;  %v4088_v4 = vpop.eup %4087  ;;  %v7387_v61 = vld [vmem:[#allocation10 + $0x40] sm:$0xff]  ;;  %11538 = vst [vmem:[#allocation214_spill] sm:$0xff] %v7397_v43 }
 0x2f6   :  { %1962 = vmatpush.msrb.mxu2 %v7372_v30  ;;  %2038 = vmatpush.msra.mxu0 %v7375_v59  ;;  %11536 = vst [vmem:[#allocation212_spill] sm:$0xff] %v7387_v61  ;;  %v7390_v59 = vld [vmem:[#allocation7 + $0x238] sm:$0xff]  ;;  %v1608_v9 = vsub.f32 %v6595_v37, %v4088_v4  ;;  %v7411_v37 = vld [vmem:[#allocation7 + $0x160] sm:$0xff] }
 0x2f7   :  { %11537 = vst [vmem:[#allocation213_spill] sm:$0xff] %v7390_v59 }
 0x2f8   :  { %1963 = vmatpush.msrb.mxu2 %v7378_v31  ;;  %2039 = vmatpush.msra.mxu0 %v7381_v14  ;;  %v7393_v31 = vld [vmem:[#allocation10 + $0x38] sm:$0xff] }
 0x2fa   :  { %1964 = vmatpush.msrb.mxu2 %v7384_v60  ;;  %2040 = vmatpush.msra.mxu0 %v7387_v61  ;;  %v7400_v60 = vld [vmem:[#allocation10 + $0x30] sm:$0xff]  ;;  %v7403_v61 = vld [vmem:[#allocation7 + $0x1a8] sm:$0xff] }
 0x2fb   :  { %v4090_v42 = vpop.eup %4089 }
 0x2fc   :  { %v1603_v30 = vmul.f32 0.5, %v4090_v42  ;;  %1965 = vmatpush.msrb.mxu2 %v7390_v59  ;;  %2041 = vmatpush.msra.mxu0 %v7393_v31  ;;  %v7406_v59 = vld [vmem:[#allocation10 + $0x28] sm:$0xff] }
 0x2fe   :  { %v1604_v14 = vadd.f32 0.5, %v1603_v30  ;;  %1966 = vmatpush.msrb.mxu2 %v7397_v43  ;;  %2042 = vmatpush.msra.mxu0 %v7400_v60  ;;  %v7414_v43 = vld [vmem:[#allocation10 + $0x20] sm:$0xff] }
 0x300   :  { %v1609_v42 = vmul.f32 %v1608_v9, %v1604_v14  ;;  %1967 = vmatpush.msrb.mxu2 %v7403_v61  ;;  %2043 = vmatpush.msra.mxu0 %v7406_v59  ;;  %v7421_v9 = vld [vmem:[#allocation7 + $0x118] sm:$0xff]  ;;  %v7424_v14 = vld [vmem:[#allocation10 + $0x18] sm:$0xff] }
 0x302   :  { %v7409_v30 = vadd.f32 %v4088_v4, %v1609_v42  ;;  %1968 = vmatpush.msrb.mxu2 %v7411_v37  ;;  %2044 = vmatpush.msra.mxu0 %v7414_v43  ;;  %v7429_v4 = vld [vmem:[#allocation7 + $0xd0] sm:$0xff]  ;;  %v7432_v42 = vld [vmem:[#allocation10 + $0x10] sm:$0xff] }
 0x304   :  { %1627 = vmatmul.f32.vlgmr.msrb.gmra.mxu1 %v7409_v30  ;;  %1673 = vmatmul.f32.vlgmr.msra.gmra.mxu3 %v7409_v30 }
 0x305   :  { %1777 = vmatpush.msrb.mxu1 %v6601_v5  ;;  %1817 = vmatpush.msra.mxu3 %v6604_v44  ;;  %v7437_v5 = vld [vmem:[#allocation7 + $0x88] sm:$0xff]  ;;  %v7440_v44 = vld [vmem:[#allocation10 + $0x8] sm:$0xff] }
 0x306   :  { %1969 = vmatpush.msrb.mxu2 %v7421_v9  ;;  %2045 = vmatpush.msra.mxu0 %v7424_v14 }
 0x307   :  { %1778 = vmatpush.msrb.mxu1 %v6609_v52  ;;  %1818 = vmatpush.msra.mxu3 %v6612_v10  ;;  %v7445_v52 = vld [vmem:[#allocation7 + $0x40] sm:$0xff]  ;;  %v7454_v10 = vld [vmem:[#allocation7 + $0x8b8] sm:$0xff] }
 0x308   :  { %1970 = vmatpush.msrb.mxu2 %v7429_v4  ;;  %2046 = vmatpush.msra.mxu0 %v7432_v42 }
 0x309   :  { %1779 = vmatpush.msrb.mxu1 %v6617_v15  ;;  %1819 = vmatpush.msra.mxu3 %v6620_v40  ;;  %v7458_v15 = vld [vmem:[#allocation10] sm:$0xff] }
 0x30a   :  { %1971 = vmatpush.msrb.mxu2 %v7437_v5  ;;  %2047 = vmatpush.msra.mxu0 %v7440_v44  ;;  %v7462_v40 = vld [vmem:[#allocation7 + $0x870] sm:$0xff] }
 0x30b   :  { %1780 = vmatpush.msrb.mxu1 %v6625_v46  ;;  %1820 = vmatpush.msra.mxu3 %v6628_v22  ;;  %v7466_v46 = vld [vmem:[#allocation7 + $0x8c0] sm:$0xff]  ;;  %v7470_v22 = vld [vmem:[#allocation7 + $0x828] sm:$0xff] }
 0x30c   :  { %1972 = vmatpush.msrb.mxu2 %v7445_v52  ;;  %1713 = vmatmul.f32.vlgmr.msra.gmra.mxu1 %v7409_v30 }
 0x30d   :  { %1753 = vmatmul.f32.vlgmr.msrb.gmra.mxu3 %v7409_v30  ;;  %1781 = vmatpush.msrb.mxu1 %v6634_v13  ;;  %v7474_v13 = vld [vmem:[#allocation7 + $0x878] sm:$0xff] }
 0x30e   :  { %1821 = vmatpush.msra.mxu3 %v6637_v3  ;;  %1973 = vmatmul.f32.vlgmr.msrb.gmra.mxu2 %v7125_v0  ;;  %v7478_v3 = vld [vmem:[#allocation7 + $0x7e0] sm:$0xff] }
 0x30f   :  { %1782 = vmatpush.msrb.mxu1 %v6641_v34  ;;  %2079 = vmatpush.msra.mxu2 %v7454_v10  ;;  %v7482_v34 = vld [vmem:[#allocation7 + $0x830] sm:$0xff] }
 0x310   :  { %1822 = vmatpush.msra.mxu3 %v6645_v47  ;;  %2048 = vmatpush.msra.mxu0 %v7458_v15  ;;  %v7486_v47 = vld [vmem:[#allocation7 + $0x798] sm:$0xff] }
 0x311   :  { %1783 = vmatpush.msrb.mxu1 %v6649_v26  ;;  %2080 = vmatpush.msra.mxu2 %v7462_v40  ;;  %v7490_v26 = vld [vmem:[#allocation7 + $0x7e8] sm:$0xff] }
 0x312   :  { %1823 = vmatpush.msra.mxu3 %v6653_v24  ;;  %2119 = vmatpush.msrb.mxu0 %v7466_v46  ;;  %v7494_v24 = vld [vmem:[#allocation7 + $0x750] sm:$0xff] }
 0x313   :  { %1784 = vmatpush.msrb.mxu1 %v6657_v2  ;;  %2081 = vmatpush.msra.mxu2 %v7470_v22  ;;  %v7498_v2 = vld [vmem:[#allocation7 + $0x7a0] sm:$0xff] }
 0x314   :  { %1824 = vmatpush.msra.mxu3 %v6661_v25  ;;  %2120 = vmatpush.msrb.mxu0 %v7474_v13  ;;  %v7502_v25 = vld [vmem:[#allocation7 + $0x708] sm:$0xff] }
 0x315   :  { %1785 = vmatpush.msrb.mxu1 %v6666_v49  ;;  %2082 = vmatpush.msra.mxu2 %v7478_v3  ;;  %v7506_v49 = vld [vmem:[#allocation7 + $0x758] sm:$0xff] }
 0x316   :  { %1825 = vmatpush.msra.mxu3 %v6669_v7  ;;  %2121 = vmatpush.msrb.mxu0 %v7482_v34  ;;  %v7510_v7 = vld [vmem:[#allocation7 + $0x6c0] sm:$0xff] }
 0x317   :  { %1786 = vmatpush.msrb.mxu1 %v6673_v50  ;;  %2083 = vmatpush.msra.mxu2 %v7486_v47  ;;  %v7514_v50 = vld [vmem:[#allocation7 + $0x710] sm:$0xff] }
 0x318   :  { %1826 = vmatpush.msra.mxu3 %v6677_v28  ;;  %2122 = vmatpush.msrb.mxu0 %v7490_v26  ;;  %v7518_v28 = vld [vmem:[#allocation7 + $0x678] sm:$0xff] }
 0x319   :  { %1787 = vmatpush.msrb.mxu1 %v6681_v35  ;;  %2084 = vmatpush.msra.mxu2 %v7494_v24  ;;  %v7522_v35 = vld [vmem:[#allocation7 + $0x6c8] sm:$0xff] }
 0x31a   :  { %1827 = vmatpush.msra.mxu3 %v6685_v53  ;;  %2123 = vmatpush.msrb.mxu0 %v7498_v2  ;;  %v7526_v53 = vld [vmem:[#allocation7 + $0x630] sm:$0xff] }
 0x31b   :  { %1788 = vmatpush.msrb.mxu1 %v6689_v36  ;;  %2085 = vmatpush.msra.mxu2 %v7502_v25  ;;  %11539 = vst [vmem:[#allocation215_spill] sm:$0xff] %v7526_v53  ;;  %v7530_v36 = vld [vmem:[#allocation7 + $0x680] sm:$0xff] }
 0x31c   :  { %1828 = vmatpush.msra.mxu3 %v6693_v63  ;;  %2124 = vmatpush.msrb.mxu0 %v7506_v49  ;;  %v7534_v63 = vld [vmem:[#allocation7 + $0x5e8] sm:$0xff] }
 0x31d   :  { %1789 = vmatpush.msrb.mxu1 %v6697_v16  ;;  %2086 = vmatpush.msra.mxu2 %v7510_v7  ;;  %11540 = vst [vmem:[#allocation216_spill] sm:$0xff] %v7534_v63  ;;  %v7542_v16 = vld [vmem:[#allocation7 + $0x5a0] sm:$0xff] }
 0x31e   :  { %1829 = vmatpush.msra.mxu3 %v6701_v8  ;;  %2125 = vmatpush.msrb.mxu0 %v7514_v50  ;;  %11541 = vst [vmem:[#allocation217_spill] sm:$0xff] %v7542_v16  ;;  %v7546_v8 = vld [vmem:[#allocation7 + $0x638] sm:$0xff] }
 0x31f   :  { %1790 = vmatpush.msrb.mxu1 %v6705_v27  ;;  %2087 = vmatpush.msra.mxu2 %v7518_v28  ;;  %11542 = vst [vmem:[#allocation218_spill] sm:$0xff] %v7546_v8  ;;  %v7550_v27 = vld [vmem:[#allocation7 + $0x558] sm:$0xff] }
 0x320   :  { %1830 = vmatpush.msra.mxu3 %v6709_v29  ;;  %2126 = vmatpush.msrb.mxu0 %v7522_v35  ;;  %11543 = vst [vmem:[#allocation219_spill] sm:$0xff] %v7550_v27  ;;  %v7554_v29 = vld [vmem:[#allocation7 + $0x5f0] sm:$0xff] }
 0x321   :  { %1791 = vmatpush.msrb.mxu1 %v6713_v62  ;;  %2088 = vmatpush.msra.mxu2 %v7526_v53  ;;  %11544 = vst [vmem:[#allocation220_spill] sm:$0xff] %v7554_v29  ;;  %v7558_v62 = vld [vmem:[#allocation7 + $0x510] sm:$0xff] }
 0x322   :  { %1831 = vmatpush.msra.mxu3 %v6717_v38  ;;  %2127 = vmatpush.msrb.mxu0 %v7530_v36  ;;  %11545 = vst [vmem:[#allocation221_spill] sm:$0xff] %v7558_v62  ;;  %v7562_v38 = vld [vmem:[#allocation7 + $0x5a8] sm:$0xff] }
 0x323   :  { %1792 = vmatpush.msrb.mxu1 %v6721_v58  ;;  %2089 = vmatpush.msra.mxu2 %v7534_v63  ;;  %11546 = vst [vmem:[#allocation222_spill] sm:$0xff] %v7562_v38  ;;  %v7566_v58 = vld [vmem:[#allocation7 + $0x4c8] sm:$0xff]  ;;  %v11665_v63 = vld [vmem:[#allocation86_spill] sm:$0xff] }
 0x324   :  { %1832 = vmatpush.msra.mxu3 %v6725_v17  ;;  %1793 = vmatmul.f32.vlgmr.msrb.gmra.mxu1 %v7409_v30  ;;  %11547 = vst [vmem:[#allocation223_spill] sm:$0xff] %v7566_v58  ;;  %v7570_v17 = vld [vmem:[#allocation7 + $0x560] sm:$0xff]  ;;  %v11669_v53 = vld [vmem:[#allocation45_spill] sm:$0xff] }
 0x325   :  { %1833 = vmatmul.f32.vlgmr.msra.gmra.mxu3 %v7409_v30  ;;  %1857 = vmatpush.msra.mxu1 %v6730_v39  ;;  %11548 = vst [vmem:[#allocation224_spill] sm:$0xff] %v7570_v17  ;;  %v7574_v39 = vld [vmem:[#allocation7 + $0x480] sm:$0xff] }
 0x326   :  { %1897 = vmatpush.msrb.mxu3 %v6733_v11  ;;  %2090 = vmatpush.msra.mxu2 %v7542_v16  ;;  %11549 = vst [vmem:[#allocation225_spill] sm:$0xff] %v7574_v39  ;;  %v11550_v11 = vld [vmem:[#allocation47_spill] sm:$0xff]  ;;  %v11663_v16 = vld [vmem:[#allocation85_spill] sm:$0xff] }
 0x327   :  { %1858 = vmatpush.msra.mxu1 %v6737_v41  ;;  %2128 = vmatpush.msrb.mxu0 %v7546_v8  ;;  %v7578_v41 = vld [vmem:[#allocation7 + $0x8c8] sm:$0xff] }
 0x328   :  { %1898 = vmatpush.msrb.mxu3 %v6741_v21  ;;  %2091 = vmatpush.msra.mxu2 %v7550_v27  ;;  %11551 = vst [vmem:[#allocation47_spill] sm:$0xff] %v7578_v41  ;;  %v11552_v21 = vld [vmem:[#allocation48_spill] sm:$0xff]  ;;  %v11661_v27 = vld [vmem:[#allocation21_spill] sm:$0xff] }
 0x329   :  { %1859 = vmatpush.msra.mxu1 %v6745_v55  ;;  %2129 = vmatpush.msrb.mxu0 %v7554_v29  ;;  %v7582_v55 = vld [vmem:[#allocation7 + $0x518] sm:$0xff]  ;;  %v11666_v8 = vld [vmem:[#allocation89_spill] sm:$0xff] }
 0x32a   :  { %1899 = vmatpush.msrb.mxu3 %v6749_v20  ;;  %2092 = vmatpush.msra.mxu2 %v7558_v62  ;;  %11553 = vst [vmem:[#allocation48_spill] sm:$0xff] %v7582_v55  ;;  %v11554_v20 = vld [vmem:[#allocation49_spill] sm:$0xff]  ;;  %v1694_v62 = vpop.f32.mrf.mxu0 }
 0x32b   :  { %1860 = vmatpush.msra.mxu1 %v6753_v12  ;;  %2130 = vmatpush.msrb.mxu0 %v7562_v38  ;;  %v7586_v12 = vld [vmem:[#allocation7 + $0x880] sm:$0xff] }
 0x32c   :  { %1900 = vmatpush.msrb.mxu3 %v6757_v1  ;;  %2093 = vmatpush.msra.mxu2 %v7566_v58  ;;  %11555 = vst [vmem:[#allocation49_spill] sm:$0xff] %v7586_v12  ;;  %v11556_v1 = vld [vmem:[#allocation50_spill] sm:$0xff] }
 0x32d   :  { %1861 = vmatpush.msra.mxu1 %v6761_v51  ;;  %2131 = vmatpush.msrb.mxu0 %v7570_v17  ;;  %v7590_v51 = vld [vmem:[#allocation7 + $0x4d0] sm:$0xff] }
 0x32e   :  { %1901 = vmatpush.msrb.mxu3 %v6765_v23  ;;  %2094 = vmatpush.msra.mxu2 %v7574_v39  ;;  %11557 = vst [vmem:[#allocation50_spill] sm:$0xff] %v7590_v51  ;;  %v11558_v23 = vld [vmem:[#allocation51_spill] sm:$0xff]  ;;  %v11606_v58 = vld [vmem:[#allocation90_spill] sm:$0xff] }
 0x32f   :  { %1862 = vmatpush.msra.mxu1 %v11550_v11  ;;  %2132 = vmatpush.msrb.mxu0 %v7582_v55  ;;  %v7594_v11 = vld [vmem:[#allocation7 + $0x838] sm:$0xff] }
 0x330   :  { %2159 = vmatpush.msrb.mxu2 %v7578_v41  ;;  %1902 = vmatpush.msrb.mxu3 %v11552_v21  ;;  %11559 = vst [vmem:[#allocation51_spill] sm:$0xff] %v7594_v11  ;;  %v11560_v21 = vld [vmem:[#allocation52_spill] sm:$0xff]  ;;  %v11565_v39 = vld [vmem:[#allocation55_spill] sm:$0xff] }
 0x331   :  { %1863 = vmatpush.msra.mxu1 %v11554_v20  ;;  %2133 = vmatpush.msrb.mxu0 %v7590_v51  ;;  %v7598_v41 = vld [vmem:[#allocation7 + $0x488] sm:$0xff]  ;;  %v7612_v51 = vld [vmem:[#allocation7 + $0x760] sm:$0xff] }
 0x332   :  { %2160 = vmatpush.msrb.mxu2 %v7586_v12  ;;  %1903 = vmatpush.msrb.mxu3 %v11556_v1  ;;  %11561 = vst [vmem:[#allocation52_spill] sm:$0xff] %v7598_v41  ;;  %v11562_v20 = vld [vmem:[#allocation53_spill] sm:$0xff]  ;;  %v11564_v1 = vld [vmem:[#allocation54_spill] sm:$0xff]  ;;  %v11610_v55 = vld [vmem:[#allocation99_spill] sm:$0xff] }
 0x333   :  { %1864 = vmatpush.msra.mxu1 %v11558_v23  ;;  %2134 = vmatpush.msrb.mxu0 %v7598_v41  ;;  %v7602_v12 = vld [vmem:[#allocation7 + $0x7f0] sm:$0xff]  ;;  %v7607_v23 = vld [vmem:[#allocation7 + $0x7a8] sm:$0xff]  ;;  %11569 = vst [vmem:[#allocation55_spill] sm:$0xff] %v7612_v51  ;;  %v11571_v41 = vld [vmem:[#allocation59_spill] sm:$0xff] }
 0x334   :  { %2161 = vmatpush.msrb.mxu2 %v7594_v11  ;;  %1904 = vmatpush.msrb.mxu3 %v11560_v21  ;;  %11563 = vst [vmem:[#allocation53_spill] sm:$0xff] %v7602_v12  ;;  %v11567_v11 = vld [vmem:[#allocation56_spill] sm:$0xff]  ;;  %v11568_v21 = vld [vmem:[#allocation57_spill] sm:$0xff] }
 0x335   :  { %1865 = vmatpush.msra.mxu1 %v11562_v20  ;;  %11566 = vst [vmem:[#allocation54_spill] sm:$0xff] %v7607_v23  ;;  %v11570_v20 = vld [vmem:[#allocation58_spill] sm:$0xff] }
 0x336   :  { %2162 = vmatpush.msrb.mxu2 %v7602_v12  ;;  %1905 = vmatpush.msrb.mxu3 %v11564_v1  ;;  %v7617_v12 = vld [vmem:[#allocation7 + $0x718] sm:$0xff]  ;;  %v11574_v1 = vld [vmem:[#allocation61_spill] sm:$0xff] }
 0x337   :  { %1866 = vmatpush.msra.mxu1 %v11565_v39  ;;  %11572 = vst [vmem:[#allocation56_spill] sm:$0xff] %v7617_v12  ;;  %v11573_v39 = vld [vmem:[#allocation60_spill] sm:$0xff] }
 0x338   :  { %2163 = vmatpush.msrb.mxu2 %v7607_v23  ;;  %1906 = vmatpush.msrb.mxu3 %v11567_v11  ;;  %v7622_v23 = vld [vmem:[#allocation7 + $0x6d0] sm:$0xff] }
 0x339   :  { %1867 = vmatpush.msra.mxu1 %v11568_v21  ;;  %11575 = vst [vmem:[#allocation57_spill] sm:$0xff] %v7622_v23  ;;  %v11576_v11 = vld [vmem:[#allocation62_spill] sm:$0xff]  ;;  %v11577_v21 = vld [vmem:[#allocation63_spill] sm:$0xff] }
 0x33a   :  { %2164 = vmatpush.msrb.mxu2 %v7612_v51  ;;  %1907 = vmatpush.msrb.mxu3 %v11570_v20  ;;  %v7627_v51 = vld [vmem:[#allocation7 + $0x688] sm:$0xff] }
 0x33b   :  { %1868 = vmatpush.msra.mxu1 %v11571_v41  ;;  %11578 = vst [vmem:[#allocation58_spill] sm:$0xff] %v7627_v51  ;;  %v11579_v41 = vld [vmem:[#allocation64_spill] sm:$0xff]  ;;  %v11580_v20 = vld [vmem:[#allocation65_spill] sm:$0xff] }
 0x33c   :  { %2165 = vmatpush.msrb.mxu2 %v7617_v12  ;;  %1908 = vmatpush.msrb.mxu3 %v11573_v39  ;;  %v7632_v12 = vld [vmem:[#allocation7 + $0x640] sm:$0xff]  ;;  %v11582_v39 = vld [vmem:[#allocation66_spill] sm:$0xff] }
 0x33d   :  { %1869 = vmatpush.msra.mxu1 %v11574_v1  ;;  %11581 = vst [vmem:[#allocation59_spill] sm:$0xff] %v7632_v12  ;;  %v11583_v1 = vld [vmem:[#allocation67_spill] sm:$0xff] }
 0x33e   :  { %2166 = vmatpush.msrb.mxu2 %v7622_v23  ;;  %1909 = vmatpush.msrb.mxu3 %v11576_v11  ;;  %v7637_v23 = vld [vmem:[#allocation7 + $0x5f8] sm:$0xff]  ;;  %v11585_v11 = vld [vmem:[#allocation68_spill] sm:$0xff] }
 0x33f   :  { %1870 = vmatpush.msra.mxu1 %v11577_v21  ;;  %11584 = vst [vmem:[#allocation60_spill] sm:$0xff] %v7637_v23  ;;  %v11586_v21 = vld [vmem:[#allocation69_spill] sm:$0xff] }
 0x340   :  { %2167 = vmatpush.msrb.mxu2 %v7627_v51  ;;  %1910 = vmatpush.msrb.mxu3 %v11579_v41  ;;  %v11587_v41 = vld [vmem:[#allocation70_spill] sm:$0xff]  ;;  %v7655_v51 = vld [vmem:[#allocation7 + $0x520] sm:$0xff] }
 0x341   :  { %1871 = vmatpush.msra.mxu1 %v11580_v20  ;;  %v7645_v20 = vld [vmem:[#allocation7 + $0x5b0] sm:$0xff]  ;;  %11594 = vst [vmem:[#allocation63_spill] sm:$0xff] %v7655_v51 }
 0x342   :  { %2168 = vmatpush.msrb.mxu2 %v7632_v12  ;;  %1911 = vmatpush.msrb.mxu3 %v11582_v39  ;;  %11588 = vst [vmem:[#allocation61_spill] sm:$0xff] %v7645_v20  ;;  %v11589_v39 = vld [vmem:[#allocation71_spill] sm:$0xff]  ;;  %v7650_v12 = vld [vmem:[#allocation7 + $0x568] sm:$0xff] }
 0x343   :  { %1872 = vmatpush.msra.mxu1 %v11583_v1  ;;  %v11590_v1 = vld [vmem:[#allocation72_spill] sm:$0xff]  ;;  %11591 = vst [vmem:[#allocation62_spill] sm:$0xff] %v7650_v12 }
 0x344   :  { %2169 = vmatpush.msrb.mxu2 %v7637_v23  ;;  %1912 = vmatpush.msrb.mxu3 %v11585_v11  ;;  %v11592_v11 = vld [vmem:[#allocation73_spill] sm:$0xff]  ;;  %v11593_v23 = vld [vmem:[#allocation74_spill] sm:$0xff] }
 0x345   :  { %1873 = vmatmul.f32.vlgmr.msra.gmra.mxu1 %v7409_v30  ;;  %1913 = vmatmul.f32.vlgmr.msrb.gmra.mxu3 %v7409_v30 }
 0x346   :  { %1937 = vmatpush.msrb.mxu1 %v11586_v21  ;;  %1977 = vmatpush.msra.mxu3 %v11587_v41  ;;  %v11595_v21 = vld [vmem:[#allocation75_spill] sm:$0xff]  ;;  %v11596_v41 = vld [vmem:[#allocation76_spill] sm:$0xff] }
 0x347   :  { %2170 = vmatpush.msrb.mxu2 %v7645_v20  ;;  %v7660_v20 = vld [vmem:[#allocation7 + $0x4d8] sm:$0xff] }
 0x348   :  { %1938 = vmatpush.msrb.mxu1 %v11589_v39  ;;  %1978 = vmatpush.msra.mxu3 %v11590_v1  ;;  %11597 = vst [vmem:[#allocation64_spill] sm:$0xff] %v7660_v20  ;;  %v11598_v39 = vld [vmem:[#allocation77_spill] sm:$0xff]  ;;  %v11599_v1 = vld [vmem:[#allocation78_spill] sm:$0xff] }
 0x349   :  { %2171 = vmatpush.msrb.mxu2 %v7650_v12  ;;  %v7665_v12 = vld [vmem:[#allocation7 + $0x490] sm:$0xff] }
 0x34a   :  { %1939 = vmatpush.msrb.mxu1 %v11592_v11  ;;  %1979 = vmatpush.msra.mxu3 %v11593_v23  ;;  %11600 = vst [vmem:[#allocation65_spill] sm:$0xff] %v7665_v12  ;;  %v11601_v23 = vld [vmem:[#allocation79_spill] sm:$0xff]  ;;  %v11602_v11 = vld [vmem:[#allocation80_spill] sm:$0xff] }
 0x34b   :  { %2172 = vmatpush.msrb.mxu2 %v7655_v51  ;;  %v11603_v51 = vld [vmem:[#allocation84_spill] sm:$0xff] }
 0x34c   :  { %1940 = vmatpush.msrb.mxu1 %v11595_v21  ;;  %1980 = vmatpush.msra.mxu3 %v11596_v41  ;;  %v11604_v21 = vld [vmem:[#allocation87_spill] sm:$0xff]  ;;  %v11605_v41 = vld [vmem:[#allocation88_spill] sm:$0xff] }
 0x34d   :  { %2173 = vmatpush.msrb.mxu2 %v7660_v20  ;;  %v11607_v20 = vld [vmem:[#allocation92_spill] sm:$0xff] }
 0x34e   :  { %1941 = vmatpush.msrb.mxu1 %v11598_v39  ;;  %1981 = vmatpush.msra.mxu3 %v11599_v1  ;;  %v11608_v39 = vld [vmem:[#allocation94_spill] sm:$0xff]  ;;  %v11609_v1 = vld [vmem:[#allocation96_spill] sm:$0xff] }
 0x34f   :  { %2174 = vmatpush.msrb.mxu2 %v7665_v12  ;;  %v11611_v12 = vld [vmem:[#allocation102_spill] sm:$0xff] }
 0x350   :  { %1942 = vmatpush.msrb.mxu1 %v11601_v23  ;;  %1982 = vmatpush.msra.mxu3 %v11602_v11  ;;  %v11612_v23 = vld [vmem:[#allocation106_spill] sm:$0xff]  ;;  %v11613_v11 = vld [vmem:[#allocation108_spill] sm:$0xff] }
 0x352   :  { %1943 = vmatpush.msrb.mxu1 %v11603_v51  ;;  %1983 = vmatpush.msra.mxu3 %v11604_v21  ;;  %v7681_v51 = vld [vmem:[#allocation7 + $0x5e0] sm:$0xff]  ;;  %v11615_v21 = vld [vmem:[#allocation110_spill] sm:$0xff] }
 0x353   :  { %11614 = vst [vmem:[#allocation66_spill] sm:$0xff] %v7681_v51 }
 0x354   :  { %1944 = vmatpush.msrb.mxu1 %v11605_v41  ;;  %1984 = vmatpush.msra.mxu3 %v11606_v58  ;;  %v7685_v58 = vld [vmem:[#allocation7 + $0x598] sm:$0xff]  ;;  %v7689_v41 = vld [vmem:[#allocation7 + $0x550] sm:$0xff] }
 0x355   :  { %11616 = vst [vmem:[#allocation67_spill] sm:$0xff] %v7685_v58 }
 0x356   :  { %1945 = vmatpush.msrb.mxu1 %v11607_v20  ;;  %1985 = vmatpush.msra.mxu3 %v11608_v39  ;;  %v11617_v20 = vld [vmem:[#allocation112_spill] sm:$0xff]  ;;  %11618 = vst [vmem:[#allocation68_spill] sm:$0xff] %v7689_v41 }
 0x357   :  { %v11621_v39 = vld [vmem:[#allocation116_spill] sm:$0xff] }
 0x358   :  { %1946 = vmatpush.msrb.mxu1 %v11609_v1  ;;  %1986 = vmatpush.msra.mxu3 %v11610_v55  ;;  %v11619_v55 = vld [vmem:[#allocation115_spill] sm:$0xff] }
 0x359   :  { %v7697_v1 = vld [vmem:[#allocation7 + $0x4c0] sm:$0xff] }
 0x35a   :  { %1947 = vmatpush.msrb.mxu1 %v11611_v12  ;;  %1987 = vmatpush.msra.mxu3 %v11612_v23  ;;  %v7693_v12 = vld [vmem:[#allocation7 + $0x508] sm:$0xff]  ;;  %11622 = vst [vmem:[#allocation70_spill] sm:$0xff] %v7697_v1 }
 0x35b   :  { %11620 = vst [vmem:[#allocation69_spill] sm:$0xff] %v7693_v12  ;;  %v11623_v23 = vld [vmem:[#allocation117_spill] sm:$0xff] }
 0x35c   :  { %1948 = vmatpush.msrb.mxu1 %v11613_v11  ;;  %1988 = vmatpush.msra.mxu3 %v7681_v51  ;;  %v7703_v11 = vld [vmem:[#allocation7 + $0x440] sm:$0xff] }
 0x35d   :  { %11624 = vst [vmem:[#allocation71_spill] sm:$0xff] %v7703_v11 }
 0x35e   :  { %1949 = vmatpush.msrb.mxu1 %v11615_v21  ;;  %1989 = vmatpush.msra.mxu3 %v7685_v58  ;;  %v11625_v21 = vld [vmem:[#allocation118_spill] sm:$0xff] }
 0x35f   :  { %v7760_v58 = vld [vmem:[#allocation7 + $0x50] sm:$0xff] }
 0x360   :  { %1950 = vmatpush.msrb.mxu1 %v11617_v20  ;;  %1990 = vmatpush.msra.mxu3 %v7689_v41  ;;  %v7707_v20 = vld [vmem:[#allocation7 + $0x3f8] sm:$0xff]  ;;  %11653 = vst [vmem:[#allocation92_spill] sm:$0xff] %v7760_v58 }
 0x361   :  { %11626 = vst [vmem:[#allocation72_spill] sm:$0xff] %v7707_v20 }
 0x362   :  { %1951 = vmatpush.msrb.mxu1 %v11619_v55  ;;  %1991 = vmatpush.msra.mxu3 %v7693_v12  ;;  %v11627_v55 = vld [vmem:[#allocation119_spill] sm:$0xff]  ;;  %v7715_v12 = vld [vmem:[#allocation7 + $0x368] sm:$0xff] }
 0x363   :  { %11630 = vst [vmem:[#allocation74_spill] sm:$0xff] %v7715_v12 }
 0x364   :  { %1952 = vmatpush.msrb.mxu1 %v11621_v39  ;;  %1992 = vmatpush.msra.mxu3 %v7697_v1  ;;  %v7711_v39 = vld [vmem:[#allocation7 + $0x3b0] sm:$0xff]  ;;  %v11629_v1 = vld [vmem:[#allocation120_spill] sm:$0xff] }
 0x365   :  { %1953 = vmatmul.f32.vlgmr.msrb.gmra.mxu1 %v7409_v30  ;;  %1993 = vmatmul.f32.vlgmr.msra.gmra.mxu3 %v7409_v30  ;;  %11628 = vst [vmem:[#allocation73_spill] sm:$0xff] %v7711_v39 }
 0x366   :  { %2059 = vmatpush.msra.mxu1 %v11623_v23  ;;  %2099 = vmatpush.msrb.mxu3 %v7703_v11  ;;  %v11631_v23 = vld [vmem:[#allocation44_spill] sm:$0xff] }
 0x367   :  { %v7719_v11 = vld [vmem:[#allocation7 + $0x320] sm:$0xff] }
 0x368   :  { %2060 = vmatpush.msra.mxu1 %v11625_v21  ;;  %2100 = vmatpush.msrb.mxu3 %v7707_v20  ;;  %11632 = vst [vmem:[#allocation75_spill] sm:$0xff] %v7719_v11  ;;  %v11633_v21 = vld [vmem:[#allocation121_spill] sm:$0xff]  ;;  %v7723_v20 = vld [vmem:[#allocation7 + $0x2d8] sm:$0xff] }
 0x369   :  { %11634 = vst [vmem:[#allocation76_spill] sm:$0xff] %v7723_v20 }
 0x36a   :  { %2061 = vmatpush.msra.mxu1 %v11627_v55  ;;  %2101 = vmatpush.msrb.mxu3 %v7711_v39  ;;  %v11635_v55 = vld [vmem:[#allocation122_spill] sm:$0xff] }
 0x36b   :  { %v7727_v39 = vld [vmem:[#allocation7 + $0x290] sm:$0xff] }
 0x36c   :  { %2062 = vmatpush.msra.mxu1 %v11629_v1  ;;  %2102 = vmatpush.msrb.mxu3 %v7715_v12  ;;  %11636 = vst [vmem:[#allocation77_spill] sm:$0xff] %v7727_v39  ;;  %v11637_v1 = vld [vmem:[#allocation123_spill] sm:$0xff]  ;;  %v7731_v12 = vld [vmem:[#allocation7 + $0x248] sm:$0xff] }
 0x36d   :  { %11638 = vst [vmem:[#allocation78_spill] sm:$0xff] %v7731_v12 }
 0x36e   :  { %2063 = vmatpush.msra.mxu1 %v11631_v23  ;;  %2103 = vmatpush.msrb.mxu3 %v7719_v11  ;;  %v11639_v23 = vld [vmem:[#allocation124_spill] sm:$0xff] }
 0x36f   :  { %v7735_v11 = vld [vmem:[#allocation7 + $0x200] sm:$0xff] }
 0x370   :  { %2064 = vmatpush.msra.mxu1 %v11633_v21  ;;  %2104 = vmatpush.msrb.mxu3 %v7723_v20  ;;  %11640 = vst [vmem:[#allocation79_spill] sm:$0xff] %v7735_v11  ;;  %v11641_v21 = vld [vmem:[#allocation125_spill] sm:$0xff]  ;;  %v7739_v20 = vld [vmem:[#allocation7 + $0x1b8] sm:$0xff] }
 0x371   :  { %11642 = vst [vmem:[#allocation80_spill] sm:$0xff] %v7739_v20 }
 0x372   :  { %2065 = vmatpush.msra.mxu1 %v11635_v55  ;;  %2105 = vmatpush.msrb.mxu3 %v7727_v39  ;;  %v11643_v55 = vld [vmem:[#allocation126_spill] sm:$0xff] }
 0x373   :  { %v7743_v39 = vld [vmem:[#allocation7 + $0x170] sm:$0xff] }
 0x374   :  { %2066 = vmatpush.msra.mxu1 %v11637_v1  ;;  %2106 = vmatpush.msrb.mxu3 %v7731_v12  ;;  %11644 = vst [vmem:[#allocation84_spill] sm:$0xff] %v7743_v39  ;;  %v11645_v1 = vld [vmem:[#allocation127_spill] sm:$0xff]  ;;  %v7747_v12 = vld [vmem:[#allocation7 + $0x128] sm:$0xff] }
 0x375   :  { %11646 = vst [vmem:[#allocation87_spill] sm:$0xff] %v7747_v12 }
 0x376   :  { %2067 = vmatpush.msra.mxu1 %v11639_v23  ;;  %2107 = vmatpush.msrb.mxu3 %v7735_v11  ;;  %v11647_v23 = vld [vmem:[#allocation128_spill] sm:$0xff] }
 0x377   :  { %v7751_v11 = vld [vmem:[#allocation7 + $0xe0] sm:$0xff] }
 0x378   :  { %2068 = vmatpush.msra.mxu1 %v11641_v21  ;;  %2108 = vmatpush.msrb.mxu3 %v7739_v20  ;;  %11648 = vst [vmem:[#allocation88_spill] sm:$0xff] %v7751_v11  ;;  %v11649_v21 = vld [vmem:[#allocation129_spill] sm:$0xff]  ;;  %v7755_v20 = vld [vmem:[#allocation7 + $0x98] sm:$0xff] }
 0x379   :  { %11650 = vst [vmem:[#allocation90_spill] sm:$0xff] %v7755_v20 }
 0x37a   :  { %2069 = vmatpush.msra.mxu1 %v11643_v55  ;;  %2109 = vmatpush.msrb.mxu3 %v7743_v39  ;;  %v11651_v39 = vld [vmem:[#allocation130_spill] sm:$0xff] }
 0x37c   :  { %2070 = vmatpush.msra.mxu1 %v11645_v1  ;;  %2110 = vmatpush.msrb.mxu3 %v7747_v12  ;;  %v11652_v1 = vld [vmem:[#allocation133_spill] sm:$0xff]  ;;  %v11654_v12 = vld [vmem:[#allocation131_spill] sm:$0xff] }
 0x37e   :  { %2071 = vmatpush.msra.mxu1 %v11647_v23  ;;  %2111 = vmatpush.msrb.mxu3 %v7751_v11  ;;  %v1654_v23 = vpop.f32.mrf.mxu2  ;;  %v7764_v11 = vld [vmem:[#allocation7 + $0x8] sm:$0xff] }
 0x37f   :  { %11655 = vst [vmem:[#allocation94_spill] sm:$0xff] %v7764_v11 }
 0x380   :  { %2072 = vmatpush.msra.mxu1 %v11649_v21  ;;  %2112 = vmatpush.msrb.mxu3 %v7755_v20  ;;  %v11656_v21 = vld [vmem:[#allocation132_spill] sm:$0xff]  ;;  %v11657_v20 = vld [vmem:[#allocation81_spill] sm:$0xff] }
 0x381   :  { %v1628_v55 = vpop.f32.mrf.mxu1 }
 0x382   :  { %2073 = vmatpush.msra.mxu1 %v11651_v39  ;;  %v1629_v41 = vadd.f32 %v11652_v1, %v1628_v55  ;;  %2113 = vmatpush.msrb.mxu3 %v7760_v58  ;;  %v11658_v39 = vld [vmem:[#allocation35_spill] sm:$0xff]  ;;  %v11659_v55 = vld [vmem:[#allocation82_spill] sm:$0xff] }
 0x383   :  { %v1655_v17 = vadd.f32 %v1654_v23, %v11658_v39  ;;  %v11660_v58 = vld [vmem:[#allocation83_spill] sm:$0xff] }
 0x384   :  { %2074 = vmatpush.msra.mxu1 %v11654_v12  ;;  %v1631_v51 = vmul.f32 0.5, %v1629_v41  ;;  %2114 = vmatpush.msrb.mxu3 %v7764_v11  ;;  %v11662_v12 = vld [vmem:[#allocation18_spill] sm:$0xff]  ;;  %v11664_v11 = vld [vmem:[#allocation24_spill] sm:$0xff]  ;;  %v11667_v23 = vld [vmem:[#allocation91_spill] sm:$0xff] }
 0x385   :  { %v205_v41 = vadd.f32 %v11662_v12, %v11661_v27  ;;  %v1695_v29 = vadd.f32 %v1694_v62, %v11664_v11  ;;  %v11670_v12 = vld [vmem:[#allocation32_spill] sm:$0xff]  ;;  %v11672_v62 = vld [vmem:[#allocation97_spill] sm:$0xff] }
 0x386   :  { %2139 = vmatpush.msrb.mxu1 %v11656_v21  ;;  %2179 = vmatpush.msra.mxu3 %v11657_v20  ;;  %4091 = vtanh.f32 %v1631_v51 }
 0x387   :  { %v1674_v1 = vpop.f32.mrf.mxu3 }
 0x388   :  { %2140 = vmatpush.msrb.mxu1 %v11659_v55  ;;  %2180 = vmatpush.msra.mxu3 %v11660_v58  ;;  %v1675_v38 = vadd.f32 %v1674_v1, %v1655_v17  ;;  %v11668_v58 = vld [vmem:[#allocation93_spill] sm:$0xff]  ;;  %v246_v17 = vadd.f32 %v11670_v12, %v11669_v53 }
 0x389   :  { %v1714_v21 = vpop.f32.mrf.mxu1 }
 0x38a   :  { %2141 = vmatpush.msrb.mxu1 %v11663_v16  ;;  %2181 = vmatpush.msra.mxu3 %v11665_v63  ;;  %v2001_v20 = vadd.f32 %v1675_v38, %v205_v41  ;;  %v1715_v51 = vadd.f32 %v1714_v21, %v1695_v29  ;;  %v11671_v16 = vld [vmem:[#allocation95_spill] sm:$0xff]  ;;  %v11673_v41 = vld [vmem:[#allocation98_spill] sm:$0xff]  ;;  %v11674_v29 = vld [vmem:[#allocation100_spill] sm:$0xff] }
 0x38c   :  { %2142 = vmatpush.msrb.mxu1 %v11666_v8  ;;  %2182 = vmatpush.msra.mxu3 %v11667_v23  ;;  %v4092_v55 = vpop.eup %4091  ;;  %v2002_v39 = vmul.f32 0.5, %v2001_v20  ;;  %v2006_v38 = vadd.f32 %v1715_v51, %v246_v17  ;;  %v1734_v8 = vpop.f32.mrf.mxu2  ;;  %v11675_v20 = vld [vmem:[#allocation101_spill] sm:$0xff]  ;;  %v11677_v51 = vld [vmem:[#allocation26_spill] sm:$0xff] }
 0x38d   :  { %v1633_v1 = vmul.f32 0.5, %v4092_v55  ;;  %v11676_v55 = vld [vmem:[#allocation103_spill] sm:$0xff]  ;;  %v11679_v17 = vld [vmem:[#allocation105_spill] sm:$0xff] }
 0x38e   :  { %2143 = vmatpush.msrb.mxu1 %v11668_v58  ;;  %2183 = vmatpush.msra.mxu3 %v11671_v16  ;;  %4093 = vtanh.f32 %v2002_v39  ;;  %v2007_v21 = vmul.f32 0.5, %v2006_v38  ;;  %v1735_v58 = vadd.f32 %v1734_v8, %v11677_v51  ;;  %v11680_v16 = vld [vmem:[#allocation107_spill] sm:$0xff] }
 0x38f   :  { %v1634_v63 = vadd.f32 0.5, %v1633_v1  ;;  %v11683_v38 = vld [vmem:[#allocation31_spill] sm:$0xff] }
 0x390   :  { %2144 = vmatpush.msrb.mxu1 %v11672_v62  ;;  %2184 = vmatpush.msra.mxu3 %v11673_v41  ;;  %v1754_v23 = vpop.f32.mrf.mxu3  ;;  %4095 = vtanh.f32 %v2007_v21  ;;  %v11681_v62 = vld [vmem:[#allocation109_spill] sm:$0xff]  ;;  %v11737_v51 = vld [vmem:[#allocation179_spill] sm:$0xff] }
 0x391   :  { %4037 = vst [vmem:[%s10313_s7 + $0x8] sm:$0xff] %v1634_v63  ;;  %v1755_v1 = vadd.f32 %v1754_v23, %v1735_v58  ;;  %v11682_v63 = vld [vmem:[#allocation27_spill] sm:$0xff]  ;;  %v11688_v23 = vld [vmem:[#allocation29_spill] sm:$0xff]  ;;  %v11689_v58 = vld [vmem:[#allocation28_spill] sm:$0xff] }
 0x392   :  { %2145 = vmatpush.msrb.mxu1 %v7062_v32  ;;  %2185 = vmatpush.msra.mxu3 %v7065_v57  ;;  %v11678_v32 = vld [vmem:[#allocation104_spill] sm:$0xff]  ;;  %v287_v41 = vadd.f32 %v11683_v38, %v11682_v63  ;;  %v11694_v38 = vld [vmem:[#allocation138_spill] sm:$0xff]  ;;  %v11735_v63 = vld [vmem:[#allocation177_spill] sm:$0xff] }
 0x394   :  { %2146 = vmatpush.msrb.mxu1 %v11674_v29  ;;  %2186 = vmatpush.msra.mxu3 %v11675_v20  ;;  %v4094_v39 = vpop.eup %4093  ;;  %v11684_v20 = vld [vmem:[#allocation111_spill] sm:$0xff] }
 0x395   :  { %v2004_v12 = vmul.f32 0.5, %v4094_v39  ;;  %v11686_v39 = vld [vmem:[#allocation113_spill] sm:$0xff] }
 0x396   :  { %2147 = vmatpush.msrb.mxu1 %v11676_v55  ;;  %2187 = vmatpush.msra.mxu3 %v11678_v32  ;;  %v11685_v55 = vld [vmem:[#allocation17_spill] sm:$0xff]  ;;  %v11687_v32 = vld [vmem:[#allocation114_spill] sm:$0xff]  ;;  %v4096_v21 = vpop.eup %4095 }
 0x397   :  { %v2005_v57 = vadd.f32 0.5, %v2004_v12  ;;  %v11690_v12 = vld [vmem:[#allocation134_spill] sm:$0xff] }
 0x398   :  { %2148 = vmatpush.msrb.mxu1 %v11679_v17  ;;  %2188 = vmatpush.msra.mxu3 %v11680_v16  ;;  %v2009_v17 = vmul.f32 0.5, %v4096_v21  ;;  %v11691_v16 = vld [vmem:[#allocation135_spill] sm:$0xff]  ;;  %v11698_v21 = vld [vmem:[#allocation142_spill] sm:$0xff] }
 0x399   :  { %v2011_v29 = vmul.f32 %v2005_v57, %v1755_v1  ;;  %v11692_v1 = vld [vmem:[#allocation136_spill] sm:$0xff]  ;;  %v11693_v57 = vld [vmem:[#allocation137_spill] sm:$0xff] }
 0x39a   :  { %2149 = vmatpush.msrb.mxu1 %v11681_v62  ;;  %2189 = vmatpush.msra.mxu3 %v11684_v20 }
 0x39b   :  { %v2012_v8 = vadd.f32 %v2011_v29, %v287_v41  ;;  %v2010_v41 = vadd.f32 0.5, %v2009_v17  ;;  %v11703_v17 = vld [vmem:[#allocation147_spill] sm:$0xff] }
 0x39c   :  { %2150 = vmatpush.msrb.mxu1 %v11685_v55  ;;  %2190 = vmatpush.msra.mxu3 %v11686_v39  ;;  %v11696_v39 = vld [vmem:[#allocation140_spill] sm:$0xff] }
 0x39d   :  { %4097 = vtanh.f32 %v2012_v8  ;;  %v11695_v8 = vld [vmem:[#allocation139_spill] sm:$0xff] }
 0x39e   :  { %2151 = vmatpush.msrb.mxu1 %v11687_v32  ;;  %2191 = vmatpush.msra.mxu3 %v11688_v23  ;;  %v11697_v32 = vld [vmem:[#allocation141_spill] sm:$0xff]  ;;  %v11699_v23 = vld [vmem:[#allocation143_spill] sm:$0xff] }
 0x3a0   :  { %2152 = vmatpush.msrb.mxu1 %v11689_v58  ;;  %2192 = vmatpush.msra.mxu3 %v11690_v12  ;;  %v11700_v58 = vld [vmem:[#allocation144_spill] sm:$0xff]  ;;  %v11702_v12 = vld [vmem:[#allocation146_spill] sm:$0xff] }
 0x3a2   :  { %2153 = vmatpush.msrb.mxu1 %v11691_v16  ;;  %2193 = vmatpush.msra.mxu3 %v11692_v1  ;;  %v11704_v16 = vld [vmem:[#allocation148_spill] sm:$0xff]  ;;  %v11705_v1 = vld [vmem:[#allocation149_spill] sm:$0xff] }
 0x3a3   :  { %v4098_v62 = vpop.eup %4097 }
 0x3a4   :  { %2154 = vmatpush.msrb.mxu1 %v11693_v57  ;;  %2194 = vmatpush.msra.mxu3 %v11694_v38  ;;  %v2014_v29 = vsub.f32 %v7125_v0, %v4098_v62  ;;  %v11701_v0 = vld [vmem:[#allocation145_spill] sm:$0xff]  ;;  %v11706_v57 = vld [vmem:[#allocation150_spill] sm:$0xff]  ;;  %v11708_v38 = vld [vmem:[#allocation152_spill] sm:$0xff] }
 0x3a6   :  { %v2015_v20 = vmul.f32 %v2014_v29, %v2010_v41  ;;  %v11709_v41 = vld [vmem:[#allocation153_spill] sm:$0xff]  ;;  %v11710_v29 = vld [vmem:[#allocation154_spill] sm:$0xff] }
 0x3a8   :  { %v7812_v55 = vadd.f32 %v4098_v62, %v2015_v20  ;;  %v11707_v62 = vld [vmem:[#allocation151_spill] sm:$0xff] }
 0x3a9   :  { %v11711_v20 = vld [vmem:[#allocation155_spill] sm:$0xff] }
 0x3aa   :  { %2075 = vmatmul.f32.vlgmr.msra.gmra.mxu1 %v7812_v55  ;;  %2115 = vmatmul.f32.vlgmr.msrb.gmra.mxu3 %v7812_v55 }
 0x3ab   :  { %2219 = vmatpush.msra.mxu1 %v11695_v8  ;;  %2259 = vmatpush.msrb.mxu3 %v11696_v39  ;;  %v11712_v8 = vld [vmem:[#allocation156_spill] sm:$0xff]  ;;  %v11713_v39 = vld [vmem:[#allocation157_spill] sm:$0xff] }
 0x3ad   :  { %2220 = vmatpush.msra.mxu1 %v11697_v32  ;;  %2260 = vmatpush.msrb.mxu3 %v11698_v21  ;;  %v11714_v32 = vld [vmem:[#allocation158_spill] sm:$0xff]  ;;  %v11715_v21 = vld [vmem:[#allocation159_spill] sm:$0xff] }
 0x3af   :  { %2221 = vmatpush.msra.mxu1 %v11699_v23  ;;  %2261 = vmatpush.msrb.mxu3 %v11700_v58  ;;  %v11716_v23 = vld [vmem:[#allocation160_spill] sm:$0xff]  ;;  %v11717_v58 = vld [vmem:[#allocation161_spill] sm:$0xff] }
 0x3b1   :  { %2222 = vmatpush.msra.mxu1 %v11701_v0  ;;  %2262 = vmatpush.msrb.mxu3 %v11702_v12  ;;  %v11718_v0 = vld [vmem:[#allocation162_spill] sm:$0xff]  ;;  %v1814_v12 = vpop.f32.mrf.mxu2 }
 0x3b2   :  { %2155 = vmatmul.f32.vlgmr.msrb.gmra.mxu1 %v7812_v55  ;;  %2195 = vmatmul.f32.vlgmr.msra.gmra.mxu3 %v7812_v55 }
 0x3b3   :  { %2223 = vmatpush.msra.mxu1 %v11703_v17  ;;  %2263 = vmatpush.msrb.mxu3 %v11704_v16  ;;  %v11719_v17 = vld [vmem:[#allocation163_spill] sm:$0xff]  ;;  %v11720_v16 = vld [vmem:[#allocation164_spill] sm:$0xff] }
 0x3b5   :  { %2224 = vmatpush.msra.mxu1 %v11705_v1  ;;  %2264 = vmatpush.msrb.mxu3 %v11706_v57  ;;  %v1834_v1 = vpop.f32.mrf.mxu3  ;;  %v11721_v57 = vld [vmem:[#allocation165_spill] sm:$0xff] }
 0x3b7   :  { %2225 = vmatpush.msra.mxu1 %v11707_v62  ;;  %2265 = vmatpush.msrb.mxu3 %v11708_v38  ;;  %v11722_v62 = vld [vmem:[#allocation166_spill] sm:$0xff]  ;;  %v11723_v38 = vld [vmem:[#allocation167_spill] sm:$0xff] }
 0x3b9   :  { %2226 = vmatpush.msra.mxu1 %v11709_v41  ;;  %2266 = vmatpush.msrb.mxu3 %v11710_v29  ;;  %v11724_v41 = vld [vmem:[#allocation168_spill] sm:$0xff]  ;;  %v11725_v29 = vld [vmem:[#allocation169_spill] sm:$0xff] }
 0x3bb   :  { %2227 = vmatpush.msra.mxu1 %v11711_v20  ;;  %2267 = vmatpush.msrb.mxu3 %v11712_v8  ;;  %v11726_v20 = vld [vmem:[#allocation170_spill] sm:$0xff]  ;;  %v1894_v8 = vpop.f32.mrf.mxu2 }
 0x3bd   :  { %2228 = vmatpush.msra.mxu1 %v11713_v39  ;;  %2268 = vmatpush.msrb.mxu3 %v11714_v32  ;;  %v11727_v39 = vld [vmem:[#allocation171_spill] sm:$0xff]  ;;  %v11728_v32 = vld [vmem:[#allocation172_spill] sm:$0xff] }
 0x3bf   :  { %2229 = vmatpush.msra.mxu1 %v11715_v21  ;;  %2269 = vmatpush.msrb.mxu3 %v11716_v23  ;;  %v1774_v21 = vpop.f32.mrf.mxu0 }
 0x3c1   :  { %2230 = vmatpush.msra.mxu1 %v11717_v58  ;;  %2270 = vmatpush.msrb.mxu3 %v11718_v0  ;;  %v11729_v58 = vld [vmem:[#allocation173_spill] sm:$0xff]  ;;  %v11730_v0 = vld [vmem:[#allocation174_spill] sm:$0xff] }
 0x3c3   :  { %2231 = vmatpush.msra.mxu1 %v11719_v17  ;;  %2271 = vmatpush.msrb.mxu3 %v11720_v16  ;;  %v11731_v17 = vld [vmem:[#allocation30_spill] sm:$0xff] }
 0x3c4   :  { %v1895_v16 = vadd.f32 %v1894_v8, %v11731_v17  ;;  %v11739_v8 = vld [vmem:[#allocation181_spill] sm:$0xff]  ;;  %v11740_v17 = vld [vmem:[#allocation182_spill] sm:$0xff] }
 0x3c5   :  { %2232 = vmatpush.msra.mxu1 %v11721_v57  ;;  %2272 = vmatpush.msrb.mxu3 %v11722_v62  ;;  %v1794_v57 = vpop.f32.mrf.mxu1  ;;  %v11732_v62 = vld [vmem:[#allocation175_spill] sm:$0xff] }
 0x3c7   :  { %2233 = vmatpush.msra.mxu1 %v11723_v38  ;;  %2273 = vmatpush.msrb.mxu3 %v11724_v41  ;;  %v11733_v38 = vld [vmem:[#allocation176_spill] sm:$0xff]  ;;  %v11734_v41 = vld [vmem:[#allocation34_spill] sm:$0xff]  ;;  %v1854_v53 = vpop.f32.mrf.mxu0 }
 0x3c8   :  { %v1914_v23 = vpop.f32.mrf.mxu3 }
 0x3c9   :  { %2234 = vmatpush.msra.mxu1 %v11725_v29  ;;  %2274 = vmatpush.msrb.mxu3 %v11726_v20  ;;  %v1775_v29 = vadd.f32 %v1774_v21, %v11734_v41  ;;  %v1915_v20 = vadd.f32 %v1914_v23, %v1895_v16  ;;  %v11744_v16 = vld [vmem:[#allocation186_spill] sm:$0xff] }
 0x3ca   :  { %2235 = vmatmul.f32.vlgmr.msra.gmra.mxu1 %v7812_v55  ;;  %2275 = vmatmul.f32.vlgmr.msrb.gmra.mxu3 %v7812_v55 }
 0x3cb   :  { %2299 = vmatpush.msrb.mxu1 %v11727_v39  ;;  %2339 = vmatpush.msra.mxu3 %v11728_v32  ;;  %v11736_v39 = vld [vmem:[#allocation178_spill] sm:$0xff]  ;;  %v1795_v32 = vadd.f32 %v1794_v57, %v1775_v29  ;;  %v11745_v57 = vld [vmem:[#allocation187_spill] sm:$0xff] }
 0x3cd   :  { %2300 = vmatpush.msrb.mxu1 %v11729_v58  ;;  %2340 = vmatpush.msra.mxu3 %v11730_v0  ;;  %v11738_v58 = vld [vmem:[#allocation180_spill] sm:$0xff]  ;;  %v2017_v0 = vadd.f32 %v1915_v20, %v1795_v32  ;;  %v1874_v23 = vpop.f32.mrf.mxu1  ;;  %v11747_v20 = vld [vmem:[#allocation189_spill] sm:$0xff] }
 0x3ce   :  { %v11750_v32 = vld [vmem:[#allocation192_spill] sm:$0xff] }
 0x3cf   :  { %2301 = vmatpush.msrb.mxu1 %v11732_v62  ;;  %2341 = vmatpush.msra.mxu3 %v11733_v38  ;;  %v11741_v62 = vld [vmem:[#allocation183_spill] sm:$0xff]  ;;  %v11742_v38 = vld [vmem:[#allocation184_spill] sm:$0xff]  ;;  %v2018_v21 = vmul.f32 0.5, %v2017_v0  ;;  %v1934_v29 = vpop.f32.mrf.mxu0 }
 0x3d0   :  { %v1935_v0 = vadd.f32 %v1934_v29, %v11526_v56  ;;  %v7884_v56 = vld [vmem:[#allocation8 + $0x8] ss:$0 sm:$0xff] }
 0x3d1   :  { %2302 = vmatpush.msrb.mxu1 %v11735_v63  ;;  %2342 = vmatpush.msra.mxu3 %v11736_v39  ;;  %v11743_v63 = vld [vmem:[#allocation185_spill] sm:$0xff]  ;;  %4099 = vtanh.f32 %v2018_v21  ;;  %v11748_v39 = vld [vmem:[#allocation190_spill] sm:$0xff] }
 0x3d3   :  { %2303 = vmatpush.msrb.mxu1 %v11737_v51  ;;  %2343 = vmatpush.msra.mxu3 %v11738_v58  ;;  %v11746_v51 = vld [vmem:[#allocation188_spill] sm:$0xff]  ;;  %v1815_v58 = vadd.f32 %v1814_v12, %v11525_v54 }
 0x3d5   :  { %2304 = vmatpush.msrb.mxu1 %v11739_v8  ;;  %2344 = vmatpush.msra.mxu3 %v11740_v17  ;;  %v11749_v17 = vld [vmem:[#allocation191_spill] sm:$0xff]  ;;  %v1835_v21 = vadd.f32 %v1834_v1, %v1815_v58  ;;  %v11758_v1 = vld [vmem:[#allocation200_spill] sm:$0xff] }
 0x3d7   :  { %2305 = vmatpush.msrb.mxu1 %v11741_v62  ;;  %2345 = vmatpush.msra.mxu3 %v11742_v38  ;;  %v11751_v62 = vld [vmem:[#allocation193_spill] sm:$0xff]  ;;  %v11752_v38 = vld [vmem:[#allocation194_spill] sm:$0xff] }
 0x3d9   :  { %2306 = vmatpush.msrb.mxu1 %v11743_v63  ;;  %2346 = vmatpush.msra.mxu3 %v11744_v16  ;;  %v4100_v63 = vpop.eup %4099 }
 0x3da   :  { %v2020_v12 = vmul.f32 0.5, %v4100_v63 }
 0x3db   :  { %2307 = vmatpush.msrb.mxu1 %v11745_v57  ;;  %2347 = vmatpush.msra.mxu3 %v11746_v51  ;;  %v11753_v57 = vld [vmem:[#allocation195_spill] sm:$0xff]  ;;  %v11754_v51 = vld [vmem:[#allocation196_spill] sm:$0xff] }
 0x3dd   :  { %2308 = vmatpush.msrb.mxu1 %v11747_v20  ;;  %2348 = vmatpush.msra.mxu3 %v11748_v39  ;;  %v1974_v20 = vpop.f32.mrf.mxu2 }
 0x3df   :  { %2309 = vmatpush.msrb.mxu1 %v11749_v17  ;;  %2349 = vmatpush.msra.mxu3 %v11750_v32  ;;  %v11755_v17 = vld [vmem:[#allocation197_spill] sm:$0xff]  ;;  %v11756_v32 = vld [vmem:[#allocation198_spill] sm:$0xff] }
 0x3e1   :  { %2310 = vmatpush.msrb.mxu1 %v11751_v62  ;;  %2350 = vmatpush.msra.mxu3 %v11752_v38  ;;  %v1975_v62 = vadd.f32 %v7884_v56, %v1974_v20  ;;  %v11757_v38 = vld [vmem:[#allocation199_spill] sm:$0xff] }
 0x3e2   :  { %v1954_v8 = vpop.f32.mrf.mxu1 }
 0x3e3   :  { %v1955_v16 = vadd.f32 %v1954_v8, %v1935_v0  ;;  %2311 = vmatpush.msrb.mxu1 %v11753_v57  ;;  %2351 = vmatpush.msra.mxu3 %v11754_v51  ;;  %v11759_v0 = vld [vmem:[#allocation46_spill] sm:$0xff] }
 0x3e4   :  { %v1855_v8 = vadd.f32 %v1854_v53, %v11759_v0  ;;  %v11761_v51 = vld [vmem:[#allocation202_spill] sm:$0xff] }
 0x3e5   :  { %v2022_v39 = vadd.f32 %v1955_v16, %v1835_v21  ;;  %2312 = vmatpush.msrb.mxu1 %v11755_v17  ;;  %2352 = vmatpush.msra.mxu3 %v11756_v32  ;;  %v2021_v21 = vadd.f32 0.5, %v2020_v12  ;;  %v11760_v16 = vld [vmem:[#allocation201_spill] sm:$0xff]  ;;  %v11763_v17 = vld [vmem:[#allocation204_spill] sm:$0xff] }
 0x3e6   :  { %v1875_v63 = vadd.f32 %v1874_v23, %v1855_v8  ;;  %v11764_v12 = vld [vmem:[#allocation205_spill] sm:$0xff] }
 0x3e7   :  { %v2023_v29 = vmul.f32 0.5, %v2022_v39  ;;  %2313 = vmatpush.msrb.mxu1 %v11757_v38  ;;  %2353 = vmatpush.msra.mxu3 %v11758_v1  ;;  %v11762_v39 = vld [vmem:[#allocation203_spill] sm:$0xff] }
 0x3e8   :  { %v1994_v58 = vpop.f32.mrf.mxu3  ;;  %v11766_v38 = vld [vmem:[#allocation207_spill] sm:$0xff] }
 0x3e9   :  { %4101 = vtanh.f32 %v2023_v29  ;;  %v1995_v57 = vadd.f32 %v1994_v58, %v1975_v62  ;;  %2314 = vmatpush.msrb.mxu1 %v11760_v16  ;;  %2354 = vmatpush.msra.mxu3 %v11761_v51  ;;  %v11765_v29 = vld [vmem:[#allocation206_spill] sm:$0xff]  ;;  %v11770_v58 = vld [vmem:[#allocation211_spill] sm:$0xff]  ;;  %v7925_v51 = vld [vmem:[#allocation7 + $0x888] sm:$0xff] }
 0x3ea   :  { %2315 = vmatmul.f32.vlgmr.msrb.gmra.mxu1 %v7812_v55  ;;  %2355 = vmatmul.f32.vlgmr.msra.gmra.mxu3 %v7812_v55  ;;  %v11773_v16 = vld [vmem:[#allocation214_spill] sm:$0xff] }
 0x3eb   :  { %v2027_v20 = vmul.f32 %v2021_v21, %v1995_v57  ;;  %2379 = vmatpush.msra.mxu1 %v11762_v39  ;;  %2455 = vmatpush.msrb.mxu3 %v11763_v17  ;;  %v11772_v57 = vld [vmem:[#allocation213_spill] sm:$0xff]  ;;  %v7920_v21 = vld [vmem:[#allocation7 + $0x8d8] sm:$0xff]  ;;  %v7944_v39 = vld [vmem:[#allocation7 + $0x800] sm:$0xff] }
 0x3ec   :  { %v7965_v17 = vld [vmem:[#allocation7 + $0x720] sm:$0xff] }
 0x3ed   :  { %v2028_v32 = vadd.f32 %v2027_v20, %v1875_v63  ;;  %2380 = vmatpush.msra.mxu1 %v7348_v6  ;;  %2456 = vmatpush.msrb.mxu3 %v7351_v48  ;;  %v11767_v6 = vld [vmem:[#allocation208_spill] sm:$0xff] }
 0x3ee   :  { %v7933_v63 = vld [vmem:[#allocation7 + $0x840] sm:$0xff]  ;;  %v7936_v20 = vld [vmem:[#allocation7 + $0x848] sm:$0xff] }
 0x3ef   :  { %v4102_v53 = vpop.eup %4101  ;;  %4103 = vtanh.f32 %v2028_v32  ;;  %2381 = vmatpush.msra.mxu1 %v7354_v33  ;;  %2457 = vmatpush.msrb.mxu3 %v7357_v19  ;;  %v11768_v33 = vld [vmem:[#allocation209_spill] sm:$0xff]  ;;  %v11769_v19 = vld [vmem:[#allocation210_spill] sm:$0xff] }
 0x3f0   :  { %v2025_v23 = vmul.f32 0.5, %v4102_v53  ;;  %v7968_v32 = vld [vmem:[#allocation7 + $0x728] sm:$0xff]  ;;  %v8061_v53 = vld [vmem:[#allocation7 + $0x850] sm:$0xff] }
 0x3f1   :  { %2382 = vmatpush.msra.mxu1 %v7360_v45  ;;  %2458 = vmatpush.msrb.mxu3 %v7363_v18  ;;  %v11771_v18 = vld [vmem:[#allocation212_spill] sm:$0xff] }
 0x3f2   :  { %v2026_v48 = vadd.f32 0.5, %v2025_v23  ;;  %v8065_v23 = vld [vmem:[#allocation7 + $0x858] sm:$0xff] }
 0x3f3   :  { %2383 = vmatpush.msra.mxu1 %v11764_v12  ;;  %2459 = vmatpush.msrb.mxu3 %v11765_v29  ;;  %v8069_v12 = vld [vmem:[#allocation7 + $0x808] sm:$0xff]  ;;  %v8073_v29 = vld [vmem:[#allocation7 + $0x810] sm:$0xff] }
 0x3f5   :  { %v4104_v62 = vpop.eup %4103  ;;  %2384 = vmatpush.msra.mxu1 %v11766_v38  ;;  %2460 = vmatpush.msrb.mxu3 %v11767_v6  ;;  %v8081_v38 = vld [vmem:[#allocation7 + $0x7c8] sm:$0xff] }
 0x3f6   :  { %v2030_v1 = vsub.f32 %v7409_v30, %v4104_v62  ;;  %v7917_v30 = vld [vmem:[#allocation7 + $0x8d0] sm:$0xff] }
 0x3f7   :  { %2385 = vmatpush.msra.mxu1 %v11768_v33  ;;  %2461 = vmatpush.msrb.mxu3 %v11769_v19  ;;  %v11778_v6 = vld [vmem:[#allocation217_spill] sm:$0xff]  ;;  %v8089_v33 = vld [vmem:[#allocation7 + $0x780] sm:$0xff] }
 0x3f8   :  { %v2031_v45 = vmul.f32 %v2030_v1, %v2026_v48  ;;  %v8085_v48 = vld [vmem:[#allocation7 + $0x778] sm:$0xff]  ;;  %11781 = vst [vmem:[#allocation99_spill] sm:$0xff] %v8089_v33 }
 0x3f9   :  { %2386 = vmatpush.msra.mxu1 %v11770_v58  ;;  %2462 = vmatpush.msrb.mxu3 %v11771_v18  ;;  %11779 = vst [vmem:[#allocation96_spill] sm:$0xff] %v8085_v48  ;;  %v11780_v1 = vld [vmem:[#allocation222_spill] sm:$0xff]  ;;  %v11782_v19 = vld [vmem:[#allocation219_spill] sm:$0xff]  ;;  %v11784_v58 = vld [vmem:[#allocation224_spill] sm:$0xff] }
 0x3fa   :  { %v7911_v8 = vadd.f32 %v4104_v62, %v2031_v45  ;;  %v8077_v62 = vld [vmem:[#allocation7 + $0x7c0] sm:$0xff]  ;;  %v8093_v45 = vld [vmem:[#allocation7 + $0x730] sm:$0xff]  ;;  %v8097_v18 = vld [vmem:[#allocation7 + $0x738] sm:$0xff] }
 0x3fb   :  { %2387 = vmatpush.msra.mxu1 %v11772_v57  ;;  %2463 = vmatpush.msrb.mxu3 %v7393_v31  ;;  %v7928_v31 = vld [vmem:[#allocation7 + $0x890] sm:$0xff]  ;;  %11783 = vst [vmem:[#allocation102_spill] sm:$0xff] %v8093_v45 }
 0x3fc   :  { %2049 = vmatmul.f32.vlgmr.msra.gmra.mxu0 %v7911_v8  ;;  %2095 = vmatmul.f32.vlgmr.msra.gmra.mxu2 %v7911_v8  ;;  %11785 = vst [vmem:[#allocation106_spill] sm:$0xff] %v8097_v18  ;;  %v11786_v57 = vld [vmem:[#allocation221_spill] sm:$0xff] }
 0x3fd   :  { %2199 = vmatpush.msra.mxu0 %v7917_v30  ;;  %2239 = vmatpush.msra.mxu2 %v7920_v21 }
 0x3fe   :  { %2388 = vmatpush.msra.mxu1 %v11773_v16  ;;  %2464 = vmatpush.msrb.mxu3 %v7400_v60  ;;  %v7941_v60 = vld [vmem:[#allocation7 + $0x7f8] sm:$0xff]  ;;  %v8101_v16 = vld [vmem:[#allocation7 + $0x6e8] sm:$0xff] }
 0x3ff   :  { %2200 = vmatpush.msra.mxu0 %v7925_v51  ;;  %2240 = vmatpush.msra.mxu2 %v7928_v31  ;;  %11787 = vst [vmem:[#allocation108_spill] sm:$0xff] %v8101_v16 }
 0x400   :  { %2389 = vmatpush.msra.mxu1 %v7403_v61  ;;  %2465 = vmatpush.msrb.mxu3 %v7406_v59  ;;  %v7949_v59 = vld [vmem:[#allocation7 + $0x7b0] sm:$0xff]  ;;  %v7952_v61 = vld [vmem:[#allocation7 + $0x7b8] sm:$0xff] }
 0x401   :  { %2201 = vmatpush.msra.mxu0 %v7933_v63  ;;  %2241 = vmatpush.msra.mxu2 %v7936_v20 }
 0x402   :  { %2390 = vmatpush.msra.mxu1 %v7411_v37  ;;  %2466 = vmatpush.msrb.mxu3 %v7414_v43  ;;  %v7957_v43 = vld [vmem:[#allocation7 + $0x768] sm:$0xff]  ;;  %v7960_v37 = vld [vmem:[#allocation7 + $0x770] sm:$0xff] }
 0x403   :  { %2202 = vmatpush.msra.mxu0 %v7941_v60  ;;  %2242 = vmatpush.msra.mxu2 %v7944_v39 }
 0x404   :  { %2135 = vmatmul.f32.vlgmr.msrb.gmra.mxu0 %v7911_v8  ;;  %2175 = vmatmul.f32.vlgmr.msrb.gmra.mxu2 %v7911_v8 }
 0x405   :  { %2203 = vmatpush.msra.mxu0 %v7949_v59  ;;  %2243 = vmatpush.msra.mxu2 %v7952_v61 }
 0x406   :  { %2391 = vmatpush.msra.mxu1 %v7421_v9  ;;  %2467 = vmatpush.msrb.mxu3 %v7424_v14  ;;  %v7973_v9 = vld [vmem:[#allocation7 + $0x6d8] sm:$0xff]  ;;  %v7976_v14 = vld [vmem:[#allocation7 + $0x6e0] sm:$0xff] }
 0x407   :  { %2204 = vmatpush.msra.mxu0 %v7957_v43  ;;  %2244 = vmatpush.msra.mxu2 %v7960_v37 }
 0x408   :  { %2392 = vmatpush.msra.mxu1 %v7429_v4  ;;  %2468 = vmatpush.msrb.mxu3 %v7432_v42  ;;  %v7982_v4 = vld [vmem:[#allocation7 + $0x690] sm:$0xff]  ;;  %v7985_v42 = vld [vmem:[#allocation7 + $0x698] sm:$0xff] }
 0x409   :  { %2205 = vmatpush.msra.mxu0 %v7965_v17  ;;  %2245 = vmatpush.msra.mxu2 %v7968_v32 }
 0x40a   :  { %2393 = vmatpush.msra.mxu1 %v7437_v5  ;;  %2469 = vmatpush.msrb.mxu3 %v7440_v44  ;;  %v7989_v5 = vld [vmem:[#allocation7 + $0x648] sm:$0xff]  ;;  %v7993_v44 = vld [vmem:[#allocation7 + $0x650] sm:$0xff] }
 0x40b   :  { %2206 = vmatpush.msra.mxu0 %v7973_v9  ;;  %2246 = vmatpush.msra.mxu2 %v7976_v14 }
 0x40c   :  { %2394 = vmatpush.msra.mxu1 %v7445_v52  ;;  %2470 = vmatpush.msrb.mxu3 %v7458_v15  ;;  %v7997_v52 = vld [vmem:[#allocation7 + $0x600] sm:$0xff]  ;;  %v8001_v15 = vld [vmem:[#allocation7 + $0x608] sm:$0xff] }
 0x40d   :  { %2395 = vmatmul.f32.vlgmr.msra.gmra.mxu1 %v7812_v55  ;;  %2207 = vmatpush.msra.mxu0 %v7982_v4 }
 0x40e   :  { %2247 = vmatpush.msra.mxu2 %v7985_v42  ;;  %2501 = vmatpush.msrb.mxu1 %v7454_v10  ;;  %v8005_v10 = vld [vmem:[#allocation7 + $0x5b8] sm:$0xff] }
 0x40f   :  { %2208 = vmatpush.msra.mxu0 %v7989_v5  ;;  %2541 = vmatpush.msra.mxu3 %v7466_v46  ;;  %v8009_v46 = vld [vmem:[#allocation7 + $0x5c0] sm:$0xff] }
 0x410   :  { %2248 = vmatpush.msra.mxu2 %v7993_v44  ;;  %2502 = vmatpush.msrb.mxu1 %v7462_v40  ;;  %v8013_v40 = vld [vmem:[#allocation7 + $0x570] sm:$0xff] }
 0x411   :  { %2209 = vmatpush.msra.mxu0 %v7997_v52  ;;  %2542 = vmatpush.msra.mxu3 %v7474_v13  ;;  %v8017_v13 = vld [vmem:[#allocation7 + $0x578] sm:$0xff] }
 0x412   :  { %2249 = vmatpush.msra.mxu2 %v8001_v15  ;;  %2503 = vmatpush.msrb.mxu1 %v7470_v22  ;;  %v8021_v22 = vld [vmem:[#allocation7 + $0x528] sm:$0xff] }
 0x413   :  { %2210 = vmatpush.msra.mxu0 %v8005_v10  ;;  %2543 = vmatpush.msra.mxu3 %v7482_v34  ;;  %v8025_v34 = vld [vmem:[#allocation7 + $0x530] sm:$0xff] }
 0x414   :  { %2250 = vmatpush.msra.mxu2 %v8009_v46  ;;  %2504 = vmatpush.msrb.mxu1 %v7478_v3  ;;  %v8029_v3 = vld [vmem:[#allocation7 + $0x4e0] sm:$0xff] }
 0x415   :  { %2211 = vmatpush.msra.mxu0 %v8013_v40  ;;  %2544 = vmatpush.msra.mxu3 %v7490_v26  ;;  %v8033_v26 = vld [vmem:[#allocation7 + $0x4e8] sm:$0xff] }
 0x416   :  { %2251 = vmatpush.msra.mxu2 %v8017_v13  ;;  %2505 = vmatpush.msrb.mxu1 %v7486_v47  ;;  %v8037_v47 = vld [vmem:[#allocation7 + $0x498] sm:$0xff] }
 0x417   :  { %2212 = vmatpush.msra.mxu0 %v8021_v22  ;;  %2545 = vmatpush.msra.mxu3 %v7498_v2  ;;  %v8041_v2 = vld [vmem:[#allocation7 + $0x4a0] sm:$0xff] }
 0x418   :  { %2252 = vmatpush.msra.mxu2 %v8025_v34  ;;  %2506 = vmatpush.msrb.mxu1 %v7494_v24  ;;  %v8046_v24 = vld [vmem:[#allocation7 + $0x8e0] sm:$0xff] }
 0x419   :  { %2213 = vmatpush.msra.mxu0 %v8029_v3  ;;  %2546 = vmatpush.msra.mxu3 %v7506_v49  ;;  %v8049_v49 = vld [vmem:[#allocation7 + $0x8e8] sm:$0xff] }
 0x41a   :  { %2253 = vmatpush.msra.mxu2 %v8033_v26  ;;  %2507 = vmatpush.msrb.mxu1 %v7502_v25  ;;  %v8053_v25 = vld [vmem:[#allocation7 + $0x898] sm:$0xff] }
 0x41b   :  { %2214 = vmatpush.msra.mxu0 %v8037_v47  ;;  %2547 = vmatpush.msra.mxu3 %v7514_v50  ;;  %v8057_v50 = vld [vmem:[#allocation7 + $0x8a0] sm:$0xff] }
 0x41c   :  { %2254 = vmatpush.msra.mxu2 %v8041_v2  ;;  %2215 = vmatmul.f32.vlgmr.msra.gmra.mxu0 %v7911_v8 }
 0x41d   :  { %2255 = vmatmul.f32.vlgmr.msra.gmra.mxu2 %v7911_v8  ;;  %2279 = vmatpush.msrb.mxu0 %v8046_v24 }
 0x41e   :  { %2319 = vmatpush.msrb.mxu2 %v8049_v49  ;;  %2508 = vmatpush.msrb.mxu1 %v7510_v7  ;;  %v11774_v7 = vld [vmem:[#allocation215_spill] sm:$0xff] }
 0x41f   :  { %2280 = vmatpush.msrb.mxu0 %v8053_v25  ;;  %2548 = vmatpush.msra.mxu3 %v7522_v35  ;;  %v11775_v35 = vld [vmem:[#allocation218_spill] sm:$0xff] }
 0x420   :  { %2320 = vmatpush.msrb.mxu2 %v8057_v50  ;;  %2509 = vmatpush.msrb.mxu1 %v7518_v28  ;;  %v11776_v28 = vld [vmem:[#allocation216_spill] sm:$0xff] }
 0x421   :  { %2281 = vmatpush.msrb.mxu0 %v8061_v53  ;;  %2549 = vmatpush.msra.mxu3 %v7530_v36  ;;  %v11777_v36 = vld [vmem:[#allocation220_spill] sm:$0xff] }
 0x422   :  { %2321 = vmatpush.msrb.mxu2 %v8065_v23  ;;  %2510 = vmatpush.msrb.mxu1 %v11774_v7  ;;  %v11788_v7 = vld [vmem:[#allocation48_spill] sm:$0xff] }
 0x423   :  { %2282 = vmatpush.msrb.mxu0 %v8069_v12  ;;  %2550 = vmatpush.msra.mxu3 %v11775_v35  ;;  %v8105_v35 = vld [vmem:[#allocation7 + $0x6f0] sm:$0xff] }
 0x424   :  { %2322 = vmatpush.msrb.mxu2 %v8073_v29  ;;  %2511 = vmatpush.msrb.mxu1 %v11776_v28  ;;  %11789 = vst [vmem:[#allocation110_spill] sm:$0xff] %v8105_v35  ;;  %v11790_v28 = vld [vmem:[#allocation223_spill] sm:$0xff] }
 0x425   :  { %2283 = vmatpush.msrb.mxu0 %v8077_v62  ;;  %2551 = vmatpush.msra.mxu3 %v11777_v36  ;;  %v8109_v36 = vld [vmem:[#allocation7 + $0x6a0] sm:$0xff] }
 0x426   :  { %2323 = vmatpush.msrb.mxu2 %v8081_v38  ;;  %2512 = vmatpush.msrb.mxu1 %v11778_v6  ;;  %11791 = vst [vmem:[#allocation112_spill] sm:$0xff] %v8109_v36  ;;  %v11792_v6 = vld [vmem:[#allocation50_spill] sm:$0xff] }
 0x427   :  { %2284 = vmatpush.msrb.mxu0 %v8085_v48  ;;  %2552 = vmatpush.msra.mxu3 %v11780_v1  ;;  %v8113_v1 = vld [vmem:[#allocation7 + $0x6a8] sm:$0xff]  ;;  %v8358_v48 = vld [vmem:[#allocation7 + $0x378] sm:$0xff] }
 0x428   :  { %2324 = vmatpush.msrb.mxu2 %v8089_v33  ;;  %2513 = vmatpush.msrb.mxu1 %v11782_v19  ;;  %11793 = vst [vmem:[#allocation115_spill] sm:$0xff] %v8113_v1  ;;  %v11794_v19 = vld [vmem:[#allocation225_spill] sm:$0xff]  ;;  %v8348_v33 = vld [vmem:[#allocation7 + $0x3b8] sm:$0xff] }
 0x429   :  { %2285 = vmatpush.msrb.mxu0 %v8093_v45  ;;  %2553 = vmatpush.msra.mxu3 %v11784_v58  ;;  %v8117_v58 = vld [vmem:[#allocation7 + $0x658] sm:$0xff]  ;;  %11897 = vst [vmem:[#allocation150_spill] sm:$0xff] %v8348_v33 }
 0x42a   :  { %2325 = vmatpush.msrb.mxu2 %v8097_v18  ;;  %2514 = vmatpush.msrb.mxu1 %v11786_v57  ;;  %11795 = vst [vmem:[#allocation116_spill] sm:$0xff] %v8117_v58  ;;  %v11796_v57 = vld [vmem:[#allocation47_spill] sm:$0xff]  ;;  %v8336_v18 = vld [vmem:[#allocation7 + $0x450] sm:$0xff] }
 0x42b   :  { %2286 = vmatpush.msrb.mxu0 %v8101_v16  ;;  %2554 = vmatpush.msra.mxu3 %v11788_v7  ;;  %v8121_v7 = vld [vmem:[#allocation7 + $0x660] sm:$0xff]  ;;  %11892 = vst [vmem:[#allocation147_spill] sm:$0xff] %v8336_v18 }
 0x42c   :  { %2326 = vmatpush.msrb.mxu2 %v8105_v35  ;;  %2515 = vmatpush.msrb.mxu1 %v11790_v28  ;;  %11797 = vst [vmem:[#allocation117_spill] sm:$0xff] %v8121_v7  ;;  %v11798_v28 = vld [vmem:[#allocation52_spill] sm:$0xff] }
 0x42d   :  { %2287 = vmatpush.msrb.mxu0 %v8109_v36  ;;  %2555 = vmatpush.msra.mxu3 %v11792_v6  ;;  %v8125_v36 = vld [vmem:[#allocation7 + $0x610] sm:$0xff]  ;;  %v11888_v35 = vld [vmem:[#allocation92_spill] sm:$0xff]  ;;  %11900 = vst [vmem:[#allocation153_spill] sm:$0xff] %v8358_v48 }
 0x42e   :  { %2327 = vmatpush.msrb.mxu2 %v8113_v1  ;;  %2516 = vmatpush.msrb.mxu1 %v11794_v19  ;;  %11799 = vst [vmem:[#allocation118_spill] sm:$0xff] %v8125_v36  ;;  %v11800_v6 = vld [vmem:[#allocation49_spill] sm:$0xff]  ;;  %v8129_v1 = vld [vmem:[#allocation7 + $0x618] sm:$0xff]  ;;  %v8329_v16 = vld [vmem:[#allocation7] sm:$0xff] }
 0x42f   :  { %2288 = vmatpush.msrb.mxu0 %v8117_v58  ;;  %2556 = vmatpush.msra.mxu3 %v11798_v28  ;;  %11801 = vst [vmem:[#allocation119_spill] sm:$0xff] %v8129_v1  ;;  %v8132_v19 = vld [vmem:[#allocation7 + $0x5c8] sm:$0xff]  ;;  %v8136_v58 = vld [vmem:[#allocation7 + $0x5d0] sm:$0xff]  ;;  %v8139_v28 = vld [vmem:[#allocation7 + $0x580] sm:$0xff] }
 0x430   :  { %2581 = vmatpush.msra.mxu1 %v11796_v57  ;;  %2328 = vmatpush.msrb.mxu2 %v8121_v7  ;;  %11802 = vst [vmem:[#allocation120_spill] sm:$0xff] %v8132_v19  ;;  %v11803_v57 = vld [vmem:[#allocation51_spill] sm:$0xff] }
 0x431   :  { %2289 = vmatpush.msrb.mxu0 %v8125_v36  ;;  %11804 = vst [vmem:[#allocation44_spill] sm:$0xff] %v8136_v58  ;;  %v11806_v36 = vld [vmem:[#allocation53_spill] sm:$0xff]  ;;  %v8256_v7 = vld [vmem:[#allocation7 + $0x500] sm:$0xff] }
 0x432   :  { %2582 = vmatpush.msra.mxu1 %v11800_v6  ;;  %2329 = vmatpush.msrb.mxu2 %v8129_v1  ;;  %11805 = vst [vmem:[#allocation121_spill] sm:$0xff] %v8139_v28  ;;  %v8143_v6 = vld [vmem:[#allocation7 + $0x588] sm:$0xff]  ;;  %v8146_v1 = vld [vmem:[#allocation7 + $0x538] sm:$0xff] }
 0x433   :  { %2290 = vmatpush.msrb.mxu0 %v8132_v19  ;;  %11807 = vst [vmem:[#allocation122_spill] sm:$0xff] %v8143_v6  ;;  %v11809_v19 = vld [vmem:[#allocation54_spill] sm:$0xff] }
 0x434   :  { %2583 = vmatpush.msra.mxu1 %v11803_v57  ;;  %2330 = vmatpush.msrb.mxu2 %v8136_v58  ;;  %11808 = vst [vmem:[#allocation123_spill] sm:$0xff] %v8146_v1  ;;  %v8150_v57 = vld [vmem:[#allocation7 + $0x540] sm:$0xff]  ;;  %v8153_v58 = vld [vmem:[#allocation7 + $0x4f0] sm:$0xff] }
 0x435   :  { %2291 = vmatpush.msrb.mxu0 %v8139_v28  ;;  %11810 = vst [vmem:[#allocation124_spill] sm:$0xff] %v8150_v57  ;;  %v11812_v28 = vld [vmem:[#allocation55_spill] sm:$0xff] }
 0x436   :  { %2584 = vmatpush.msra.mxu1 %v11806_v36  ;;  %2331 = vmatpush.msrb.mxu2 %v8143_v6  ;;  %11811 = vst [vmem:[#allocation125_spill] sm:$0xff] %v8153_v58  ;;  %v8157_v36 = vld [vmem:[#allocation7 + $0x4f8] sm:$0xff]  ;;  %v8160_v6 = vld [vmem:[#allocation7 + $0x4a8] sm:$0xff] }
 0x437   :  { %2292 = vmatpush.msrb.mxu0 %v8146_v1  ;;  %11813 = vst [vmem:[#allocation126_spill] sm:$0xff] %v8157_v36  ;;  %v11815_v1 = vld [vmem:[#allocation56_spill] sm:$0xff] }
 0x438   :  { %2585 = vmatpush.msra.mxu1 %v11809_v19  ;;  %2332 = vmatpush.msrb.mxu2 %v8150_v57  ;;  %11814 = vst [vmem:[#allocation127_spill] sm:$0xff] %v8160_v6  ;;  %v8164_v19 = vld [vmem:[#allocation7 + $0x4b0] sm:$0xff]  ;;  %v8183_v57 = vld [vmem:[#allocation7 + $0x860] sm:$0xff] }
 0x439   :  { %2293 = vmatpush.msrb.mxu0 %v8153_v58  ;;  %11816 = vst [vmem:[#allocation128_spill] sm:$0xff] %v8164_v19  ;;  %v8169_v58 = vld [vmem:[#allocation7 + $0x8f0] sm:$0xff] }
 0x43a   :  { %2586 = vmatpush.msra.mxu1 %v11812_v28  ;;  %2333 = vmatpush.msrb.mxu2 %v8157_v36  ;;  %11817 = vst [vmem:[#allocation129_spill] sm:$0xff] %v8169_v58  ;;  %v8172_v28 = vld [vmem:[#allocation7 + $0x8f8] sm:$0xff]  ;;  %v11819_v36 = vld [vmem:[#allocation57_spill] sm:$0xff] }
 0x43b   :  { %2294 = vmatpush.msrb.mxu0 %v8160_v6  ;;  %11818 = vst [vmem:[#allocation130_spill] sm:$0xff] %v8172_v28  ;;  %v8176_v6 = vld [vmem:[#allocation7 + $0x8a8] sm:$0xff] }
 0x43c   :  { %2587 = vmatpush.msra.mxu1 %v11815_v1  ;;  %2334 = vmatpush.msrb.mxu2 %v8164_v19  ;;  %11820 = vst [vmem:[#allocation133_spill] sm:$0xff] %v8176_v6  ;;  %v8179_v1 = vld [vmem:[#allocation7 + $0x8b0] sm:$0xff] }
 0x43d   :  { %2295 = vmatmul.f32.vlgmr.msrb.gmra.mxu0 %v7911_v8  ;;  %2335 = vmatmul.f32.vlgmr.msrb.gmra.mxu2 %v7911_v8  ;;  %11821 = vst [vmem:[#allocation131_spill] sm:$0xff] %v8179_v1  ;;  %v11822_v19 = vld [vmem:[#allocation58_spill] sm:$0xff] }
 0x43e   :  { %2359 = vmatpush.msra.mxu0 %v8169_v58  ;;  %2399 = vmatpush.msra.mxu2 %v8172_v28  ;;  %11823 = vst [vmem:[#allocation132_spill] sm:$0xff] %v8183_v57  ;;  %v8186_v58 = vld [vmem:[#allocation7 + $0x868] sm:$0xff]  ;;  %v11825_v28 = vld [vmem:[#allocation59_spill] sm:$0xff] }
 0x43f   :  { %2588 = vmatpush.msra.mxu1 %v11819_v36  ;;  %11824 = vst [vmem:[#allocation81_spill] sm:$0xff] %v8186_v58  ;;  %v8190_v36 = vld [vmem:[#allocation7 + $0x818] sm:$0xff] }
 0x440   :  { %2360 = vmatpush.msra.mxu0 %v8176_v6  ;;  %2400 = vmatpush.msra.mxu2 %v8179_v1  ;;  %11826 = vst [vmem:[#allocation82_spill] sm:$0xff] %v8190_v36  ;;  %v8193_v6 = vld [vmem:[#allocation7 + $0x820] sm:$0xff] }
 0x441   :  { %2589 = vmatpush.msra.mxu1 %v11822_v19  ;;  %11827 = vst [vmem:[#allocation83_spill] sm:$0xff] %v8193_v6  ;;  %v11828_v1 = vld [vmem:[#allocation60_spill] sm:$0xff]  ;;  %v8197_v19 = vld [vmem:[#allocation7 + $0x7d0] sm:$0xff] }
 0x442   :  { %2361 = vmatpush.msra.mxu0 %v8183_v57  ;;  %2401 = vmatpush.msra.mxu2 %v8186_v58  ;;  %11829 = vst [vmem:[#allocation18_spill] sm:$0xff] %v8197_v19  ;;  %v8200_v57 = vld [vmem:[#allocation7 + $0x7d8] sm:$0xff]  ;;  %v11831_v58 = vld [vmem:[#allocation61_spill] sm:$0xff] }
 0x443   :  { %2590 = vmatpush.msra.mxu1 %v11825_v28  ;;  %11830 = vst [vmem:[#allocation85_spill] sm:$0xff] %v8200_v57  ;;  %v8204_v28 = vld [vmem:[#allocation7 + $0x788] sm:$0xff] }
 0x444   :  { %2362 = vmatpush.msra.mxu0 %v8190_v36  ;;  %2402 = vmatpush.msra.mxu2 %v8193_v6  ;;  %11832 = vst [vmem:[#allocation86_spill] sm:$0xff] %v8204_v28  ;;  %v8207_v36 = vld [vmem:[#allocation7 + $0x790] sm:$0xff] }
 0x445   :  { %2591 = vmatpush.msra.mxu1 %v11828_v1  ;;  %11833 = vst [vmem:[#allocation89_spill] sm:$0xff] %v8207_v36  ;;  %v11834_v6 = vld [vmem:[#allocation62_spill] sm:$0xff]  ;;  %v8211_v1 = vld [vmem:[#allocation7 + $0x740] sm:$0xff] }
 0x446   :  { %2363 = vmatpush.msra.mxu0 %v8197_v19  ;;  %2403 = vmatpush.msra.mxu2 %v8200_v57  ;;  %11835 = vst [vmem:[#allocation91_spill] sm:$0xff] %v8211_v1  ;;  %v8214_v19 = vld [vmem:[#allocation7 + $0x748] sm:$0xff]  ;;  %v11837_v57 = vld [vmem:[#allocation63_spill] sm:$0xff] }
 0x447   :  { %2592 = vmatpush.msra.mxu1 %v11831_v58  ;;  %11836 = vst [vmem:[#allocation93_spill] sm:$0xff] %v8214_v19  ;;  %v8218_v58 = vld [vmem:[#allocation7 + $0x6f8] sm:$0xff] }
 0x448   :  { %2364 = vmatpush.msra.mxu0 %v8204_v28  ;;  %2404 = vmatpush.msra.mxu2 %v8207_v36  ;;  %11838 = vst [vmem:[#allocation32_spill] sm:$0xff] %v8218_v58  ;;  %v8221_v28 = vld [vmem:[#allocation7 + $0x700] sm:$0xff] }
 0x449   :  { %2593 = vmatpush.msra.mxu1 %v11834_v6  ;;  %11839 = vst [vmem:[#allocation95_spill] sm:$0xff] %v8221_v28  ;;  %v11840_v36 = vld [vmem:[#allocation64_spill] sm:$0xff]  ;;  %v8225_v6 = vld [vmem:[#allocation7 + $0x6b0] sm:$0xff] }
 0x44a   :  { %2365 = vmatpush.msra.mxu0 %v8211_v1  ;;  %2405 = vmatpush.msra.mxu2 %v8214_v19  ;;  %11841 = vst [vmem:[#allocation97_spill] sm:$0xff] %v8225_v6  ;;  %v8228_v1 = vld [vmem:[#allocation7 + $0x6b8] sm:$0xff]  ;;  %v11843_v19 = vld [vmem:[#allocation65_spill] sm:$0xff] }
 0x44b   :  { %2594 = vmatpush.msra.mxu1 %v11837_v57  ;;  %11842 = vst [vmem:[#allocation98_spill] sm:$0xff] %v8228_v1  ;;  %v8232_v57 = vld [vmem:[#allocation7 + $0x668] sm:$0xff] }
 0x44c   :  { %2366 = vmatpush.msra.mxu0 %v8218_v58  ;;  %2406 = vmatpush.msra.mxu2 %v8221_v28  ;;  %11844 = vst [vmem:[#allocation100_spill] sm:$0xff] %v8232_v57  ;;  %v8235_v58 = vld [vmem:[#allocation7 + $0x670] sm:$0xff]  ;;  %v8238_v28 = vld [vmem:[#allocation7 + $0x620] sm:$0xff] }
 0x44d   :  { %2595 = vmatpush.msra.mxu1 %v11840_v36  ;;  %11845 = vst [vmem:[#allocation101_spill] sm:$0xff] %v8235_v58  ;;  %v8241_v36 = vld [vmem:[#allocation7 + $0x628] sm:$0xff] }
 0x44e   :  { %2367 = vmatpush.msra.mxu0 %v8225_v6  ;;  %2407 = vmatpush.msra.mxu2 %v8228_v1  ;;  %11846 = vst [vmem:[#allocation103_spill] sm:$0xff] %v8238_v28  ;;  %v8244_v6 = vld [vmem:[#allocation7 + $0x5d8] sm:$0xff]  ;;  %v8248_v1 = vld [vmem:[#allocation7 + $0x590] sm:$0xff] }
 0x44f   :  { %2596 = vmatpush.msra.mxu1 %v11843_v19  ;;  %11847 = vst [vmem:[#allocation104_spill] sm:$0xff] %v8241_v36  ;;  %v11849_v19 = vld [vmem:[#allocation66_spill] sm:$0xff] }
 0x450   :  { %2368 = vmatpush.msra.mxu0 %v8232_v57  ;;  %2408 = vmatpush.msra.mxu2 %v8235_v58  ;;  %11848 = vst [vmem:[#allocation105_spill] sm:$0xff] %v8244_v6  ;;  %v11851_v57 = vld [vmem:[#allocation67_spill] sm:$0xff]  ;;  %v8252_v58 = vld [vmem:[#allocation7 + $0x548] sm:$0xff] }
 0x451   :  { %11850 = vst [vmem:[#allocation107_spill] sm:$0xff] %v8248_v1 }
 0x452   :  { %2369 = vmatpush.msra.mxu0 %v8238_v28  ;;  %2409 = vmatpush.msra.mxu2 %v8241_v36  ;;  %11852 = vst [vmem:[#allocation109_spill] sm:$0xff] %v8252_v58  ;;  %v11853_v28 = vld [vmem:[#allocation68_spill] sm:$0xff]  ;;  %v11855_v36 = vld [vmem:[#allocation69_spill] sm:$0xff] }
 0x453   :  { %11854 = vst [vmem:[#allocation31_spill] sm:$0xff] %v8256_v7 }
 0x454   :  { %2370 = vmatpush.msra.mxu0 %v8244_v6  ;;  %2410 = vmatpush.msra.mxu2 %v11849_v19  ;;  %v8260_v6 = vld [vmem:[#allocation7 + $0x4b8] sm:$0xff]  ;;  %11889 = vst [vmem:[#allocation145_spill] sm:$0xff] %v8329_v16 }
 0x455   :  { %11856 = vst [vmem:[#allocation111_spill] sm:$0xff] %v8260_v6  ;;  %v11857_v19 = vld [vmem:[#allocation70_spill] sm:$0xff] }
 0x456   :  { %2371 = vmatpush.msra.mxu0 %v8248_v1  ;;  %2411 = vmatpush.msra.mxu2 %v11851_v57  ;;  %v8266_v57 = vld [vmem:[#allocation7 + $0x438] sm:$0xff] }
 0x457   :  { %11858 = vst [vmem:[#allocation17_spill] sm:$0xff] %v8266_v57  ;;  %v11865_v1 = vld [vmem:[#allocation74_spill] sm:$0xff] }
 0x458   :  { %2372 = vmatpush.msra.mxu0 %v8252_v58  ;;  %2412 = vmatpush.msra.mxu2 %v11853_v28  ;;  %v11859_v28 = vld [vmem:[#allocation71_spill] sm:$0xff]  ;;  %v8270_v58 = vld [vmem:[#allocation7 + $0x3f0] sm:$0xff] }
 0x459   :  { %11860 = vst [vmem:[#allocation113_spill] sm:$0xff] %v8270_v58 }
 0x45a   :  { %2373 = vmatpush.msra.mxu0 %v8256_v7  ;;  %2413 = vmatpush.msra.mxu2 %v11855_v36  ;;  %v11861_v36 = vld [vmem:[#allocation72_spill] sm:$0xff] }
 0x45b   :  { %v8274_v7 = vld [vmem:[#allocation7 + $0x3a8] sm:$0xff] }
 0x45c   :  { %2374 = vmatpush.msra.mxu0 %v8260_v6  ;;  %2414 = vmatpush.msra.mxu2 %v11857_v19  ;;  %11862 = vst [vmem:[#allocation114_spill] sm:$0xff] %v8274_v7  ;;  %v11863_v19 = vld [vmem:[#allocation73_spill] sm:$0xff]  ;;  %v8278_v6 = vld [vmem:[#allocation7 + $0x360] sm:$0xff] }
 0x45d   :  { %2375 = vmatmul.f32.vlgmr.msra.gmra.mxu0 %v7911_v8  ;;  %2415 = vmatmul.f32.vlgmr.msra.gmra.mxu2 %v7911_v8  ;;  %11864 = vst [vmem:[#allocation29_spill] sm:$0xff] %v8278_v6 }
 0x45e   :  { %2481 = vmatpush.msrb.mxu0 %v8266_v57  ;;  %2521 = vmatpush.msrb.mxu2 %v11859_v28  ;;  %v8282_v57 = vld [vmem:[#allocation7 + $0x318] sm:$0xff] }
 0x45f   :  { %11866 = vst [vmem:[#allocation28_spill] sm:$0xff] %v8282_v57  ;;  %v11867_v28 = vld [vmem:[#allocation75_spill] sm:$0xff] }
 0x460   :  { %2482 = vmatpush.msrb.mxu0 %v8270_v58  ;;  %2522 = vmatpush.msrb.mxu2 %v11861_v36  ;;  %v8286_v58 = vld [vmem:[#allocation7 + $0x2d0] sm:$0xff]  ;;  %v11869_v36 = vld [vmem:[#allocation76_spill] sm:$0xff] }
 0x461   :  { %11868 = vst [vmem:[#allocation134_spill] sm:$0xff] %v8286_v58 }
 0x462   :  { %2483 = vmatpush.msrb.mxu0 %v8274_v7  ;;  %2523 = vmatpush.msrb.mxu2 %v11863_v19  ;;  %v8290_v7 = vld [vmem:[#allocation7 + $0x288] sm:$0xff] }
 0x463   :  { %11870 = vst [vmem:[#allocation135_spill] sm:$0xff] %v8290_v7  ;;  %v11871_v19 = vld [vmem:[#allocation77_spill] sm:$0xff] }
 0x464   :  { %2484 = vmatpush.msrb.mxu0 %v8278_v6  ;;  %2524 = vmatpush.msrb.mxu2 %v11865_v1  ;;  %v8294_v6 = vld [vmem:[#allocation7 + $0x240] sm:$0xff]  ;;  %v11873_v1 = vld [vmem:[#allocation78_spill] sm:$0xff] }
 0x465   :  { %11872 = vst [vmem:[#allocation136_spill] sm:$0xff] %v8294_v6 }
 0x466   :  { %2485 = vmatpush.msrb.mxu0 %v8282_v57  ;;  %2525 = vmatpush.msrb.mxu2 %v11867_v28  ;;  %v8298_v57 = vld [vmem:[#allocation7 + $0x1f8] sm:$0xff] }
 0x467   :  { %11874 = vst [vmem:[#allocation137_spill] sm:$0xff] %v8298_v57  ;;  %v11875_v28 = vld [vmem:[#allocation79_spill] sm:$0xff] }
 0x468   :  { %2486 = vmatpush.msrb.mxu0 %v8286_v58  ;;  %2526 = vmatpush.msrb.mxu2 %v11869_v36  ;;  %v8302_v58 = vld [vmem:[#allocation7 + $0x1b0] sm:$0xff]  ;;  %v11877_v36 = vld [vmem:[#allocation80_spill] sm:$0xff] }
 0x469   :  { %11876 = vst [vmem:[#allocation138_spill] sm:$0xff] %v8302_v58 }
 0x46a   :  { %2487 = vmatpush.msrb.mxu0 %v8290_v7  ;;  %2527 = vmatpush.msrb.mxu2 %v11871_v19  ;;  %v8306_v7 = vld [vmem:[#allocation7 + $0x168] sm:$0xff] }
 0x46b   :  { %11878 = vst [vmem:[#allocation139_spill] sm:$0xff] %v8306_v7  ;;  %v11879_v19 = vld [vmem:[#allocation84_spill] sm:$0xff] }
 0x46c   :  { %2488 = vmatpush.msrb.mxu0 %v8294_v6  ;;  %2528 = vmatpush.msrb.mxu2 %v11873_v1  ;;  %v8310_v6 = vld [vmem:[#allocation7 + $0x120] sm:$0xff] }
 0x46d   :  { %11880 = vst [vmem:[#allocation140_spill] sm:$0xff] %v8310_v6  ;;  %v11881_v1 = vld [vmem:[#allocation87_spill] sm:$0xff] }
 0x46e   :  { %2489 = vmatpush.msrb.mxu0 %v8298_v57  ;;  %2529 = vmatpush.msrb.mxu2 %v11875_v28  ;;  %v8314_v57 = vld [vmem:[#allocation7 + $0xd8] sm:$0xff]  ;;  %v11883_v28 = vld [vmem:[#allocation88_spill] sm:$0xff] }
 0x46f   :  { %11882 = vst [vmem:[#allocation141_spill] sm:$0xff] %v8314_v57 }
 0x470   :  { %2490 = vmatpush.msrb.mxu0 %v8302_v58  ;;  %2530 = vmatpush.msrb.mxu2 %v11877_v36  ;;  %v8318_v58 = vld [vmem:[#allocation7 + $0x90] sm:$0xff] }
 0x471   :  { %11884 = vst [vmem:[#allocation142_spill] sm:$0xff] %v8318_v58  ;;  %v11885_v36 = vld [vmem:[#allocation90_spill] sm:$0xff] }
 0x472   :  { %2491 = vmatpush.msrb.mxu0 %v8306_v7  ;;  %2531 = vmatpush.msrb.mxu2 %v11879_v19  ;;  %v8322_v19 = vld [vmem:[#allocation7 + $0x48] sm:$0xff] }
 0x473   :  { %11886 = vst [vmem:[#allocation143_spill] sm:$0xff] %v8322_v19 }
 0x474   :  { %2492 = vmatpush.msrb.mxu0 %v8310_v6  ;;  %2532 = vmatpush.msrb.mxu2 %v11881_v1  ;;  %v8325_v6 = vld [vmem:[#allocation11] ss:$0 sm:$0xff] }
 0x475   :  { %11887 = vst [vmem:[#allocation144_spill] sm:$0xff] %v8325_v6 }
 0x476   :  { %2493 = vmatpush.msrb.mxu0 %v8314_v57  ;;  %2533 = vmatpush.msrb.mxu2 %v11883_v28  ;;  %v2076_v57 = vpop.f32.mrf.mxu1 }
 0x478   :  { %2494 = vmatpush.msrb.mxu0 %v8318_v58  ;;  %2534 = vmatpush.msrb.mxu2 %v11885_v36  ;;  %v11890_v58 = vld [vmem:[#allocation94_spill] sm:$0xff]  ;;  %v8333_v36 = vld [vmem:[#allocation7 + $0x448] sm:$0xff] }
 0x479   :  { %v2050_v7 = vpop.f32.mrf.mxu0  ;;  %11891 = vst [vmem:[#allocation146_spill] sm:$0xff] %v8333_v36 }
 0x47a   :  { %2495 = vmatpush.msrb.mxu0 %v8322_v19  ;;  %v2051_v1 = vadd.f32 %v8325_v6, %v2050_v7  ;;  %2535 = vmatpush.msrb.mxu2 %v11888_v35  ;;  %v11893_v19 = vld [vmem:[#allocation35_spill] sm:$0xff]  ;;  %v2116_v6 = vpop.f32.mrf.mxu3 }
 0x47b   :  { %v2077_v7 = vadd.f32 %v2076_v57, %v11893_v19  ;;  %v8340_v35 = vld [vmem:[#allocation7 + $0x400] sm:$0xff]  ;;  %v2117_v57 = vadd.f32 %v2116_v6, %v11664_v11  ;;  %v8355_v19 = vld [vmem:[#allocation7 + $0x370] sm:$0xff] }
 0x47c   :  { %2496 = vmatpush.msrb.mxu0 %v8329_v16  ;;  %v2053_v28 = vmul.f32 0.5, %v2051_v1  ;;  %2536 = vmatpush.msrb.mxu2 %v11890_v58  ;;  %11894 = vst [vmem:[#allocation148_spill] sm:$0xff] %v8340_v35  ;;  %v8343_v1 = vld [vmem:[#allocation7 + $0x408] sm:$0xff]  ;;  %v11896_v58 = vld [vmem:[#allocation19_spill] sm:$0xff] }
 0x47d   :  { %11895 = vst [vmem:[#allocation149_spill] sm:$0xff] %v8343_v1  ;;  %v11902_v6 = vld [vmem:[#allocation45_spill] sm:$0xff] }
 0x47e   :  { %2561 = vmatpush.msra.mxu0 %v8333_v36  ;;  %2601 = vmatpush.msra.mxu2 %v8336_v18  ;;  %4105 = vtanh.f32 %v2053_v28  ;;  %v208_v36 = vadd.f32 %v11896_v58, %v11661_v27  ;;  %v8352_v18 = vld [vmem:[#allocation7 + $0x3c0] sm:$0xff]  ;;  %11899 = vst [vmem:[#allocation152_spill] sm:$0xff] %v8355_v19  ;;  %v8361_v58 = vld [vmem:[#allocation7 + $0x328] sm:$0xff] }
 0x47f   :  { %v2096_v16 = vpop.f32.mrf.mxu2  ;;  %11898 = vst [vmem:[#allocation151_spill] sm:$0xff] %v8352_v18  ;;  %v11903_v11 = vld [vmem:[#allocation33_spill] sm:$0xff] }
 0x480   :  { %2562 = vmatpush.msra.mxu0 %v8340_v35  ;;  %2602 = vmatpush.msra.mxu2 %v8343_v1  ;;  %v2097_v45 = vadd.f32 %v2096_v16, %v2077_v7  ;;  %11901 = vst [vmem:[#allocation154_spill] sm:$0xff] %v8361_v58 }
 0x481   :  { %v2136_v28 = vpop.f32.mrf.mxu0 }
 0x482   :  { %2563 = vmatpush.msra.mxu0 %v8348_v33  ;;  %2603 = vmatpush.msra.mxu2 %v8352_v18  ;;  %v2423_v35 = vadd.f32 %v2097_v45, %v208_v36  ;;  %v2137_v1 = vadd.f32 %v2136_v28, %v2117_v57  ;;  %v249_v33 = vadd.f32 %v11903_v11, %v11902_v6  ;;  %v8366_v45 = vld [vmem:[#allocation7 + $0x330] sm:$0xff]  ;;  %v8369_v36 = vld [vmem:[#allocation7 + $0x2e0] sm:$0xff]  ;;  %v8390_v6 = vld [vmem:[#allocation7 + $0x208] sm:$0xff] }
 0x483   :  { %11904 = vst [vmem:[#allocation155_spill] sm:$0xff] %v8366_v45  ;;  %v8381_v11 = vld [vmem:[#allocation7 + $0x2a0] sm:$0xff] }
 0x484   :  { %2564 = vmatpush.msra.mxu0 %v8355_v19  ;;  %2604 = vmatpush.msra.mxu2 %v8358_v48  ;;  %v4106_v16 = vpop.eup %4105  ;;  %v2424_v7 = vmul.f32 0.5, %v2423_v35  ;;  %11905 = vst [vmem:[#allocation156_spill] sm:$0xff] %v8369_v36  ;;  %v2428_v28 = vadd.f32 %v2137_v1, %v249_v33  ;;  %v8372_v35 = vld [vmem:[#allocation7 + $0x2e8] sm:$0xff]  ;;  %v8403_v48 = vld [vmem:[#allocation7 + $0x178] sm:$0xff]  ;;  %v8570_v19 = vld [vmem:[#allocation7 + $0x390] sm:$0xff] }
 0x485   :  { %v2055_v18 = vmul.f32 0.5, %v4106_v16  ;;  %11906 = vst [vmem:[#allocation157_spill] sm:$0xff] %v8372_v35  ;;  %v2156_v16 = vpop.f32.mrf.mxu1 }
 0x486   :  { %2565 = vmatpush.msra.mxu0 %v8361_v58  ;;  %2605 = vmatpush.msra.mxu2 %v8366_v45  ;;  %4107 = vtanh.f32 %v2424_v7  ;;  %v8375_v58 = vld [vmem:[#allocation7 + $0x298] sm:$0xff]  ;;  %11908 = vst [vmem:[#allocation159_spill] sm:$0xff] %v8381_v11  ;;  %v8384_v7 = vld [vmem:[#allocation7 + $0x250] sm:$0xff]  ;;  %v2429_v33 = vmul.f32 0.5, %v2428_v28  ;;  %v8397_v45 = vld [vmem:[#allocation7 + $0x1c0] sm:$0xff] }
 0x487   :  { %v2056_v57 = vadd.f32 0.5, %v2055_v18  ;;  %11907 = vst [vmem:[#allocation158_spill] sm:$0xff] %v8375_v58  ;;  %v8387_v18 = vld [vmem:[#allocation7 + $0x258] sm:$0xff] }
 0x488   :  { %2566 = vmatpush.msra.mxu0 %v8369_v36  ;;  %2606 = vmatpush.msra.mxu2 %v8372_v35  ;;  %11909 = vst [vmem:[#allocation160_spill] sm:$0xff] %v8384_v7  ;;  %4109 = vtanh.f32 %v2429_v33 }
 0x489   :  { %4038 = vst [vmem:[%s10313_s7 + $0x10] sm:$0xff] %v2056_v57  ;;  %v11912_v57 = vld [vmem:[#allocation26_spill] sm:$0xff] }
 0x48a   :  { %2567 = vmatpush.msra.mxu0 %v8375_v58  ;;  %2607 = vmatpush.msra.mxu2 %v8381_v11  ;;  %11910 = vst [vmem:[#allocation161_spill] sm:$0xff] %v8387_v18  ;;  %v2176_v58 = vpop.f32.mrf.mxu2  ;;  %v2157_v35 = vadd.f32 %v2156_v16, %v11912_v57  ;;  %v8394_v11 = vld [vmem:[#allocation7 + $0x210] sm:$0xff]  ;;  %v11917_v16 = vld [vmem:[#allocation27_spill] sm:$0xff] }
 0x48b   :  { %11911 = vst [vmem:[#allocation162_spill] sm:$0xff] %v8390_v6 }
 0x48c   :  { %2568 = vmatpush.msra.mxu0 %v8384_v7  ;;  %2608 = vmatpush.msra.mxu2 %v8387_v18  ;;  %v4108_v1 = vpop.eup %4107  ;;  %11913 = vst [vmem:[#allocation163_spill] sm:$0xff] %v8394_v11  ;;  %v2177_v28 = vadd.f32 %v2176_v58, %v2157_v35  ;;  %v8400_v7 = vld [vmem:[#allocation7 + $0x1c8] sm:$0xff] }
 0x48d   :  { %v2426_v36 = vmul.f32 0.5, %v4108_v1  ;;  %11914 = vst [vmem:[#allocation164_spill] sm:$0xff] %v8397_v45  ;;  %v11918_v1 = vld [vmem:[#allocation36_spill] sm:$0xff] }
 0x48e   :  { %2569 = vmatpush.msra.mxu0 %v8390_v6  ;;  %2609 = vmatpush.msra.mxu2 %v8394_v11  ;;  %11915 = vst [vmem:[#allocation165_spill] sm:$0xff] %v8400_v7  ;;  %v290_v6 = vadd.f32 %v11918_v1, %v11917_v16  ;;  %v8408_v11 = vld [vmem:[#allocation7 + $0x180] sm:$0xff]  ;;  %v8417_v35 = vld [vmem:[#allocation7 + $0xe8] sm:$0xff]  ;;  %v4110_v33 = vpop.eup %4109 }
 0x48f   :  { %v2427_v18 = vadd.f32 0.5, %v2426_v36  ;;  %11916 = vst [vmem:[#allocation166_spill] sm:$0xff] %v8403_v48  ;;  %v8414_v36 = vld [vmem:[#allocation7 + $0x138] sm:$0xff]  ;;  %v8426_v1 = vld [vmem:[#allocation7 + $0xa8] sm:$0xff] }
 0x490   :  { %2570 = vmatpush.msra.mxu0 %v8397_v45  ;;  %2610 = vmatpush.msra.mxu2 %v8400_v7  ;;  %11919 = vst [vmem:[#allocation167_spill] sm:$0xff] %v8408_v11  ;;  %v8411_v45 = vld [vmem:[#allocation7 + $0x130] sm:$0xff]  ;;  %v8563_v7 = vld [vmem:[#allocation7 + $0x3d8] sm:$0xff] }
 0x491   :  { %v2433_v57 = vmul.f32 %v2427_v18, %v2177_v28  ;;  %11920 = vst [vmem:[#allocation168_spill] sm:$0xff] %v8411_v45  ;;  %v8420_v18 = vld [vmem:[#allocation7 + $0xf0] sm:$0xff]  ;;  %v8423_v28 = vld [vmem:[#allocation7 + $0xa0] sm:$0xff] }
 0x492   :  { %2571 = vmatpush.msra.mxu0 %v8403_v48  ;;  %2611 = vmatpush.msra.mxu2 %v8408_v11  ;;  %11921 = vst [vmem:[#allocation169_spill] sm:$0xff] %v8414_v36 }
 0x493   :  { %v2434_v58 = vadd.f32 %v2433_v57, %v290_v6  ;;  %11922 = vst [vmem:[#allocation170_spill] sm:$0xff] %v8417_v35  ;;  %v2431_v6 = vmul.f32 0.5, %v4110_v33  ;;  %v8429_v57 = vld [vmem:[#allocation7 + $0x58] sm:$0xff] }
 0x494   :  { %2572 = vmatpush.msra.mxu0 %v8411_v45  ;;  %2612 = vmatpush.msra.mxu2 %v8414_v36  ;;  %11923 = vst [vmem:[#allocation171_spill] sm:$0xff] %v8420_v18  ;;  %v8438_v36 = vld [vmem:[#allocation7 + $0x18] sm:$0xff] }
 0x495   :  { %4111 = vtanh.f32 %v2434_v58  ;;  %11924 = vst [vmem:[#allocation172_spill] sm:$0xff] %v8423_v28  ;;  %v8435_v58 = vld [vmem:[#allocation7 + $0x10] sm:$0xff] }
 0x496   :  { %2573 = vmatpush.msra.mxu0 %v8417_v35  ;;  %2613 = vmatpush.msra.mxu2 %v8420_v18  ;;  %11925 = vst [vmem:[#allocation173_spill] sm:$0xff] %v8426_v1  ;;  %v8432_v35 = vld [vmem:[#allocation7 + $0x60] sm:$0xff] }
 0x497   :  { %11926 = vst [vmem:[#allocation174_spill] sm:$0xff] %v8429_v57 }
 0x498   :  { %2574 = vmatpush.msra.mxu0 %v8423_v28  ;;  %2614 = vmatpush.msra.mxu2 %v8426_v1  ;;  %11927 = vst [vmem:[#allocation175_spill] sm:$0xff] %v8432_v35  ;;  %v2432_v28 = vadd.f32 0.5, %v2431_v6  ;;  %v8467_v6 = vld [vmem:[#allocation7 + $0x388] sm:$0xff] }
 0x499   :  { %11928 = vst [vmem:[#allocation176_spill] sm:$0xff] %v8435_v58  ;;  %v2216_v48 = vpop.f32.mrf.mxu0 }
 0x49a   :  { %2575 = vmatpush.msra.mxu0 %v8429_v57  ;;  %2615 = vmatpush.msra.mxu2 %v8432_v35  ;;  %11929 = vst [vmem:[#allocation177_spill] sm:$0xff] %v8438_v36  ;;  %v8446_v35 = vld [vmem:[#allocation7 + $0x458] sm:$0xff]  ;;  %v8452_v57 = vld [vmem:[#allocation7 + $0x410] sm:$0xff] }
 0x49b   :  { %v4112_v18 = vpop.eup %4111  ;;  %11930 = vst [vmem:[#allocation178_spill] sm:$0xff] %v8446_v35 }
 0x49c   :  { %2576 = vmatpush.msra.mxu0 %v8435_v58  ;;  %2616 = vmatpush.msra.mxu2 %v8438_v36  ;;  %v2436_v33 = vsub.f32 %v7812_v55, %v4112_v18  ;;  %v8449_v58 = vld [vmem:[#allocation7 + $0x460] sm:$0xff]  ;;  %11932 = vst [vmem:[#allocation180_spill] sm:$0xff] %v8452_v57  ;;  %v8455_v55 = vld [vmem:[#allocation7 + $0x418] sm:$0xff] }
 0x49d   :  { %11931 = vst [vmem:[#allocation179_spill] sm:$0xff] %v8449_v58  ;;  %v11966_v36 = vld [vmem:[#allocation30_spill] sm:$0xff] }
 0x49e   :  { %v2437_v1 = vmul.f32 %v2436_v33, %v2432_v28  ;;  %11933 = vst [vmem:[#allocation181_spill] sm:$0xff] %v8455_v55  ;;  %v8461_v28 = vld [vmem:[#allocation7 + $0x3d0] sm:$0xff]  ;;  %v8472_v33 = vld [vmem:[#allocation7 + $0x338] sm:$0xff] }
 0x49f   :  { %11935 = vst [vmem:[#allocation183_spill] sm:$0xff] %v8461_v28 }
 0x4a0   :  { %v8442_v45 = vadd.f32 %v4112_v18, %v2437_v1  ;;  %v8458_v18 = vld [vmem:[#allocation7 + $0x3c8] sm:$0xff]  ;;  %v8464_v1 = vld [vmem:[#allocation7 + $0x380] sm:$0xff]  ;;  %11937 = vst [vmem:[#allocation185_spill] sm:$0xff] %v8467_v6 }
 0x4a1   :  { %11934 = vst [vmem:[#allocation182_spill] sm:$0xff] %v8458_v18 }
 0x4a2   :  { %2497 = vmatmul.f32.vlgmr.msrb.gmra.mxu0 %v8442_v45  ;;  %2537 = vmatmul.f32.vlgmr.msrb.gmra.mxu2 %v8442_v45  ;;  %11936 = vst [vmem:[#allocation184_spill] sm:$0xff] %v8464_v1 }
 0x4a3   :  { %2641 = vmatpush.msrb.mxu0 %v8446_v35  ;;  %2681 = vmatpush.msrb.mxu2 %v8449_v58  ;;  %11938 = vst [vmem:[#allocation186_spill] sm:$0xff] %v8472_v33  ;;  %v8539_v58 = vld [vmem:[#allocation7 + $0x70] sm:$0xff] }
 0x4a4   :  { %11959 = vst [vmem:[#allocation207_spill] sm:$0xff] %v8539_v58 }
 0x4a5   :  { %2642 = vmatpush.msrb.mxu0 %v8452_v57  ;;  %2682 = vmatpush.msrb.mxu2 %v8455_v55  ;;  %v8487_v55 = vld [vmem:[#allocation7 + $0x2b0] sm:$0xff]  ;;  %v8522_v57 = vld [vmem:[#allocation7 + $0xf8] sm:$0xff]  ;;  %11967 = vst [vmem:[#allocation214_spill] sm:$0xff] %v8563_v7 }
 0x4a6   :  { %11943 = vst [vmem:[#allocation191_spill] sm:$0xff] %v8487_v55 }
 0x4a7   :  { %2643 = vmatpush.msrb.mxu0 %v8458_v18  ;;  %2683 = vmatpush.msrb.mxu2 %v8461_v28  ;;  %v8475_v18 = vld [vmem:[#allocation7 + $0x340] sm:$0xff]  ;;  %v8478_v28 = vld [vmem:[#allocation7 + $0x2f0] sm:$0xff]  ;;  %11954 = vst [vmem:[#allocation202_spill] sm:$0xff] %v8522_v57 }
 0x4a8   :  { %11939 = vst [vmem:[#allocation187_spill] sm:$0xff] %v8475_v18 }
 0x4a9   :  { %2644 = vmatpush.msrb.mxu0 %v8464_v1  ;;  %2684 = vmatpush.msrb.mxu2 %v8467_v6  ;;  %11940 = vst [vmem:[#allocation188_spill] sm:$0xff] %v8478_v28  ;;  %v8481_v1 = vld [vmem:[#allocation7 + $0x2f8] sm:$0xff]  ;;  %v8484_v6 = vld [vmem:[#allocation7 + $0x2a8] sm:$0xff] }
 0x4aa   :  { %2577 = vmatmul.f32.vlgmr.msra.gmra.mxu0 %v8442_v45  ;;  %2617 = vmatmul.f32.vlgmr.msra.gmra.mxu2 %v8442_v45  ;;  %11941 = vst [vmem:[#allocation189_spill] sm:$0xff] %v8481_v1 }
 0x4ab   :  { %2645 = vmatpush.msrb.mxu0 %v8472_v33  ;;  %2685 = vmatpush.msrb.mxu2 %v8475_v18  ;;  %11942 = vst [vmem:[#allocation190_spill] sm:$0xff] %v8484_v6  ;;  %v8490_v33 = vld [vmem:[#allocation7 + $0x260] sm:$0xff]  ;;  %v8493_v18 = vld [vmem:[#allocation7 + $0x268] sm:$0xff] }
 0x4ac   :  { %11944 = vst [vmem:[#allocation192_spill] sm:$0xff] %v8490_v33 }
 0x4ad   :  { %2646 = vmatpush.msrb.mxu0 %v8478_v28  ;;  %2686 = vmatpush.msrb.mxu2 %v8481_v1  ;;  %11945 = vst [vmem:[#allocation193_spill] sm:$0xff] %v8493_v18  ;;  %v8496_v28 = vld [vmem:[#allocation7 + $0x218] sm:$0xff]  ;;  %v8499_v1 = vld [vmem:[#allocation7 + $0x220] sm:$0xff] }
 0x4ae   :  { %11946 = vst [vmem:[#allocation194_spill] sm:$0xff] %v8496_v28 }
 0x4af   :  { %2647 = vmatpush.msrb.mxu0 %v8484_v6  ;;  %2687 = vmatpush.msrb.mxu2 %v8487_v55  ;;  %11947 = vst [vmem:[#allocation195_spill] sm:$0xff] %v8499_v1  ;;  %v8502_v6 = vld [vmem:[#allocation7 + $0x1d0] sm:$0xff]  ;;  %v8505_v55 = vld [vmem:[#allocation7 + $0x1d8] sm:$0xff] }
 0x4b0   :  { %11948 = vst [vmem:[#allocation196_spill] sm:$0xff] %v8502_v6 }
 0x4b1   :  { %2648 = vmatpush.msrb.mxu0 %v8490_v33  ;;  %2688 = vmatpush.msrb.mxu2 %v8493_v18  ;;  %11949 = vst [vmem:[#allocation197_spill] sm:$0xff] %v8505_v55  ;;  %v8508_v33 = vld [vmem:[#allocation7 + $0x188] sm:$0xff]  ;;  %v8511_v18 = vld [vmem:[#allocation7 + $0x190] sm:$0xff] }
 0x4b2   :  { %11950 = vst [vmem:[#allocation198_spill] sm:$0xff] %v8508_v33 }
 0x4b3   :  { %2649 = vmatpush.msrb.mxu0 %v8496_v28  ;;  %2689 = vmatpush.msrb.mxu2 %v8499_v1  ;;  %11951 = vst [vmem:[#allocation199_spill] sm:$0xff] %v8511_v18  ;;  %v8514_v28 = vld [vmem:[#allocation7 + $0x140] sm:$0xff]  ;;  %v8517_v1 = vld [vmem:[#allocation7 + $0x148] sm:$0xff] }
 0x4b4   :  { %11952 = vst [vmem:[#allocation200_spill] sm:$0xff] %v8514_v28 }
 0x4b5   :  { %2650 = vmatpush.msrb.mxu0 %v8502_v6  ;;  %2690 = vmatpush.msrb.mxu2 %v8505_v55  ;;  %11953 = vst [vmem:[#allocation201_spill] sm:$0xff] %v8517_v1  ;;  %v8520_v6 = vpop.f32.mrf.mxu1  ;;  %v8525_v55 = vld [vmem:[#allocation7 + $0x100] sm:$0xff] }
 0x4b6   :  { %11955 = vst [vmem:[#allocation203_spill] sm:$0xff] %v8525_v55 }
 0x4b7   :  { %2651 = vmatpush.msrb.mxu0 %v8508_v33  ;;  %2691 = vmatpush.msrb.mxu2 %v8511_v18  ;;  %v8528_v33 = vpop.f32.mrf.mxu2  ;;  %v8530_v18 = vld [vmem:[#allocation7 + $0xb0] sm:$0xff]  ;;  %11969 = vst [vmem:[#allocation218_spill] sm:$0xff] %v8570_v19 }
 0x4b8   :  { %11956 = vst [vmem:[#allocation204_spill] sm:$0xff] %v8530_v18 }
 0x4b9   :  { %2652 = vmatpush.msrb.mxu0 %v8514_v28  ;;  %2692 = vmatpush.msrb.mxu2 %v8517_v1  ;;  %v8533_v28 = vld [vmem:[#allocation7 + $0xb8] sm:$0xff]  ;;  %v8536_v1 = vld [vmem:[#allocation7 + $0x68] sm:$0xff] }
 0x4ba   :  { %11957 = vst [vmem:[#allocation205_spill] sm:$0xff] %v8533_v28 }
 0x4bb   :  { %2653 = vmatpush.msrb.mxu0 %v8522_v57  ;;  %2693 = vmatpush.msrb.mxu2 %v8525_v55  ;;  %11958 = vst [vmem:[#allocation206_spill] sm:$0xff] %v8536_v1  ;;  %v8542_v57 = vld [vmem:[#allocation7 + $0x20] sm:$0xff]  ;;  %v8545_v55 = vld [vmem:[#allocation7 + $0x28] sm:$0xff] }
 0x4bc   :  { %11960 = vst [vmem:[#allocation208_spill] sm:$0xff] %v8542_v57 }
 0x4bd   :  { %2654 = vmatpush.msrb.mxu0 %v8530_v18  ;;  %2694 = vmatpush.msrb.mxu2 %v8533_v28  ;;  %11961 = vst [vmem:[#allocation209_spill] sm:$0xff] %v8545_v55  ;;  %v2316_v28 = vpop.f32.mrf.mxu1  ;;  %v8550_v18 = vld [vmem:[#allocation7 + $0x468] sm:$0xff] }
 0x4be   :  { %11962 = vst [vmem:[#allocation210_spill] sm:$0xff] %v8550_v18  ;;  %v2317_v11 = vadd.f32 %v2316_v28, %v11966_v36  ;;  %v8628_v36 = vld [vmem:[#allocation7 + $0x108] sm:$0xff] }
 0x4bf   :  { %2655 = vmatpush.msrb.mxu0 %v8536_v1  ;;  %2695 = vmatpush.msrb.mxu2 %v8539_v58  ;;  %v8553_v1 = vld [vmem:[#allocation7 + $0x470] sm:$0xff]  ;;  %v2196_v58 = vpop.f32.mrf.mxu3  ;;  %11987 = vst [vmem:[#allocation54_spill] sm:$0xff] %v8628_v36 }
 0x4c0   :  { %11963 = vst [vmem:[#allocation211_spill] sm:$0xff] %v8553_v1  ;;  %v2336_v35 = vpop.f32.mrf.mxu2 }
 0x4c1   :  { %2656 = vmatpush.msrb.mxu0 %v8542_v57  ;;  %2696 = vmatpush.msrb.mxu2 %v8545_v55  ;;  %v8556_v57 = vld [vmem:[#allocation7 + $0x420] sm:$0xff]  ;;  %v8559_v55 = vld [vmem:[#allocation7 + $0x428] sm:$0xff]  ;;  %v2337_v16 = vadd.f32 %v2336_v35, %v2317_v11 }
 0x4c2   :  { %2657 = vmatmul.f32.vlgmr.msrb.gmra.mxu0 %v8442_v45  ;;  %2697 = vmatmul.f32.vlgmr.msrb.gmra.mxu2 %v8442_v45  ;;  %11964 = vst [vmem:[#allocation212_spill] sm:$0xff] %v8556_v57  ;;  %v8582_v11 = vld [vmem:[#allocation7 + $0x300] sm:$0xff]  ;;  %v8585_v35 = vld [vmem:[#allocation7 + $0x308] sm:$0xff] }
 0x4c3   :  { %2721 = vmatpush.msra.mxu0 %v8550_v18  ;;  %2761 = vmatpush.msra.mxu2 %v8553_v1  ;;  %11965 = vst [vmem:[#allocation213_spill] sm:$0xff] %v8559_v55  ;;  %v8566_v18 = vld [vmem:[#allocation7 + $0x3e0] sm:$0xff]  ;;  %v2197_v1 = vadd.f32 %v2196_v58, %v11734_v41 }
 0x4c4   :  { %11968 = vst [vmem:[#allocation215_spill] sm:$0xff] %v8566_v18 }
 0x4c5   :  { %2722 = vmatpush.msra.mxu0 %v8556_v57  ;;  %2762 = vmatpush.msra.mxu2 %v8559_v55  ;;  %v8573_v57 = vld [vmem:[#allocation7 + $0x398] sm:$0xff]  ;;  %v2217_v28 = vadd.f32 %v2216_v48, %v2197_v1  ;;  %v8576_v55 = vld [vmem:[#allocation7 + $0x348] sm:$0xff]  ;;  %11973 = vst [vmem:[#allocation222_spill] sm:$0xff] %v8582_v11  ;;  %v8591_v48 = vld [vmem:[#allocation7 + $0x2c0] sm:$0xff] }
 0x4c6   :  { %11970 = vst [vmem:[#allocation216_spill] sm:$0xff] %v8573_v57 }
 0x4c7   :  { %2723 = vmatpush.msra.mxu0 %v8563_v7  ;;  %2763 = vmatpush.msra.mxu2 %v8566_v18  ;;  %11971 = vst [vmem:[#allocation220_spill] sm:$0xff] %v8576_v55  ;;  %v8579_v7 = vld [vmem:[#allocation7 + $0x350] sm:$0xff]  ;;  %v2439_v18 = vadd.f32 %v2337_v16, %v2217_v28  ;;  %v2276_v58 = vpop.f32.mrf.mxu3  ;;  %v8597_v28 = vld [vmem:[#allocation7 + $0x278] sm:$0xff] }
 0x4c8   :  { %11972 = vst [vmem:[#allocation217_spill] sm:$0xff] %v8579_v7  ;;  %v8594_v16 = vld [vmem:[#allocation7 + $0x270] sm:$0xff] }
 0x4c9   :  { %2724 = vmatpush.msra.mxu0 %v8570_v19  ;;  %2764 = vmatpush.msra.mxu2 %v8573_v57  ;;  %11974 = vst [vmem:[#allocation219_spill] sm:$0xff] %v8585_v35  ;;  %v8588_v57 = vld [vmem:[#allocation7 + $0x2b8] sm:$0xff]  ;;  %v2440_v1 = vmul.f32 0.5, %v2439_v18  ;;  %v8606_v18 = vld [vmem:[#allocation7 + $0x1e0] sm:$0xff]  ;;  %v8621_v19 = vld [vmem:[#allocation7 + $0x150] sm:$0xff] }
 0x4ca   :  { %11975 = vst [vmem:[#allocation224_spill] sm:$0xff] %v8588_v57 }
 0x4cb   :  { %2725 = vmatpush.msra.mxu0 %v8576_v55  ;;  %2765 = vmatpush.msra.mxu2 %v8579_v7  ;;  %11976 = vst [vmem:[#allocation221_spill] sm:$0xff] %v8591_v48  ;;  %v2296_v7 = vpop.f32.mrf.mxu0  ;;  %4113 = vtanh.f32 %v2440_v1  ;;  %v2237_v1 = vadd.f32 %v8520_v6, %v11525_v54  ;;  %v8631_v6 = vld [vmem:[#allocation7 + $0x110] sm:$0xff]  ;;  %v8634_v54 = vld [vmem:[#allocation7 + $0xc0] sm:$0xff] }
 0x4cc   :  { %11977 = vst [vmem:[#allocation48_spill] sm:$0xff] %v8594_v16 }
 0x4cd   :  { %2726 = vmatpush.msra.mxu0 %v8582_v11  ;;  %2766 = vmatpush.msra.mxu2 %v8585_v35  ;;  %11978 = vst [vmem:[#allocation223_spill] sm:$0xff] %v8597_v28  ;;  %v8600_v11 = vld [vmem:[#allocation7 + $0x228] sm:$0xff]  ;;  %v8603_v35 = vld [vmem:[#allocation7 + $0x230] sm:$0xff] }
 0x4ce   :  { %11979 = vst [vmem:[#allocation50_spill] sm:$0xff] %v8600_v11 }
 0x4cf   :  { %2727 = vmatpush.msra.mxu0 %v8588_v57  ;;  %2767 = vmatpush.msra.mxu2 %v8591_v48  ;;  %11980 = vst [vmem:[#allocation225_spill] sm:$0xff] %v8603_v35  ;;  %v2356_v48 = vpop.f32.mrf.mxu3  ;;  %v8609_v57 = vld [vmem:[#allocation7 + $0x1e8] sm:$0xff] }
 0x4d0   :  { %11981 = vst [vmem:[#allocation47_spill] sm:$0xff] %v8606_v18 }
 0x4d1   :  { %2728 = vmatpush.msra.mxu0 %v8594_v16  ;;  %2768 = vmatpush.msra.mxu2 %v8597_v28  ;;  %11982 = vst [vmem:[#allocation52_spill] sm:$0xff] %v8609_v57  ;;  %v8612_v16 = vld [vmem:[#allocation7 + $0x198] sm:$0xff]  ;;  %v8615_v28 = vld [vmem:[#allocation7 + $0x1a0] sm:$0xff] }
 0x4d2   :  { %11983 = vst [vmem:[#allocation49_spill] sm:$0xff] %v8612_v16 }
 0x4d3   :  { %2729 = vmatpush.msra.mxu0 %v8600_v11  ;;  %2769 = vmatpush.msra.mxu2 %v8603_v35  ;;  %v11984_v35 = vld [vmem:[#allocation38_spill] sm:$0xff]  ;;  %11985 = vst [vmem:[#allocation51_spill] sm:$0xff] %v8621_v19 }
 0x4d4   :  { %v2357_v11 = vadd.f32 %v2356_v48, %v11984_v35  ;;  %11988 = vst [vmem:[#allocation55_spill] sm:$0xff] %v8631_v6  ;;  %v2396_v48 = vpop.f32.mrf.mxu1 }
 0x4d5   :  { %2730 = vmatpush.msra.mxu0 %v8606_v18  ;;  %2770 = vmatpush.msra.mxu2 %v8609_v57  ;;  %v8624_v18 = vld [vmem:[#allocation7 + $0x158] sm:$0xff]  ;;  %v4114_v57 = vpop.eup %4113  ;;  %11989 = vst [vmem:[#allocation56_spill] sm:$0xff] %v8634_v54 }
 0x4d6   :  { %11986 = vst [vmem:[#allocation53_spill] sm:$0xff] %v8624_v18 }
 0x4d7   :  { %2731 = vmatpush.msra.mxu0 %v8612_v16  ;;  %2771 = vmatpush.msra.mxu2 %v8615_v28  ;;  %v2257_v16 = vadd.f32 %v8528_v33, %v2237_v1  ;;  %v2442_v33 = vmul.f32 0.5, %v4114_v57  ;;  %v8641_v1 = vld [vmem:[#allocation7 + $0x78] sm:$0xff] }
 0x4d8   :  { %v8651_v57 = vld [vmem:[#allocation7 + $0x38] sm:$0xff] }
 0x4d9   :  { %2732 = vmatpush.msra.mxu0 %v8621_v19  ;;  %2772 = vmatpush.msra.mxu2 %v8624_v18  ;;  %v8637_v19 = vld [vmem:[#allocation7 + $0xc8] sm:$0xff]  ;;  %v8648_v18 = vld [vmem:[#allocation7 + $0x30] sm:$0xff] }
 0x4da   :  { %v2376_v55 = vpop.f32.mrf.mxu0 }
 0x4db   :  { %v2377_v41 = vadd.f32 %v2376_v55, %v2357_v11  ;;  %2733 = vmatpush.msra.mxu0 %v8628_v36  ;;  %2773 = vmatpush.msra.mxu2 %v8631_v6  ;;  %v2397_v11 = vadd.f32 %v7884_v56, %v2396_v48  ;;  %v8644_v36 = vld [vmem:[#allocation7 + $0x80] sm:$0xff]  ;;  %v2443_v6 = vadd.f32 0.5, %v2442_v33  ;;  %v8656_v48 = vld [vmem:[#allocation7 + $0x478] sm:$0xff] }
 0x4dd   :  { %v2444_v35 = vadd.f32 %v2377_v41, %v2257_v16  ;;  %2734 = vmatpush.msra.mxu0 %v8634_v54  ;;  %2774 = vmatpush.msra.mxu2 %v8637_v19  ;;  %v2277_v16 = vadd.f32 %v2276_v58, %v11759_v0  ;;  %v8659_v58 = vld [vmem:[#allocation10 + $0x78] sm:$0xff] }
 0x4df   :  { %v2445_v55 = vmul.f32 0.5, %v2444_v35  ;;  %2735 = vmatpush.msra.mxu0 %v8641_v1  ;;  %2775 = vmatpush.msra.mxu2 %v8644_v36  ;;  %v2297_v56 = vadd.f32 %v2296_v7, %v2277_v16  ;;  %v8671_v7 = vld [vmem:[#allocation10 + $0x68] sm:$0xff]  ;;  %v8677_v16 = vld [vmem:[#allocation10 + $0x60] sm:$0xff] }
 0x4e0   :  { %v2416_v41 = vpop.f32.mrf.mxu2  ;;  %11993 = vst [vmem:[#allocation60_spill] sm:$0xff] %v8671_v7 }
 0x4e1   :  { %4115 = vtanh.f32 %v2445_v55  ;;  %v2417_v54 = vadd.f32 %v2416_v41, %v2397_v11  ;;  %2736 = vmatpush.msra.mxu0 %v8648_v18  ;;  %2776 = vmatpush.msra.mxu2 %v8651_v57  ;;  %v8662_v55 = vld [vmem:[#allocation7 + $0x430] sm:$0xff]  ;;  %v8665_v11 = vld [vmem:[#allocation10 + $0x70] sm:$0xff]  ;;  %11995 = vst [vmem:[#allocation62_spill] sm:$0xff] %v8677_v16 }
 0x4e2   :  { %2737 = vmatmul.f32.vlgmr.msra.gmra.mxu0 %v8442_v45  ;;  %2777 = vmatmul.f32.vlgmr.msra.gmra.mxu2 %v8442_v45  ;;  %11990 = vst [vmem:[#allocation57_spill] sm:$0xff] %v8662_v55 }
 0x4e3   :  { %v2449_v35 = vmul.f32 %v2443_v6, %v2417_v54  ;;  %2801 = vmatpush.msrb.mxu0 %v8656_v48  ;;  %2877 = vmatpush.msrb.mxu2 %v8659_v58  ;;  %11991 = vst [vmem:[#allocation58_spill] sm:$0xff] %v8665_v11  ;;  %v8668_v54 = vld [vmem:[#allocation7 + $0x3e8] sm:$0xff]  ;;  %v8674_v6 = vld [vmem:[#allocation7 + $0x3a0] sm:$0xff] }
 0x4e4   :  { %11992 = vst [vmem:[#allocation59_spill] sm:$0xff] %v8668_v54 }
 0x4e5   :  { %v2450_v33 = vadd.f32 %v2449_v35, %v2297_v56  ;;  %2802 = vmatpush.msrb.mxu0 %v8662_v55  ;;  %2878 = vmatpush.msrb.mxu2 %v8665_v11  ;;  %11994 = vst [vmem:[#allocation61_spill] sm:$0xff] %v8674_v6  ;;  %v8680_v35 = vld [vmem:[#allocation7 + $0x358] sm:$0xff]  ;;  %v8686_v11 = vld [vmem:[#allocation7 + $0x310] sm:$0xff]  ;;  %v8699_v55 = vld [vmem:[#allocation7 + $0x280] sm:$0xff] }
 0x4e6   :  { %11996 = vst [vmem:[#allocation63_spill] sm:$0xff] %v8680_v35 }
 0x4e7   :  { %v4116_v41 = vpop.eup %4115  ;;  %4117 = vtanh.f32 %v2450_v33  ;;  %2803 = vmatpush.msrb.mxu0 %v8668_v54  ;;  %2879 = vmatpush.msrb.mxu2 %v8671_v7  ;;  %v8683_v33 = vld [vmem:[#allocation10 + $0x58] sm:$0xff]  ;;  %11998 = vst [vmem:[#allocation65_spill] sm:$0xff] %v8686_v11  ;;  %v8689_v7 = vld [vmem:[#allocation10 + $0x50] sm:$0xff] }
 0x4e8   :  { %v2447_v56 = vmul.f32 0.5, %v4116_v41  ;;  %11997 = vst [vmem:[#allocation64_spill] sm:$0xff] %v8683_v33 }
 0x4e9   :  { %2804 = vmatpush.msrb.mxu0 %v8674_v6  ;;  %2880 = vmatpush.msrb.mxu2 %v8677_v16  ;;  %v8693_v16 = vld [vmem:[#allocation7 + $0x2c8] sm:$0xff] }
 0x4ea   :  { %v2448_v6 = vadd.f32 0.5, %v2447_v56  ;;  %11999 = vst [vmem:[#allocation66_spill] sm:$0xff] %v8693_v16 }
 0x4eb   :  { %2805 = vmatpush.msrb.mxu0 %v8680_v35  ;;  %2881 = vmatpush.msrb.mxu2 %v8683_v33  ;;  %v8696_v35 = vld [vmem:[#allocation10 + $0x48] sm:$0xff] }
 0x4ed   :  { %v4118_v54 = vpop.eup %4117  ;;  %2806 = vmatpush.msrb.mxu0 %v8686_v11  ;;  %2882 = vmatpush.msrb.mxu2 %v8689_v7  ;;  %v8702_v11 = vld [vmem:[#allocation10 + $0x40] sm:$0xff] }
 0x4ee   :  { %v2452_v41 = vsub.f32 %v7911_v8, %v4118_v54  ;;  %v8707_v8 = vld [vmem:[#allocation7 + $0x238] sm:$0xff] }
 0x4ef   :  { %2807 = vmatpush.msrb.mxu0 %v8693_v16  ;;  %2883 = vmatpush.msrb.mxu2 %v8696_v35  ;;  %v8710_v16 = vld [vmem:[#allocation10 + $0x38] sm:$0xff] }
 0x4f0   :  { %v2453_v33 = vmul.f32 %v2452_v41, %v2448_v6  ;;  %v8717_v6 = vld [vmem:[#allocation7 + $0x1f0] sm:$0xff] }
 0x4f1   :  { %2808 = vmatpush.msrb.mxu0 %v8699_v55  ;;  %2884 = vmatpush.msrb.mxu2 %v8702_v11  ;;  %v8728_v41 = vld [vmem:[#allocation10 + $0x28] sm:$0xff] }
 0x4f2   :  { %v8705_v56 = vadd.f32 %v4118_v54, %v2453_v33  ;;  %v8720_v54 = vld [vmem:[#allocation10 + $0x30] sm:$0xff]  ;;  %v8725_v33 = vld [vmem:[#allocation7 + $0x1a8] sm:$0xff] }
 0x4f3   :  { %2809 = vmatpush.msrb.mxu0 %v8707_v8  ;;  %2885 = vmatpush.msrb.mxu2 %v8710_v16 }
 0x4f4   :  { %2471 = vmatmul.f32.vlgmr.msrb.gmra.mxu3 %v8705_v56  ;;  %2517 = vmatmul.f32.vlgmr.msrb.gmra.mxu1 %v8705_v56 }
 0x4f5   :  { %2621 = vmatpush.msrb.mxu3 %v7917_v30  ;;  %2661 = vmatpush.msrb.mxu1 %v7920_v21  ;;  %v8733_v30 = vld [vmem:[#allocation7 + $0x160] sm:$0xff]  ;;  %v8736_v21 = vld [vmem:[#allocation10 + $0x20] sm:$0xff] }
 0x4f6   :  { %2810 = vmatpush.msrb.mxu0 %v8717_v6  ;;  %2886 = vmatpush.msrb.mxu2 %v8720_v54 }
 0x4f7   :  { %2622 = vmatpush.msrb.mxu3 %v7925_v51  ;;  %2662 = vmatpush.msrb.mxu1 %v7928_v31  ;;  %v8745_v51 = vld [vmem:[#allocation7 + $0x118] sm:$0xff]  ;;  %v8748_v31 = vld [vmem:[#allocation10 + $0x18] sm:$0xff] }
 0x4f8   :  { %2811 = vmatpush.msrb.mxu0 %v8725_v33  ;;  %2887 = vmatpush.msrb.mxu2 %v8728_v41 }
 0x4f9   :  { %2623 = vmatpush.msrb.mxu3 %v7933_v63  ;;  %2663 = vmatpush.msrb.mxu1 %v7936_v20  ;;  %v8753_v63 = vld [vmem:[#allocation7 + $0xd0] sm:$0xff]  ;;  %v8756_v20 = vld [vmem:[#allocation10 + $0x10] sm:$0xff] }
 0x4fa   :  { %2812 = vmatpush.msrb.mxu0 %v8733_v30  ;;  %2888 = vmatpush.msrb.mxu2 %v8736_v21 }
 0x4fb   :  { %2624 = vmatpush.msrb.mxu3 %v7941_v60  ;;  %2664 = vmatpush.msrb.mxu1 %v7944_v39  ;;  %v8761_v60 = vld [vmem:[#allocation7 + $0x88] sm:$0xff]  ;;  %v8764_v39 = vld [vmem:[#allocation10 + $0x8] sm:$0xff] }
 0x4fc   :  { %2557 = vmatmul.f32.vlgmr.msra.gmra.mxu3 %v8705_v56  ;;  %2597 = vmatmul.f32.vlgmr.msra.gmra.mxu1 %v8705_v56 }
 0x4fd   :  { %2625 = vmatpush.msrb.mxu3 %v7949_v59  ;;  %2665 = vmatpush.msrb.mxu1 %v7952_v61  ;;  %v8769_v59 = vld [vmem:[#allocation7 + $0x40] sm:$0xff]  ;;  %v8772_v61 = vld [vmem:[#allocation10] sm:$0xff] }
 0x4fe   :  { %2813 = vmatpush.msrb.mxu0 %v8745_v51  ;;  %2889 = vmatpush.msrb.mxu2 %v8748_v31 }
 0x4ff   :  { %2626 = vmatpush.msrb.mxu3 %v7957_v43  ;;  %2666 = vmatpush.msrb.mxu1 %v7960_v37  ;;  %v8778_v43 = vld [vmem:[#allocation7 + $0x8b8] sm:$0xff]  ;;  %v8782_v37 = vld [vmem:[#allocation7 + $0x8c0] sm:$0xff] }
 0x500   :  { %2814 = vmatpush.msrb.mxu0 %v8753_v63  ;;  %2890 = vmatpush.msrb.mxu2 %v8756_v20 }
 0x501   :  { %2627 = vmatpush.msrb.mxu3 %v7965_v17  ;;  %2667 = vmatpush.msrb.mxu1 %v7968_v32  ;;  %v8786_v17 = vld [vmem:[#allocation7 + $0x870] sm:$0xff]  ;;  %v8790_v32 = vld [vmem:[#allocation7 + $0x878] sm:$0xff] }
 0x502   :  { %2815 = vmatpush.msrb.mxu0 %v8761_v60  ;;  %2891 = vmatpush.msrb.mxu2 %v8764_v39 }
 0x503   :  { %2628 = vmatpush.msrb.mxu3 %v7973_v9  ;;  %2668 = vmatpush.msrb.mxu1 %v7976_v14  ;;  %v8794_v9 = vld [vmem:[#allocation7 + $0x828] sm:$0xff]  ;;  %v8798_v14 = vld [vmem:[#allocation7 + $0x830] sm:$0xff] }
 0x504   :  { %2816 = vmatpush.msrb.mxu0 %v8769_v59  ;;  %2892 = vmatpush.msrb.mxu2 %v8772_v61 }
 0x505   :  { %2817 = vmatmul.f32.vlgmr.msrb.gmra.mxu0 %v8442_v45  ;;  %2629 = vmatpush.msrb.mxu3 %v7982_v4  ;;  %v8802_v4 = vld [vmem:[#allocation7 + $0x7e0] sm:$0xff] }
 0x506   :  { %2669 = vmatpush.msrb.mxu1 %v7985_v42  ;;  %2923 = vmatpush.msra.mxu0 %v8778_v43  ;;  %v8806_v42 = vld [vmem:[#allocation7 + $0x7e8] sm:$0xff] }
 0x507   :  { %2630 = vmatpush.msrb.mxu3 %v7989_v5  ;;  %2963 = vmatpush.msra.mxu2 %v8782_v37  ;;  %v8810_v5 = vld [vmem:[#allocation7 + $0x798] sm:$0xff] }
 0x508   :  { %2670 = vmatpush.msrb.mxu1 %v7993_v44  ;;  %2924 = vmatpush.msra.mxu0 %v8786_v17  ;;  %v8814_v44 = vld [vmem:[#allocation7 + $0x7a0] sm:$0xff] }
 0x509   :  { %2631 = vmatpush.msrb.mxu3 %v7997_v52  ;;  %2964 = vmatpush.msra.mxu2 %v8790_v32  ;;  %12000 = vst [vmem:[#allocation67_spill] sm:$0xff] %v8814_v44  ;;  %v8818_v52 = vld [vmem:[#allocation7 + $0x750] sm:$0xff] }
 0x50a   :  { %2671 = vmatpush.msrb.mxu1 %v8001_v15  ;;  %2925 = vmatpush.msra.mxu0 %v8794_v9  ;;  %v8822_v15 = vld [vmem:[#allocation7 + $0x758] sm:$0xff] }
 0x50b   :  { %2632 = vmatpush.msrb.mxu3 %v8005_v10  ;;  %2965 = vmatpush.msra.mxu2 %v8798_v14  ;;  %12001 = vst [vmem:[#allocation68_spill] sm:$0xff] %v8822_v15  ;;  %v8826_v10 = vld [vmem:[#allocation7 + $0x708] sm:$0xff] }
 0x50c   :  { %2672 = vmatpush.msrb.mxu1 %v8009_v46  ;;  %2926 = vmatpush.msra.mxu0 %v8802_v4  ;;  %12002 = vst [vmem:[#allocation69_spill] sm:$0xff] %v8826_v10  ;;  %v8830_v46 = vld [vmem:[#allocation7 + $0x710] sm:$0xff] }
 0x50d   :  { %2633 = vmatpush.msrb.mxu3 %v8013_v40  ;;  %2966 = vmatpush.msra.mxu2 %v8806_v42  ;;  %12003 = vst [vmem:[#allocation70_spill] sm:$0xff] %v8830_v46  ;;  %v8838_v40 = vld [vmem:[#allocation7 + $0x6c0] sm:$0xff] }
 0x50e   :  { %2673 = vmatpush.msrb.mxu1 %v8017_v13  ;;  %2927 = vmatpush.msra.mxu0 %v8810_v5  ;;  %12004 = vst [vmem:[#allocation71_spill] sm:$0xff] %v8838_v40  ;;  %v8842_v13 = vld [vmem:[#allocation7 + $0x6c8] sm:$0xff] }
 0x50f   :  { %2634 = vmatpush.msrb.mxu3 %v8021_v22  ;;  %2967 = vmatpush.msra.mxu2 %v8814_v44  ;;  %12005 = vst [vmem:[#allocation72_spill] sm:$0xff] %v8842_v13  ;;  %v8846_v22 = vld [vmem:[#allocation7 + $0x678] sm:$0xff] }
 0x510   :  { %2674 = vmatpush.msrb.mxu1 %v8025_v34  ;;  %2928 = vmatpush.msra.mxu0 %v8818_v52  ;;  %12006 = vst [vmem:[#allocation73_spill] sm:$0xff] %v8846_v22  ;;  %v8850_v34 = vld [vmem:[#allocation7 + $0x680] sm:$0xff] }
 0x511   :  { %2635 = vmatpush.msrb.mxu3 %v8029_v3  ;;  %2968 = vmatpush.msra.mxu2 %v8822_v15  ;;  %12007 = vst [vmem:[#allocation74_spill] sm:$0xff] %v8850_v34  ;;  %v8854_v3 = vld [vmem:[#allocation7 + $0x630] sm:$0xff]  ;;  %v12145_v15 = vld [vmem:[#allocation160_spill] sm:$0xff] }
 0x512   :  { %2675 = vmatpush.msrb.mxu1 %v8033_v26  ;;  %2929 = vmatpush.msra.mxu0 %v8826_v10  ;;  %12008 = vst [vmem:[#allocation75_spill] sm:$0xff] %v8854_v3  ;;  %v8858_v26 = vld [vmem:[#allocation7 + $0x638] sm:$0xff] }
 0x513   :  { %2636 = vmatpush.msrb.mxu3 %v8037_v47  ;;  %2969 = vmatpush.msra.mxu2 %v8830_v46  ;;  %12009 = vst [vmem:[#allocation76_spill] sm:$0xff] %v8858_v26  ;;  %v8862_v47 = vld [vmem:[#allocation7 + $0x5e8] sm:$0xff]  ;;  %v12143_v46 = vld [vmem:[#allocation158_spill] sm:$0xff] }
 0x514   :  { %2676 = vmatpush.msrb.mxu1 %v8041_v2  ;;  %2637 = vmatmul.f32.vlgmr.msrb.gmra.mxu3 %v8705_v56  ;;  %12010 = vst [vmem:[#allocation77_spill] sm:$0xff] %v8862_v47  ;;  %v8866_v2 = vld [vmem:[#allocation7 + $0x5f0] sm:$0xff] }
 0x515   :  { %2677 = vmatmul.f32.vlgmr.msrb.gmra.mxu1 %v8705_v56  ;;  %2701 = vmatpush.msra.mxu3 %v8046_v24  ;;  %12011 = vst [vmem:[#allocation78_spill] sm:$0xff] %v8866_v2  ;;  %v8870_v24 = vld [vmem:[#allocation7 + $0x5a0] sm:$0xff] }
 0x516   :  { %2741 = vmatpush.msra.mxu1 %v8049_v49  ;;  %2930 = vmatpush.msra.mxu0 %v8838_v40  ;;  %12012 = vst [vmem:[#allocation79_spill] sm:$0xff] %v8870_v24  ;;  %v12013_v49 = vld [vmem:[#allocation96_spill] sm:$0xff]  ;;  %v12144_v40 = vld [vmem:[#allocation159_spill] sm:$0xff] }
 0x517   :  { %2702 = vmatpush.msra.mxu3 %v8053_v25  ;;  %2970 = vmatpush.msra.mxu2 %v8842_v13  ;;  %v8874_v25 = vld [vmem:[#allocation7 + $0x5a8] sm:$0xff] }
 0x518   :  { %2742 = vmatpush.msra.mxu1 %v8057_v50  ;;  %2931 = vmatpush.msra.mxu0 %v8846_v22  ;;  %12014 = vst [vmem:[#allocation80_spill] sm:$0xff] %v8874_v25  ;;  %v12015_v50 = vld [vmem:[#allocation99_spill] sm:$0xff]  ;;  %v12141_v13 = vld [vmem:[#allocation45_spill] sm:$0xff] }
 0x519   :  { %2703 = vmatpush.msra.mxu3 %v8061_v53  ;;  %2971 = vmatpush.msra.mxu2 %v8850_v34  ;;  %v8878_v53 = vld [vmem:[#allocation7 + $0x558] sm:$0xff] }
 0x51a   :  { %2743 = vmatpush.msra.mxu1 %v8065_v23  ;;  %2932 = vmatpush.msra.mxu0 %v8854_v3  ;;  %12016 = vst [vmem:[#allocation84_spill] sm:$0xff] %v8878_v53  ;;  %v12017_v23 = vld [vmem:[#allocation102_spill] sm:$0xff] }
 0x51b   :  { %2704 = vmatpush.msra.mxu3 %v8069_v12  ;;  %2972 = vmatpush.msra.mxu2 %v8858_v26  ;;  %v8882_v12 = vld [vmem:[#allocation7 + $0x560] sm:$0xff] }
 0x51c   :  { %2744 = vmatpush.msra.mxu1 %v8073_v29  ;;  %2933 = vmatpush.msra.mxu0 %v8862_v47  ;;  %12018 = vst [vmem:[#allocation87_spill] sm:$0xff] %v8882_v12  ;;  %v12019_v29 = vld [vmem:[#allocation106_spill] sm:$0xff]  ;;  %v9080_v47 = vld [vmem:[#allocation7 + $0x8] sm:$0xff] }
 0x51d   :  { %2705 = vmatpush.msra.mxu3 %v8077_v62  ;;  %2973 = vmatpush.msra.mxu2 %v8866_v2  ;;  %v8886_v62 = vld [vmem:[#allocation7 + $0x510] sm:$0xff] }
 0x51e   :  { %2745 = vmatpush.msra.mxu1 %v8081_v38  ;;  %2934 = vmatpush.msra.mxu0 %v8870_v24  ;;  %12020 = vst [vmem:[#allocation88_spill] sm:$0xff] %v8886_v62  ;;  %v12021_v38 = vld [vmem:[#allocation108_spill] sm:$0xff]  ;;  %v8924_v2 = vld [vmem:[#allocation7 + $0x7f0] sm:$0xff] }
 0x51f   :  { %2706 = vmatpush.msra.mxu3 %v12013_v49  ;;  %2974 = vmatpush.msra.mxu2 %v8874_v25  ;;  %v8890_v49 = vld [vmem:[#allocation7 + $0x518] sm:$0xff]  ;;  %v8894_v25 = vld [vmem:[#allocation7 + $0x4c8] sm:$0xff]  ;;  %12040 = vst [vmem:[#allocation102_spill] sm:$0xff] %v8924_v2 }
 0x520   :  { %2746 = vmatpush.msra.mxu1 %v12015_v50  ;;  %2935 = vmatpush.msra.mxu0 %v8878_v53  ;;  %12022 = vst [vmem:[#allocation90_spill] sm:$0xff] %v8890_v49  ;;  %v12023_v50 = vld [vmem:[#allocation110_spill] sm:$0xff]  ;;  %v8995_v53 = vld [vmem:[#allocation7 + $0x5e0] sm:$0xff] }
 0x521   :  { %2707 = vmatpush.msra.mxu3 %v12017_v23  ;;  %2975 = vmatpush.msra.mxu2 %v8882_v12  ;;  %12024 = vst [vmem:[#allocation92_spill] sm:$0xff] %v8894_v25  ;;  %v12025_v23 = vld [vmem:[#allocation112_spill] sm:$0xff]  ;;  %v8898_v12 = vld [vmem:[#allocation7 + $0x4d0] sm:$0xff] }
 0x522   :  { %2747 = vmatpush.msra.mxu1 %v12019_v29  ;;  %2936 = vmatpush.msra.mxu0 %v8886_v62  ;;  %12026 = vst [vmem:[#allocation94_spill] sm:$0xff] %v8898_v12  ;;  %v12027_v29 = vld [vmem:[#allocation115_spill] sm:$0xff] }
 0x523   :  { %2708 = vmatpush.msra.mxu3 %v12021_v38  ;;  %2976 = vmatpush.msra.mxu2 %v8890_v49  ;;  %v8902_v62 = vld [vmem:[#allocation7 + $0x480] sm:$0xff]  ;;  %v8906_v49 = vld [vmem:[#allocation7 + $0x8c8] sm:$0xff] }
 0x524   :  { %2748 = vmatpush.msra.mxu1 %v12023_v50  ;;  %2937 = vmatpush.msra.mxu0 %v8894_v25  ;;  %12028 = vst [vmem:[#allocation19_spill] sm:$0xff] %v8902_v62  ;;  %v12029_v38 = vld [vmem:[#allocation116_spill] sm:$0xff]  ;;  %v12031_v50 = vld [vmem:[#allocation117_spill] sm:$0xff] }
 0x525   :  { %2709 = vmatpush.msra.mxu3 %v12025_v23  ;;  %2977 = vmatpush.msra.mxu2 %v8898_v12  ;;  %12030 = vst [vmem:[#allocation33_spill] sm:$0xff] %v8906_v49  ;;  %v8910_v25 = vld [vmem:[#allocation7 + $0x488] sm:$0xff]  ;;  %v12033_v23 = vld [vmem:[#allocation118_spill] sm:$0xff]  ;;  %v8914_v12 = vld [vmem:[#allocation7 + $0x880] sm:$0xff] }
 0x526   :  { %2749 = vmatpush.msra.mxu1 %v12027_v29  ;;  %2938 = vmatpush.msra.mxu0 %v8902_v62  ;;  %12032 = vst [vmem:[#allocation36_spill] sm:$0xff] %v8910_v25  ;;  %v12035_v29 = vld [vmem:[#allocation119_spill] sm:$0xff]  ;;  %v12036_v62 = vld [vmem:[#allocation120_spill] sm:$0xff] }
 0x527   :  { %2710 = vmatpush.msra.mxu3 %v12029_v38  ;;  %2978 = vmatpush.msra.mxu2 %v8910_v25  ;;  %12034 = vst [vmem:[#allocation96_spill] sm:$0xff] %v8914_v12  ;;  %v8919_v38 = vld [vmem:[#allocation7 + $0x838] sm:$0xff] }
 0x528   :  { %3003 = vmatpush.msrb.mxu0 %v8906_v49  ;;  %2750 = vmatpush.msra.mxu1 %v12031_v50  ;;  %12037 = vst [vmem:[#allocation99_spill] sm:$0xff] %v8919_v38  ;;  %v12038_v49 = vld [vmem:[#allocation44_spill] sm:$0xff]  ;;  %v12039_v50 = vld [vmem:[#allocation121_spill] sm:$0xff]  ;;  %v12042_v25 = vld [vmem:[#allocation123_spill] sm:$0xff] }
 0x529   :  { %2711 = vmatpush.msra.mxu3 %v12033_v23  ;;  %v12041_v23 = vld [vmem:[#allocation122_spill] sm:$0xff] }
 0x52a   :  { %3004 = vmatpush.msrb.mxu0 %v8914_v12  ;;  %2751 = vmatpush.msra.mxu1 %v12035_v29  ;;  %v8929_v12 = vld [vmem:[#allocation7 + $0x7a8] sm:$0xff]  ;;  %12083 = vst [vmem:[#allocation122_spill] sm:$0xff] %v8995_v53 }
 0x52b   :  { %2712 = vmatpush.msra.mxu3 %v12036_v62  ;;  %12043 = vst [vmem:[#allocation106_spill] sm:$0xff] %v8929_v12  ;;  %v12044_v62 = vld [vmem:[#allocation124_spill] sm:$0xff]  ;;  %v12045_v29 = vld [vmem:[#allocation125_spill] sm:$0xff] }
 0x52c   :  { %3005 = vmatpush.msrb.mxu0 %v8919_v38  ;;  %2752 = vmatpush.msra.mxu1 %v12038_v49  ;;  %v8934_v38 = vld [vmem:[#allocation7 + $0x760] sm:$0xff]  ;;  %v12047_v49 = vld [vmem:[#allocation126_spill] sm:$0xff] }
 0x52d   :  { %2713 = vmatpush.msra.mxu3 %v12039_v50  ;;  %12046 = vst [vmem:[#allocation108_spill] sm:$0xff] %v8934_v38  ;;  %v12048_v50 = vld [vmem:[#allocation127_spill] sm:$0xff] }
 0x52e   :  { %3006 = vmatpush.msrb.mxu0 %v8924_v2  ;;  %2753 = vmatpush.msra.mxu1 %v12041_v23  ;;  %v8939_v2 = vld [vmem:[#allocation7 + $0x718] sm:$0xff]  ;;  %v12051_v23 = vld [vmem:[#allocation129_spill] sm:$0xff] }
 0x52f   :  { %2714 = vmatpush.msra.mxu3 %v12042_v25  ;;  %12049 = vst [vmem:[#allocation110_spill] sm:$0xff] %v8939_v2  ;;  %v12050_v25 = vld [vmem:[#allocation128_spill] sm:$0xff] }
 0x530   :  { %3007 = vmatpush.msrb.mxu0 %v8929_v12  ;;  %2754 = vmatpush.msra.mxu1 %v12044_v62  ;;  %v12052_v62 = vld [vmem:[#allocation130_spill] sm:$0xff]  ;;  %v8957_v12 = vld [vmem:[#allocation7 + $0x640] sm:$0xff] }
 0x531   :  { %2715 = vmatpush.msra.mxu3 %v12045_v29  ;;  %v8947_v29 = vld [vmem:[#allocation7 + $0x6d0] sm:$0xff]  ;;  %12059 = vst [vmem:[#allocation116_spill] sm:$0xff] %v8957_v12 }
 0x532   :  { %3008 = vmatpush.msrb.mxu0 %v8934_v38  ;;  %2755 = vmatpush.msra.mxu1 %v12047_v49  ;;  %12053 = vst [vmem:[#allocation112_spill] sm:$0xff] %v8947_v29  ;;  %v12054_v49 = vld [vmem:[#allocation133_spill] sm:$0xff] }
 0x533   :  { %2716 = vmatpush.msra.mxu3 %v12048_v50  ;;  %v12055_v50 = vld [vmem:[#allocation131_spill] sm:$0xff]  ;;  %v8952_v38 = vld [vmem:[#allocation7 + $0x688] sm:$0xff] }
 0x534   :  { %3009 = vmatpush.msrb.mxu0 %v8939_v2  ;;  %2756 = vmatpush.msra.mxu1 %v12050_v25  ;;  %12056 = vst [vmem:[#allocation115_spill] sm:$0xff] %v8952_v38  ;;  %v12057_v25 = vld [vmem:[#allocation132_spill] sm:$0xff]  ;;  %v12058_v2 = vld [vmem:[#allocation81_spill] sm:$0xff] }
 0x535   :  { %2717 = vmatmul.f32.vlgmr.msra.gmra.mxu3 %v8705_v56  ;;  %2757 = vmatmul.f32.vlgmr.msra.gmra.mxu1 %v8705_v56 }
 0x536   :  { %2781 = vmatpush.msrb.mxu3 %v12051_v23  ;;  %2821 = vmatpush.msrb.mxu1 %v12052_v62  ;;  %v12060_v23 = vld [vmem:[#allocation82_spill] sm:$0xff]  ;;  %v12061_v62 = vld [vmem:[#allocation83_spill] sm:$0xff] }
 0x537   :  { %3010 = vmatpush.msrb.mxu0 %v8947_v29  ;;  %v8962_v29 = vld [vmem:[#allocation7 + $0x5f8] sm:$0xff] }
 0x538   :  { %2782 = vmatpush.msrb.mxu3 %v12054_v49  ;;  %2822 = vmatpush.msrb.mxu1 %v12055_v50  ;;  %12062 = vst [vmem:[#allocation117_spill] sm:$0xff] %v8962_v29  ;;  %v12063_v49 = vld [vmem:[#allocation18_spill] sm:$0xff]  ;;  %v12064_v50 = vld [vmem:[#allocation85_spill] sm:$0xff] }
 0x539   :  { %3011 = vmatpush.msrb.mxu0 %v8952_v38  ;;  %v8967_v38 = vld [vmem:[#allocation7 + $0x5b0] sm:$0xff] }
 0x53a   :  { %2783 = vmatpush.msrb.mxu3 %v12057_v25  ;;  %2823 = vmatpush.msrb.mxu1 %v12058_v2  ;;  %12065 = vst [vmem:[#allocation118_spill] sm:$0xff] %v8967_v38  ;;  %v12066_v2 = vld [vmem:[#allocation86_spill] sm:$0xff]  ;;  %v12067_v25 = vld [vmem:[#allocation89_spill] sm:$0xff] }
 0x53b   :  { %3012 = vmatpush.msrb.mxu0 %v8957_v12  ;;  %v8972_v12 = vld [vmem:[#allocation7 + $0x568] sm:$0xff] }
 0x53c   :  { %2784 = vmatpush.msrb.mxu3 %v12060_v23  ;;  %2824 = vmatpush.msrb.mxu1 %v12061_v62  ;;  %12068 = vst [vmem:[#allocation119_spill] sm:$0xff] %v8972_v12  ;;  %v12069_v23 = vld [vmem:[#allocation91_spill] sm:$0xff]  ;;  %v12070_v62 = vld [vmem:[#allocation93_spill] sm:$0xff] }
 0x53d   :  { %3013 = vmatpush.msrb.mxu0 %v8962_v29  ;;  %v8977_v29 = vld [vmem:[#allocation7 + $0x520] sm:$0xff]  ;;  %12125 = vst [vmem:[#allocation93_spill] sm:$0xff] %v9080_v47 }
 0x53e   :  { %2785 = vmatpush.msrb.mxu3 %v12063_v49  ;;  %2825 = vmatpush.msrb.mxu1 %v12064_v50  ;;  %12071 = vst [vmem:[#allocation120_spill] sm:$0xff] %v8977_v29  ;;  %v12072_v49 = vld [vmem:[#allocation32_spill] sm:$0xff]  ;;  %v12073_v50 = vld [vmem:[#allocation95_spill] sm:$0xff] }
 0x53f   :  { %3014 = vmatpush.msrb.mxu0 %v8967_v38  ;;  %v8982_v38 = vld [vmem:[#allocation7 + $0x4d8] sm:$0xff] }
 0x540   :  { %2786 = vmatpush.msrb.mxu3 %v12066_v2  ;;  %2826 = vmatpush.msrb.mxu1 %v12067_v25  ;;  %12074 = vst [vmem:[#allocation44_spill] sm:$0xff] %v8982_v38  ;;  %v12075_v2 = vld [vmem:[#allocation97_spill] sm:$0xff]  ;;  %v12076_v25 = vld [vmem:[#allocation98_spill] sm:$0xff] }
 0x541   :  { %3015 = vmatpush.msrb.mxu0 %v8972_v12  ;;  %v8987_v12 = vld [vmem:[#allocation7 + $0x490] sm:$0xff] }
 0x542   :  { %2787 = vmatpush.msrb.mxu3 %v12069_v23  ;;  %2827 = vmatpush.msrb.mxu1 %v12070_v62  ;;  %12077 = vst [vmem:[#allocation121_spill] sm:$0xff] %v8987_v12  ;;  %v12078_v23 = vld [vmem:[#allocation100_spill] sm:$0xff]  ;;  %v12079_v62 = vld [vmem:[#allocation101_spill] sm:$0xff] }
 0x543   :  { %3016 = vmatpush.msrb.mxu0 %v8977_v29  ;;  %v12080_v29 = vld [vmem:[#allocation103_spill] sm:$0xff] }
 0x544   :  { %2788 = vmatpush.msrb.mxu3 %v12072_v49  ;;  %2828 = vmatpush.msrb.mxu1 %v12073_v50  ;;  %v12081_v49 = vld [vmem:[#allocation104_spill] sm:$0xff]  ;;  %v12082_v50 = vld [vmem:[#allocation105_spill] sm:$0xff] }
 0x545   :  { %3017 = vmatpush.msrb.mxu0 %v8982_v38  ;;  %v9070_v38 = vld [vmem:[#allocation7 + $0x98] sm:$0xff] }
 0x546   :  { %2789 = vmatpush.msrb.mxu3 %v12075_v2  ;;  %2829 = vmatpush.msrb.mxu1 %v12076_v25  ;;  %v12084_v2 = vld [vmem:[#allocation107_spill] sm:$0xff]  ;;  %12120 = vst [vmem:[#allocation89_spill] sm:$0xff] %v9070_v38 }
 0x547   :  { %3018 = vmatpush.msrb.mxu0 %v8987_v12  ;;  %v8999_v25 = vld [vmem:[#allocation7 + $0x598] sm:$0xff]  ;;  %v12086_v12 = vld [vmem:[#allocation109_spill] sm:$0xff] }
 0x548   :  { %2790 = vmatpush.msrb.mxu3 %v12078_v23  ;;  %2830 = vmatpush.msrb.mxu1 %v12079_v62  ;;  %12085 = vst [vmem:[#allocation123_spill] sm:$0xff] %v8999_v25  ;;  %v9003_v23 = vld [vmem:[#allocation7 + $0x550] sm:$0xff]  ;;  %v9007_v62 = vld [vmem:[#allocation7 + $0x508] sm:$0xff] }
 0x549   :  { %12087 = vst [vmem:[#allocation124_spill] sm:$0xff] %v9003_v23 }
 0x54a   :  { %2791 = vmatpush.msrb.mxu3 %v12080_v29  ;;  %2831 = vmatpush.msrb.mxu1 %v12081_v49  ;;  %v12088_v29 = vld [vmem:[#allocation31_spill] sm:$0xff]  ;;  %12089 = vst [vmem:[#allocation125_spill] sm:$0xff] %v9007_v62 }
 0x54b   :  { %v12090_v49 = vld [vmem:[#allocation111_spill] sm:$0xff] }
 0x54c   :  { %2792 = vmatpush.msrb.mxu3 %v12082_v50  ;;  %2832 = vmatpush.msrb.mxu1 %v8995_v53  ;;  %v9011_v50 = vld [vmem:[#allocation7 + $0x4c0] sm:$0xff] }
 0x54d   :  { %12091 = vst [vmem:[#allocation126_spill] sm:$0xff] %v9011_v50 }
 0x54e   :  { %2793 = vmatpush.msrb.mxu3 %v12084_v2  ;;  %2833 = vmatpush.msrb.mxu1 %v8999_v25  ;;  %v9017_v2 = vld [vmem:[#allocation7 + $0x440] sm:$0xff]  ;;  %v9029_v25 = vld [vmem:[#allocation7 + $0x368] sm:$0xff] }
 0x54f   :  { %12093 = vst [vmem:[#allocation127_spill] sm:$0xff] %v9017_v2 }
 0x550   :  { %2794 = vmatpush.msrb.mxu3 %v12086_v12  ;;  %2834 = vmatpush.msrb.mxu1 %v9003_v23  ;;  %v12092_v12 = vld [vmem:[#allocation17_spill] sm:$0xff]  ;;  %v9021_v23 = vld [vmem:[#allocation7 + $0x3f8] sm:$0xff]  ;;  %12099 = vst [vmem:[#allocation130_spill] sm:$0xff] %v9029_v25 }
 0x551   :  { %12095 = vst [vmem:[#allocation128_spill] sm:$0xff] %v9021_v23 }
 0x552   :  { %2795 = vmatpush.msrb.mxu3 %v12088_v29  ;;  %2835 = vmatpush.msrb.mxu1 %v9007_v62  ;;  %v12094_v29 = vld [vmem:[#allocation113_spill] sm:$0xff] }
 0x553   :  { %v9025_v62 = vld [vmem:[#allocation7 + $0x3b0] sm:$0xff] }
 0x554   :  { %2796 = vmatpush.msrb.mxu3 %v12090_v49  ;;  %2836 = vmatpush.msrb.mxu1 %v9011_v50  ;;  %v12096_v49 = vld [vmem:[#allocation114_spill] sm:$0xff]  ;;  %12097 = vst [vmem:[#allocation129_spill] sm:$0xff] %v9025_v62  ;;  %v12098_v50 = vld [vmem:[#allocation29_spill] sm:$0xff] }
 0x555   :  { %2797 = vmatmul.f32.vlgmr.msrb.gmra.mxu3 %v8705_v56  ;;  %2837 = vmatmul.f32.vlgmr.msrb.gmra.mxu1 %v8705_v56 }
 0x556   :  { %2903 = vmatpush.msra.mxu3 %v12092_v12  ;;  %2943 = vmatpush.msra.mxu1 %v9017_v2  ;;  %v12100_v12 = vld [vmem:[#allocation28_spill] sm:$0xff] }
 0x557   :  { %v9033_v2 = vld [vmem:[#allocation7 + $0x320] sm:$0xff] }
 0x558   :  { %2904 = vmatpush.msra.mxu3 %v12094_v29  ;;  %2944 = vmatpush.msra.mxu1 %v9021_v23  ;;  %12101 = vst [vmem:[#allocation133_spill] sm:$0xff] %v9033_v2  ;;  %v12102_v29 = vld [vmem:[#allocation134_spill] sm:$0xff] }
 0x559   :  { %v9037_v23 = vld [vmem:[#allocation7 + $0x2d8] sm:$0xff] }
 0x55a   :  { %2905 = vmatpush.msra.mxu3 %v12096_v49  ;;  %2945 = vmatpush.msra.mxu1 %v9025_v62  ;;  %12103 = vst [vmem:[#allocation131_spill] sm:$0xff] %v9037_v23  ;;  %v12104_v49 = vld [vmem:[#allocation135_spill] sm:$0xff]  ;;  %v9041_v62 = vld [vmem:[#allocation7 + $0x290] sm:$0xff] }
 0x55b   :  { %12105 = vst [vmem:[#allocation132_spill] sm:$0xff] %v9041_v62 }
 0x55c   :  { %2906 = vmatpush.msra.mxu3 %v12098_v50  ;;  %2946 = vmatpush.msra.mxu1 %v9029_v25  ;;  %v12106_v50 = vld [vmem:[#allocation136_spill] sm:$0xff] }
 0x55d   :  { %v9045_v25 = vld [vmem:[#allocation7 + $0x248] sm:$0xff] }
 0x55e   :  { %2907 = vmatpush.msra.mxu3 %v12100_v12  ;;  %2947 = vmatpush.msra.mxu1 %v9033_v2  ;;  %12107 = vst [vmem:[#allocation81_spill] sm:$0xff] %v9045_v25  ;;  %v12108_v12 = vld [vmem:[#allocation137_spill] sm:$0xff]  ;;  %v9049_v2 = vld [vmem:[#allocation7 + $0x200] sm:$0xff] }
 0x55f   :  { %12109 = vst [vmem:[#allocation82_spill] sm:$0xff] %v9049_v2 }
 0x560   :  { %2908 = vmatpush.msra.mxu3 %v12102_v29  ;;  %2948 = vmatpush.msra.mxu1 %v9037_v23  ;;  %v12110_v29 = vld [vmem:[#allocation138_spill] sm:$0xff] }
 0x561   :  { %v9053_v23 = vld [vmem:[#allocation7 + $0x1b8] sm:$0xff] }
 0x562   :  { %2909 = vmatpush.msra.mxu3 %v12104_v49  ;;  %2949 = vmatpush.msra.mxu1 %v9041_v62  ;;  %12111 = vst [vmem:[#allocation83_spill] sm:$0xff] %v9053_v23  ;;  %v12112_v49 = vld [vmem:[#allocation139_spill] sm:$0xff]  ;;  %v9057_v62 = vld [vmem:[#allocation7 + $0x170] sm:$0xff] }
 0x563   :  { %12113 = vst [vmem:[#allocation18_spill] sm:$0xff] %v9057_v62 }
 0x564   :  { %2910 = vmatpush.msra.mxu3 %v12106_v50  ;;  %2950 = vmatpush.msra.mxu1 %v9045_v25  ;;  %v12114_v50 = vld [vmem:[#allocation140_spill] sm:$0xff] }
 0x565   :  { %v9061_v25 = vld [vmem:[#allocation7 + $0x128] sm:$0xff] }
 0x566   :  { %2911 = vmatpush.msra.mxu3 %v12108_v12  ;;  %2951 = vmatpush.msra.mxu1 %v9049_v2  ;;  %12115 = vst [vmem:[#allocation85_spill] sm:$0xff] %v9061_v25  ;;  %v2498_v12 = vpop.f32.mrf.mxu0  ;;  %v12116_v2 = vld [vmem:[#allocation141_spill] sm:$0xff] }
 0x568   :  { %2912 = vmatpush.msra.mxu3 %v12110_v29  ;;  %2952 = vmatpush.msra.mxu1 %v9053_v23  ;;  %v9065_v29 = vld [vmem:[#allocation7 + $0xe0] sm:$0xff]  ;;  %v12118_v23 = vld [vmem:[#allocation142_spill] sm:$0xff] }
 0x569   :  { %12117 = vst [vmem:[#allocation86_spill] sm:$0xff] %v9065_v29 }
 0x56a   :  { %2913 = vmatpush.msra.mxu3 %v12112_v49  ;;  %2953 = vmatpush.msra.mxu1 %v9057_v62  ;;  %v12119_v49 = vld [vmem:[#allocation35_spill] sm:$0xff] }
 0x56b   :  { %v2499_v53 = vadd.f32 %v2498_v12, %v12119_v49  ;;  %v12121_v62 = vld [vmem:[#allocation143_spill] sm:$0xff]  ;;  %v12126_v12 = vld [vmem:[#allocation146_spill] sm:$0xff]  ;;  %v12128_v49 = vld [vmem:[#allocation148_spill] sm:$0xff] }
 0x56c   :  { %2914 = vmatpush.msra.mxu3 %v12114_v50  ;;  %2954 = vmatpush.msra.mxu1 %v9061_v25  ;;  %v12122_v25 = vld [vmem:[#allocation20_spill] sm:$0xff] }
 0x56d   :  { %v211_v26 = vadd.f32 %v12122_v25, %v11661_v27  ;;  %v12131_v27 = vld [vmem:[#allocation150_spill] sm:$0xff] }
 0x56e   :  { %2915 = vmatpush.msra.mxu3 %v12116_v2  ;;  %2955 = vmatpush.msra.mxu1 %v9065_v29  ;;  %v9076_v2 = vld [vmem:[#allocation7 + $0x50] sm:$0xff] }
 0x56f   :  { %12123 = vst [vmem:[#allocation91_spill] sm:$0xff] %v9076_v2  ;;  %v12124_v29 = vld [vmem:[#allocation145_spill] sm:$0xff] }
 0x570   :  { %2916 = vmatpush.msra.mxu3 %v12118_v23  ;;  %2956 = vmatpush.msra.mxu1 %v9070_v38  ;;  %v12127_v38 = vld [vmem:[#allocation147_spill] sm:$0xff] }
 0x571   :  { %v2518_v50 = vpop.f32.mrf.mxu1 }
 0x572   :  { %2917 = vmatpush.msra.mxu3 %v12121_v62  ;;  %v2519_v24 = vadd.f32 %v2518_v50, %v2499_v53  ;;  %2957 = vmatpush.msra.mxu1 %v9076_v2  ;;  %v12129_v53 = vld [vmem:[#allocation149_spill] sm:$0xff]  ;;  %v12130_v50 = vld [vmem:[#allocation144_spill] sm:$0xff] }
 0x574   :  { %2918 = vmatpush.msra.mxu3 %v12124_v29  ;;  %v2845_v23 = vadd.f32 %v2519_v24, %v211_v26  ;;  %2958 = vmatpush.msra.mxu1 %v9080_v47  ;;  %v12132_v26 = vld [vmem:[#allocation151_spill] sm:$0xff]  ;;  %v12133_v29 = vld [vmem:[#allocation152_spill] sm:$0xff]  ;;  %v2538_v47 = vpop.f32.mrf.mxu2 }
 0x576   :  { %2983 = vmatpush.msrb.mxu3 %v12126_v12  ;;  %3023 = vmatpush.msrb.mxu1 %v12127_v38  ;;  %v2846_v62 = vmul.f32 0.5, %v2845_v23  ;;  %v12134_v12 = vld [vmem:[#allocation153_spill] sm:$0xff]  ;;  %v2578_v38 = vpop.f32.mrf.mxu0  ;;  %v12135_v23 = vld [vmem:[#allocation154_spill] sm:$0xff] }
 0x577   :  { %v2472_v25 = vpop.f32.mrf.mxu3 }
 0x578   :  { %2984 = vmatpush.msrb.mxu3 %v12128_v49  ;;  %3024 = vmatpush.msrb.mxu1 %v12129_v53  ;;  %4119 = vtanh.f32 %v2846_v62  ;;  %v2473_v2 = vadd.f32 %v12130_v50, %v2472_v25  ;;  %v12136_v49 = vld [vmem:[#allocation155_spill] sm:$0xff]  ;;  %v12137_v62 = vld [vmem:[#allocation24_spill] sm:$0xff] }
 0x579   :  { %v2539_v34 = vadd.f32 %v2538_v47, %v12137_v62  ;;  %v2598_v25 = vpop.f32.mrf.mxu1  ;;  %v12138_v50 = vld [vmem:[#allocation156_spill] sm:$0xff] }
 0x57a   :  { %2985 = vmatpush.msrb.mxu3 %v12131_v27  ;;  %3025 = vmatpush.msrb.mxu1 %v12132_v26  ;;  %v2475_v24 = vmul.f32 0.5, %v2473_v2  ;;  %v12139_v27 = vld [vmem:[#allocation26_spill] sm:$0xff] }
 0x57b   :  { %v2579_v26 = vadd.f32 %v2578_v38, %v12139_v27  ;;  %v12147_v38 = vld [vmem:[#allocation37_spill] sm:$0xff] }
 0x57c   :  { %2986 = vmatpush.msrb.mxu3 %v12133_v29  ;;  %3026 = vmatpush.msrb.mxu1 %v12134_v12  ;;  %4121 = vtanh.f32 %v2475_v24  ;;  %v12140_v29 = vld [vmem:[#allocation157_spill] sm:$0xff]  ;;  %v12142_v12 = vld [vmem:[#allocation39_spill] sm:$0xff] }
 0x57d   :  { %v252_v22 = vadd.f32 %v12142_v12, %v12141_v13  ;;  %v12149_v12 = vld [vmem:[#allocation162_spill] sm:$0xff] }
 0x57e   :  { %2987 = vmatpush.msrb.mxu3 %v12135_v23  ;;  %3027 = vmatpush.msrb.mxu1 %v12136_v49  ;;  %v4120_v53 = vpop.eup %4119  ;;  %v2599_v23 = vadd.f32 %v2598_v25, %v2579_v26  ;;  %v12154_v25 = vld [vmem:[#allocation167_spill] sm:$0xff]  ;;  %v12157_v26 = vld [vmem:[#allocation170_spill] sm:$0xff] }
 0x57f   :  { %v2848_v2 = vmul.f32 0.5, %v4120_v53  ;;  %v2558_v3 = vpop.f32.mrf.mxu3 }
 0x580   :  { %2988 = vmatpush.msrb.mxu3 %v12138_v50  ;;  %3028 = vmatpush.msrb.mxu1 %v12140_v29  ;;  %v2559_v24 = vadd.f32 %v2558_v3, %v2539_v34  ;;  %v12146_v50 = vld [vmem:[#allocation27_spill] sm:$0xff]  ;;  %v12148_v29 = vld [vmem:[#allocation161_spill] sm:$0xff] }
 0x581   :  { %v2849_v49 = vadd.f32 0.5, %v2848_v2  ;;  %v293_v53 = vadd.f32 %v12147_v38, %v12146_v50  ;;  %v12150_v3 = vld [vmem:[#allocation163_spill] sm:$0xff]  ;;  %v12160_v38 = vld [vmem:[#allocation173_spill] sm:$0xff] }
 0x582   :  { %2989 = vmatpush.msrb.mxu3 %v12143_v46  ;;  %3029 = vmatpush.msrb.mxu1 %v12144_v40  ;;  %v4122_v47 = vpop.eup %4121  ;;  %v2850_v62 = vadd.f32 %v2559_v24, %v252_v22  ;;  %v12151_v40 = vld [vmem:[#allocation164_spill] sm:$0xff]  ;;  %v12153_v22 = vld [vmem:[#allocation166_spill] sm:$0xff]  ;;  %v12158_v24 = vld [vmem:[#allocation171_spill] sm:$0xff] }
 0x583   :  { %v2477_v27 = vmul.f32 0.5, %v4122_v47  ;;  %v2855_v10 = vmul.f32 %v2849_v49, %v2599_v23  ;;  %v12159_v49 = vld [vmem:[#allocation172_spill] sm:$0xff] }
 0x584   :  { %2990 = vmatpush.msrb.mxu3 %v12145_v15  ;;  %3030 = vmatpush.msrb.mxu1 %v12148_v29  ;;  %v2851_v44 = vmul.f32 0.5, %v2850_v62  ;;  %v12152_v15 = vld [vmem:[#allocation165_spill] sm:$0xff]  ;;  %v12155_v62 = vld [vmem:[#allocation168_spill] sm:$0xff] }
 0x585   :  { %v2478_v34 = vadd.f32 0.5, %v2477_v27  ;;  %v2856_v46 = vadd.f32 %v2855_v10, %v293_v53  ;;  %v12156_v27 = vld [vmem:[#allocation169_spill] sm:$0xff]  ;;  %v12161_v53 = vld [vmem:[#allocation174_spill] sm:$0xff] }
 0x586   :  { %2991 = vmatpush.msrb.mxu3 %v12149_v12  ;;  %3031 = vmatpush.msrb.mxu1 %v12150_v3  ;;  %4123 = vtanh.f32 %v2851_v44  ;;  %v12162_v12 = vld [vmem:[#allocation175_spill] sm:$0xff]  ;;  %v12164_v3 = vld [vmem:[#allocation177_spill] sm:$0xff] }
 0x587   :  { %4039 = vst [vmem:[%s10313_s7 + $0x18] sm:$0xff] %v2478_v34  ;;  %4125 = vtanh.f32 %v2856_v46  ;;  %v12163_v34 = vld [vmem:[#allocation176_spill] sm:$0xff] }
 0x588   :  { %2992 = vmatpush.msrb.mxu3 %v12151_v40  ;;  %3032 = vmatpush.msrb.mxu1 %v12152_v15  ;;  %v12166_v40 = vld [vmem:[#allocation179_spill] sm:$0xff]  ;;  %v12167_v15 = vld [vmem:[#allocation180_spill] sm:$0xff] }
 0x58a   :  { %2993 = vmatpush.msrb.mxu3 %v12153_v22  ;;  %3033 = vmatpush.msrb.mxu1 %v12154_v25  ;;  %v12168_v22 = vld [vmem:[#allocation181_spill] sm:$0xff]  ;;  %v12169_v25 = vld [vmem:[#allocation182_spill] sm:$0xff] }
 0x58c   :  { %2994 = vmatpush.msrb.mxu3 %v12155_v62  ;;  %3034 = vmatpush.msrb.mxu1 %v12156_v27  ;;  %v4124_v10 = vpop.eup %4123  ;;  %v12170_v62 = vld [vmem:[#allocation183_spill] sm:$0xff]  ;;  %v12171_v27 = vld [vmem:[#allocation184_spill] sm:$0xff] }
 0x58d   :  { %v4126_v44 = vpop.eup %4125  ;;  %v2853_v2 = vmul.f32 0.5, %v4124_v10  ;;  %v12172_v10 = vld [vmem:[#allocation185_spill] sm:$0xff] }
 0x58e   :  { %2995 = vmatpush.msrb.mxu3 %v12157_v26  ;;  %3035 = vmatpush.msrb.mxu1 %v12158_v24  ;;  %v2858_v23 = vsub.f32 %v8442_v45, %v4126_v44  ;;  %v12165_v45 = vld [vmem:[#allocation178_spill] sm:$0xff]  ;;  %v12176_v24 = vld [vmem:[#allocation189_spill] sm:$0xff] }
 0x58f   :  { %v2854_v47 = vadd.f32 0.5, %v2853_v2  ;;  %v12173_v26 = vld [vmem:[#allocation186_spill] sm:$0xff]  ;;  %v12175_v2 = vld [vmem:[#allocation188_spill] sm:$0xff] }
 0x590   :  { %2996 = vmatpush.msrb.mxu3 %v12159_v49  ;;  %3036 = vmatpush.msrb.mxu1 %v12160_v38  ;;  %v12178_v49 = vld [vmem:[#allocation191_spill] sm:$0xff]  ;;  %v12180_v38 = vld [vmem:[#allocation193_spill] sm:$0xff] }
 0x591   :  { %v2859_v29 = vmul.f32 %v2858_v23, %v2854_v47  ;;  %v12177_v23 = vld [vmem:[#allocation190_spill] sm:$0xff]  ;;  %v12179_v47 = vld [vmem:[#allocation192_spill] sm:$0xff] }
 0x592   :  { %2997 = vmatpush.msrb.mxu3 %v12161_v53  ;;  %3037 = vmatpush.msrb.mxu1 %v12162_v12  ;;  %v12181_v53 = vld [vmem:[#allocation194_spill] sm:$0xff]  ;;  %v12183_v12 = vld [vmem:[#allocation196_spill] sm:$0xff] }
 0x593   :  { %v9125_v46 = vadd.f32 %v4126_v44, %v2859_v29  ;;  %v12174_v44 = vld [vmem:[#allocation187_spill] sm:$0xff] }
 0x594   :  { %2998 = vmatpush.msrb.mxu3 %v12163_v34  ;;  %3038 = vmatpush.msrb.mxu1 %v12164_v3  ;;  %v12182_v29 = vld [vmem:[#allocation195_spill] sm:$0xff]  ;;  %v12184_v34 = vld [vmem:[#allocation197_spill] sm:$0xff]  ;;  %v12185_v3 = vld [vmem:[#allocation198_spill] sm:$0xff] }
 0x595   :  { %2919 = vmatmul.f32.vlgmr.msra.gmra.mxu3 %v9125_v46  ;;  %2959 = vmatmul.f32.vlgmr.msra.gmra.mxu1 %v9125_v46 }
 0x596   :  { %3063 = vmatpush.msra.mxu3 %v12165_v45  ;;  %3103 = vmatpush.msra.mxu1 %v12166_v40  ;;  %v12186_v45 = vld [vmem:[#allocation199_spill] sm:$0xff]  ;;  %v12187_v40 = vld [vmem:[#allocation200_spill] sm:$0xff] }
 0x598   :  { %3064 = vmatpush.msra.mxu3 %v12167_v15  ;;  %3104 = vmatpush.msra.mxu1 %v12168_v22  ;;  %v12188_v15 = vld [vmem:[#allocation201_spill] sm:$0xff]  ;;  %v9156_v22 = vpop.f32.mrf.mxu0 }
 0x59a   :  { %3065 = vmatpush.msra.mxu3 %v12169_v25  ;;  %3105 = vmatpush.msra.mxu1 %v12170_v62  ;;  %v12189_v25 = vld [vmem:[#allocation202_spill] sm:$0xff]  ;;  %v12190_v62 = vld [vmem:[#allocation203_spill] sm:$0xff] }
 0x59c   :  { %3066 = vmatpush.msra.mxu3 %v12171_v27  ;;  %3106 = vmatpush.msra.mxu1 %v12172_v10  ;;  %v9160_v27 = vpop.f32.mrf.mxu1  ;;  %v12191_v10 = vld [vmem:[#allocation204_spill] sm:$0xff] }
 0x59d   :  { %2999 = vmatmul.f32.vlgmr.msrb.gmra.mxu3 %v9125_v46  ;;  %3039 = vmatmul.f32.vlgmr.msrb.gmra.mxu1 %v9125_v46 }
 0x59e   :  { %3067 = vmatpush.msra.mxu3 %v12173_v26  ;;  %3107 = vmatpush.msra.mxu1 %v12174_v44  ;;  %v12192_v26 = vld [vmem:[#allocation205_spill] sm:$0xff]  ;;  %v12193_v44 = vld [vmem:[#allocation206_spill] sm:$0xff] }
 0x5a0   :  { %3068 = vmatpush.msra.mxu3 %v12175_v2  ;;  %3108 = vmatpush.msra.mxu1 %v12176_v24  ;;  %v12194_v2 = vld [vmem:[#allocation207_spill] sm:$0xff]  ;;  %v12195_v24 = vld [vmem:[#allocation208_spill] sm:$0xff] }
 0x5a2   :  { %3069 = vmatpush.msra.mxu3 %v12177_v23  ;;  %3109 = vmatpush.msra.mxu1 %v12178_v49  ;;  %v12196_v23 = vld [vmem:[#allocation209_spill] sm:$0xff]  ;;  %v2738_v49 = vpop.f32.mrf.mxu0 }
 0x5a4   :  { %3070 = vmatpush.msra.mxu3 %v12179_v47  ;;  %3110 = vmatpush.msra.mxu1 %v12180_v38  ;;  %v12197_v47 = vld [vmem:[#allocation210_spill] sm:$0xff]  ;;  %v12198_v38 = vld [vmem:[#allocation211_spill] sm:$0xff] }
 0x5a6   :  { %3071 = vmatpush.msra.mxu3 %v12181_v53  ;;  %3111 = vmatpush.msra.mxu1 %v12182_v29  ;;  %v2618_v53 = vpop.f32.mrf.mxu2 }
 0x5a8   :  { %3072 = vmatpush.msra.mxu3 %v12183_v12  ;;  %3112 = vmatpush.msra.mxu1 %v12184_v34  ;;  %v12199_v12 = vld [vmem:[#allocation30_spill] sm:$0xff] }
 0x5a9   :  { %v2739_v34 = vadd.f32 %v2738_v49, %v12199_v12  ;;  %v12208_v49 = vld [vmem:[#allocation217_spill] sm:$0xff] }
 0x5aa   :  { %3073 = vmatpush.msra.mxu3 %v12185_v3  ;;  %3113 = vmatpush.msra.mxu1 %v12186_v45  ;;  %v12200_v3 = vld [vmem:[#allocation212_spill] sm:$0xff]  ;;  %v12201_v45 = vld [vmem:[#allocation213_spill] sm:$0xff] }
 0x5ac   :  { %3074 = vmatpush.msra.mxu3 %v12187_v40  ;;  %3114 = vmatpush.msra.mxu1 %v12188_v15  ;;  %v2638_v40 = vpop.f32.mrf.mxu3  ;;  %v12202_v15 = vld [vmem:[#allocation34_spill] sm:$0xff] }
 0x5ae   :  { %3075 = vmatpush.msra.mxu3 %v12189_v25  ;;  %3115 = vmatpush.msra.mxu1 %v12190_v62  ;;  %v2619_v25 = vadd.f32 %v2618_v53, %v12202_v15 }
 0x5b0   :  { %3076 = vmatpush.msra.mxu3 %v12191_v10  ;;  %3116 = vmatpush.msra.mxu1 %v12192_v26  ;;  %v12203_v10 = vld [vmem:[#allocation214_spill] sm:$0xff]  ;;  %v12204_v26 = vld [vmem:[#allocation215_spill] sm:$0xff] }
 0x5b2   :  { %3077 = vmatpush.msra.mxu3 %v12193_v44  ;;  %3117 = vmatpush.msra.mxu1 %v12194_v2  ;;  %v2758_v29 = vpop.f32.mrf.mxu1  ;;  %v2639_v44 = vadd.f32 %v2638_v40, %v2619_v25  ;;  %v12205_v2 = vld [vmem:[#allocation218_spill] sm:$0xff]  ;;  %v12214_v40 = vld [vmem:[#allocation223_spill] sm:$0xff] }
 0x5b3   :  { %v2759_v62 = vadd.f32 %v2758_v29, %v2739_v34  ;;  %v12211_v29 = vld [vmem:[#allocation224_spill] sm:$0xff]  ;;  %v12212_v34 = vld [vmem:[#allocation221_spill] sm:$0xff]  ;;  %v12215_v25 = vld [vmem:[#allocation50_spill] sm:$0xff] }
 0x5b4   :  { %3078 = vmatpush.msra.mxu3 %v12195_v24  ;;  %3118 = vmatpush.msra.mxu1 %v12196_v23  ;;  %v12206_v24 = vld [vmem:[#allocation216_spill] sm:$0xff] }
 0x5b5   :  { %3079 = vmatmul.f32.vlgmr.msra.gmra.mxu3 %v9125_v46  ;;  %3119 = vmatmul.f32.vlgmr.msra.gmra.mxu1 %v9125_v46  ;;  %v2861_v23 = vadd.f32 %v2759_v62, %v2639_v44  ;;  %v12216_v62 = vld [vmem:[#allocation225_spill] sm:$0xff] }
 0x5b6   :  { %3143 = vmatpush.msrb.mxu3 %v12197_v47  ;;  %3183 = vmatpush.msrb.mxu1 %v12198_v38  ;;  %v12207_v47 = vld [vmem:[#allocation220_spill] sm:$0xff]  ;;  %v12209_v38 = vld [vmem:[#allocation222_spill] sm:$0xff]  ;;  %v12219_v44 = vld [vmem:[#allocation49_spill] sm:$0xff] }
 0x5b7   :  { %v2862_v53 = vmul.f32 0.5, %v2861_v23  ;;  %v12220_v23 = vld [vmem:[#allocation51_spill] sm:$0xff] }
 0x5b8   :  { %3144 = vmatpush.msrb.mxu3 %v12200_v3  ;;  %3184 = vmatpush.msrb.mxu1 %v12201_v45  ;;  %v12210_v3 = vld [vmem:[#allocation219_spill] sm:$0xff]  ;;  %v12213_v45 = vld [vmem:[#allocation48_spill] sm:$0xff] }
 0x5b9   :  { %4127 = vtanh.f32 %v2862_v53  ;;  %v2718_v53 = vpop.f32.mrf.mxu3 }
 0x5ba   :  { %3145 = vmatpush.msrb.mxu3 %v12203_v10  ;;  %3185 = vmatpush.msrb.mxu1 %v12204_v26  ;;  %v12217_v10 = vld [vmem:[#allocation47_spill] sm:$0xff]  ;;  %v12218_v26 = vld [vmem:[#allocation52_spill] sm:$0xff] }
 0x5bc   :  { %3146 = vmatpush.msrb.mxu3 %v12205_v2  ;;  %3186 = vmatpush.msrb.mxu1 %v12206_v24  ;;  %v2698_v2 = vpop.f32.mrf.mxu2 }
 0x5be   :  { %3147 = vmatpush.msrb.mxu3 %v12207_v47  ;;  %3187 = vmatpush.msrb.mxu1 %v12208_v49  ;;  %v12221_v47 = vld [vmem:[#allocation53_spill] sm:$0xff]  ;;  %v2818_v49 = vpop.f32.mrf.mxu0 }
 0x5bf   :  { %v4128_v24 = vpop.eup %4127 }
 0x5c0   :  { %3148 = vmatpush.msrb.mxu3 %v12209_v38  ;;  %3188 = vmatpush.msrb.mxu1 %v12210_v3  ;;  %v12222_v38 = vld [vmem:[#allocation54_spill] sm:$0xff]  ;;  %v12223_v3 = vld [vmem:[#allocation55_spill] sm:$0xff] }
 0x5c2   :  { %3149 = vmatpush.msrb.mxu3 %v12211_v29  ;;  %3189 = vmatpush.msrb.mxu1 %v12212_v34  ;;  %v2864_v29 = vmul.f32 0.5, %v4128_v24  ;;  %v12224_v34 = vld [vmem:[#allocation56_spill] sm:$0xff] }
 0x5c4   :  { %3150 = vmatpush.msrb.mxu3 %v12213_v45  ;;  %3190 = vmatpush.msrb.mxu1 %v12214_v40  ;;  %v9200_v45 = vld [vmem:[#allocation8 + $0x8] ss:$0 sm:$0xff] }
 0x5c6   :  { %3151 = vmatpush.msrb.mxu3 %v12215_v25  ;;  %3191 = vmatpush.msrb.mxu1 %v12216_v62  ;;  %v2778_v25 = vpop.f32.mrf.mxu2 }
 0x5c8   :  { %3152 = vmatpush.msrb.mxu3 %v12217_v10  ;;  %3192 = vmatpush.msrb.mxu1 %v12218_v26  ;;  %v2865_v10 = vadd.f32 0.5, %v2864_v29  ;;  %v2699_v26 = vadd.f32 %v2698_v2, %v11759_v0  ;;  %v12227_v2 = vld [vmem:[#allocation57_spill] sm:$0xff]  ;;  %v12229_v29 = vld [vmem:[#allocation59_spill] sm:$0xff] }
 0x5ca   :  { %3153 = vmatpush.msrb.mxu3 %v12219_v44  ;;  %3193 = vmatpush.msrb.mxu1 %v8615_v28  ;;  %v2819_v28 = vadd.f32 %v9200_v45, %v2818_v49  ;;  %v12228_v49 = vld [vmem:[#allocation58_spill] sm:$0xff] }
 0x5cc   :  { %3154 = vmatpush.msrb.mxu3 %v12220_v23  ;;  %3194 = vmatpush.msrb.mxu1 %v12221_v47 }
 0x5ce   :  { %3155 = vmatpush.msrb.mxu3 %v12222_v38  ;;  %3195 = vmatpush.msrb.mxu1 %v12223_v3 }
 0x5d0   :  { %3156 = vmatpush.msrb.mxu3 %v12224_v34  ;;  %3196 = vmatpush.msrb.mxu1 %v8637_v19  ;;  %v12225_v19 = vld [vmem:[#allocation41_spill] sm:$0xff] }
 0x5d1   :  { %v2659_v24 = vadd.f32 %v9156_v22, %v12225_v19  ;;  %v12230_v22 = vld [vmem:[#allocation60_spill] sm:$0xff] }
 0x5d2   :  { %v2838_v40 = vpop.f32.mrf.mxu1  ;;  %3157 = vmatpush.msrb.mxu3 %v8641_v1  ;;  %3197 = vmatpush.msrb.mxu1 %v8644_v36  ;;  %v12226_v1 = vld [vmem:[#allocation38_spill] sm:$0xff]  ;;  %v2719_v36 = vadd.f32 %v2718_v53, %v2699_v26  ;;  %v12235_v53 = vld [vmem:[#allocation65_spill] sm:$0xff] }
 0x5d3   :  { %v2839_v62 = vadd.f32 %v2838_v40, %v2819_v28  ;;  %v2779_v23 = vadd.f32 %v2778_v25, %v12226_v1  ;;  %v12231_v28 = vld [vmem:[#allocation61_spill] sm:$0xff]  ;;  %v12236_v40 = vld [vmem:[#allocation66_spill] sm:$0xff] }
 0x5d4   :  { %3158 = vmatpush.msrb.mxu3 %v8648_v18  ;;  %3198 = vmatpush.msrb.mxu1 %v8651_v57  ;;  %v2679_v57 = vadd.f32 %v9160_v27, %v2659_v24  ;;  %v12234_v27 = vld [vmem:[#allocation64_spill] sm:$0xff]  ;;  %v9343_v24 = vld [vmem:[#allocation7 + $0x578] sm:$0xff] }
 0x5d5   :  { %v2871_v44 = vmul.f32 %v2865_v10, %v2839_v62  ;;  %3159 = vmatmul.f32.vlgmr.msrb.gmra.mxu3 %v9125_v46  ;;  %3199 = vmatmul.f32.vlgmr.msrb.gmra.mxu1 %v9125_v46 }
 0x5d6   :  { %3223 = vmatpush.msra.mxu3 %v8656_v48  ;;  %3299 = vmatpush.msra.mxu1 %v8659_v58  ;;  %v12232_v48 = vld [vmem:[#allocation62_spill] sm:$0xff]  ;;  %v12233_v58 = vld [vmem:[#allocation63_spill] sm:$0xff] }
 0x5d7   :  { %v2872_v38 = vadd.f32 %v2871_v44, %v2719_v36  ;;  %v9347_v36 = vld [vmem:[#allocation7 + $0x528] sm:$0xff] }
 0x5d8   :  { %v2798_v18 = vpop.f32.mrf.mxu3  ;;  %3224 = vmatpush.msra.mxu3 %v12227_v2  ;;  %3300 = vmatpush.msra.mxu1 %v12228_v49  ;;  %v9355_v2 = vld [vmem:[#allocation7 + $0x4e0] sm:$0xff] }
 0x5d9   :  { %v2799_v47 = vadd.f32 %v2798_v18, %v2779_v23  ;;  %4129 = vtanh.f32 %v2872_v38  ;;  %v12241_v23 = vld [vmem:[#allocation70_spill] sm:$0xff]  ;;  %v12242_v18 = vld [vmem:[#allocation73_spill] sm:$0xff]  ;;  %v12244_v49 = vld [vmem:[#allocation75_spill] sm:$0xff] }
 0x5da   :  { %3225 = vmatpush.msra.mxu3 %v12229_v29  ;;  %3301 = vmatpush.msra.mxu1 %v12230_v22  ;;  %v9359_v38 = vld [vmem:[#allocation7 + $0x4e8] sm:$0xff]  ;;  %v9363_v29 = vld [vmem:[#allocation7 + $0x498] sm:$0xff] }
 0x5db   :  { %v2866_v3 = vadd.f32 %v2799_v47, %v2679_v57  ;;  %v9351_v57 = vld [vmem:[#allocation7 + $0x530] sm:$0xff]  ;;  %v12243_v47 = vld [vmem:[#allocation72_spill] sm:$0xff] }
 0x5dc   :  { %3226 = vmatpush.msra.mxu3 %v12231_v28  ;;  %3302 = vmatpush.msra.mxu1 %v12232_v48  ;;  %v12246_v22 = vld [vmem:[#allocation77_spill] sm:$0xff]  ;;  %v9372_v28 = vld [vmem:[#allocation7 + $0x8e0] sm:$0xff] }
 0x5dd   :  { %v2867_v34 = vmul.f32 0.5, %v2866_v3  ;;  %v12245_v3 = vld [vmem:[#allocation74_spill] sm:$0xff]  ;;  %v9375_v48 = vld [vmem:[#allocation7 + $0x8e8] sm:$0xff] }
 0x5de   :  { %3227 = vmatpush.msra.mxu3 %v12233_v58  ;;  %3303 = vmatpush.msra.mxu1 %v12234_v27  ;;  %v12247_v58 = vld [vmem:[#allocation79_spill] sm:$0xff] }
 0x5df   :  { %4131 = vtanh.f32 %v2867_v34  ;;  %v4130_v25 = vpop.eup %4129  ;;  %v9367_v34 = vld [vmem:[#allocation7 + $0x4a0] sm:$0xff]  ;;  %v9379_v27 = vld [vmem:[#allocation7 + $0x898] sm:$0xff] }
 0x5e0   :  { %3228 = vmatpush.msra.mxu3 %v12235_v53  ;;  %3304 = vmatpush.msra.mxu1 %v8689_v7  ;;  %v2874_v44 = vsub.f32 %v8705_v56, %v4130_v25  ;;  %v9254_v56 = vld [vmem:[#allocation7 + $0x890] sm:$0xff]  ;;  %12248 = vst [vmem:[#allocation32_spill] sm:$0xff] %v9379_v27  ;;  %v12249_v53 = vld [vmem:[#allocation76_spill] sm:$0xff] }
 0x5e2   :  { %3229 = vmatpush.msra.mxu3 %v12236_v40  ;;  %3305 = vmatpush.msra.mxu1 %v8696_v35  ;;  %v9251_v35 = vld [vmem:[#allocation7 + $0x888] sm:$0xff]  ;;  %v9383_v40 = vld [vmem:[#allocation7 + $0x8a0] sm:$0xff] }
 0x5e3   :  { %12250 = vst [vmem:[#allocation95_spill] sm:$0xff] %v9383_v40 }
 0x5e4   :  { %3230 = vmatpush.msra.mxu3 %v8699_v55  ;;  %3306 = vmatpush.msra.mxu1 %v8702_v11  ;;  %v9243_v11 = vld [vmem:[#allocation7 + $0x8d0] sm:$0xff] }
 0x5e5   :  { %v4132_v62 = vpop.eup %4131 }
 0x5e6   :  { %v2869_v10 = vmul.f32 0.5, %v4132_v62  ;;  %3231 = vmatpush.msra.mxu3 %v8707_v8  ;;  %3307 = vmatpush.msra.mxu1 %v8710_v16  ;;  %v9246_v16 = vld [vmem:[#allocation7 + $0x8d8] sm:$0xff]  ;;  %v9259_v8 = vld [vmem:[#allocation7 + $0x840] sm:$0xff]  ;;  %v9387_v62 = vld [vmem:[#allocation7 + $0x850] sm:$0xff] }
 0x5e7   :  { %12252 = vst [vmem:[#allocation97_spill] sm:$0xff] %v9387_v62 }
 0x5e8   :  { %v2870_v26 = vadd.f32 0.5, %v2869_v10  ;;  %3232 = vmatpush.msra.mxu3 %v8717_v6  ;;  %3308 = vmatpush.msra.mxu1 %v8720_v54  ;;  %v9262_v6 = vld [vmem:[#allocation7 + $0x848] sm:$0xff]  ;;  %v9267_v54 = vld [vmem:[#allocation7 + $0x7f8] sm:$0xff] }
 0x5e9   :  { %v12253_v10 = vld [vmem:[#allocation78_spill] sm:$0xff] }
 0x5ea   :  { %v2875_v7 = vmul.f32 %v2874_v44, %v2870_v26  ;;  %3233 = vmatpush.msra.mxu3 %v8725_v33  ;;  %3309 = vmatpush.msra.mxu1 %v8728_v41  ;;  %v9270_v33 = vld [vmem:[#allocation7 + $0x800] sm:$0xff]  ;;  %v9276_v41 = vld [vmem:[#allocation7 + $0x7b0] sm:$0xff]  ;;  %v9391_v26 = vld [vmem:[#allocation7 + $0x858] sm:$0xff] }
 0x5eb   :  { %12254 = vst [vmem:[#allocation98_spill] sm:$0xff] %v9391_v26  ;;  %v12255_v44 = vld [vmem:[#allocation88_spill] sm:$0xff] }
 0x5ec   :  { %v9237_v55 = vadd.f32 %v4130_v25, %v2875_v7  ;;  %3234 = vmatpush.msra.mxu3 %v8733_v30  ;;  %3310 = vmatpush.msra.mxu1 %v8736_v21  ;;  %v9279_v30 = vld [vmem:[#allocation7 + $0x7b8] sm:$0xff]  ;;  %v9283_v21 = vld [vmem:[#allocation7 + $0x768] sm:$0xff] }
 0x5ed   :  { %v12251_v25 = vld [vmem:[#allocation84_spill] sm:$0xff] }
 0x5ee   :  { %2893 = vmatmul.f32.vlgmr.msrb.gmra.mxu2 %v9237_v55  ;;  %2939 = vmatmul.f32.vlgmr.msra.gmra.mxu0 %v9237_v55  ;;  %v9395_v7 = vld [vmem:[#allocation7 + $0x808] sm:$0xff] }
 0x5ef   :  { %3043 = vmatpush.msrb.mxu2 %v9243_v11  ;;  %3083 = vmatpush.msra.mxu0 %v9246_v16  ;;  %12256 = vst [vmem:[#allocation100_spill] sm:$0xff] %v9395_v7 }
 0x5f0   :  { %3235 = vmatpush.msra.mxu3 %v8745_v51  ;;  %3311 = vmatpush.msra.mxu1 %v8748_v31  ;;  %v9287_v51 = vld [vmem:[#allocation7 + $0x770] sm:$0xff]  ;;  %v9291_v31 = vld [vmem:[#allocation7 + $0x720] sm:$0xff] }
 0x5f1   :  { %3044 = vmatpush.msrb.mxu2 %v9251_v35  ;;  %3084 = vmatpush.msra.mxu0 %v9254_v56 }
 0x5f2   :  { %3236 = vmatpush.msra.mxu3 %v8753_v63  ;;  %3312 = vmatpush.msra.mxu1 %v8756_v20  ;;  %v9295_v63 = vld [vmem:[#allocation7 + $0x728] sm:$0xff]  ;;  %v9299_v20 = vld [vmem:[#allocation7 + $0x6d8] sm:$0xff] }
 0x5f3   :  { %3045 = vmatpush.msrb.mxu2 %v9259_v8  ;;  %3085 = vmatpush.msra.mxu0 %v9262_v6 }
 0x5f4   :  { %3237 = vmatpush.msra.mxu3 %v8761_v60  ;;  %3313 = vmatpush.msra.mxu1 %v8764_v39  ;;  %v9303_v60 = vld [vmem:[#allocation7 + $0x6e0] sm:$0xff]  ;;  %v9307_v39 = vld [vmem:[#allocation7 + $0x690] sm:$0xff] }
 0x5f5   :  { %3046 = vmatpush.msrb.mxu2 %v9267_v54  ;;  %3086 = vmatpush.msra.mxu0 %v9270_v33 }
 0x5f6   :  { %3238 = vmatpush.msra.mxu3 %v8769_v59  ;;  %2979 = vmatmul.f32.vlgmr.msra.gmra.mxu2 %v9237_v55  ;;  %v9311_v59 = vld [vmem:[#allocation7 + $0x698] sm:$0xff] }
 0x5f7   :  { %3019 = vmatmul.f32.vlgmr.msrb.gmra.mxu0 %v9237_v55  ;;  %3047 = vmatpush.msrb.mxu2 %v9276_v41 }
 0x5f8   :  { %3087 = vmatpush.msra.mxu0 %v9279_v30  ;;  %3239 = vmatmul.f32.vlgmr.msra.gmra.mxu3 %v9125_v46 }
 0x5f9   :  { %3048 = vmatpush.msrb.mxu2 %v9283_v21  ;;  %3345 = vmatpush.msrb.mxu3 %v8778_v43  ;;  %v9319_v43 = vld [vmem:[#allocation7 + $0x650] sm:$0xff] }
 0x5fa   :  { %3088 = vmatpush.msra.mxu0 %v9287_v51  ;;  %3314 = vmatpush.msra.mxu1 %v8772_v61  ;;  %v9315_v61 = vld [vmem:[#allocation7 + $0x648] sm:$0xff] }
 0x5fb   :  { %3049 = vmatpush.msrb.mxu2 %v9291_v31  ;;  %3346 = vmatpush.msrb.mxu3 %v8786_v17  ;;  %v9327_v17 = vld [vmem:[#allocation7 + $0x608] sm:$0xff] }
 0x5fc   :  { %3089 = vmatpush.msra.mxu0 %v9295_v63  ;;  %3385 = vmatpush.msrb.mxu1 %v8782_v37  ;;  %v9323_v37 = vld [vmem:[#allocation7 + $0x600] sm:$0xff] }
 0x5fd   :  { %3050 = vmatpush.msrb.mxu2 %v9299_v20  ;;  %3347 = vmatpush.msrb.mxu3 %v8794_v9  ;;  %v9331_v9 = vld [vmem:[#allocation7 + $0x5b8] sm:$0xff] }
 0x5fe   :  { %3090 = vmatpush.msra.mxu0 %v9303_v60  ;;  %3386 = vmatpush.msrb.mxu1 %v8790_v32  ;;  %v12237_v32 = vld [vmem:[#allocation67_spill] sm:$0xff] }
 0x5ff   :  { %3051 = vmatpush.msrb.mxu2 %v9307_v39  ;;  %3348 = vmatpush.msrb.mxu3 %v8802_v4  ;;  %v9335_v4 = vld [vmem:[#allocation7 + $0x5c0] sm:$0xff] }
 0x600   :  { %3091 = vmatpush.msra.mxu0 %v9311_v59  ;;  %3387 = vmatpush.msrb.mxu1 %v8798_v14  ;;  %v12238_v14 = vld [vmem:[#allocation69_spill] sm:$0xff] }
 0x601   :  { %3052 = vmatpush.msrb.mxu2 %v9315_v61  ;;  %3349 = vmatpush.msrb.mxu3 %v8810_v5  ;;  %v9339_v5 = vld [vmem:[#allocation7 + $0x570] sm:$0xff] }
 0x602   :  { %3092 = vmatpush.msra.mxu0 %v9319_v43  ;;  %3388 = vmatpush.msrb.mxu1 %v8806_v42  ;;  %v12239_v42 = vld [vmem:[#allocation68_spill] sm:$0xff] }
 0x603   :  { %3053 = vmatpush.msrb.mxu2 %v9323_v37  ;;  %3350 = vmatpush.msrb.mxu3 %v8818_v52  ;;  %v12240_v52 = vld [vmem:[#allocation71_spill] sm:$0xff] }
 0x604   :  { %3093 = vmatpush.msra.mxu0 %v9327_v17  ;;  %3389 = vmatpush.msrb.mxu1 %v12237_v32  ;;  %v12257_v32 = vld [vmem:[#allocation80_spill] sm:$0xff] }
 0x605   :  { %3054 = vmatpush.msrb.mxu2 %v9331_v9  ;;  %3351 = vmatpush.msrb.mxu3 %v12238_v14  ;;  %v9399_v14 = vld [vmem:[#allocation7 + $0x810] sm:$0xff] }
 0x606   :  { %3094 = vmatpush.msra.mxu0 %v9335_v4  ;;  %3390 = vmatpush.msrb.mxu1 %v12239_v42  ;;  %12258 = vst [vmem:[#allocation101_spill] sm:$0xff] %v9399_v14  ;;  %v12259_v42 = vld [vmem:[#allocation92_spill] sm:$0xff] }
 0x607   :  { %3055 = vmatpush.msrb.mxu2 %v9339_v5  ;;  %3352 = vmatpush.msrb.mxu3 %v12240_v52  ;;  %v9403_v52 = vld [vmem:[#allocation7 + $0x7c0] sm:$0xff] }
 0x608   :  { %3095 = vmatpush.msra.mxu0 %v9343_v24  ;;  %3391 = vmatpush.msrb.mxu1 %v12241_v23  ;;  %12260 = vst [vmem:[#allocation103_spill] sm:$0xff] %v9403_v52  ;;  %v12261_v23 = vld [vmem:[#allocation87_spill] sm:$0xff] }
 0x609   :  { %3056 = vmatpush.msrb.mxu2 %v9347_v36  ;;  %3353 = vmatpush.msrb.mxu3 %v12242_v18  ;;  %v9407_v18 = vld [vmem:[#allocation7 + $0x7c8] sm:$0xff] }
 0x60a   :  { %3096 = vmatpush.msra.mxu0 %v9351_v57  ;;  %3392 = vmatpush.msrb.mxu1 %v12243_v47  ;;  %12262 = vst [vmem:[#allocation104_spill] sm:$0xff] %v9407_v18  ;;  %v12263_v47 = vld [vmem:[#allocation19_spill] sm:$0xff] }
 0x60b   :  { %3057 = vmatpush.msrb.mxu2 %v9355_v2  ;;  %3354 = vmatpush.msrb.mxu3 %v12244_v49  ;;  %v9411_v49 = vld [vmem:[#allocation7 + $0x778] sm:$0xff] }
 0x60c   :  { %3097 = vmatpush.msra.mxu0 %v9359_v38  ;;  %3393 = vmatpush.msrb.mxu1 %v12245_v3  ;;  %12264 = vst [vmem:[#allocation105_spill] sm:$0xff] %v9411_v49  ;;  %v12265_v3 = vld [vmem:[#allocation33_spill] sm:$0xff] }
 0x60d   :  { %3058 = vmatpush.msrb.mxu2 %v9363_v29  ;;  %3355 = vmatpush.msrb.mxu3 %v12246_v22  ;;  %v9415_v22 = vld [vmem:[#allocation7 + $0x780] sm:$0xff] }
 0x60e   :  { %3098 = vmatpush.msra.mxu0 %v9367_v34  ;;  %3059 = vmatmul.f32.vlgmr.msrb.gmra.mxu2 %v9237_v55  ;;  %12266 = vst [vmem:[#allocation107_spill] sm:$0xff] %v9415_v22 }
 0x60f   :  { %3099 = vmatmul.f32.vlgmr.msra.gmra.mxu0 %v9237_v55  ;;  %3123 = vmatpush.msra.mxu2 %v9372_v28 }
 0x610   :  { %3163 = vmatpush.msrb.mxu0 %v9375_v48  ;;  %3356 = vmatpush.msrb.mxu3 %v12247_v58  ;;  %v12267_v58 = vld [vmem:[#allocation90_spill] sm:$0xff] }
 0x611   :  { %3124 = vmatpush.msra.mxu2 %v9379_v27  ;;  %3394 = vmatpush.msrb.mxu1 %v12249_v53  ;;  %v9419_v53 = vld [vmem:[#allocation7 + $0x730] sm:$0xff]  ;;  %v9635_v27 = vld [vmem:[#allocation7 + $0x258] sm:$0xff] }
 0x612   :  { %3164 = vmatpush.msrb.mxu0 %v9383_v40  ;;  %3357 = vmatpush.msrb.mxu3 %v12251_v25  ;;  %12268 = vst [vmem:[#allocation109_spill] sm:$0xff] %v9419_v53  ;;  %v12269_v25 = vld [vmem:[#allocation96_spill] sm:$0xff] }
 0x613   :  { %3125 = vmatpush.msra.mxu2 %v9387_v62  ;;  %3395 = vmatpush.msrb.mxu1 %v12253_v10  ;;  %v9423_v10 = vld [vmem:[#allocation7 + $0x738] sm:$0xff]  ;;  %12367 = vst [vmem:[#allocation177_spill] sm:$0xff] %v9635_v27 }
 0x614   :  { %3165 = vmatpush.msrb.mxu0 %v9391_v26  ;;  %3358 = vmatpush.msrb.mxu3 %v12255_v44  ;;  %12270 = vst [vmem:[#allocation31_spill] sm:$0xff] %v9423_v10  ;;  %v12271_v44 = vld [vmem:[#allocation94_spill] sm:$0xff] }
 0x615   :  { %3126 = vmatpush.msra.mxu2 %v9395_v7  ;;  %3396 = vmatpush.msrb.mxu1 %v12257_v32  ;;  %v9427_v32 = vld [vmem:[#allocation7 + $0x6e8] sm:$0xff]  ;;  %v4999_v26 = vld [vmem:[#allocation7 + $0x298] sm:$0xff] }
 0x616   :  { %3166 = vmatpush.msrb.mxu0 %v9399_v14  ;;  %3359 = vmatpush.msrb.mxu3 %v12259_v42  ;;  %12272 = vst [vmem:[#allocation111_spill] sm:$0xff] %v9427_v32  ;;  %v12273_v42 = vld [vmem:[#allocation99_spill] sm:$0xff]  ;;  %v12355_v7 = vld [vmem:[#allocation93_spill] sm:$0xff] }
 0x617   :  { %3127 = vmatpush.msra.mxu2 %v9403_v52  ;;  %3397 = vmatpush.msrb.mxu1 %v12261_v23  ;;  %v9431_v23 = vld [vmem:[#allocation7 + $0x6f0] sm:$0xff]  ;;  %v12354_v14 = vld [vmem:[#allocation91_spill] sm:$0xff] }
 0x618   :  { %3167 = vmatpush.msrb.mxu0 %v9407_v18  ;;  %3360 = vmatpush.msrb.mxu3 %v12263_v47  ;;  %12274 = vst [vmem:[#allocation17_spill] sm:$0xff] %v9431_v23  ;;  %v12275_v47 = vld [vmem:[#allocation36_spill] sm:$0xff] }
 0x619   :  { %3128 = vmatpush.msra.mxu2 %v9411_v49  ;;  %3398 = vmatpush.msrb.mxu1 %v12267_v58  ;;  %v12277_v58 = vld [vmem:[#allocation102_spill] sm:$0xff]  ;;  %v4984_v18 = vld [vmem:[#allocation7 + $0x48] sm:$0xff] }
 0x61a   :  { %3425 = vmatpush.msra.mxu3 %v12265_v3  ;;  %3168 = vmatpush.msrb.mxu0 %v9415_v22  ;;  %v9435_v3 = vld [vmem:[#allocation7 + $0x6a0] sm:$0xff]  ;;  %v4975_v22 = vld [vmem:[#allocation7 + $0x2d0] sm:$0xff] }
 0x61b   :  { %3129 = vmatpush.msra.mxu2 %v9419_v53  ;;  %3399 = vmatpush.msrb.mxu1 %v12271_v44  ;;  %12276 = vst [vmem:[#allocation113_spill] sm:$0xff] %v9435_v3  ;;  %v9442_v44 = vld [vmem:[#allocation7 + $0x658] sm:$0xff]  ;;  %v12341_v53 = vld [vmem:[#allocation133_spill] sm:$0xff] }
 0x61c   :  { %3426 = vmatpush.msra.mxu3 %v12269_v25  ;;  %3169 = vmatpush.msrb.mxu0 %v9423_v10  ;;  %v9439_v25 = vld [vmem:[#allocation7 + $0x6a8] sm:$0xff]  ;;  %12279 = vst [vmem:[#allocation29_spill] sm:$0xff] %v9442_v44  ;;  %v4973_v10 = vld [vmem:[#allocation7 + $0x360] sm:$0xff] }
 0x61d   :  { %3130 = vmatpush.msra.mxu2 %v9427_v32  ;;  %3400 = vmatpush.msrb.mxu1 %v12275_v47  ;;  %12278 = vst [vmem:[#allocation114_spill] sm:$0xff] %v9439_v25  ;;  %v9446_v32 = vld [vmem:[#allocation7 + $0x660] sm:$0xff]  ;;  %v9449_v47 = vld [vmem:[#allocation7 + $0x610] sm:$0xff] }
 0x61e   :  { %3427 = vmatpush.msra.mxu3 %v12273_v42  ;;  %3170 = vmatpush.msrb.mxu0 %v9431_v23  ;;  %v12280_v42 = vld [vmem:[#allocation106_spill] sm:$0xff]  ;;  %12281 = vst [vmem:[#allocation28_spill] sm:$0xff] %v9446_v32  ;;  %v9576_v23 = vld [vmem:[#allocation7 + $0x500] sm:$0xff] }
 0x61f   :  { %3131 = vmatpush.msra.mxu2 %v9435_v3  ;;  %12282 = vst [vmem:[#allocation134_spill] sm:$0xff] %v9449_v47  ;;  %v12283_v3 = vld [vmem:[#allocation108_spill] sm:$0xff] }
 0x620   :  { %3428 = vmatpush.msra.mxu3 %v12277_v58  ;;  %3171 = vmatpush.msrb.mxu0 %v9439_v25  ;;  %v9453_v58 = vld [vmem:[#allocation7 + $0x618] sm:$0xff]  ;;  %v9456_v25 = vld [vmem:[#allocation7 + $0x5c8] sm:$0xff]  ;;  %12333 = vst [vmem:[#allocation168_spill] sm:$0xff] %v9576_v23 }
 0x621   :  { %3132 = vmatpush.msra.mxu2 %v9442_v44  ;;  %12284 = vst [vmem:[#allocation135_spill] sm:$0xff] %v9453_v58  ;;  %v12286_v44 = vld [vmem:[#allocation110_spill] sm:$0xff] }
 0x622   :  { %3429 = vmatpush.msra.mxu3 %v12280_v42  ;;  %3172 = vmatpush.msrb.mxu0 %v9446_v32  ;;  %12285 = vst [vmem:[#allocation136_spill] sm:$0xff] %v9456_v25  ;;  %v9460_v42 = vld [vmem:[#allocation7 + $0x5d0] sm:$0xff]  ;;  %v9463_v32 = vld [vmem:[#allocation7 + $0x580] sm:$0xff] }
 0x623   :  { %3133 = vmatpush.msra.mxu2 %v9449_v47  ;;  %12287 = vst [vmem:[#allocation137_spill] sm:$0xff] %v9460_v42  ;;  %v12289_v47 = vld [vmem:[#allocation112_spill] sm:$0xff] }
 0x624   :  { %3430 = vmatpush.msra.mxu3 %v12283_v3  ;;  %3173 = vmatpush.msrb.mxu0 %v9453_v58  ;;  %12288 = vst [vmem:[#allocation138_spill] sm:$0xff] %v9463_v32  ;;  %v9467_v3 = vld [vmem:[#allocation7 + $0x588] sm:$0xff]  ;;  %v9470_v58 = vld [vmem:[#allocation7 + $0x538] sm:$0xff] }
 0x625   :  { %3134 = vmatpush.msra.mxu2 %v9456_v25  ;;  %12290 = vst [vmem:[#allocation139_spill] sm:$0xff] %v9467_v3  ;;  %v12292_v25 = vld [vmem:[#allocation115_spill] sm:$0xff] }
 0x626   :  { %3431 = vmatpush.msra.mxu3 %v12286_v44  ;;  %3174 = vmatpush.msrb.mxu0 %v9460_v42  ;;  %12291 = vst [vmem:[#allocation140_spill] sm:$0xff] %v9470_v58  ;;  %v9474_v44 = vld [vmem:[#allocation7 + $0x540] sm:$0xff]  ;;  %v9477_v42 = vld [vmem:[#allocation7 + $0x4f0] sm:$0xff] }
 0x627   :  { %3135 = vmatpush.msra.mxu2 %v9463_v32  ;;  %12293 = vst [vmem:[#allocation141_spill] sm:$0xff] %v9474_v44  ;;  %v12295_v32 = vld [vmem:[#allocation116_spill] sm:$0xff] }
 0x628   :  { %3432 = vmatpush.msra.mxu3 %v12289_v47  ;;  %3175 = vmatpush.msrb.mxu0 %v9467_v3  ;;  %12294 = vst [vmem:[#allocation142_spill] sm:$0xff] %v9477_v42  ;;  %v9481_v47 = vld [vmem:[#allocation7 + $0x4f8] sm:$0xff]  ;;  %v9484_v3 = vld [vmem:[#allocation7 + $0x4a8] sm:$0xff] }
 0x629   :  { %3136 = vmatpush.msra.mxu2 %v9470_v58  ;;  %12296 = vst [vmem:[#allocation143_spill] sm:$0xff] %v9481_v47  ;;  %v12298_v58 = vld [vmem:[#allocation117_spill] sm:$0xff] }
 0x62a   :  { %3433 = vmatpush.msra.mxu3 %v12292_v25  ;;  %3176 = vmatpush.msrb.mxu0 %v9474_v44  ;;  %12297 = vst [vmem:[#allocation20_spill] sm:$0xff] %v9484_v3  ;;  %v9488_v25 = vld [vmem:[#allocation7 + $0x4b0] sm:$0xff]  ;;  %v9507_v44 = vld [vmem:[#allocation7 + $0x860] sm:$0xff] }
 0x62b   :  { %3137 = vmatpush.msra.mxu2 %v9477_v42  ;;  %12299 = vst [vmem:[#allocation145_spill] sm:$0xff] %v9488_v25  ;;  %v9493_v42 = vld [vmem:[#allocation7 + $0x8f0] sm:$0xff] }
 0x62c   :  { %3434 = vmatpush.msra.mxu3 %v12295_v32  ;;  %3177 = vmatpush.msrb.mxu0 %v9481_v47  ;;  %12300 = vst [vmem:[#allocation146_spill] sm:$0xff] %v9493_v42  ;;  %v9496_v32 = vld [vmem:[#allocation7 + $0x8f8] sm:$0xff] }
 0x62d   :  { %3138 = vmatpush.msra.mxu2 %v9484_v3  ;;  %12301 = vst [vmem:[#allocation147_spill] sm:$0xff] %v9496_v32  ;;  %v12302_v47 = vld [vmem:[#allocation118_spill] sm:$0xff]  ;;  %v9500_v3 = vld [vmem:[#allocation7 + $0x8a8] sm:$0xff] }
 0x62e   :  { %3435 = vmatpush.msra.mxu3 %v12298_v58  ;;  %3178 = vmatpush.msrb.mxu0 %v9488_v25  ;;  %12303 = vst [vmem:[#allocation148_spill] sm:$0xff] %v9500_v3  ;;  %v9503_v58 = vld [vmem:[#allocation7 + $0x8b0] sm:$0xff]  ;;  %v12305_v25 = vld [vmem:[#allocation119_spill] sm:$0xff] }
 0x62f   :  { %3139 = vmatmul.f32.vlgmr.msra.gmra.mxu2 %v9237_v55  ;;  %3179 = vmatmul.f32.vlgmr.msrb.gmra.mxu0 %v9237_v55  ;;  %12304 = vst [vmem:[#allocation149_spill] sm:$0xff] %v9503_v58 }
 0x630   :  { %3203 = vmatpush.msrb.mxu2 %v9493_v42  ;;  %3243 = vmatpush.msra.mxu0 %v9496_v32  ;;  %12306 = vst [vmem:[#allocation144_spill] sm:$0xff] %v9507_v44  ;;  %v9510_v42 = vld [vmem:[#allocation7 + $0x868] sm:$0xff] }
 0x631   :  { %3436 = vmatpush.msra.mxu3 %v12302_v47  ;;  %12307 = vst [vmem:[#allocation150_spill] sm:$0xff] %v9510_v42  ;;  %v12308_v32 = vld [vmem:[#allocation120_spill] sm:$0xff]  ;;  %v9514_v47 = vld [vmem:[#allocation7 + $0x818] sm:$0xff] }
 0x632   :  { %3204 = vmatpush.msrb.mxu2 %v9500_v3  ;;  %3244 = vmatpush.msra.mxu0 %v9503_v58  ;;  %12309 = vst [vmem:[#allocation151_spill] sm:$0xff] %v9514_v47  ;;  %v9517_v3 = vld [vmem:[#allocation7 + $0x820] sm:$0xff] }
 0x633   :  { %3437 = vmatpush.msra.mxu3 %v12305_v25  ;;  %12310 = vst [vmem:[#allocation152_spill] sm:$0xff] %v9517_v3  ;;  %v12311_v58 = vld [vmem:[#allocation44_spill] sm:$0xff]  ;;  %v9521_v25 = vld [vmem:[#allocation7 + $0x7d0] sm:$0xff] }
 0x634   :  { %3205 = vmatpush.msrb.mxu2 %v9507_v44  ;;  %3245 = vmatpush.msra.mxu0 %v9510_v42  ;;  %12312 = vst [vmem:[#allocation153_spill] sm:$0xff] %v9521_v25  ;;  %v9524_v44 = vld [vmem:[#allocation7 + $0x7d8] sm:$0xff]  ;;  %v12314_v42 = vld [vmem:[#allocation121_spill] sm:$0xff] }
 0x635   :  { %3438 = vmatpush.msra.mxu3 %v12308_v32  ;;  %12313 = vst [vmem:[#allocation154_spill] sm:$0xff] %v9524_v44  ;;  %v9528_v32 = vld [vmem:[#allocation7 + $0x788] sm:$0xff] }
 0x636   :  { %3206 = vmatpush.msrb.mxu2 %v9514_v47  ;;  %3246 = vmatpush.msra.mxu0 %v9517_v3  ;;  %12315 = vst [vmem:[#allocation155_spill] sm:$0xff] %v9528_v32  ;;  %v9531_v47 = vld [vmem:[#allocation7 + $0x790] sm:$0xff]  ;;  %v9534_v3 = vld [vmem:[#allocation7 + $0x740] sm:$0xff] }
 0x637   :  { %3439 = vmatpush.msra.mxu3 %v12311_v58  ;;  %12316 = vst [vmem:[#allocation156_spill] sm:$0xff] %v9531_v47  ;;  %v9537_v58 = vld [vmem:[#allocation7 + $0x748] sm:$0xff] }
 0x638   :  { %3207 = vmatpush.msrb.mxu2 %v9521_v25  ;;  %3247 = vmatpush.msra.mxu0 %v9524_v44  ;;  %12317 = vst [vmem:[#allocation157_spill] sm:$0xff] %v9534_v3  ;;  %v9540_v25 = vld [vmem:[#allocation7 + $0x6f8] sm:$0xff]  ;;  %v9568_v44 = vld [vmem:[#allocation7 + $0x590] sm:$0xff] }
 0x639   :  { %3440 = vmatpush.msra.mxu3 %v12314_v42  ;;  %12318 = vst [vmem:[#allocation39_spill] sm:$0xff] %v9537_v58  ;;  %v9543_v42 = vld [vmem:[#allocation7 + $0x700] sm:$0xff] }
 0x63a   :  { %3208 = vmatpush.msrb.mxu2 %v9528_v32  ;;  %3248 = vmatpush.msra.mxu0 %v9531_v47  ;;  %12319 = vst [vmem:[#allocation158_spill] sm:$0xff] %v9540_v25  ;;  %v9546_v32 = vld [vmem:[#allocation7 + $0x6b0] sm:$0xff]  ;;  %v9549_v47 = vld [vmem:[#allocation7 + $0x6b8] sm:$0xff] }
 0x63b   :  { %12320 = vst [vmem:[#allocation159_spill] sm:$0xff] %v9543_v42 }
 0x63c   :  { %3209 = vmatpush.msrb.mxu2 %v9534_v3  ;;  %3249 = vmatpush.msra.mxu0 %v9537_v58  ;;  %12321 = vst [vmem:[#allocation160_spill] sm:$0xff] %v9546_v32  ;;  %v9552_v3 = vld [vmem:[#allocation7 + $0x668] sm:$0xff]  ;;  %v9555_v58 = vld [vmem:[#allocation7 + $0x670] sm:$0xff] }
 0x63d   :  { %12322 = vst [vmem:[#allocation37_spill] sm:$0xff] %v9549_v47 }
 0x63e   :  { %3210 = vmatpush.msrb.mxu2 %v9540_v25  ;;  %3250 = vmatpush.msra.mxu0 %v9543_v42  ;;  %12323 = vst [vmem:[#allocation161_spill] sm:$0xff] %v9552_v3  ;;  %v9558_v25 = vld [vmem:[#allocation7 + $0x620] sm:$0xff]  ;;  %v9561_v42 = vld [vmem:[#allocation7 + $0x628] sm:$0xff] }
 0x63f   :  { %12324 = vst [vmem:[#allocation162_spill] sm:$0xff] %v9555_v58 }
 0x640   :  { %3211 = vmatpush.msrb.mxu2 %v9546_v32  ;;  %3251 = vmatpush.msra.mxu0 %v9549_v47  ;;  %12325 = vst [vmem:[#allocation163_spill] sm:$0xff] %v9558_v25  ;;  %v9564_v32 = vld [vmem:[#allocation7 + $0x5d8] sm:$0xff] }
 0x641   :  { %12326 = vst [vmem:[#allocation164_spill] sm:$0xff] %v9561_v42  ;;  %v12328_v47 = vld [vmem:[#allocation122_spill] sm:$0xff] }
 0x642   :  { %3212 = vmatpush.msrb.mxu2 %v9552_v3  ;;  %3252 = vmatpush.msra.mxu0 %v9555_v58  ;;  %12327 = vst [vmem:[#allocation165_spill] sm:$0xff] %v9564_v32  ;;  %v12330_v3 = vld [vmem:[#allocation123_spill] sm:$0xff]  ;;  %v9572_v58 = vld [vmem:[#allocation7 + $0x548] sm:$0xff] }
 0x643   :  { %12329 = vst [vmem:[#allocation166_spill] sm:$0xff] %v9568_v44 }
 0x644   :  { %3213 = vmatpush.msrb.mxu2 %v9558_v25  ;;  %3253 = vmatpush.msra.mxu0 %v9561_v42  ;;  %12331 = vst [vmem:[#allocation167_spill] sm:$0xff] %v9572_v58  ;;  %v12332_v25 = vld [vmem:[#allocation124_spill] sm:$0xff]  ;;  %v12334_v42 = vld [vmem:[#allocation125_spill] sm:$0xff] }
 0x646   :  { %3214 = vmatpush.msrb.mxu2 %v9564_v32  ;;  %3254 = vmatpush.msra.mxu0 %v12328_v47  ;;  %v9580_v32 = vld [vmem:[#allocation7 + $0x4b8] sm:$0xff] }
 0x647   :  { %12335 = vst [vmem:[#allocation169_spill] sm:$0xff] %v9580_v32  ;;  %v12336_v47 = vld [vmem:[#allocation126_spill] sm:$0xff] }
 0x648   :  { %3215 = vmatpush.msrb.mxu2 %v9568_v44  ;;  %3255 = vmatpush.msra.mxu0 %v12330_v3  ;;  %v4970_v3 = vld [vmem:[#allocation7 + $0x438] sm:$0xff]  ;;  %v12338_v44 = vld [vmem:[#allocation128_spill] sm:$0xff] }
 0x64a   :  { %3216 = vmatpush.msrb.mxu2 %v9572_v58  ;;  %3256 = vmatpush.msra.mxu0 %v12332_v25  ;;  %v12337_v58 = vld [vmem:[#allocation127_spill] sm:$0xff]  ;;  %v4971_v25 = vld [vmem:[#allocation7 + $0x3f0] sm:$0xff] }
 0x64c   :  { %3217 = vmatpush.msrb.mxu2 %v9576_v23  ;;  %3257 = vmatpush.msra.mxu0 %v12334_v42  ;;  %v4972_v23 = vld [vmem:[#allocation7 + $0x3a8] sm:$0xff] }
 0x64d   :  { %v12339_v42 = vld [vmem:[#allocation129_spill] sm:$0xff] }
 0x64e   :  { %3218 = vmatpush.msrb.mxu2 %v9580_v32  ;;  %3258 = vmatpush.msra.mxu0 %v12336_v47  ;;  %v12340_v32 = vld [vmem:[#allocation130_spill] sm:$0xff] }
 0x64f   :  { %3219 = vmatmul.f32.vlgmr.msrb.gmra.mxu2 %v9237_v55  ;;  %3259 = vmatmul.f32.vlgmr.msra.gmra.mxu0 %v9237_v55  ;;  %v4974_v47 = vld [vmem:[#allocation7 + $0x318] sm:$0xff] }
 0x650   :  { %3325 = vmatpush.msra.mxu2 %v4970_v3  ;;  %3365 = vmatpush.msrb.mxu0 %v12337_v58  ;;  %v12342_v3 = vld [vmem:[#allocation131_spill] sm:$0xff]  ;;  %v4976_v58 = vld [vmem:[#allocation7 + $0x288] sm:$0xff] }
 0x652   :  { %3326 = vmatpush.msra.mxu2 %v4971_v25  ;;  %3366 = vmatpush.msrb.mxu0 %v12338_v44  ;;  %v12343_v25 = vld [vmem:[#allocation132_spill] sm:$0xff] }
 0x653   :  { %v4977_v44 = vld [vmem:[#allocation7 + $0x240] sm:$0xff] }
 0x654   :  { %3327 = vmatpush.msra.mxu2 %v4972_v23  ;;  %3367 = vmatpush.msrb.mxu0 %v12339_v42  ;;  %v12344_v23 = vld [vmem:[#allocation81_spill] sm:$0xff]  ;;  %v4978_v42 = vld [vmem:[#allocation7 + $0x1f8] sm:$0xff] }
 0x656   :  { %3328 = vmatpush.msra.mxu2 %v4973_v10  ;;  %3368 = vmatpush.msrb.mxu0 %v12340_v32  ;;  %v12345_v10 = vld [vmem:[#allocation82_spill] sm:$0xff] }
 0x657   :  { %v4979_v32 = vld [vmem:[#allocation7 + $0x1b0] sm:$0xff] }
 0x658   :  { %3329 = vmatpush.msra.mxu2 %v4974_v47  ;;  %3369 = vmatpush.msrb.mxu0 %v12341_v53  ;;  %v12346_v47 = vld [vmem:[#allocation83_spill] sm:$0xff]  ;;  %v4980_v53 = vld [vmem:[#allocation7 + $0x168] sm:$0xff] }
 0x65a   :  { %3330 = vmatpush.msra.mxu2 %v4975_v22  ;;  %3370 = vmatpush.msrb.mxu0 %v12342_v3  ;;  %v12347_v22 = vld [vmem:[#allocation18_spill] sm:$0xff]  ;;  %v4981_v3 = vld [vmem:[#allocation7 + $0x120] sm:$0xff] }
 0x65c   :  { %3331 = vmatpush.msra.mxu2 %v4976_v58  ;;  %3371 = vmatpush.msrb.mxu0 %v12343_v25  ;;  %v12348_v58 = vld [vmem:[#allocation85_spill] sm:$0xff]  ;;  %v2920_v25 = vpop.f32.mrf.mxu3 }
 0x65e   :  { %3332 = vmatpush.msra.mxu2 %v4977_v44  ;;  %3372 = vmatpush.msrb.mxu0 %v12344_v23  ;;  %v4982_v44 = vld [vmem:[#allocation7 + $0xd8] sm:$0xff] }
 0x65f   :  { %v12349_v23 = vld [vmem:[#allocation86_spill] sm:$0xff] }
 0x660   :  { %3333 = vmatpush.msra.mxu2 %v4978_v42  ;;  %3373 = vmatpush.msrb.mxu0 %v12345_v10  ;;  %v4983_v42 = vld [vmem:[#allocation7 + $0x90] sm:$0xff]  ;;  %v12350_v10 = vld [vmem:[#allocation35_spill] sm:$0xff] }
 0x661   :  { %v2921_v49 = vadd.f32 %v2920_v25, %v12350_v10  ;;  %v9608_v10 = vld [vmem:[#allocation7 + $0x408] sm:$0xff] }
 0x662   :  { %3334 = vmatpush.msra.mxu2 %v4979_v32  ;;  %3374 = vmatpush.msrb.mxu0 %v12346_v47  ;;  %v12351_v32 = vld [vmem:[#allocation89_spill] sm:$0xff]  ;;  %12357 = vst [vmem:[#allocation171_spill] sm:$0xff] %v9608_v10 }
 0x664   :  { %3335 = vmatpush.msra.mxu2 %v4980_v53  ;;  %3375 = vmatpush.msrb.mxu0 %v12347_v22  ;;  %v12352_v53 = vld [vmem:[#allocation21_spill] sm:$0xff]  ;;  %v12353_v22 = vld [vmem:[#allocation42_spill] sm:$0xff] }
 0x665   :  { %v214_v52 = vadd.f32 %v12353_v22, %v12352_v53  ;;  %v4993_v22 = vld [vmem:[#allocation7 + $0x370] sm:$0xff] }
 0x666   :  { %3336 = vmatpush.msra.mxu2 %v4981_v3  ;;  %3376 = vmatpush.msrb.mxu0 %v12348_v58  ;;  %v4985_v58 = vld [vmem:[#allocation7] sm:$0xff] }
 0x668   :  { %3337 = vmatpush.msra.mxu2 %v4982_v44  ;;  %3377 = vmatpush.msrb.mxu0 %v12349_v23  ;;  %v4986_v23 = vld [vmem:[#allocation7 + $0x448] sm:$0xff] }
 0x66a   :  { %3338 = vmatpush.msra.mxu2 %v4983_v42  ;;  %3378 = vmatpush.msrb.mxu0 %v12351_v32  ;;  %v9605_v42 = vld [vmem:[#allocation7 + $0x450] sm:$0xff]  ;;  %v4988_v32 = vld [vmem:[#allocation7 + $0x400] sm:$0xff] }
 0x66b   :  { %v2940_v47 = vpop.f32.mrf.mxu0  ;;  %12356 = vst [vmem:[#allocation170_spill] sm:$0xff] %v9605_v42 }
 0x66c   :  { %3339 = vmatpush.msra.mxu2 %v4984_v18  ;;  %v2941_v3 = vadd.f32 %v2940_v47, %v2921_v49  ;;  %3379 = vmatpush.msrb.mxu0 %v12354_v14  ;;  %v9611_v14 = vld [vmem:[#allocation11] ss:$0 sm:$0xff]  ;;  %v9614_v49 = vld [vmem:[#allocation7 + $0x3c0] sm:$0xff] }
 0x66d   :  { %12358 = vst [vmem:[#allocation172_spill] sm:$0xff] %v9611_v14 }
 0x66e   :  { %3340 = vmatpush.msra.mxu2 %v4985_v58  ;;  %v3267_v44 = vadd.f32 %v2941_v3, %v214_v52  ;;  %3380 = vmatpush.msrb.mxu0 %v12355_v7  ;;  %v4991_v7 = vld [vmem:[#allocation7 + $0x3b8] sm:$0xff]  ;;  %12359 = vst [vmem:[#allocation173_spill] sm:$0xff] %v9614_v49  ;;  %v2960_v3 = vpop.f32.mrf.mxu1 }
 0x66f   :  { %v9617_v58 = vld [vmem:[#allocation7 + $0x378] sm:$0xff] }
 0x670   :  { %3405 = vmatpush.msrb.mxu2 %v4986_v23  ;;  %3445 = vmatpush.msra.mxu0 %v9605_v42  ;;  %v3268_v25 = vmul.f32 0.5, %v3267_v44  ;;  %12360 = vst [vmem:[#allocation174_spill] sm:$0xff] %v9617_v58  ;;  %v3000_v44 = vpop.f32.mrf.mxu3  ;;  %v4995_v23 = vld [vmem:[#allocation7 + $0x328] sm:$0xff] }
 0x671   :  { %v2894_v18 = vpop.f32.mrf.mxu2  ;;  %v9625_v42 = vld [vmem:[#allocation7 + $0x2e8] sm:$0xff] }
 0x672   :  { %3406 = vmatpush.msrb.mxu2 %v4988_v32  ;;  %3446 = vmatpush.msra.mxu0 %v9608_v10  ;;  %4133 = vtanh.f32 %v3268_v25  ;;  %v2895_v52 = vadd.f32 %v9611_v14, %v2894_v18  ;;  %v9620_v25 = vld [vmem:[#allocation7 + $0x330] sm:$0xff]  ;;  %v12362_v18 = vld [vmem:[#allocation24_spill] sm:$0xff]  ;;  %12364 = vst [vmem:[#allocation176_spill] sm:$0xff] %v9625_v42 }
 0x673   :  { %12361 = vst [vmem:[#allocation175_spill] sm:$0xff] %v9620_v25 }
 0x674   :  { %3407 = vmatpush.msrb.mxu2 %v4991_v7  ;;  %3447 = vmatpush.msra.mxu0 %v9614_v49  ;;  %v2897_v47 = vmul.f32 0.5, %v2895_v52  ;;  %v2961_v7 = vadd.f32 %v2960_v3, %v12362_v18  ;;  %v3020_v53 = vpop.f32.mrf.mxu0  ;;  %v4997_v52 = vld [vmem:[#allocation7 + $0x2e0] sm:$0xff] }
 0x675   :  { %v9630_v3 = vld [vmem:[#allocation7 + $0x2a0] sm:$0xff] }
 0x676   :  { %3408 = vmatpush.msrb.mxu2 %v4993_v22  ;;  %3448 = vmatpush.msra.mxu0 %v9617_v58  ;;  %4135 = vtanh.f32 %v2897_v47  ;;  %v12363_v22 = vld [vmem:[#allocation26_spill] sm:$0xff] }
 0x677   :  { %v3001_v14 = vadd.f32 %v3000_v44, %v12363_v22  ;;  %v12365_v47 = vld [vmem:[#allocation22_spill] sm:$0xff]  ;;  %v12366_v22 = vld [vmem:[#allocation40_spill] sm:$0xff] }
 0x678   :  { %3409 = vmatpush.msrb.mxu2 %v4995_v23  ;;  %3449 = vmatpush.msra.mxu0 %v9620_v25  ;;  %v4134_v32 = vpop.eup %4133  ;;  %v255_v23 = vadd.f32 %v12365_v47, %v12141_v13  ;;  %v296_v18 = vadd.f32 %v12366_v22, %v12146_v50  ;;  %v5011_v22 = vld [vmem:[#allocation7 + $0xe8] sm:$0xff]  ;;  %v9702_v50 = vld [vmem:[#allocation7 + $0x2f0] sm:$0xff]  ;;  %v9705_v13 = vld [vmem:[#allocation7 + $0x2f8] sm:$0xff] }
 0x679   :  { %v3270_v49 = vmul.f32 0.5, %v4134_v32  ;;  %v2980_v10 = vpop.f32.mrf.mxu2  ;;  %v3021_v25 = vadd.f32 %v3020_v53, %v3001_v14  ;;  %v5001_v32 = vld [vmem:[#allocation7 + $0x250] sm:$0xff]  ;;  %12381 = vst [vmem:[#allocation191_spill] sm:$0xff] %v9705_v13 }
 0x67a   :  { %3410 = vmatpush.msrb.mxu2 %v4997_v52  ;;  %3450 = vmatpush.msra.mxu0 %v9625_v42  ;;  %v2981_v58 = vadd.f32 %v2980_v10, %v2961_v7  ;;  %v5003_v10 = vld [vmem:[#allocation7 + $0x208] sm:$0xff] }
 0x67b   :  { %v3271_v62 = vadd.f32 0.5, %v3270_v49  ;;  %v9638_v49 = vld [vmem:[#allocation7 + $0x210] sm:$0xff] }
 0x67c   :  { %3411 = vmatpush.msrb.mxu2 %v4999_v26  ;;  %3451 = vmatpush.msra.mxu0 %v9630_v3  ;;  %v4136_v52 = vpop.eup %4135  ;;  %v3272_v44 = vadd.f32 %v2981_v58, %v255_v23  ;;  %12368 = vst [vmem:[#allocation178_spill] sm:$0xff] %v9638_v49  ;;  %v5005_v58 = vld [vmem:[#allocation7 + $0x1c0] sm:$0xff] }
 0x67d   :  { %v2899_v42 = vmul.f32 0.5, %v4136_v52  ;;  %v3277_v40 = vmul.f32 %v3271_v62, %v3021_v25  ;;  %v9644_v62 = vld [vmem:[#allocation7 + $0x1c8] sm:$0xff]  ;;  %v5007_v25 = vld [vmem:[#allocation7 + $0x178] sm:$0xff]  ;;  %v9653_v52 = vld [vmem:[#allocation7 + $0xf0] sm:$0xff] }
 0x67e   :  { %3412 = vmatpush.msrb.mxu2 %v5001_v32  ;;  %3452 = vmatpush.msra.mxu0 %v9635_v27  ;;  %v3273_v26 = vmul.f32 0.5, %v3272_v44  ;;  %12369 = vst [vmem:[#allocation179_spill] sm:$0xff] %v9644_v62  ;;  %v5013_v32 = vld [vmem:[#allocation7 + $0xa0] sm:$0xff]  ;;  %v9867_v27 = vld [vmem:[#allocation7 + $0x30] sm:$0xff] }
 0x67f   :  { %v2900_v53 = vadd.f32 0.5, %v2899_v42  ;;  %v3278_v14 = vadd.f32 %v3277_v40, %v296_v18  ;;  %v9647_v42 = vld [vmem:[#allocation7 + $0x180] sm:$0xff]  ;;  %v5009_v40 = vld [vmem:[#allocation7 + $0x130] sm:$0xff]  ;;  %v9650_v18 = vld [vmem:[#allocation7 + $0x138] sm:$0xff]  ;;  %12372 = vst [vmem:[#allocation182_spill] sm:$0xff] %v9653_v52 }
 0x680   :  { %3413 = vmatpush.msrb.mxu2 %v5003_v10  ;;  %3453 = vmatpush.msra.mxu0 %v9638_v49  ;;  %4137 = vtanh.f32 %v3273_v26  ;;  %12370 = vst [vmem:[#allocation180_spill] sm:$0xff] %v9647_v42  ;;  %v9657_v10 = vld [vmem:[#allocation7 + $0xa8] sm:$0xff] }
 0x681   :  { %4040 = vst [vmem:[%s10313_s7 + $0x20] sm:$0xff] %v2900_v53  ;;  %4139 = vtanh.f32 %v3278_v14  ;;  %v5015_v53 = vld [vmem:[#allocation7 + $0x58] sm:$0xff] }
 0x682   :  { %3414 = vmatpush.msrb.mxu2 %v5005_v58  ;;  %3454 = vmatpush.msra.mxu0 %v9644_v62  ;;  %12371 = vst [vmem:[#allocation181_spill] sm:$0xff] %v9650_v18  ;;  %v9660_v58 = vld [vmem:[#allocation7 + $0x60] sm:$0xff] }
 0x683   :  { %12373 = vst [vmem:[#allocation183_spill] sm:$0xff] %v9657_v10  ;;  %v9781_v62 = vld [vmem:[#allocation7 + $0x420] sm:$0xff] }
 0x684   :  { %3415 = vmatpush.msrb.mxu2 %v5007_v25  ;;  %3455 = vmatpush.msra.mxu0 %v9647_v42  ;;  %12374 = vst [vmem:[#allocation184_spill] sm:$0xff] %v9660_v58  ;;  %v5017_v25 = vld [vmem:[#allocation7 + $0x10] sm:$0xff] }
 0x685   :  { %v9763_v42 = vld [vmem:[#allocation7 + $0x70] sm:$0xff]  ;;  %12403 = vst [vmem:[#allocation213_spill] sm:$0xff] %v9781_v62 }
 0x686   :  { %3416 = vmatpush.msrb.mxu2 %v5009_v40  ;;  %3456 = vmatpush.msra.mxu0 %v9650_v18  ;;  %v4138_v7 = vpop.eup %4137  ;;  %v9746_v18 = vld [vmem:[#allocation7 + $0xf8] sm:$0xff]  ;;  %12398 = vst [vmem:[#allocation208_spill] sm:$0xff] %v9763_v42 }
 0x687   :  { %v4140_v47 = vpop.eup %4139  ;;  %v3275_v23 = vmul.f32 0.5, %v4138_v7  ;;  %v9665_v7 = vld [vmem:[#allocation7 + $0x18] sm:$0xff]  ;;  %12393 = vst [vmem:[#allocation203_spill] sm:$0xff] %v9746_v18 }
 0x688   :  { %3417 = vmatpush.msrb.mxu2 %v5011_v22  ;;  %3457 = vmatpush.msra.mxu0 %v9653_v52  ;;  %v3280_v44 = vsub.f32 %v9125_v46, %v4140_v47  ;;  %12375 = vst [vmem:[#allocation185_spill] sm:$0xff] %v9665_v7  ;;  %v9670_v46 = vld [vmem:[#allocation7 + $0x458] sm:$0xff]  ;;  %v9673_v22 = vld [vmem:[#allocation7 + $0x460] sm:$0xff]  ;;  %v9744_v52 = vpop.f32.mrf.mxu3 }
 0x689   :  { %v3276_v26 = vadd.f32 0.5, %v3275_v23  ;;  %12376 = vst [vmem:[#allocation186_spill] sm:$0xff] %v9673_v22  ;;  %v9676_v23 = vld [vmem:[#allocation7 + $0x410] sm:$0xff] }
 0x68a   :  { %3418 = vmatpush.msrb.mxu2 %v5013_v32  ;;  %3458 = vmatpush.msra.mxu0 %v9657_v10  ;;  %v9685_v32 = vld [vmem:[#allocation7 + $0x3d0] sm:$0xff]  ;;  %v9738_v10 = vld [vmem:[#allocation7 + $0x140] sm:$0xff] }
 0x68b   :  { %v3281_v14 = vmul.f32 %v3280_v44, %v3276_v26  ;;  %v9682_v44 = vld [vmem:[#allocation7 + $0x3c8] sm:$0xff]  ;;  %12378 = vst [vmem:[#allocation188_spill] sm:$0xff] %v9685_v32  ;;  %v9688_v26 = vld [vmem:[#allocation7 + $0x380] sm:$0xff] }
 0x68c   :  { %3419 = vmatpush.msrb.mxu2 %v5015_v53  ;;  %3459 = vmatpush.msra.mxu0 %v9660_v58  ;;  %v9691_v53 = vld [vmem:[#allocation7 + $0x388] sm:$0xff]  ;;  %12391 = vst [vmem:[#allocation201_spill] sm:$0xff] %v9738_v10 }
 0x68d   :  { %v9663_v40 = vadd.f32 %v4140_v47, %v3281_v14  ;;  %v9679_v47 = vld [vmem:[#allocation7 + $0x418] sm:$0xff]  ;;  %12379 = vst [vmem:[#allocation189_spill] sm:$0xff] %v9691_v53  ;;  %v9732_v58 = vld [vmem:[#allocation7 + $0x188] sm:$0xff] }
 0x68e   :  { %3420 = vmatpush.msrb.mxu2 %v5017_v25  ;;  %3460 = vmatpush.msra.mxu0 %v9665_v7  ;;  %12377 = vst [vmem:[#allocation187_spill] sm:$0xff] %v9679_v47  ;;  %v9696_v14 = vld [vmem:[#allocation7 + $0x338] sm:$0xff]  ;;  %v9699_v25 = vld [vmem:[#allocation7 + $0x340] sm:$0xff]  ;;  %v9726_v7 = vld [vmem:[#allocation7 + $0x1d0] sm:$0xff] }
 0x68f   :  { %3341 = vmatmul.f32.vlgmr.msra.gmra.mxu2 %v9663_v40  ;;  %3381 = vmatmul.f32.vlgmr.msrb.gmra.mxu0 %v9663_v40  ;;  %12380 = vst [vmem:[#allocation190_spill] sm:$0xff] %v9699_v25 }
 0x690   :  { %3485 = vmatpush.msra.mxu2 %v9670_v46  ;;  %3525 = vmatpush.msrb.mxu0 %v9673_v22  ;;  %v9720_v22 = vld [vmem:[#allocation7 + $0x218] sm:$0xff]  ;;  %12387 = vst [vmem:[#allocation197_spill] sm:$0xff] %v9726_v7 }
 0x691   :  { %12385 = vst [vmem:[#allocation195_spill] sm:$0xff] %v9720_v22 }
 0x692   :  { %3486 = vmatpush.msra.mxu2 %v9676_v23  ;;  %3526 = vmatpush.msrb.mxu0 %v9679_v47  ;;  %v9714_v47 = vld [vmem:[#allocation7 + $0x260] sm:$0xff]  ;;  %12389 = vst [vmem:[#allocation199_spill] sm:$0xff] %v9732_v58 }
 0x693   :  { %12383 = vst [vmem:[#allocation193_spill] sm:$0xff] %v9714_v47 }
 0x694   :  { %3487 = vmatpush.msra.mxu2 %v9682_v44  ;;  %3527 = vmatpush.msrb.mxu0 %v9685_v32  ;;  %v9711_v32 = vld [vmem:[#allocation7 + $0x2b0] sm:$0xff] }
 0x695   :  { %12382 = vst [vmem:[#allocation192_spill] sm:$0xff] %v9711_v32 }
 0x696   :  { %3488 = vmatpush.msra.mxu2 %v9688_v26  ;;  %3528 = vmatpush.msrb.mxu0 %v9691_v53  ;;  %v9708_v53 = vld [vmem:[#allocation7 + $0x2a8] sm:$0xff] }
 0x697   :  { %3421 = vmatmul.f32.vlgmr.msrb.gmra.mxu2 %v9663_v40  ;;  %3461 = vmatmul.f32.vlgmr.msra.gmra.mxu0 %v9663_v40 }
 0x698   :  { %3489 = vmatpush.msra.mxu2 %v9696_v14  ;;  %3529 = vmatpush.msrb.mxu0 %v9699_v25  ;;  %v9717_v25 = vld [vmem:[#allocation7 + $0x268] sm:$0xff] }
 0x699   :  { %12384 = vst [vmem:[#allocation194_spill] sm:$0xff] %v9717_v25 }
 0x69a   :  { %3490 = vmatpush.msra.mxu2 %v9702_v50  ;;  %3530 = vmatpush.msrb.mxu0 %v9705_v13  ;;  %v9723_v13 = vld [vmem:[#allocation7 + $0x220] sm:$0xff] }
 0x69b   :  { %12386 = vst [vmem:[#allocation196_spill] sm:$0xff] %v9723_v13 }
 0x69c   :  { %3491 = vmatpush.msra.mxu2 %v9708_v53  ;;  %3531 = vmatpush.msrb.mxu0 %v9711_v32  ;;  %v9729_v32 = vld [vmem:[#allocation7 + $0x1d8] sm:$0xff] }
 0x69d   :  { %12388 = vst [vmem:[#allocation198_spill] sm:$0xff] %v9729_v32 }
 0x69e   :  { %3492 = vmatpush.msra.mxu2 %v9714_v47  ;;  %3532 = vmatpush.msrb.mxu0 %v9717_v25  ;;  %v9735_v25 = vld [vmem:[#allocation7 + $0x190] sm:$0xff]  ;;  %v9788_v47 = vld [vmem:[#allocation7 + $0x3d8] sm:$0xff] }
 0x69f   :  { %12390 = vst [vmem:[#allocation200_spill] sm:$0xff] %v9735_v25 }
 0x6a0   :  { %3493 = vmatpush.msra.mxu2 %v9720_v22  ;;  %3533 = vmatpush.msrb.mxu0 %v9723_v13  ;;  %v9741_v13 = vld [vmem:[#allocation7 + $0x148] sm:$0xff]  ;;  %v3060_v22 = vpop.f32.mrf.mxu2  ;;  %12405 = vst [vmem:[#allocation215_spill] sm:$0xff] %v9788_v47 }
 0x6a1   :  { %12392 = vst [vmem:[#allocation202_spill] sm:$0xff] %v9741_v13 }
 0x6a2   :  { %3494 = vmatpush.msra.mxu2 %v9726_v7  ;;  %3534 = vmatpush.msrb.mxu0 %v9729_v32  ;;  %v9749_v32 = vld [vmem:[#allocation7 + $0x100] sm:$0xff] }
 0x6a3   :  { %12394 = vst [vmem:[#allocation204_spill] sm:$0xff] %v9749_v32 }
 0x6a4   :  { %3495 = vmatpush.msra.mxu2 %v9732_v58  ;;  %3535 = vmatpush.msrb.mxu0 %v9735_v25  ;;  %v9752_v58 = vpop.f32.mrf.mxu0  ;;  %v9754_v25 = vld [vmem:[#allocation7 + $0xb0] sm:$0xff] }
 0x6a5   :  { %12395 = vst [vmem:[#allocation205_spill] sm:$0xff] %v9754_v25 }
 0x6a6   :  { %3496 = vmatpush.msra.mxu2 %v9738_v10  ;;  %3536 = vmatpush.msrb.mxu0 %v9741_v13  ;;  %v9757_v10 = vld [vmem:[#allocation7 + $0xb8] sm:$0xff]  ;;  %v9760_v13 = vld [vmem:[#allocation7 + $0x68] sm:$0xff] }
 0x6a7   :  { %12396 = vst [vmem:[#allocation206_spill] sm:$0xff] %v9757_v10 }
 0x6a8   :  { %3497 = vmatpush.msra.mxu2 %v9746_v18  ;;  %3537 = vmatpush.msrb.mxu0 %v9749_v32  ;;  %12397 = vst [vmem:[#allocation207_spill] sm:$0xff] %v9760_v13  ;;  %v9766_v18 = vld [vmem:[#allocation7 + $0x20] sm:$0xff]  ;;  %v9769_v32 = vld [vmem:[#allocation7 + $0x28] sm:$0xff] }
 0x6a9   :  { %12399 = vst [vmem:[#allocation209_spill] sm:$0xff] %v9766_v18 }
 0x6aa   :  { %3498 = vmatpush.msra.mxu2 %v9754_v25  ;;  %3538 = vmatpush.msrb.mxu0 %v9757_v10  ;;  %12400 = vst [vmem:[#allocation210_spill] sm:$0xff] %v9769_v32  ;;  %v3160_v25 = vpop.f32.mrf.mxu3  ;;  %v9774_v10 = vld [vmem:[#allocation7 + $0x468] sm:$0xff] }
 0x6ab   :  { %12401 = vst [vmem:[#allocation211_spill] sm:$0xff] %v9774_v10 }
 0x6ac   :  { %3499 = vmatpush.msra.mxu2 %v9760_v13  ;;  %3539 = vmatpush.msrb.mxu0 %v9763_v42  ;;  %v9777_v13 = vld [vmem:[#allocation7 + $0x470] sm:$0xff]  ;;  %v3040_v42 = vpop.f32.mrf.mxu1  ;;  %v3180_v7 = vpop.f32.mrf.mxu0 }
 0x6ad   :  { %12402 = vst [vmem:[#allocation212_spill] sm:$0xff] %v9777_v13  ;;  %v3041_v49 = vadd.f32 %v3040_v42, %v12202_v15  ;;  %v9800_v42 = vld [vmem:[#allocation7 + $0x348] sm:$0xff]  ;;  %v9812_v15 = vld [vmem:[#allocation7 + $0x2b8] sm:$0xff] }
 0x6ae   :  { %3500 = vmatpush.msra.mxu2 %v9766_v18  ;;  %3540 = vmatpush.msrb.mxu0 %v9769_v32  ;;  %v3161_v18 = vadd.f32 %v3160_v25, %v12199_v12  ;;  %v9784_v32 = vld [vmem:[#allocation7 + $0x428] sm:$0xff]  ;;  %v9794_v12 = vld [vmem:[#allocation7 + $0x390] sm:$0xff]  ;;  %12409 = vst [vmem:[#allocation217_spill] sm:$0xff] %v9800_v42 }
 0x6af   :  { %3501 = vmatmul.f32.vlgmr.msra.gmra.mxu2 %v9663_v40  ;;  %3541 = vmatmul.f32.vlgmr.msrb.gmra.mxu0 %v9663_v40  ;;  %12404 = vst [vmem:[#allocation214_spill] sm:$0xff] %v9784_v32  ;;  %v3061_v25 = vadd.f32 %v3060_v22, %v3041_v49  ;;  %v9809_v49 = vld [vmem:[#allocation7 + $0x308] sm:$0xff] }
 0x6b0   :  { %3565 = vmatpush.msrb.mxu2 %v9774_v10  ;;  %3605 = vmatpush.msra.mxu0 %v9777_v13  ;;  %v3181_v10 = vadd.f32 %v3180_v7, %v3161_v18  ;;  %v9791_v13 = vld [vmem:[#allocation7 + $0x3e0] sm:$0xff]  ;;  %12407 = vst [vmem:[#allocation216_spill] sm:$0xff] %v9794_v12  ;;  %v9803_v18 = vld [vmem:[#allocation7 + $0x350] sm:$0xff] }
 0x6b1   :  { %12406 = vst [vmem:[#allocation218_spill] sm:$0xff] %v9791_v13  ;;  %v9806_v7 = vld [vmem:[#allocation7 + $0x300] sm:$0xff] }
 0x6b2   :  { %3566 = vmatpush.msrb.mxu2 %v9781_v62  ;;  %3606 = vmatpush.msra.mxu0 %v9784_v32  ;;  %v9797_v62 = vld [vmem:[#allocation7 + $0x398] sm:$0xff]  ;;  %v3283_v32 = vadd.f32 %v3181_v10, %v3061_v25  ;;  %12410 = vst [vmem:[#allocation222_spill] sm:$0xff] %v9803_v18  ;;  %v9815_v10 = vld [vmem:[#allocation7 + $0x2c0] sm:$0xff]  ;;  %v9818_v25 = vld [vmem:[#allocation7 + $0x270] sm:$0xff] }
 0x6b3   :  { %12408 = vst [vmem:[#allocation220_spill] sm:$0xff] %v9797_v62 }
 0x6b4   :  { %3567 = vmatpush.msrb.mxu2 %v9788_v47  ;;  %3607 = vmatpush.msra.mxu0 %v9791_v13  ;;  %12411 = vst [vmem:[#allocation219_spill] sm:$0xff] %v9806_v7  ;;  %v3284_v22 = vmul.f32 0.5, %v3283_v32  ;;  %v9827_v32 = vld [vmem:[#allocation7 + $0x230] sm:$0xff]  ;;  %v9836_v13 = vld [vmem:[#allocation7 + $0x198] sm:$0xff] }
 0x6b5   :  { %12412 = vst [vmem:[#allocation224_spill] sm:$0xff] %v9809_v49 }
 0x6b6   :  { %3568 = vmatpush.msrb.mxu2 %v9794_v12  ;;  %3608 = vmatpush.msra.mxu0 %v9797_v62  ;;  %12413 = vst [vmem:[#allocation221_spill] sm:$0xff] %v9812_v15  ;;  %4141 = vtanh.f32 %v3284_v22  ;;  %v9824_v62 = vld [vmem:[#allocation7 + $0x228] sm:$0xff]  ;;  %v9839_v22 = vld [vmem:[#allocation7 + $0x1a0] sm:$0xff]  ;;  %v9861_v12 = vld [vmem:[#allocation7 + $0x78] sm:$0xff] }
 0x6b7   :  { %12414 = vst [vmem:[#allocation48_spill] sm:$0xff] %v9815_v10 }
 0x6b8   :  { %3569 = vmatpush.msrb.mxu2 %v9800_v42  ;;  %3609 = vmatpush.msra.mxu0 %v9803_v18  ;;  %12415 = vst [vmem:[#allocation223_spill] sm:$0xff] %v9818_v25  ;;  %v9821_v18 = vld [vmem:[#allocation7 + $0x278] sm:$0xff] }
 0x6b9   :  { %12416 = vst [vmem:[#allocation50_spill] sm:$0xff] %v9821_v18 }
 0x6ba   :  { %3570 = vmatpush.msrb.mxu2 %v9806_v7  ;;  %3610 = vmatpush.msra.mxu0 %v9809_v49  ;;  %12417 = vst [vmem:[#allocation225_spill] sm:$0xff] %v9824_v62  ;;  %v9830_v49 = vld [vmem:[#allocation7 + $0x1e0] sm:$0xff] }
 0x6bb   :  { %12418 = vst [vmem:[#allocation47_spill] sm:$0xff] %v9827_v32  ;;  %v9854_v7 = vld [vmem:[#allocation7 + $0xc0] sm:$0xff] }
 0x6bc   :  { %3571 = vmatpush.msrb.mxu2 %v9812_v15  ;;  %3611 = vmatpush.msra.mxu0 %v9815_v10  ;;  %12419 = vst [vmem:[#allocation52_spill] sm:$0xff] %v9830_v49  ;;  %v9833_v10 = vld [vmem:[#allocation7 + $0x1e8] sm:$0xff] }
 0x6bd   :  { %12420 = vst [vmem:[#allocation49_spill] sm:$0xff] %v9833_v10 }
 0x6be   :  { %3572 = vmatpush.msrb.mxu2 %v9818_v25  ;;  %3612 = vmatpush.msra.mxu0 %v9821_v18  ;;  %12421 = vst [vmem:[#allocation51_spill] sm:$0xff] %v9836_v13  ;;  %v3120_v18 = vpop.f32.mrf.mxu1  ;;  %v9842_v25 = vld [vmem:[#allocation7 + $0x150] sm:$0xff] }
 0x6bf   :  { %12422 = vst [vmem:[#allocation53_spill] sm:$0xff] %v9839_v22 }
 0x6c0   :  { %3573 = vmatpush.msrb.mxu2 %v9824_v62  ;;  %3613 = vmatpush.msra.mxu0 %v9827_v32  ;;  %v4142_v62 = vpop.eup %4141  ;;  %12423 = vst [vmem:[#allocation54_spill] sm:$0xff] %v9842_v25  ;;  %v9845_v32 = vld [vmem:[#allocation7 + $0x158] sm:$0xff] }
 0x6c1   :  { %12424 = vst [vmem:[#allocation55_spill] sm:$0xff] %v9845_v32  ;;  %v3286_v15 = vmul.f32 0.5, %v4142_v62 }
 0x6c2   :  { %3574 = vmatpush.msrb.mxu2 %v9830_v49  ;;  %3614 = vmatpush.msra.mxu0 %v9833_v10  ;;  %v3240_v49 = vpop.f32.mrf.mxu3  ;;  %v9848_v10 = vld [vmem:[#allocation7 + $0x108] sm:$0xff]  ;;  %12427 = vst [vmem:[#allocation58_spill] sm:$0xff] %v9854_v7 }
 0x6c3   :  { %12425 = vst [vmem:[#allocation56_spill] sm:$0xff] %v9848_v10  ;;  %v3287_v47 = vadd.f32 0.5, %v3286_v15 }
 0x6c4   :  { %3575 = vmatpush.msrb.mxu2 %v9836_v13  ;;  %3615 = vmatpush.msra.mxu0 %v9839_v22  ;;  %v9851_v13 = vld [vmem:[#allocation7 + $0x110] sm:$0xff]  ;;  %v3140_v22 = vpop.f32.mrf.mxu2 }
 0x6c5   :  { %12426 = vst [vmem:[#allocation57_spill] sm:$0xff] %v9851_v13 }
 0x6c6   :  { %3576 = vmatpush.msrb.mxu2 %v9842_v25  ;;  %3616 = vmatpush.msra.mxu0 %v9845_v32  ;;  %v9857_v25 = vld [vmem:[#allocation7 + $0xc8] sm:$0xff]  ;;  %v3241_v32 = vadd.f32 %v9200_v45, %v3240_v49  ;;  %v3200_v62 = vpop.f32.mrf.mxu1  ;;  %v3121_v45 = vadd.f32 %v3120_v18, %v11759_v0  ;;  %v9886_v0 = vld [vmem:[#allocation7 + $0x430] sm:$0xff] }
 0x6c7   :  { %12428 = vst [vmem:[#allocation59_spill] sm:$0xff] %v9857_v25  ;;  %v3201_v15 = vadd.f32 %v3200_v62, %v12226_v1 }
 0x6c8   :  { %3577 = vmatpush.msrb.mxu2 %v9848_v10  ;;  %3617 = vmatpush.msra.mxu0 %v9851_v13  ;;  %v9864_v10 = vld [vmem:[#allocation7 + $0x80] sm:$0xff] }
 0x6c9   :  { %12429 = vst [vmem:[#allocation60_spill] sm:$0xff] %v9864_v10 }
 0x6ca   :  { %3578 = vmatpush.msrb.mxu2 %v9854_v7  ;;  %3618 = vmatpush.msra.mxu0 %v9857_v25  ;;  %v9870_v7 = vld [vmem:[#allocation7 + $0x38] sm:$0xff] }
 0x6cb   :  { %12430 = vst [vmem:[#allocation61_spill] sm:$0xff] %v9870_v7  ;;  %v9938_v25 = vld [vmem:[#allocation10 + $0x30] sm:$0xff] }
 0x6cc   :  { %v3260_v42 = vpop.f32.mrf.mxu0  ;;  %3579 = vmatpush.msrb.mxu2 %v9861_v12  ;;  %3619 = vmatpush.msra.mxu0 %v9864_v10  ;;  %v3081_v10 = vadd.f32 %v9744_v52, %v12225_v19  ;;  %v9889_v52 = vld [vmem:[#allocation10 + $0x70] sm:$0xff]  ;;  %v9892_v19 = vld [vmem:[#allocation7 + $0x3e8] sm:$0xff] }
 0x6cd   :  { %v3261_v13 = vadd.f32 %v3260_v42, %v3241_v32  ;;  %v9879_v42 = vld [vmem:[#allocation7 + $0x478] sm:$0xff]  ;;  %v9882_v32 = vld [vmem:[#allocation10 + $0x78] sm:$0xff]  ;;  %12432 = vst [vmem:[#allocation63_spill] sm:$0xff] %v9889_v52 }
 0x6ce   :  { %3580 = vmatpush.msrb.mxu2 %v9867_v27  ;;  %3620 = vmatpush.msra.mxu0 %v9870_v7  ;;  %12431 = vst [vmem:[#allocation62_spill] sm:$0xff] %v9882_v32  ;;  %v3141_v7 = vadd.f32 %v3140_v22, %v3121_v45  ;;  %v9901_v22 = vld [vmem:[#allocation10 + $0x60] sm:$0xff]  ;;  %v9907_v45 = vld [vmem:[#allocation10 + $0x58] sm:$0xff] }
 0x6cf   :  { %v3293_v49 = vmul.f32 %v3287_v47, %v3261_v13  ;;  %3581 = vmatmul.f32.vlgmr.msrb.gmra.mxu2 %v9663_v40  ;;  %3621 = vmatmul.f32.vlgmr.msra.gmra.mxu0 %v9663_v40  ;;  %v3101_v13 = vadd.f32 %v9752_v58, %v3081_v10  ;;  %v9898_v10 = vld [vmem:[#allocation7 + $0x3a0] sm:$0xff]  ;;  %12434 = vst [vmem:[#allocation65_spill] sm:$0xff] %v9901_v22 }
 0x6d0   :  { %3645 = vmatpush.msra.mxu2 %v9879_v42  ;;  %3721 = vmatpush.msrb.mxu0 %v9882_v32  ;;  %v9895_v32 = vld [vmem:[#allocation10 + $0x68] sm:$0xff]  ;;  %12435 = vst [vmem:[#allocation66_spill] sm:$0xff] %v9907_v45 }
 0x6d1   :  { %v3294_v62 = vadd.f32 %v3293_v49, %v3141_v7  ;;  %12433 = vst [vmem:[#allocation64_spill] sm:$0xff] %v9895_v32  ;;  %v9904_v7 = vld [vmem:[#allocation7 + $0x358] sm:$0xff]  ;;  %v9910_v49 = vld [vmem:[#allocation7 + $0x310] sm:$0xff] }
 0x6d2   :  { %v3220_v18 = vpop.f32.mrf.mxu2  ;;  %3646 = vmatpush.msra.mxu2 %v9886_v0  ;;  %3722 = vmatpush.msrb.mxu0 %v9889_v52  ;;  %v9935_v52 = vld [vmem:[#allocation7 + $0x1f0] sm:$0xff] }
 0x6d3   :  { %v3221_v47 = vadd.f32 %v3220_v18, %v3201_v15  ;;  %4143 = vtanh.f32 %v3294_v62  ;;  %v9916_v15 = vld [vmem:[#allocation7 + $0x2c8] sm:$0xff]  ;;  %v9919_v18 = vld [vmem:[#allocation10 + $0x48] sm:$0xff]  ;;  %v9922_v62 = vld [vmem:[#allocation7 + $0x280] sm:$0xff] }
 0x6d4   :  { %3647 = vmatpush.msra.mxu2 %v9892_v19  ;;  %3723 = vmatpush.msrb.mxu0 %v9895_v32  ;;  %12437 = vst [vmem:[#allocation69_spill] sm:$0xff] %v9919_v18 }
 0x6d5   :  { %v3288_v1 = vadd.f32 %v3221_v47, %v3101_v13 }
 0x6d6   :  { %3648 = vmatpush.msra.mxu2 %v9898_v10  ;;  %3724 = vmatpush.msrb.mxu0 %v9901_v22  ;;  %v9931_v22 = vld [vmem:[#allocation10 + $0x38] sm:$0xff] }
 0x6d7   :  { %v3289_v58 = vmul.f32 0.5, %v3288_v1  ;;  %v9913_v1 = vld [vmem:[#allocation10 + $0x50] sm:$0xff]  ;;  %12440 = vst [vmem:[#allocation70_spill] sm:$0xff] %v9931_v22 }
 0x6d8   :  { %3649 = vmatpush.msra.mxu2 %v9904_v7  ;;  %3725 = vmatpush.msrb.mxu0 %v9907_v45  ;;  %12436 = vst [vmem:[#allocation67_spill] sm:$0xff] %v9913_v1 }
 0x6d9   :  { %4145 = vtanh.f32 %v3289_v58  ;;  %v4144_v13 = vpop.eup %4143  ;;  %v9925_v58 = vld [vmem:[#allocation10 + $0x40] sm:$0xff] }
 0x6da   :  { %3650 = vmatpush.msra.mxu2 %v9910_v49  ;;  %3726 = vmatpush.msrb.mxu0 %v9913_v1  ;;  %12438 = vst [vmem:[#allocation68_spill] sm:$0xff] %v9925_v58  ;;  %v9928_v1 = vld [vmem:[#allocation7 + $0x238] sm:$0xff]  ;;  %v3296_v32 = vsub.f32 %v9237_v55, %v4144_v13  ;;  %v9949_v55 = vld [vmem:[#allocation7 + $0x160] sm:$0xff] }
 0x6db   :  { %12439 = vst [vmem:[#allocation71_spill] sm:$0xff] %v9928_v1 }
 0x6dc   :  { %3651 = vmatpush.msra.mxu2 %v9916_v15  ;;  %3727 = vmatpush.msrb.mxu0 %v9919_v18 }
 0x6de   :  { %3652 = vmatpush.msra.mxu2 %v9922_v62  ;;  %3728 = vmatpush.msrb.mxu0 %v9925_v58  ;;  %v9941_v58 = vld [vmem:[#allocation7 + $0x1a8] sm:$0xff] }
 0x6df   :  { %v4146_v47 = vpop.eup %4145 }
 0x6e0   :  { %v3291_v45 = vmul.f32 0.5, %v4146_v47  ;;  %3653 = vmatpush.msra.mxu2 %v9928_v1  ;;  %3729 = vmatpush.msrb.mxu0 %v9931_v22  ;;  %v9944_v1 = vld [vmem:[#allocation10 + $0x28] sm:$0xff]  ;;  %v9952_v22 = vld [vmem:[#allocation10 + $0x20] sm:$0xff] }
 0x6e1   :  { %12441 = vst [vmem:[#allocation73_spill] sm:$0xff] %v9944_v1 }
 0x6e2   :  { %v3292_v18 = vadd.f32 0.5, %v3291_v45  ;;  %3654 = vmatpush.msra.mxu2 %v9935_v52  ;;  %3730 = vmatpush.msrb.mxu0 %v9938_v25  ;;  %12442 = vst [vmem:[#allocation72_spill] sm:$0xff] %v9952_v22 }
 0x6e4   :  { %v3297_v47 = vmul.f32 %v3296_v32, %v3292_v18  ;;  %3655 = vmatpush.msra.mxu2 %v9941_v58  ;;  %3731 = vmatpush.msrb.mxu0 %v9944_v1  ;;  %v9959_v32 = vld [vmem:[#allocation7 + $0x118] sm:$0xff]  ;;  %v9962_v18 = vld [vmem:[#allocation10 + $0x18] sm:$0xff] }
 0x6e5   :  { %12443 = vst [vmem:[#allocation75_spill] sm:$0xff] %v9962_v18  ;;  %v9983_v1 = vld [vmem:[#allocation7 + $0x40] sm:$0xff] }
 0x6e6   :  { %v9947_v45 = vadd.f32 %v4144_v13, %v3297_v47  ;;  %3656 = vmatpush.msra.mxu2 %v9949_v55  ;;  %3732 = vmatpush.msrb.mxu0 %v9952_v22  ;;  %v9967_v13 = vld [vmem:[#allocation7 + $0xd0] sm:$0xff]  ;;  %v9970_v47 = vld [vmem:[#allocation10 + $0x10] sm:$0xff]  ;;  %v9975_v22 = vld [vmem:[#allocation7 + $0x88] sm:$0xff] }
 0x6e8   :  { %3315 = vmatmul.f32.vlgmr.msra.gmra.mxu1 %v9947_v45  ;;  %3361 = vmatmul.f32.vlgmr.msrb.gmra.mxu3 %v9947_v45 }
 0x6e9   :  { %3465 = vmatpush.msra.mxu1 %v9243_v11  ;;  %3505 = vmatpush.msrb.mxu3 %v9246_v16 }
 0x6ea   :  { %3657 = vmatpush.msra.mxu2 %v9959_v32  ;;  %3733 = vmatpush.msrb.mxu0 %v9962_v18  ;;  %v9978_v18 = vld [vmem:[#allocation10 + $0x8] sm:$0xff] }
 0x6eb   :  { %3466 = vmatpush.msra.mxu1 %v9251_v35  ;;  %3506 = vmatpush.msrb.mxu3 %v9254_v56  ;;  %12444 = vst [vmem:[#allocation74_spill] sm:$0xff] %v9978_v18 }
 0x6ec   :  { %3658 = vmatpush.msra.mxu2 %v9967_v13  ;;  %3734 = vmatpush.msrb.mxu0 %v9970_v47 }
 0x6ed   :  { %3467 = vmatpush.msra.mxu1 %v9259_v8  ;;  %3507 = vmatpush.msrb.mxu3 %v9262_v6 }
 0x6ee   :  { %3659 = vmatpush.msra.mxu2 %v9975_v22  ;;  %3735 = vmatpush.msrb.mxu0 %v9978_v18  ;;  %v9994_v18 = vld [vmem:[#allocation10] sm:$0xff] }
 0x6ef   :  { %3468 = vmatpush.msra.mxu1 %v9267_v54  ;;  %3508 = vmatpush.msrb.mxu3 %v9270_v33 }
 0x6f0   :  { %3660 = vmatpush.msra.mxu2 %v9983_v1  ;;  %3401 = vmatmul.f32.vlgmr.msrb.gmra.mxu1 %v9947_v45 }
 0x6f1   :  { %3441 = vmatmul.f32.vlgmr.msra.gmra.mxu3 %v9947_v45  ;;  %3469 = vmatpush.msra.mxu1 %v9276_v41 }
 0x6f2   :  { %3509 = vmatpush.msrb.mxu3 %v9279_v30  ;;  %3661 = vmatmul.f32.vlgmr.msra.gmra.mxu2 %v9663_v40 }
 0x6f3   :  { %3470 = vmatpush.msra.mxu1 %v9283_v21  ;;  %3767 = vmatpush.msrb.mxu2 %v9243_v11  ;;  %v12445_v11 = vld [vmem:[#allocation32_spill] sm:$0xff] }
 0x6f4   :  { %3510 = vmatpush.msrb.mxu3 %v9287_v51  ;;  %3736 = vmatpush.msrb.mxu0 %v9994_v18 }
 0x6f5   :  { %3471 = vmatpush.msra.mxu1 %v9291_v31  ;;  %3768 = vmatpush.msrb.mxu2 %v9251_v35  ;;  %v12447_v35 = vld [vmem:[#allocation97_spill] sm:$0xff] }
 0x6f6   :  { %3511 = vmatpush.msrb.mxu3 %v9295_v63  ;;  %3807 = vmatpush.msra.mxu0 %v9246_v16  ;;  %v12446_v16 = vld [vmem:[#allocation95_spill] sm:$0xff] }
 0x6f7   :  { %3472 = vmatpush.msra.mxu1 %v9299_v20  ;;  %3769 = vmatpush.msrb.mxu2 %v9259_v8  ;;  %v12449_v8 = vld [vmem:[#allocation100_spill] sm:$0xff] }
 0x6f8   :  { %3512 = vmatpush.msrb.mxu3 %v9303_v60  ;;  %3808 = vmatpush.msra.mxu0 %v9254_v56  ;;  %v12448_v56 = vld [vmem:[#allocation98_spill] sm:$0xff] }
 0x6f9   :  { %3473 = vmatpush.msra.mxu1 %v9307_v39  ;;  %3770 = vmatpush.msrb.mxu2 %v9267_v54  ;;  %v12451_v54 = vld [vmem:[#allocation103_spill] sm:$0xff] }
 0x6fa   :  { %3513 = vmatpush.msrb.mxu3 %v9311_v59  ;;  %3809 = vmatpush.msra.mxu0 %v9262_v6  ;;  %v12450_v6 = vld [vmem:[#allocation101_spill] sm:$0xff] }
 0x6fb   :  { %3474 = vmatpush.msra.mxu1 %v9315_v61  ;;  %3771 = vmatpush.msrb.mxu2 %v9276_v41  ;;  %v12453_v41 = vld [vmem:[#allocation105_spill] sm:$0xff] }
 0x6fc   :  { %3514 = vmatpush.msrb.mxu3 %v9319_v43  ;;  %3810 = vmatpush.msra.mxu0 %v9270_v33  ;;  %v12452_v33 = vld [vmem:[#allocation104_spill] sm:$0xff] }
 0x6fd   :  { %3475 = vmatpush.msra.mxu1 %v9323_v37  ;;  %3772 = vmatpush.msrb.mxu2 %v9283_v21  ;;  %v12455_v21 = vld [vmem:[#allocation109_spill] sm:$0xff] }
 0x6fe   :  { %3515 = vmatpush.msrb.mxu3 %v9327_v17  ;;  %3811 = vmatpush.msra.mxu0 %v9279_v30  ;;  %v12454_v30 = vld [vmem:[#allocation107_spill] sm:$0xff] }
 0x6ff   :  { %3476 = vmatpush.msra.mxu1 %v9331_v9  ;;  %3773 = vmatpush.msrb.mxu2 %v9291_v31  ;;  %v12457_v31 = vld [vmem:[#allocation111_spill] sm:$0xff] }
 0x700   :  { %3516 = vmatpush.msrb.mxu3 %v9335_v4  ;;  %3812 = vmatpush.msra.mxu0 %v9287_v51  ;;  %v12456_v51 = vld [vmem:[#allocation31_spill] sm:$0xff] }
 0x701   :  { %3477 = vmatpush.msra.mxu1 %v9339_v5  ;;  %3774 = vmatpush.msrb.mxu2 %v9299_v20  ;;  %v12459_v20 = vld [vmem:[#allocation113_spill] sm:$0xff] }
 0x702   :  { %3517 = vmatpush.msrb.mxu3 %v9343_v24  ;;  %3813 = vmatpush.msra.mxu0 %v9295_v63  ;;  %v12458_v63 = vld [vmem:[#allocation17_spill] sm:$0xff] }
 0x703   :  { %3478 = vmatpush.msra.mxu1 %v9347_v36  ;;  %3775 = vmatpush.msrb.mxu2 %v9307_v39  ;;  %v12461_v39 = vld [vmem:[#allocation29_spill] sm:$0xff] }
 0x704   :  { %3518 = vmatpush.msrb.mxu3 %v9351_v57  ;;  %3814 = vmatpush.msra.mxu0 %v9303_v60  ;;  %v12460_v60 = vld [vmem:[#allocation114_spill] sm:$0xff] }
 0x705   :  { %3479 = vmatpush.msra.mxu1 %v9355_v2  ;;  %3776 = vmatpush.msrb.mxu2 %v9315_v61  ;;  %v12463_v61 = vld [vmem:[#allocation134_spill] sm:$0xff] }
 0x706   :  { %3519 = vmatpush.msrb.mxu3 %v9359_v38  ;;  %3815 = vmatpush.msra.mxu0 %v9311_v59  ;;  %v12462_v59 = vld [vmem:[#allocation28_spill] sm:$0xff] }
 0x707   :  { %3480 = vmatpush.msra.mxu1 %v9363_v29  ;;  %3777 = vmatpush.msrb.mxu2 %v9323_v37  ;;  %v12465_v37 = vld [vmem:[#allocation136_spill] sm:$0xff] }
 0x708   :  { %3520 = vmatpush.msrb.mxu3 %v9367_v34  ;;  %3481 = vmatmul.f32.vlgmr.msra.gmra.mxu1 %v9947_v45 }
 0x709   :  { %3521 = vmatmul.f32.vlgmr.msrb.gmra.mxu3 %v9947_v45  ;;  %3545 = vmatpush.msrb.mxu1 %v9372_v28 }
 0x70a   :  { %3585 = vmatpush.msra.mxu3 %v9375_v48  ;;  %3778 = vmatpush.msrb.mxu2 %v9331_v9  ;;  %v12467_v9 = vld [vmem:[#allocation138_spill] sm:$0xff]  ;;  %v12478_v48 = vld [vmem:[#allocation149_spill] sm:$0xff] }
 0x70b   :  { %3546 = vmatpush.msrb.mxu1 %v12445_v11  ;;  %3816 = vmatpush.msra.mxu0 %v9319_v43  ;;  %v12464_v43 = vld [vmem:[#allocation135_spill] sm:$0xff] }
 0x70c   :  { %3586 = vmatpush.msra.mxu3 %v12446_v16  ;;  %3779 = vmatpush.msrb.mxu2 %v9339_v5  ;;  %v12469_v5 = vld [vmem:[#allocation140_spill] sm:$0xff]  ;;  %v12480_v16 = vld [vmem:[#allocation150_spill] sm:$0xff] }
 0x70d   :  { %3547 = vmatpush.msrb.mxu1 %v12447_v35  ;;  %3817 = vmatpush.msra.mxu0 %v9327_v17  ;;  %v12466_v17 = vld [vmem:[#allocation137_spill] sm:$0xff] }
 0x70e   :  { %3587 = vmatpush.msra.mxu3 %v12448_v56  ;;  %3780 = vmatpush.msrb.mxu2 %v9347_v36  ;;  %v12471_v36 = vld [vmem:[#allocation142_spill] sm:$0xff]  ;;  %v12482_v56 = vld [vmem:[#allocation152_spill] sm:$0xff] }
 0x70f   :  { %3548 = vmatpush.msrb.mxu1 %v12449_v8  ;;  %3818 = vmatpush.msra.mxu0 %v9335_v4  ;;  %v12468_v4 = vld [vmem:[#allocation139_spill] sm:$0xff] }
 0x710   :  { %3588 = vmatpush.msra.mxu3 %v12450_v6  ;;  %3781 = vmatpush.msrb.mxu2 %v9355_v2  ;;  %v12473_v2 = vld [vmem:[#allocation20_spill] sm:$0xff]  ;;  %v12484_v6 = vld [vmem:[#allocation154_spill] sm:$0xff] }
 0x711   :  { %3549 = vmatpush.msrb.mxu1 %v12451_v54  ;;  %3819 = vmatpush.msra.mxu0 %v9343_v24  ;;  %v12470_v24 = vld [vmem:[#allocation141_spill] sm:$0xff] }
 0x712   :  { %3589 = vmatpush.msra.mxu3 %v12452_v33  ;;  %3782 = vmatpush.msrb.mxu2 %v9363_v29  ;;  %v12475_v29 = vld [vmem:[#allocation146_spill] sm:$0xff]  ;;  %v12486_v33 = vld [vmem:[#allocation156_spill] sm:$0xff] }
 0x713   :  { %3550 = vmatpush.msrb.mxu1 %v12453_v41  ;;  %3820 = vmatpush.msra.mxu0 %v9351_v57  ;;  %v12472_v57 = vld [vmem:[#allocation143_spill] sm:$0xff] }
 0x714   :  { %3847 = vmatpush.msra.mxu2 %v9372_v28  ;;  %3590 = vmatpush.msra.mxu3 %v12454_v30  ;;  %v12477_v28 = vld [vmem:[#allocation148_spill] sm:$0xff]  ;;  %v12488_v30 = vld [vmem:[#allocation39_spill] sm:$0xff] }
 0x715   :  { %3551 = vmatpush.msrb.mxu1 %v12455_v21  ;;  %3821 = vmatpush.msra.mxu0 %v9359_v38  ;;  %v12474_v38 = vld [vmem:[#allocation145_spill] sm:$0xff] }
 0x716   :  { %3848 = vmatpush.msra.mxu2 %v12445_v11  ;;  %3591 = vmatpush.msra.mxu3 %v12456_v51  ;;  %v12479_v11 = vld [vmem:[#allocation144_spill] sm:$0xff]  ;;  %v12490_v51 = vld [vmem:[#allocation159_spill] sm:$0xff] }
 0x717   :  { %3552 = vmatpush.msrb.mxu1 %v12457_v31  ;;  %3822 = vmatpush.msra.mxu0 %v9367_v34  ;;  %v12476_v34 = vld [vmem:[#allocation147_spill] sm:$0xff] }
 0x718   :  { %3849 = vmatpush.msra.mxu2 %v12447_v35  ;;  %3592 = vmatpush.msra.mxu3 %v12458_v63  ;;  %v12481_v35 = vld [vmem:[#allocation151_spill] sm:$0xff]  ;;  %v12492_v63 = vld [vmem:[#allocation37_spill] sm:$0xff] }
 0x719   :  { %3553 = vmatpush.msrb.mxu1 %v12459_v20 }
 0x71a   :  { %3850 = vmatpush.msra.mxu2 %v12449_v8  ;;  %3593 = vmatpush.msra.mxu3 %v12460_v60  ;;  %v12483_v8 = vld [vmem:[#allocation153_spill] sm:$0xff]  ;;  %v12494_v60 = vld [vmem:[#allocation162_spill] sm:$0xff] }
 0x71b   :  { %3554 = vmatpush.msrb.mxu1 %v12461_v39 }
 0x71c   :  { %3851 = vmatpush.msra.mxu2 %v12451_v54  ;;  %3594 = vmatpush.msra.mxu3 %v12462_v59  ;;  %v12485_v54 = vld [vmem:[#allocation155_spill] sm:$0xff]  ;;  %v12496_v59 = vld [vmem:[#allocation164_spill] sm:$0xff] }
 0x71d   :  { %3555 = vmatpush.msrb.mxu1 %v12463_v61 }
 0x71e   :  { %3852 = vmatpush.msra.mxu2 %v12453_v41  ;;  %3595 = vmatpush.msra.mxu3 %v12464_v43  ;;  %v12487_v41 = vld [vmem:[#allocation157_spill] sm:$0xff]  ;;  %v10123_v43 = vld [vmem:[#allocation7 + $0x5e0] sm:$0xff] }
 0x71f   :  { %3556 = vmatpush.msrb.mxu1 %v12465_v37 }
 0x720   :  { %3853 = vmatpush.msra.mxu2 %v12455_v21  ;;  %3596 = vmatpush.msra.mxu3 %v12466_v17  ;;  %v12489_v21 = vld [vmem:[#allocation158_spill] sm:$0xff] }
 0x721   :  { %3557 = vmatpush.msrb.mxu1 %v12467_v9  ;;  %v10127_v17 = vld [vmem:[#allocation7 + $0x598] sm:$0xff] }
 0x722   :  { %3854 = vmatpush.msra.mxu2 %v12457_v31  ;;  %3597 = vmatpush.msra.mxu3 %v12468_v4  ;;  %v12491_v31 = vld [vmem:[#allocation160_spill] sm:$0xff]  ;;  %v10131_v4 = vld [vmem:[#allocation7 + $0x550] sm:$0xff] }
 0x723   :  { %3558 = vmatpush.msrb.mxu1 %v12469_v5 }
 0x724   :  { %3855 = vmatpush.msra.mxu2 %v12459_v20  ;;  %3598 = vmatpush.msra.mxu3 %v12470_v24  ;;  %v12493_v20 = vld [vmem:[#allocation161_spill] sm:$0xff] }
 0x725   :  { %3559 = vmatpush.msrb.mxu1 %v12471_v36  ;;  %v10135_v24 = vld [vmem:[#allocation7 + $0x508] sm:$0xff] }
 0x726   :  { %3856 = vmatpush.msra.mxu2 %v12461_v39  ;;  %3599 = vmatpush.msra.mxu3 %v12472_v57  ;;  %v12495_v39 = vld [vmem:[#allocation163_spill] sm:$0xff] }
 0x727   :  { %3560 = vmatpush.msrb.mxu1 %v12473_v2  ;;  %v10139_v57 = vld [vmem:[#allocation7 + $0x4c0] sm:$0xff] }
 0x728   :  { %3857 = vmatpush.msra.mxu2 %v12463_v61  ;;  %3600 = vmatpush.msra.mxu3 %v12474_v38  ;;  %v12497_v61 = vld [vmem:[#allocation165_spill] sm:$0xff]  ;;  %v12503_v38 = vld [vmem:[#allocation171_spill] sm:$0xff] }
 0x729   :  { %3561 = vmatmul.f32.vlgmr.msrb.gmra.mxu1 %v9947_v45  ;;  %3601 = vmatmul.f32.vlgmr.msra.gmra.mxu3 %v9947_v45 }
 0x72a   :  { %3625 = vmatpush.msra.mxu1 %v12475_v29  ;;  %3665 = vmatpush.msrb.mxu3 %v12476_v34  ;;  %v12504_v29 = vld [vmem:[#allocation173_spill] sm:$0xff]  ;;  %v12505_v34 = vld [vmem:[#allocation174_spill] sm:$0xff] }
 0x72b   :  { %3858 = vmatpush.msra.mxu2 %v12465_v37  ;;  %v12498_v37 = vld [vmem:[#allocation166_spill] sm:$0xff] }
 0x72c   :  { %3626 = vmatpush.msra.mxu1 %v12477_v28  ;;  %3666 = vmatpush.msrb.mxu3 %v12478_v48  ;;  %v12506_v28 = vld [vmem:[#allocation175_spill] sm:$0xff]  ;;  %v12507_v48 = vld [vmem:[#allocation176_spill] sm:$0xff] }
 0x72d   :  { %3859 = vmatpush.msra.mxu2 %v12467_v9  ;;  %v12499_v9 = vld [vmem:[#allocation167_spill] sm:$0xff] }
 0x72e   :  { %3627 = vmatpush.msra.mxu1 %v12479_v11  ;;  %3667 = vmatpush.msrb.mxu3 %v12480_v16  ;;  %v12511_v11 = vld [vmem:[#allocation195_spill] sm:$0xff]  ;;  %v12513_v16 = vld [vmem:[#allocation197_spill] sm:$0xff] }
 0x72f   :  { %3860 = vmatpush.msra.mxu2 %v12469_v5  ;;  %v12500_v5 = vld [vmem:[#allocation168_spill] sm:$0xff] }
 0x730   :  { %3628 = vmatpush.msra.mxu1 %v12481_v35  ;;  %3668 = vmatpush.msrb.mxu3 %v12482_v56  ;;  %v12515_v35 = vld [vmem:[#allocation199_spill] sm:$0xff] }
 0x731   :  { %3861 = vmatpush.msra.mxu2 %v12471_v36  ;;  %v12501_v36 = vld [vmem:[#allocation169_spill] sm:$0xff]  ;;  %v12519_v56 = vld [vmem:[#allocation203_spill] sm:$0xff] }
 0x732   :  { %3629 = vmatpush.msra.mxu1 %v12483_v8  ;;  %3669 = vmatpush.msrb.mxu3 %v12484_v6  ;;  %v12520_v8 = vld [vmem:[#allocation183_spill] sm:$0xff]  ;;  %v12521_v6 = vld [vmem:[#allocation205_spill] sm:$0xff] }
 0x733   :  { %3862 = vmatpush.msra.mxu2 %v12473_v2  ;;  %v12502_v2 = vld [vmem:[#allocation170_spill] sm:$0xff] }
 0x734   :  { %3630 = vmatpush.msra.mxu1 %v12485_v54  ;;  %3670 = vmatpush.msrb.mxu3 %v12486_v33  ;;  %v12522_v33 = vld [vmem:[#allocation184_spill] sm:$0xff] }
 0x736   :  { %3631 = vmatpush.msra.mxu1 %v12487_v41  ;;  %3671 = vmatpush.msrb.mxu3 %v12488_v30  ;;  %v12523_v41 = vld [vmem:[#allocation172_spill] sm:$0xff] }
 0x738   :  { %3632 = vmatpush.msra.mxu1 %v12489_v21  ;;  %3672 = vmatpush.msrb.mxu3 %v12490_v51  ;;  %v12524_v21 = vld [vmem:[#allocation207_spill] sm:$0xff]  ;;  %v3342_v51 = vpop.f32.mrf.mxu2 }
 0x73a   :  { %3633 = vmatpush.msra.mxu1 %v12491_v31  ;;  %3673 = vmatpush.msrb.mxu3 %v12492_v63  ;;  %v12525_v31 = vld [vmem:[#allocation185_spill] sm:$0xff] }
 0x73c   :  { %3634 = vmatpush.msra.mxu1 %v12493_v20  ;;  %3674 = vmatpush.msrb.mxu3 %v12494_v60  ;;  %v12526_v20 = vld [vmem:[#allocation209_spill] sm:$0xff]  ;;  %v12527_v60 = vld [vmem:[#allocation186_spill] sm:$0xff] }
 0x73e   :  { %3635 = vmatpush.msra.mxu1 %v12495_v39  ;;  %3675 = vmatpush.msrb.mxu3 %v12496_v59  ;;  %v12528_v39 = vld [vmem:[#allocation211_spill] sm:$0xff]  ;;  %v3382_v59 = vpop.f32.mrf.mxu0 }
 0x740   :  { %3636 = vmatpush.msra.mxu1 %v12497_v61  ;;  %3676 = vmatpush.msrb.mxu3 %v10123_v43  ;;  %v12529_v61 = vld [vmem:[#allocation35_spill] sm:$0xff] }
 0x742   :  { %3637 = vmatpush.msra.mxu1 %v12498_v37  ;;  %3677 = vmatpush.msrb.mxu3 %v10127_v17  ;;  %v3343_v37 = vadd.f32 %v3342_v51, %v12529_v61  ;;  %v12545_v51 = vld [vmem:[#allocation192_spill] sm:$0xff] }
 0x744   :  { %3638 = vmatpush.msra.mxu1 %v12499_v9  ;;  %3678 = vmatpush.msrb.mxu3 %v10131_v4  ;;  %v12530_v9 = vld [vmem:[#allocation187_spill] sm:$0xff] }
 0x746   :  { %3639 = vmatpush.msra.mxu1 %v12500_v5  ;;  %3679 = vmatpush.msrb.mxu3 %v10135_v24 }
 0x748   :  { %3640 = vmatpush.msra.mxu1 %v12501_v36  ;;  %3680 = vmatpush.msrb.mxu3 %v10139_v57  ;;  %v12531_v36 = vld [vmem:[#allocation213_spill] sm:$0xff] }
 0x749   :  { %3641 = vmatmul.f32.vlgmr.msra.gmra.mxu1 %v9947_v45  ;;  %3681 = vmatmul.f32.vlgmr.msrb.gmra.mxu3 %v9947_v45 }
 0x74a   :  { %3747 = vmatpush.msrb.mxu1 %v12502_v2  ;;  %3787 = vmatpush.msra.mxu3 %v9670_v46  ;;  %v12508_v46 = vld [vmem:[#allocation177_spill] sm:$0xff] }
 0x74b   :  { %v12532_v2 = vld [vmem:[#allocation21_spill] sm:$0xff] }
 0x74c   :  { %3748 = vmatpush.msrb.mxu1 %v12503_v38  ;;  %3788 = vmatpush.msra.mxu3 %v9676_v23  ;;  %v12509_v23 = vld [vmem:[#allocation193_spill] sm:$0xff]  ;;  %v12533_v38 = vld [vmem:[#allocation23_spill] sm:$0xff] }
 0x74e   :  { %3749 = vmatpush.msrb.mxu1 %v12504_v29  ;;  %3789 = vmatpush.msra.mxu3 %v9682_v44  ;;  %v12510_v44 = vld [vmem:[#allocation178_spill] sm:$0xff]  ;;  %v217_v29 = vadd.f32 %v12533_v38, %v12532_v2  ;;  %v12551_v2 = vld [vmem:[#allocation225_spill] sm:$0xff] }
 0x74f   :  { %v12552_v38 = vld [vmem:[#allocation198_spill] sm:$0xff] }
 0x750   :  { %3750 = vmatpush.msrb.mxu1 %v12505_v34  ;;  %3790 = vmatpush.msra.mxu3 %v9688_v26  ;;  %v12512_v26 = vld [vmem:[#allocation179_spill] sm:$0xff] }
 0x752   :  { %3751 = vmatpush.msrb.mxu1 %v12506_v28  ;;  %3791 = vmatpush.msra.mxu3 %v9696_v14  ;;  %v12514_v14 = vld [vmem:[#allocation180_spill] sm:$0xff] }
 0x753   :  { %v12534_v28 = vld [vmem:[#allocation188_spill] sm:$0xff] }
 0x754   :  { %3752 = vmatpush.msrb.mxu1 %v12507_v48  ;;  %3792 = vmatpush.msra.mxu3 %v9702_v50  ;;  %v12516_v50 = vld [vmem:[#allocation181_spill] sm:$0xff]  ;;  %v12535_v48 = vld [vmem:[#allocation24_spill] sm:$0xff] }
 0x756   :  { %3753 = vmatpush.msrb.mxu1 %v9630_v3  ;;  %3793 = vmatpush.msra.mxu3 %v9708_v53  ;;  %v12517_v3 = vld [vmem:[#allocation201_spill] sm:$0xff]  ;;  %v12518_v53 = vld [vmem:[#allocation182_spill] sm:$0xff] }
 0x758   :  { %3754 = vmatpush.msrb.mxu1 %v12508_v46  ;;  %3794 = vmatpush.msra.mxu3 %v12509_v23  ;;  %v3383_v46 = vadd.f32 %v3382_v59, %v12535_v48  ;;  %v12554_v48 = vld [vmem:[#allocation200_spill] sm:$0xff] }
 0x75a   :  { %3755 = vmatpush.msrb.mxu1 %v12510_v44  ;;  %3795 = vmatpush.msra.mxu3 %v12511_v11  ;;  %v12536_v44 = vld [vmem:[#allocation215_spill] sm:$0xff] }
 0x75c   :  { %3756 = vmatpush.msrb.mxu1 %v12512_v26  ;;  %3796 = vmatpush.msra.mxu3 %v12513_v16  ;;  %v12537_v26 = vld [vmem:[#allocation189_spill] sm:$0xff] }
 0x75e   :  { %3757 = vmatpush.msrb.mxu1 %v12514_v14  ;;  %3797 = vmatpush.msra.mxu3 %v12515_v35  ;;  %v12538_v14 = vld [vmem:[#allocation216_spill] sm:$0xff] }
 0x760   :  { %3758 = vmatpush.msrb.mxu1 %v12516_v50  ;;  %3798 = vmatpush.msra.mxu3 %v12517_v3  ;;  %v12539_v3 = vld [vmem:[#allocation190_spill] sm:$0xff] }
 0x762   :  { %3759 = vmatpush.msrb.mxu1 %v12518_v53  ;;  %3799 = vmatpush.msra.mxu3 %v12519_v56  ;;  %v12540_v53 = vld [vmem:[#allocation45_spill] sm:$0xff]  ;;  %v12541_v56 = vld [vmem:[#allocation43_spill] sm:$0xff] }
 0x764   :  { %3760 = vmatpush.msrb.mxu1 %v12520_v8  ;;  %3800 = vmatpush.msra.mxu3 %v12521_v6  ;;  %v258_v8 = vadd.f32 %v12541_v56, %v12540_v53  ;;  %v12561_v53 = vld [vmem:[#allocation56_spill] sm:$0xff]  ;;  %v12562_v56 = vld [vmem:[#allocation206_spill] sm:$0xff] }
 0x765   :  { %v3316_v54 = vpop.f32.mrf.mxu1 }
 0x766   :  { %3761 = vmatpush.msrb.mxu1 %v12522_v33  ;;  %v3317_v30 = vadd.f32 %v12523_v41, %v3316_v54  ;;  %3801 = vmatpush.msra.mxu3 %v12524_v21  ;;  %v12542_v54 = vld [vmem:[#allocation217_spill] sm:$0xff]  ;;  %v12543_v33 = vld [vmem:[#allocation191_spill] sm:$0xff] }
 0x767   :  { %v12544_v21 = vld [vmem:[#allocation219_spill] sm:$0xff] }
 0x768   :  { %3762 = vmatpush.msrb.mxu1 %v12525_v31  ;;  %v3319_v63 = vmul.f32 0.5, %v3317_v30  ;;  %3802 = vmatpush.msra.mxu3 %v12526_v20  ;;  %v12546_v31 = vld [vmem:[#allocation221_spill] sm:$0xff]  ;;  %v12547_v20 = vld [vmem:[#allocation194_spill] sm:$0xff] }
 0x76a   :  { %3827 = vmatpush.msra.mxu1 %v12527_v60  ;;  %3867 = vmatpush.msrb.mxu3 %v12528_v39  ;;  %4147 = vtanh.f32 %v3319_v63  ;;  %v3422_v63 = vpop.f32.mrf.mxu2  ;;  %v12548_v39 = vld [vmem:[#allocation223_spill] sm:$0xff] }
 0x76b   :  { %v3362_v5 = vpop.f32.mrf.mxu3 }
 0x76c   :  { %3828 = vmatpush.msra.mxu1 %v12530_v9  ;;  %3868 = vmatpush.msrb.mxu3 %v12531_v36  ;;  %v3363_v34 = vadd.f32 %v3362_v5, %v3343_v37  ;;  %v12549_v37 = vld [vmem:[#allocation196_spill] sm:$0xff]  ;;  %v12550_v9 = vld [vmem:[#allocation26_spill] sm:$0xff] }
 0x76d   :  { %v3402_v23 = vpop.f32.mrf.mxu1  ;;  %v3423_v5 = vadd.f32 %v3422_v63, %v12550_v9  ;;  %v12566_v63 = vld [vmem:[#allocation212_spill] sm:$0xff]  ;;  %v3462_v9 = vpop.f32.mrf.mxu0 }
 0x76e   :  { %3829 = vmatpush.msra.mxu1 %v12534_v28  ;;  %3869 = vmatpush.msrb.mxu3 %v12536_v44  ;;  %v3689_v11 = vadd.f32 %v3363_v34, %v217_v29  ;;  %v3403_v16 = vadd.f32 %v3402_v23, %v3383_v46  ;;  %v12553_v28 = vld [vmem:[#allocation52_spill] sm:$0xff]  ;;  %v12555_v46 = vld [vmem:[#allocation27_spill] sm:$0xff]  ;;  %v12556_v23 = vld [vmem:[#allocation25_spill] sm:$0xff] }
 0x76f   :  { %v299_v44 = vadd.f32 %v12556_v23, %v12555_v46 }
 0x770   :  { %3830 = vmatpush.msra.mxu1 %v12537_v26  ;;  %3870 = vmatpush.msrb.mxu3 %v12538_v14  ;;  %v4148_v35 = vpop.eup %4147  ;;  %v3690_v50 = vmul.f32 0.5, %v3689_v11  ;;  %v3694_v30 = vadd.f32 %v3403_v16, %v258_v8  ;;  %v12557_v26 = vld [vmem:[#allocation51_spill] sm:$0xff]  ;;  %v12558_v16 = vld [vmem:[#allocation202_spill] sm:$0xff] }
 0x771   :  { %v3321_v6 = vmul.f32 0.5, %v4148_v35  ;;  %v12559_v35 = vld [vmem:[#allocation54_spill] sm:$0xff] }
 0x772   :  { %3831 = vmatpush.msra.mxu1 %v12539_v3  ;;  %3871 = vmatpush.msrb.mxu3 %v12542_v54  ;;  %4149 = vtanh.f32 %v3690_v50  ;;  %v3695_v60 = vmul.f32 0.5, %v3694_v30  ;;  %v12560_v50 = vld [vmem:[#allocation204_spill] sm:$0xff]  ;;  %v12563_v8 = vld [vmem:[#allocation58_spill] sm:$0xff] }
 0x773   :  { %v3322_v41 = vadd.f32 0.5, %v3321_v6  ;;  %v12564_v54 = vld [vmem:[#allocation208_spill] sm:$0xff] }
 0x774   :  { %3832 = vmatpush.msra.mxu1 %v12543_v33  ;;  %3872 = vmatpush.msrb.mxu3 %v12544_v21  ;;  %v3442_v61 = vpop.f32.mrf.mxu3  ;;  %4151 = vtanh.f32 %v3695_v60  ;;  %v12565_v33 = vld [vmem:[#allocation210_spill] sm:$0xff]  ;;  %v12571_v60 = vld [vmem:[#allocation224_spill] sm:$0xff] }
 0x775   :  { %4041 = vst [vmem:[%s10313_s7 + $0x28] sm:$0xff] %v3322_v41  ;;  %v3443_v29 = vadd.f32 %v3442_v61, %v3423_v5  ;;  %v12580_v61 = vld [vmem:[#allocation59_spill] sm:$0xff]  ;;  %v3542_v23 = vpop.f32.mrf.mxu0 }
 0x776   :  { %3833 = vmatpush.msra.mxu1 %v12545_v51  ;;  %3873 = vmatpush.msrb.mxu3 %v12546_v31  ;;  %v12584_v5 = vld [vmem:[#allocation63_spill] sm:$0xff] }
 0x778   :  { %3834 = vmatpush.msra.mxu1 %v12547_v20  ;;  %3874 = vmatpush.msrb.mxu3 %v12548_v39  ;;  %v4150_v59 = vpop.eup %4149  ;;  %v12567_v20 = vld [vmem:[#allocation214_spill] sm:$0xff]  ;;  %v12576_v39 = vld [vmem:[#allocation49_spill] sm:$0xff] }
 0x779   :  { %v3692_v36 = vmul.f32 0.5, %v4150_v59  ;;  %v12579_v59 = vld [vmem:[#allocation57_spill] sm:$0xff] }
 0x77a   :  { %3835 = vmatpush.msra.mxu1 %v12549_v37  ;;  %3875 = vmatpush.msrb.mxu3 %v12551_v2  ;;  %v4152_v3 = vpop.eup %4151  ;;  %v12581_v37 = vld [vmem:[#allocation60_spill] sm:$0xff] }
 0x77b   :  { %v3693_v34 = vadd.f32 0.5, %v3692_v36  ;;  %v3697_v6 = vmul.f32 0.5, %v4152_v3  ;;  %v12585_v36 = vld [vmem:[#allocation30_spill] sm:$0xff]  ;;  %v12594_v3 = vld [vmem:[#allocation73_spill] sm:$0xff] }
 0x77c   :  { %3836 = vmatpush.msra.mxu1 %v12552_v38  ;;  %3876 = vmatpush.msrb.mxu3 %v12553_v28  ;;  %v12586_v38 = vld [vmem:[#allocation64_spill] sm:$0xff]  ;;  %v12588_v28 = vld [vmem:[#allocation65_spill] sm:$0xff] }
 0x77d   :  { %v3699_v11 = vmul.f32 %v3693_v34, %v3443_v29  ;;  %v3698_v30 = vadd.f32 0.5, %v3697_v6  ;;  %v12587_v29 = vld [vmem:[#allocation34_spill] sm:$0xff] }
 0x77e   :  { %3837 = vmatpush.msra.mxu1 %v12554_v48  ;;  %3877 = vmatpush.msrb.mxu3 %v12557_v26  ;;  %v12589_v48 = vld [vmem:[#allocation66_spill] sm:$0xff] }
 0x77f   :  { %v3700_v14 = vadd.f32 %v3699_v11, %v299_v44  ;;  %v12590_v44 = vld [vmem:[#allocation67_spill] sm:$0xff]  ;;  %v12591_v11 = vld [vmem:[#allocation69_spill] sm:$0xff] }
 0x780   :  { %3838 = vmatpush.msra.mxu1 %v12558_v16  ;;  %3878 = vmatpush.msrb.mxu3 %v12559_v35  ;;  %v12593_v35 = vld [vmem:[#allocation70_spill] sm:$0xff] }
 0x781   :  { %4153 = vtanh.f32 %v3700_v14  ;;  %v12592_v14 = vld [vmem:[#allocation68_spill] sm:$0xff] }
 0x782   :  { %3839 = vmatpush.msra.mxu1 %v12560_v50  ;;  %3879 = vmatpush.msrb.mxu3 %v12561_v53  ;;  %v3622_v50 = vpop.f32.mrf.mxu0  ;;  %v12595_v53 = vld [vmem:[#allocation41_spill] sm:$0xff] }
 0x784   :  { %3840 = vmatpush.msra.mxu1 %v12562_v56  ;;  %3880 = vmatpush.msrb.mxu3 %v12563_v8  ;;  %v12596_v8 = vld [vmem:[#allocation38_spill] sm:$0xff] }
 0x785   :  { %v3623_v6 = vadd.f32 %v3622_v50, %v12596_v8  ;;  %v5144_v50 = vld [vmem:[#allocation7 + $0x5d8] sm:$0xff] }
 0x786   :  { %3841 = vmatpush.msra.mxu1 %v12564_v54  ;;  %3881 = vmatpush.msrb.mxu3 %v9861_v12  ;;  %v12568_v12 = vld [vmem:[#allocation218_spill] sm:$0xff] }
 0x787   :  { %v4154_v41 = vpop.eup %4153 }
 0x788   :  { %3842 = vmatpush.msra.mxu1 %v12565_v33  ;;  %3882 = vmatpush.msrb.mxu3 %v9867_v27  ;;  %v3702_v21 = vsub.f32 %v9663_v40, %v4154_v41  ;;  %v12569_v27 = vld [vmem:[#allocation220_spill] sm:$0xff]  ;;  %v12570_v40 = vld [vmem:[#allocation222_spill] sm:$0xff] }
 0x789   :  { %v12597_v33 = vld [vmem:[#allocation72_spill] sm:$0xff] }
 0x78a   :  { %v3703_v51 = vmul.f32 %v3702_v21, %v3698_v30 }
 0x78c   :  { %v3704_v31 = vadd.f32 %v4154_v41, %v3703_v51  ;;  %v12598_v51 = vld [vmem:[#allocation75_spill] sm:$0xff] }
 0x78e   :  { %3763 = vmatmul.f32.vlgmr.msrb.gmra.mxu1 %v3704_v31  ;;  %3803 = vmatmul.f32.vlgmr.msra.gmra.mxu3 %v3704_v31 }
 0x78f   :  { %3907 = vmatpush.msrb.mxu1 %v12566_v63  ;;  %3947 = vmatpush.msra.mxu3 %v9879_v42  ;;  %v12572_v42 = vld [vmem:[#allocation48_spill] sm:$0xff] }
 0x791   :  { %3908 = vmatpush.msrb.mxu1 %v12567_v20  ;;  %3948 = vmatpush.msra.mxu3 %v9886_v0  ;;  %v12573_v0 = vld [vmem:[#allocation50_spill] sm:$0xff] }
 0x793   :  { %3909 = vmatpush.msrb.mxu1 %v12568_v12  ;;  %3949 = vmatpush.msra.mxu3 %v9892_v19  ;;  %v12574_v19 = vld [vmem:[#allocation47_spill] sm:$0xff]  ;;  %v10272_v12 = vld [vmem:[#allocation8 + $0x8] ss:$0 sm:$0xff] }
 0x795   :  { %3910 = vmatpush.msrb.mxu1 %v12569_v27  ;;  %3950 = vmatpush.msra.mxu3 %v9898_v10  ;;  %v12575_v10 = vld [vmem:[#allocation71_spill] sm:$0xff] }
 0x796   :  { %3843 = vmatmul.f32.vlgmr.msra.gmra.mxu1 %v3704_v31  ;;  %3883 = vmatmul.f32.vlgmr.msrb.gmra.mxu3 %v3704_v31 }
 0x797   :  { %3911 = vmatpush.msrb.mxu1 %v12570_v40  ;;  %3951 = vmatpush.msra.mxu3 %v9904_v7  ;;  %v12577_v7 = vld [vmem:[#allocation53_spill] sm:$0xff]  ;;  %v12599_v40 = vld [vmem:[#allocation74_spill] sm:$0xff] }
 0x799   :  { %3912 = vmatpush.msrb.mxu1 %v12571_v60  ;;  %3952 = vmatpush.msra.mxu3 %v9910_v49  ;;  %v12578_v49 = vld [vmem:[#allocation55_spill] sm:$0xff] }
 0x79b   :  { %3913 = vmatpush.msrb.mxu1 %v12572_v42  ;;  %3953 = vmatpush.msra.mxu3 %v9916_v15  ;;  %v3502_v15 = vpop.f32.mrf.mxu2  ;;  %v12600_v42 = vld [vmem:[#allocation46_spill] sm:$0xff] }
 0x79c   :  { %v3503_v56 = vadd.f32 %v3502_v15, %v12595_v53 }
 0x79d   :  { %3914 = vmatpush.msrb.mxu1 %v12573_v0  ;;  %3954 = vmatpush.msra.mxu3 %v9922_v62  ;;  %v3522_v62 = vpop.f32.mrf.mxu3  ;;  %v3543_v0 = vadd.f32 %v3542_v23, %v12600_v42  ;;  %v5137_v23 = vld [vmem:[#allocation7 + $0x6a8] sm:$0xff] }
 0x79e   :  { %v3523_v30 = vadd.f32 %v3522_v62, %v3503_v56  ;;  %v5146_v56 = vld [vmem:[#allocation7 + $0x590] sm:$0xff] }
 0x79f   :  { %3915 = vmatpush.msrb.mxu1 %v12574_v19  ;;  %3955 = vmatpush.msra.mxu3 %v12575_v10 }
 0x7a1   :  { %3916 = vmatpush.msrb.mxu1 %v12576_v39  ;;  %3956 = vmatpush.msra.mxu3 %v9935_v52  ;;  %v12582_v52 = vld [vmem:[#allocation61_spill] sm:$0xff] }
 0x7a3   :  { %3917 = vmatpush.msrb.mxu1 %v12577_v7  ;;  %3957 = vmatpush.msra.mxu3 %v9941_v58  ;;  %v3582_v58 = vpop.f32.mrf.mxu2 }
 0x7a4   :  { %v3583_v2 = vadd.f32 %v3582_v58, %v12585_v36  ;;  %v5121_v58 = vld [vmem:[#allocation7 + $0x8e8] sm:$0xff] }
 0x7a5   :  { %3918 = vmatpush.msrb.mxu1 %v12578_v49  ;;  %3958 = vmatpush.msra.mxu3 %v9949_v55  ;;  %v12583_v55 = vld [vmem:[#allocation62_spill] sm:$0xff] }
 0x7a7   :  { %3919 = vmatpush.msrb.mxu1 %v12579_v59  ;;  %3959 = vmatpush.msra.mxu3 %v9959_v32 }
 0x7a9   :  { %3920 = vmatpush.msrb.mxu1 %v12580_v61  ;;  %3960 = vmatpush.msra.mxu3 %v9967_v13  ;;  %v3482_v13 = vpop.f32.mrf.mxu1 }
 0x7ab   :  { %3921 = vmatpush.msrb.mxu1 %v12581_v37  ;;  %3961 = vmatpush.msra.mxu3 %v9975_v22  ;;  %v3463_v22 = vadd.f32 %v3462_v9, %v12587_v29  ;;  %v5124_v9 = vld [vmem:[#allocation7 + $0x8a8] sm:$0xff] }
 0x7ac   :  { %v3602_v32 = vpop.f32.mrf.mxu3 }
 0x7ad   :  { %3922 = vmatpush.msrb.mxu1 %v12582_v52  ;;  %3962 = vmatpush.msra.mxu3 %v9983_v1  ;;  %v3603_v34 = vadd.f32 %v3602_v32, %v3583_v2  ;;  %v3483_v1 = vadd.f32 %v3482_v13, %v3463_v22  ;;  %v5125_v32 = vld [vmem:[#allocation7 + $0x858] sm:$0xff]  ;;  %v5129_v13 = vld [vmem:[#allocation7 + $0x7c8] sm:$0xff]  ;;  %v5131_v22 = vld [vmem:[#allocation7 + $0x780] sm:$0xff] }
 0x7ae   :  { %3923 = vmatmul.f32.vlgmr.msrb.gmra.mxu1 %v3704_v31  ;;  %3963 = vmatmul.f32.vlgmr.msra.gmra.mxu3 %v3704_v31  ;;  %v3662_v31 = vpop.f32.mrf.mxu2  ;;  %v5128_v2 = vld [vmem:[#allocation7 + $0x818] sm:$0xff] }
 0x7af   :  { %4003 = vmatpush.msra.mxu1 %v12583_v55  ;;  %v3705_v46 = vadd.f32 %v3603_v34, %v3483_v1  ;;  %v3663_v27 = vadd.f32 %v10272_v12, %v3662_v31  ;;  %v5123_v55 = vld [vmem:[#allocation7 + $0x8a0] sm:$0xff]  ;;  %v5132_v34 = vld [vmem:[#allocation7 + $0x788] sm:$0xff]  ;;  %v5154_v31 = vld [vmem:[#allocation7 + $0x8b0] sm:$0xff] }
 0x7b0   :  { %v5134_v1 = vld [vmem:[#allocation7 + $0x740] sm:$0xff] }
 0x7b1   :  { %4004 = vmatpush.msra.mxu1 %v12584_v5  ;;  %v3706_v26 = vmul.f32 0.5, %v3705_v46  ;;  %v3562_v16 = vpop.f32.mrf.mxu1  ;;  %v5126_v5 = vld [vmem:[#allocation7 + $0x860] sm:$0xff]  ;;  %v5136_v46 = vld [vmem:[#allocation7 + $0x6f8] sm:$0xff] }
 0x7b2   :  { %v3563_v39 = vadd.f32 %v3562_v16, %v3543_v0  ;;  %v5141_v16 = vld [vmem:[#allocation7 + $0x618] sm:$0xff] }
 0x7b3   :  { %4005 = vmatpush.msra.mxu1 %v12586_v38  ;;  %4155 = vtanh.f32 %v3706_v26  ;;  %v5130_v38 = vld [vmem:[#allocation7 + $0x7d0] sm:$0xff]  ;;  %v5140_v26 = vld [vmem:[#allocation7 + $0x668] sm:$0xff]  ;;  %v5161_v0 = vld [vmem:[#allocation7 + $0x6b8] sm:$0xff] }
 0x7b5   :  { %4006 = vmatpush.msra.mxu1 %v12588_v28  ;;  %v5133_v28 = vld [vmem:[#allocation7 + $0x738] sm:$0xff] }
 0x7b7   :  { %4007 = vmatpush.msra.mxu1 %v12589_v48  ;;  %v5135_v48 = vld [vmem:[#allocation7 + $0x6f0] sm:$0xff] }
 0x7b9   :  { %4008 = vmatpush.msra.mxu1 %v12590_v44  ;;  %v4156_v41 = vpop.eup %4155  ;;  %v5138_v44 = vld [vmem:[#allocation7 + $0x6b0] sm:$0xff] }
 0x7ba   :  { %v3708_v20 = vmul.f32 0.5, %v4156_v41  ;;  %v5150_v41 = vld [vmem:[#allocation7 + $0x500] sm:$0xff] }
 0x7bb   :  { %4009 = vmatpush.msra.mxu1 %v12591_v11  ;;  %v5139_v11 = vld [vmem:[#allocation7 + $0x660] sm:$0xff] }
 0x7bc   :  { %v3709_v10 = vadd.f32 0.5, %v3708_v20  ;;  %v5156_v20 = vld [vmem:[#allocation7 + $0x820] sm:$0xff] }
 0x7bd   :  { %4010 = vmatpush.msra.mxu1 %v12592_v14  ;;  %v5142_v14 = vld [vmem:[#allocation7 + $0x620] sm:$0xff] }
 0x7bf   :  { %4011 = vmatpush.msra.mxu1 %v12593_v35  ;;  %v5143_v35 = vld [vmem:[#allocation7 + $0x5d0] sm:$0xff] }
 0x7c1   :  { %4012 = vmatpush.msra.mxu1 %v9938_v25 }
 0x7c3   :  { %4013 = vmatpush.msra.mxu1 %v12594_v3  ;;  %v5145_v3 = vld [vmem:[#allocation7 + $0x588] sm:$0xff] }
 0x7c5   :  { %4014 = vmatpush.msra.mxu1 %v12597_v33  ;;  %v5149_v33 = vld [vmem:[#allocation7 + $0x4f8] sm:$0xff] }
 0x7c6   :  { %v3642_v54 = vpop.f32.mrf.mxu1 }
 0x7c7   :  { %v3643_v21 = vadd.f32 %v3642_v54, %v3623_v6  ;;  %4015 = vmatpush.msra.mxu1 %v12598_v51  ;;  %v5147_v6 = vld [vmem:[#allocation7 + $0x540] sm:$0xff]  ;;  %v5148_v54 = vld [vmem:[#allocation7 + $0x548] sm:$0xff]  ;;  %v5153_v51 = vld [vmem:[#allocation7 + $0x8f8] sm:$0xff] }
 0x7c9   :  { %v3710_v63 = vadd.f32 %v3643_v21, %v3523_v30  ;;  %4016 = vmatpush.msra.mxu1 %v9970_v47  ;;  %v5151_v30 = vld [vmem:[#allocation7 + $0x4b0] sm:$0xff]  ;;  %v5152_v21 = vld [vmem:[#allocation7 + $0x4b8] sm:$0xff] }
 0x7cb   :  { %v3711_v25 = vmul.f32 0.5, %v3710_v63  ;;  %4017 = vmatpush.msra.mxu1 %v12599_v40  ;;  %v5155_v63 = vld [vmem:[#allocation7 + $0x868] sm:$0xff] }
 0x7cc   :  { %v3682_v60 = vpop.f32.mrf.mxu3  ;;  %v5159_v40 = vld [vmem:[#allocation7 + $0x748] sm:$0xff] }
 0x7cd   :  { %4157 = vtanh.f32 %v3711_v25  ;;  %v3683_v19 = vadd.f32 %v3682_v60, %v3663_v27  ;;  %4018 = vmatpush.msra.mxu1 %v9994_v18  ;;  %v5122_v18 = vld [vmem:[#allocation7 + $0x8f0] sm:$0xff]  ;;  %v5157_v25 = vld [vmem:[#allocation7 + $0x7d8] sm:$0xff]  ;;  %v5160_v60 = vld [vmem:[#allocation7 + $0x700] sm:$0xff] }
 0x7ce   :  { %v5158_v27 = vld [vmem:[#allocation7 + $0x790] sm:$0xff] }
 0x7cf   :  { %v3715_v7 = vmul.f32 %v3709_v10, %v3683_v19  ;;  %v5162_v19 = vld [vmem:[#allocation7 + $0x670] sm:$0xff]  ;;  %v5163_v10 = vld [vmem:[#allocation7 + $0x628] sm:$0xff] }
 0x7d1   :  { %v3716_v49 = vadd.f32 %v3715_v7, %v3563_v39  ;;  %v5164_v7 = vld [vmem:[#allocation11] ss:$0 sm:$0xff] }
 0x7d3   :  { %v4158_v15 = vpop.eup %4157  ;;  %4159 = vtanh.f32 %v3716_v49 }
 0x7d4   :  { %v3713_v47 = vmul.f32 0.5, %v4158_v15 }
 0x7d6   :  { %v3714_v62 = vadd.f32 0.5, %v3713_v47 }
 0x7d9   :  { %v4160_v59 = vpop.eup %4159 }
 0x7da   :  { %v3718_v61 = vsub.f32 %v9947_v45, %v4160_v59  ;;  %v5127_v45 = vld [vmem:[#allocation7 + $0x810] sm:$0xff] }
 0x7dc   :  { %v3719_v37 = vmul.f32 %v3718_v61, %v3714_v62 }
 0x7de   :  { %v10279_v52 = vadd.f32 %v4160_v59, %v3719_v37 }
 0x7e0   :  { %3737 = vmatmul.f32.vlgmr.msrb.gmra.mxu0 %v10279_v52  ;;  %3783 = vmatmul.f32.vlgmr.msrb.gmra.mxu2 %v10279_v52 }
 0x7e1   :  { %3887 = vmatpush.msrb.mxu0 %v5121_v58  ;;  %3927 = vmatpush.msrb.mxu2 %v5122_v18 }
 0x7e3   :  { %3888 = vmatpush.msrb.mxu0 %v5123_v55  ;;  %3928 = vmatpush.msrb.mxu2 %v5124_v9 }
 0x7e5   :  { %3889 = vmatpush.msrb.mxu0 %v5125_v32  ;;  %3929 = vmatpush.msrb.mxu2 %v5126_v5 }
 0x7e7   :  { %3890 = vmatpush.msrb.mxu0 %v5127_v45  ;;  %3930 = vmatpush.msrb.mxu2 %v5128_v2 }
 0x7e8   :  { %3823 = vmatmul.f32.vlgmr.msra.gmra.mxu0 %v10279_v52  ;;  %3863 = vmatmul.f32.vlgmr.msra.gmra.mxu2 %v10279_v52 }
 0x7e9   :  { %3891 = vmatpush.msrb.mxu0 %v5129_v13  ;;  %3931 = vmatpush.msrb.mxu2 %v5130_v38 }
 0x7eb   :  { %3892 = vmatpush.msrb.mxu0 %v5131_v22  ;;  %3932 = vmatpush.msrb.mxu2 %v5132_v34 }
 0x7ed   :  { %3893 = vmatpush.msrb.mxu0 %v5133_v28  ;;  %3933 = vmatpush.msrb.mxu2 %v5134_v1 }
 0x7ef   :  { %3894 = vmatpush.msrb.mxu0 %v5135_v48  ;;  %3934 = vmatpush.msrb.mxu2 %v5136_v46 }
 0x7f1   :  { %3895 = vmatpush.msrb.mxu0 %v5137_v23  ;;  %3935 = vmatpush.msrb.mxu2 %v5138_v44 }
 0x7f3   :  { %3896 = vmatpush.msrb.mxu0 %v5139_v11  ;;  %3936 = vmatpush.msrb.mxu2 %v5140_v26 }
 0x7f5   :  { %3897 = vmatpush.msrb.mxu0 %v5141_v16  ;;  %3937 = vmatpush.msrb.mxu2 %v5142_v14 }
 0x7f7   :  { %3898 = vmatpush.msrb.mxu0 %v5143_v35  ;;  %3938 = vmatpush.msrb.mxu2 %v5144_v50 }
 0x7f9   :  { %3899 = vmatpush.msrb.mxu0 %v5145_v3  ;;  %3939 = vmatpush.msrb.mxu2 %v5146_v56 }
 0x7fb   :  { %3900 = vmatpush.msrb.mxu0 %v5147_v6  ;;  %3940 = vmatpush.msrb.mxu2 %v5148_v54 }
 0x7fd   :  { %3901 = vmatpush.msrb.mxu0 %v5149_v33  ;;  %3941 = vmatpush.msrb.mxu2 %v5150_v41 }
 0x7ff   :  { %3902 = vmatpush.msrb.mxu0 %v5151_v30  ;;  %3942 = vmatpush.msrb.mxu2 %v5152_v21 }
 0x800   :  { %3903 = vmatmul.f32.vlgmr.msrb.gmra.mxu0 %v10279_v52  ;;  %3943 = vmatmul.f32.vlgmr.msrb.gmra.mxu2 %v10279_v52 }
 0x801   :  { %3967 = vmatpush.msra.mxu0 %v5153_v51 }
 0x803   :  { %3968 = vmatpush.msra.mxu0 %v5154_v31 }
 0x805   :  { %3969 = vmatpush.msra.mxu0 %v5155_v63 }
 0x807   :  { %3970 = vmatpush.msra.mxu0 %v5156_v20 }
 0x809   :  { %3971 = vmatpush.msra.mxu0 %v5157_v25 }
 0x80b   :  { %3972 = vmatpush.msra.mxu0 %v5158_v27 }
 0x80d   :  { %3973 = vmatpush.msra.mxu0 %v5159_v40 }
 0x80f   :  { %3974 = vmatpush.msra.mxu0 %v5160_v60 }
 0x811   :  { %3975 = vmatpush.msra.mxu0 %v5161_v0 }
 0x813   :  { %3976 = vmatpush.msra.mxu0 %v5162_v19 }
 0x815   :  { %3977 = vmatpush.msra.mxu0 %v5163_v10 }
 0x817   :  { %3978 = vmatpush.msra.mxu0 %v10123_v43  ;;  %v3804_v43 = vpop.f32.mrf.mxu3 }
 0x818   :  { %v3805_v22 = vadd.f32 %v3804_v43, %v12595_v53 }
 0x819   :  { %3979 = vmatpush.msra.mxu0 %v10127_v17 }
 0x81b   :  { %3980 = vmatpush.msra.mxu0 %v10131_v4  ;;  %v3764_v4 = vpop.f32.mrf.mxu1 }
 0x81c   :  { %v3765_v58 = vadd.f32 %v3764_v4, %v12587_v29 }
 0x81d   :  { %3981 = vmatpush.msra.mxu0 %v10135_v24 }
 0x81f   :  { %3982 = vmatpush.msra.mxu0 %v10139_v57  ;;  %v3884_v61 = vpop.f32.mrf.mxu3 }
 0x820   :  { %3983 = vmatmul.f32.vlgmr.msra.gmra.mxu0 %v10279_v52  ;;  %v3885_v37 = vadd.f32 %v3884_v61, %v12585_v36 }
 0x823   :  { %v3844_v18 = vpop.f32.mrf.mxu1 }
 0x824   :  { %v3845_v11 = vadd.f32 %v3844_v18, %v12600_v42 }
 0x82b   :  { %v3924_v45 = vpop.f32.mrf.mxu1 }
 0x82c   :  { %v3925_v38 = vadd.f32 %v3924_v45, %v12596_v8 }
 0x831   :  { %v3964_v36 = vpop.f32.mrf.mxu3 }
 0x832   :  { %v3965_v23 = vadd.f32 %v10272_v12, %v3964_v36 }
 0x85d   :  { %v3738_v39 = vpop.f32.mrf.mxu0 }
 0x85e   :  { %v3739_v49 = vadd.f32 %v5164_v7, %v3738_v39 }
 0x860   :  { %v3741_v15 = vmul.f32 0.5, %v3739_v49 }
 0x862   :  { %4161 = vtanh.f32 %v3741_v15 }
 0x863   :  { %v3784_v24 = vpop.f32.mrf.mxu2 }
 0x864   :  { %v3785_v9 = vadd.f32 %v3784_v24, %v3765_v58 }
 0x865   :  { %v3824_v17 = vpop.f32.mrf.mxu0 }
 0x866   :  { %v3825_v28 = vadd.f32 %v3824_v17, %v3805_v22 }
 0x868   :  { %v4162_v47 = vpop.eup %4161 }
 0x869   :  { %v3743_v59 = vmul.f32 0.5, %v4162_v47 }
 0x86b   :  { %v3744_v62 = vadd.f32 0.5, %v3743_v59  ;;  %v3864_v32 = vpop.f32.mrf.mxu2 }
 0x86c   :  { %v3865_v14 = vadd.f32 %v3864_v32, %v3845_v11 }
 0x86d   :  { %4042 = vst [vmem:[%s10313_s7 + $0x30] sm:$0xff] %v3744_v62 }
 0x87d   :  { %v3904_v57 = vpop.f32.mrf.mxu0 }
 0x87e   :  { %v3905_v55 = vadd.f32 %v3904_v57, %v3885_v37 }
 0x880   :  { %v3987_v5 = vadd.f32 %v3905_v55, %v3785_v9 }
 0x882   :  { %v3988_v2 = vmul.f32 0.5, %v3987_v5 }
 0x883   :  { %v3944_v13 = vpop.f32.mrf.mxu2 }
 0x884   :  { %4163 = vtanh.f32 %v3988_v2  ;;  %v3945_v34 = vadd.f32 %v3944_v13, %v3925_v38 }
 0x886   :  { %v3992_v1 = vadd.f32 %v3945_v34, %v3825_v28 }
 0x888   :  { %v3993_v46 = vmul.f32 0.5, %v3992_v1 }
 0x88a   :  { %v4164_v48 = vpop.eup %4163  ;;  %4165 = vtanh.f32 %v3993_v46 }
 0x88b   :  { %v3990_v29 = vmul.f32 0.5, %v4164_v48 }
 0x88d   :  { %v3991_v16 = vadd.f32 0.5, %v3990_v29 }
 0x890   :  { %v4166_v50 = vpop.eup %4165 }
 0x891   :  { %v3995_v53 = vmul.f32 0.5, %v4166_v50 }
 0x893   :  { %v3996_v56 = vadd.f32 0.5, %v3995_v53 }
 0x89d   :  { %v3984_v44 = vpop.f32.mrf.mxu0 }
 0x89e   :  { %v3985_v26 = vadd.f32 %v3984_v44, %v3965_v23 }
 0x8a0   :  { %v3997_v8 = vmul.f32 %v3991_v16, %v3985_v26 }
 0x8a2   :  { %v3998_v35 = vadd.f32 %v3997_v8, %v3865_v14 }
 0x8a4   :  { %4167 = vtanh.f32 %v3998_v35 }
 0x8aa   :  { %v4168_v3 = vpop.eup %4167 }
 0x8ab   :  { %v4000_v6 = vsub.f32 %v10279_v52, %v4168_v3 }
 0x8ad   :  { %v4001_v54 = vmul.f32 %v4000_v6, %v3996_v56 }
 0x8af   :  { %v4002_v33 = vadd.f32 %v4168_v3, %v4001_v54 }
 0x8b1   :  { %4019 = vmatmul.f32.vlgmr.msra.gmra.mxu1 %v4002_v33 }
 0x92e   :  { %v4020_v12 = vpop.f32.mrf.mxu1 }
 0x92f   :  { %v4021_v41 = vadd.f32 %v5164_v7, %v4020_v12 }
 0x931   :  { %v4023_v30 = vmul.f32 0.5, %v4021_v41 }
 0x933   :  { %4169 = vtanh.f32 %v4023_v30 }
 0x939   :  { %v4170_v42 = vpop.eup %4169 }
 0x93a   :  { %v4025_v21 = vmul.f32 0.5, %v4170_v42 }
 0x93c   :  { %v4026_v51 = vadd.f32 0.5, %v4025_v21 }
 0x93e   :  { %4043 = vst [vmem:[%s10313_s7 + $0x38] sm:$0xff] %v4026_v51 }
 0x93f   :  { %4033 = vsyncpa [#allocation4], 1 }
 0x940   :  { %4034 = vsyncpa [#allocation6], 1 }
 0x941   :  { %4035 = vsyncpa [#allocation9], 1 }
 0x942   :  { %4036 = vsyncpa [#allocation12], 1 }

</bundles_post_ra>
